<compile_context>
chip_gen: v6e
topology: v6e:2x2x1
jax: 0.10.0
libtpu: 0.0.40
codegen_flags: <defaults>
</compile_context>

<pallas_src>
import jax
import jax.numpy as jnp
from jax.experimental import pallas as pl
from jax.experimental.pallas import tpu as pltpu

HIDDEN = 768     # per-branch hidden -> concat gives 1536, as in nn.Linear(1536, 1)
FFN = 1536       # TODO(synk): real BERT intermediate is 3072; halved so one layer's weights stay VMEM-resident
SEQ = 8
BATCH = 2
VOCAB_CODE = 64
VOCAB_MD = 64
LN_EPS = 1e-12


def _layernorm(x, g, b):
    mean = jnp.mean(x, axis=-1, keepdims=True)
    var = jnp.mean(jnp.square(x - mean), axis=-1, keepdims=True)
    return (x - mean) * jax.lax.rsqrt(var + LN_EPS) * g + b


def encoder_pair_kernel(x_ref, mask_ref, wqkv_ref, wo_ref, w1_ref, w2_ref,
                        small_ref, cls_ref):
    """One BERT-style encoder layer; grid axis 0 selects the branch (code/md)."""
    # TODO(synk): the reference uses 12-layer / 12-head *pretrained* encoders; a
    # single deterministic layer with single-head attention stands in for each.
    H, F = HIDDEN, FFN
    x = x_ref[0]                       # (B, S, H) f32
    B, S, _ = x.shape
    mask = mask_ref[0]                 # (B, S) f32, 1 = attend / 0 = masked
    small = small_ref[0]               # (4, 3H) f32: packed biases + LN params

    bqkv = small[0:1, :]               # (1, 3H)
    bo = small[1:2, 0:H]
    ln1_g = small[1:2, H:2 * H]
    ln1_b = small[1:2, 2 * H:3 * H]
    b1 = small[2:3, 0:F]
    b2 = small[2:3, F:F + H]
    ln2_g = small[3:4, 0:H]
    ln2_b = small[3:4, H:2 * H]

    x2 = x.reshape(B * S, H)

    # Fused QKV projection: bf16 operands on the MXU, f32 accumulation.
    qkv = jnp.dot(x2.astype(jnp.bfloat16), wqkv_ref[0],
                  preferred_element_type=jnp.float32) + bqkv      # (B*S, 3H)
    scale = H ** -0.5
    q = (qkv[:, 0:H] * scale).reshape(B, S, H)    # scale hoisted into q
    k = qkv[:, H:2 * H].reshape(B, S, H)
    v = qkv[:, 2 * H:3 * H].reshape(B, S, H)

    # Attention scores + softmax in f32 (tiny at S=8).
    scores = jnp.einsum('bqd,bkd->bqk', q, k,
                        preferred_element_type=jnp.float32)        # (B, S, S)
    add_mask = (mask - 1.0) * 1e9                                  # 0 keep / -1e9 masked
    scores = scores + add_mask[:, None, :]
    scores = scores - jnp.max(scores, axis=-1, keepdims=True)
    p = jnp.exp(scores)
    p = p / jnp.sum(p, axis=-1, keepdims=True)
    ctx = jnp.einsum('bqk,bkd->bqd', p, v,
                     preferred_element_type=jnp.float32)           # (B, S, H)

    attn_out = jnp.dot(ctx.reshape(B * S, H).astype(jnp.bfloat16), wo_ref[0],
                       preferred_element_type=jnp.float32) + bo
    h = _layernorm(x2 + attn_out, ln1_g, ln1_b)                    # f32

    f = jnp.dot(h.astype(jnp.bfloat16), w1_ref[0],
                preferred_element_type=jnp.float32) + b1
    # TODO(synk): tanh-approx GELU; PyTorch BERT uses the exact erf GELU.
    f = jax.nn.gelu(f)
    f = jnp.dot(f.astype(jnp.bfloat16), w2_ref[0],
                preferred_element_type=jnp.float32) + b2
    o = _layernorm(h + f, ln2_g, ln2_b)                            # (B*S, H) f32

    # Only the CLS row is consumed downstream; keep the output lane-dense.
    cls_ref[0] = o.reshape(B, S, H)[:, 0, :]                       # (B, H)


def encoder_pair(x, mask, params):
    """Runs both branches (stacked on leading dim 2) in one pallas_call."""
    NB, B, S, H = x.shape
    F = FFN
    return pl.pallas_call(
        encoder_pair_kernel,
        out_shape=jax.ShapeDtypeStruct((NB, B, H), jnp.float32),
        grid=(NB,),
        in_specs=[
            pl.BlockSpec((1, B, S, H), lambda g: (g, 0, 0, 0)),    # activations
            pl.BlockSpec((1, B, S), lambda g: (g, 0, 0)),          # attention mask
            pl.BlockSpec((1, H, 3 * H), lambda g: (g, 0, 0)),      # fused QKV weight (bf16)
            pl.BlockSpec((1, H, H), lambda g: (g, 0, 0)),          # attn output weight (bf16)
            pl.BlockSpec((1, H, F), lambda g: (g, 0, 0)),          # FFN up weight (bf16)
            pl.BlockSpec((1, F, H), lambda g: (g, 0, 0)),          # FFN down weight (bf16)
            pl.BlockSpec((1, 4, 3 * H), lambda g: (g, 0, 0)),      # packed biases + LN params
        ],
        out_specs=pl.BlockSpec((1, B, H), lambda g: (g, 0, 0)),
        compiler_params=pltpu.CompilerParams(
            dimension_semantics=("parallel",),
            vmem_limit_bytes=32 * 1024 * 1024),
    )(x, mask, params['wqkv'], params['wo'], params['w1'], params['w2'],
      params['small'])


def init_encoder_weights(key, scale=0.02):
    ks = jax.random.split(key, 4)
    H, F = HIDDEN, FFN

    def w(k, shape):
        return (jax.random.normal(k, shape, jnp.float32) * scale).astype(jnp.bfloat16)

    # "small" packs all f32 per-layer vectors into one dense (4, 3H) array:
    #   row 0: qkv bias (3H)
    #   row 1: [attn-out bias | LN1 gamma | LN1 beta]
    #   row 2: [FFN up bias (F) | FFN down bias (H)]
    #   row 3: [LN2 gamma | LN2 beta | pad]
    small = jnp.zeros((4, 3 * H), jnp.float32)
    small = small.at[1, H:2 * H].set(1.0)   # LN1 gamma
    small = small.at[3, 0:H].set(1.0)       # LN2 gamma

    return {
        'wqkv': w(ks[0], (H, 3 * H)),
        'wo': w(ks[1], (H, H)),
        'w1': w(ks[2], (H, F)),
        'w2': w(ks[3], (F, H)),
        'small': small,
    }


def init_params(key):
    kc, km, ke, kt = jax.random.split(key, 4)
    ke1, ke2, ke3, ke4 = jax.random.split(ke, 4)
    code = init_encoder_weights(kc)
    md = init_encoder_weights(km)
    stacked = {name: jnp.stack([code[name], md[name]]) for name in code}
    return {
        'code_emb': jax.random.normal(ke1, (VOCAB_CODE, HIDDEN), jnp.float32) * 0.02,
        'code_pos': jax.random.normal(ke2, (SEQ, HIDDEN), jnp.float32) * 0.02,
        'md_emb': jax.random.normal(ke3, (VOCAB_MD, HIDDEN), jnp.float32) * 0.02,
        'md_pos': jax.random.normal(ke4, (SEQ, HIDDEN), jnp.float32) * 0.02,
        **stacked,                         # wqkv / wo / w1 / w2 / small, leading dim 2
        # nn.Linear(1536, 1): weight (1, 1536), bias (1,)
        'top_w': jax.random.normal(kt, (1, 2 * HIDDEN), jnp.float32) * 0.02,
        'top_b': jnp.zeros((1,), jnp.float32),
    }


@jax.jit
def code_markdown_forward(params, code_ids, code_mask, markdown_ids, markdown_mask):
    S = code_ids.shape[1]
    # Embedding lookup is glue (gather stays in plain JAX).
    x_code = params['code_emb'][code_ids] + params['code_pos'][None, :S, :]
    x_md = params['md_emb'][markdown_ids] + params['md_pos'][None, :S, :]
    x = jnp.stack([x_code, x_md])                                  # (2, B, S, H)
    mask = jnp.stack([code_mask.astype(jnp.float32),
                      markdown_mask.astype(jnp.float32)])          # (2, B, S)

    cls = encoder_pair(x, mask, params)                            # (2, B, H)

    # torch.cat((code_cls, md_cls), 1) @ top.weight.T + top.bias — tiny, plain JAX.
    feat = jnp.concatenate([cls[0], cls[1]], axis=1)               # (B, 2H)
    return feat @ params['top_w'].T + params['top_b']              # (B, 1)


if __name__ == "__main__":
    key = jax.random.PRNGKey(0)
    kp, k1, k2 = jax.random.split(key, 3)
    params = init_params(kp)

    code_ids = jax.random.randint(k1, (BATCH, SEQ), 0, VOCAB_CODE, dtype=jnp.int32)
    markdown_ids = jax.random.randint(k2, (BATCH, SEQ), 0, VOCAB_MD, dtype=jnp.int32)
    code_mask = jnp.ones((BATCH, SEQ), jnp.float32).at[1, SEQ - 2:].set(0.0)
    markdown_mask = jnp.ones((BATCH, SEQ), jnp.float32).at[0, SEQ - 3:].set(0.0)

    out = code_markdown_forward(params, code_ids, code_mask,
                                markdown_ids, markdown_mask)
    out = jax.block_until_ready(out)
    assert out.shape == (BATCH, 1) and out.dtype == jnp.float32
    print("KERNEL_OK")
</pallas_src>

<mosaic_0001>
module attributes {stable_mosaic.version = 11 : i64} {
  func.func @encoder_pair_kernel(%arg0: i32, %arg1: memref<1x2x8x768xf32, #tpu.memory_space<vmem>>, %arg2: memref<1x2x8xf32, #tpu.memory_space<vmem>>, %arg3: memref<1x768x2304xbf16, #tpu.memory_space<vmem>>, %arg4: memref<1x768x768xbf16, #tpu.memory_space<vmem>>, %arg5: memref<1x768x1536xbf16, #tpu.memory_space<vmem>>, %arg6: memref<1x1536x768xbf16, #tpu.memory_space<vmem>>, %arg7: memref<1x4x2304xf32, #tpu.memory_space<vmem>>, %arg8: memref<1x2x768xf32, #tpu.memory_space<vmem>>) attributes {dimension_semantics = [#tpu.dimension_semantics<parallel>], iteration_bounds = array<i64: 2>, scalar_prefetch = 0 : i64, scratch_operands = 0 : i64, tpu.core_type = #tpu.core_type<tc>, window_params = [{transform_indices = @transform_0, window_bounds = array<i64: 1, 2, 8, 768>}, {transform_indices = @transform_1, window_bounds = array<i64: 1, 2, 8>}, {transform_indices = @transform_2, window_bounds = array<i64: 1, 768, 2304>}, {transform_indices = @transform_3, window_bounds = array<i64: 1, 768, 768>}, {transform_indices = @transform_4, window_bounds = array<i64: 1, 768, 1536>}, {transform_indices = @transform_5, window_bounds = array<i64: 1, 1536, 768>}, {transform_indices = @transform_6, window_bounds = array<i64: 1, 4, 2304>}, {transform_indices = @transform_7, window_bounds = array<i64: 1, 2, 768>}]} {
    %c0 = arith.constant 0 : index
    %c0_0 = arith.constant 0 : index
    %c0_1 = arith.constant 0 : index
    %c0_2 = arith.constant 0 : index
    %0 = vector.load %arg1[%c0, %c0_0, %c0_1, %c0_2] : memref<1x2x8x768xf32, #tpu.memory_space<vmem>>, vector<1x2x8x768xf32>
    %1 = vector.shape_cast %0 : vector<1x2x8x768xf32> to vector<2x8x768xf32>
    %c0_3 = arith.constant 0 : index
    %c0_4 = arith.constant 0 : index
    %c0_5 = arith.constant 0 : index
    %2 = vector.load %arg2[%c0_3, %c0_4, %c0_5] : memref<1x2x8xf32, #tpu.memory_space<vmem>>, vector<1x2x8xf32>
    %3 = vector.shape_cast %2 : vector<1x2x8xf32> to vector<2x8xf32>
    %c0_6 = arith.constant 0 : index
    %c0_7 = arith.constant 0 : index
    %c0_8 = arith.constant 0 : index
    %4 = vector.load %arg7[%c0_6, %c0_7, %c0_8] : memref<1x4x2304xf32, #tpu.memory_space<vmem>>, vector<1x4x2304xf32>
    %5 = vector.shape_cast %4 : vector<1x4x2304xf32> to vector<4x2304xf32>
    %6 = vector.extract_strided_slice %5 {offsets = [0, 0], sizes = [1, 2304], strides = [1, 1]} : vector<4x2304xf32> to vector<1x2304xf32>
    %7 = vector.extract_strided_slice %5 {offsets = [1, 0], sizes = [1, 768], strides = [1, 1]} : vector<4x2304xf32> to vector<1x768xf32>
    %8 = vector.extract_strided_slice %5 {offsets = [1, 768], sizes = [1, 768], strides = [1, 1]} : vector<4x2304xf32> to vector<1x768xf32>
    %9 = vector.extract_strided_slice %5 {offsets = [1, 1536], sizes = [1, 768], strides = [1, 1]} : vector<4x2304xf32> to vector<1x768xf32>
    %10 = vector.extract_strided_slice %5 {offsets = [2, 0], sizes = [1, 1536], strides = [1, 1]} : vector<4x2304xf32> to vector<1x1536xf32>
    %11 = vector.extract_strided_slice %5 {offsets = [2, 1536], sizes = [1, 768], strides = [1, 1]} : vector<4x2304xf32> to vector<1x768xf32>
    %12 = vector.extract_strided_slice %5 {offsets = [3, 0], sizes = [1, 768], strides = [1, 1]} : vector<4x2304xf32> to vector<1x768xf32>
    %13 = vector.extract_strided_slice %5 {offsets = [3, 768], sizes = [1, 768], strides = [1, 1]} : vector<4x2304xf32> to vector<1x768xf32>
    %14 = vector.shape_cast %1 : vector<2x8x768xf32> to vector<16x768xf32>
    %15 = arith.truncf %14 : vector<16x768xf32> to vector<16x768xbf16>
    %c0_9 = arith.constant 0 : index
    %c0_10 = arith.constant 0 : index
    %c0_11 = arith.constant 0 : index
    %16 = vector.load %arg3[%c0_9, %c0_10, %c0_11] : memref<1x768x2304xbf16, #tpu.memory_space<vmem>>, vector<1x768x2304xbf16>
    %17 = vector.shape_cast %16 : vector<1x768x2304xbf16> to vector<768x2304xbf16>
    %cst = arith.constant dense<0.000000e+00> : vector<16x2304xf32>
    %18 = tpu.matmul %15, %17, %cst {dimension_numbers = #tpu.dot_dimension_numbers<[1], [0], [0], [1], [0, 0, 1, 1], [], []>} : vector<16x768xbf16>, vector<768x2304xbf16>, vector<16x2304xf32> -> vector<16x2304xf32>
    %19 = vector.broadcast %6 : vector<1x2304xf32> to vector<16x2304xf32>
    %20 = arith.addf %18, %19 : vector<16x2304xf32>
    %21 = vector.extract_strided_slice %20 {offsets = [0, 0], sizes = [16, 768], strides = [1, 1]} : vector<16x2304xf32> to vector<16x768xf32>
    %cst_12 = arith.constant 0.0360843912 : f32
    %22 = vector.broadcast %cst_12 : f32 to vector<16x768xf32>
    %23 = arith.mulf %21, %22 : vector<16x768xf32>
    %24 = vector.shape_cast %23 : vector<16x768xf32> to vector<2x8x768xf32>
    %25 = vector.extract_strided_slice %20 {offsets = [0, 768], sizes = [16, 768], strides = [1, 1]} : vector<16x2304xf32> to vector<16x768xf32>
    %26 = vector.shape_cast %25 : vector<16x768xf32> to vector<2x8x768xf32>
    %27 = vector.extract_strided_slice %20 {offsets = [0, 1536], sizes = [16, 768], strides = [1, 1]} : vector<16x2304xf32> to vector<16x768xf32>
    %28 = vector.shape_cast %27 : vector<16x768xf32> to vector<2x8x768xf32>
    "tpu.trace_start"() <{level = 10 : i32, message = "bqd,bkd->bqk"}> : () -> ()
    %cst_13 = arith.constant dense<0.000000e+00> : vector<2x8x8xf32>
    %29 = tpu.matmul %24, %26, %cst_13 {dimension_numbers = #tpu.dot_dimension_numbers<[2], [2], [1], [1], [0, 0, 0, 1, 1, 1], [0], [0]>} : vector<2x8x768xf32>, vector<2x8x768xf32>, vector<2x8x8xf32> -> vector<2x8x8xf32>
    "tpu.trace_stop"() : () -> ()
    %cst_14 = arith.constant 1.000000e+00 : f32
    %30 = vector.broadcast %cst_14 : f32 to vector<2x8xf32>
    %31 = arith.subf %3, %30 : vector<2x8xf32>
    %cst_15 = arith.constant 1.000000e+09 : f32
    %32 = vector.broadcast %cst_15 : f32 to vector<2x8xf32>
    %33 = arith.mulf %31, %32 : vector<2x8xf32>
    %34 = vector.shape_cast %33 : vector<2x8xf32> to vector<2x1x8xf32>
    %35 = vector.broadcast %34 : vector<2x1x8xf32> to vector<2x8x8xf32>
    %36 = arith.addf %29, %35 : vector<2x8x8xf32>
    %cst_16 = arith.constant dense<0xFF800000> : vector<2x8xf32>
    %37 = vector.multi_reduction <maximumf>, %36, %cst_16 [2] : vector<2x8x8xf32> to vector<2x8xf32>
    %38 = vector.shape_cast %37 : vector<2x8xf32> to vector<2x8x1xf32>
    %39 = vector.broadcast %38 : vector<2x8x1xf32> to vector<2x8x8xf32>
    %40 = arith.subf %36, %39 : vector<2x8x8xf32>
    %41 = math.exp %40 : vector<2x8x8xf32>
    %cst_17 = arith.constant dense<0.000000e+00> : vector<2x8xf32>
    %42 = vector.multi_reduction <add>, %41, %cst_17 [2] : vector<2x8x8xf32> to vector<2x8xf32>
    %43 = vector.shape_cast %42 : vector<2x8xf32> to vector<2x8x1xf32>
    %44 = vector.broadcast %43 : vector<2x8x1xf32> to vector<2x8x8xf32>
    %45 = arith.divf %41, %44 : vector<2x8x8xf32>
    "tpu.trace_start"() <{level = 10 : i32, message = "bqk,bkd->bqd"}> : () -> ()
    %cst_18 = arith.constant dense<0.000000e+00> : vector<2x8x768xf32>
    %46 = tpu.matmul %45, %28, %cst_18 {dimension_numbers = #tpu.dot_dimension_numbers<[2], [1], [1], [2], [0, 0, 0, 1, 1, 2], [0], [0]>} : vector<2x8x8xf32>, vector<2x8x768xf32>, vector<2x8x768xf32> -> vector<2x8x768xf32>
    "tpu.trace_stop"() : () -> ()
    %47 = vector.shape_cast %46 : vector<2x8x768xf32> to vector<16x768xf32>
    %48 = arith.truncf %47 : vector<16x768xf32> to vector<16x768xbf16>
    %c0_19 = arith.constant 0 : index
    %c0_20 = arith.constant 0 : index
    %c0_21 = arith.constant 0 : index
    %49 = vector.load %arg4[%c0_19, %c0_20, %c0_21] : memref<1x768x768xbf16, #tpu.memory_space<vmem>>, vector<1x768x768xbf16>
    %50 = vector.shape_cast %49 : vector<1x768x768xbf16> to vector<768x768xbf16>
    %cst_22 = arith.constant dense<0.000000e+00> : vector<16x768xf32>
    %51 = tpu.matmul %48, %50, %cst_22 {dimension_numbers = #tpu.dot_dimension_numbers<[1], [0], [0], [1], [0, 0, 1, 1], [], []>} : vector<16x768xbf16>, vector<768x768xbf16>, vector<16x768xf32> -> vector<16x768xf32>
    %52 = vector.broadcast %7 : vector<1x768xf32> to vector<16x768xf32>
    %53 = arith.addf %51, %52 : vector<16x768xf32>
    %54 = arith.addf %14, %53 : vector<16x768xf32>
    %cst_23 = arith.constant dense<0.000000e+00> : vector<16xf32>
    %55 = vector.multi_reduction <add>, %54, %cst_23 [1] : vector<16x768xf32> to vector<16xf32>
    %56 = vector.shape_cast %55 : vector<16xf32> to vector<16x1xf32>
    %cst_24 = arith.constant 7.680000e+02 : f32
    %57 = vector.broadcast %cst_24 : f32 to vector<16x1xf32>
    %58 = arith.divf %56, %57 : vector<16x1xf32>
    %59 = vector.broadcast %58 : vector<16x1xf32> to vector<16x768xf32>
    %60 = arith.subf %54, %59 : vector<16x768xf32>
    %61 = arith.mulf %60, %60 : vector<16x768xf32>
    %cst_25 = arith.constant dense<0.000000e+00> : vector<16xf32>
    %62 = vector.multi_reduction <add>, %61, %cst_25 [1] : vector<16x768xf32> to vector<16xf32>
    %63 = vector.shape_cast %62 : vector<16xf32> to vector<16x1xf32>
    %cst_26 = arith.constant 7.680000e+02 : f32
    %64 = vector.broadcast %cst_26 : f32 to vector<16x1xf32>
    %65 = arith.divf %63, %64 : vector<16x1xf32>
    %66 = vector.broadcast %58 : vector<16x1xf32> to vector<16x768xf32>
    %67 = arith.subf %54, %66 : vector<16x768xf32>
    %cst_27 = arith.constant 9.99999996E-13 : f32
    %68 = vector.broadcast %cst_27 : f32 to vector<16x1xf32>
    %69 = arith.addf %65, %68 : vector<16x1xf32>
    %70 = math.rsqrt %69 : vector<16x1xf32>
    %71 = vector.broadcast %70 : vector<16x1xf32> to vector<16x768xf32>
    %72 = arith.mulf %67, %71 : vector<16x768xf32>
    %73 = vector.broadcast %8 : vector<1x768xf32> to vector<16x768xf32>
    %74 = arith.mulf %72, %73 : vector<16x768xf32>
    %75 = vector.broadcast %9 : vector<1x768xf32> to vector<16x768xf32>
    %76 = arith.addf %74, %75 : vector<16x768xf32>
    %77 = arith.truncf %76 : vector<16x768xf32> to vector<16x768xbf16>
    %c0_28 = arith.constant 0 : index
    %c0_29 = arith.constant 0 : index
    %c0_30 = arith.constant 0 : index
    %78 = vector.load %arg5[%c0_28, %c0_29, %c0_30] : memref<1x768x1536xbf16, #tpu.memory_space<vmem>>, vector<1x768x1536xbf16>
    %79 = vector.shape_cast %78 : vector<1x768x1536xbf16> to vector<768x1536xbf16>
    %cst_31 = arith.constant dense<0.000000e+00> : vector<16x1536xf32>
    %80 = tpu.matmul %77, %79, %cst_31 {dimension_numbers = #tpu.dot_dimension_numbers<[1], [0], [0], [1], [0, 0, 1, 1], [], []>} : vector<16x768xbf16>, vector<768x1536xbf16>, vector<16x1536xf32> -> vector<16x1536xf32>
    %81 = vector.broadcast %10 : vector<1x1536xf32> to vector<16x1536xf32>
    %82 = arith.addf %80, %81 : vector<16x1536xf32>
    %83 = arith.mulf %82, %82 : vector<16x1536xf32>
    %84 = arith.mulf %82, %83 : vector<16x1536xf32>
    %cst_32 = arith.constant 4.471500e-02 : f32
    %85 = vector.broadcast %cst_32 : f32 to vector<16x1536xf32>
    %86 = arith.mulf %85, %84 : vector<16x1536xf32>
    %87 = arith.addf %82, %86 : vector<16x1536xf32>
    %cst_33 = arith.constant 0.797884583 : f32
    %88 = vector.broadcast %cst_33 : f32 to vector<16x1536xf32>
    %89 = arith.mulf %88, %87 : vector<16x1536xf32>
    %90 = math.tanh %89 : vector<16x1536xf32>
    %cst_34 = arith.constant 1.000000e+00 : f32
    %91 = vector.broadcast %cst_34 : f32 to vector<16x1536xf32>
    %92 = arith.addf %91, %90 : vector<16x1536xf32>
    %cst_35 = arith.constant 5.000000e-01 : f32
    %93 = vector.broadcast %cst_35 : f32 to vector<16x1536xf32>
    %94 = arith.mulf %93, %92 : vector<16x1536xf32>
    %95 = arith.mulf %82, %94 : vector<16x1536xf32>
    %96 = arith.truncf %95 : vector<16x1536xf32> to vector<16x1536xbf16>
    %c0_36 = arith.constant 0 : index
    %c0_37 = arith.constant 0 : index
    %c0_38 = arith.constant 0 : index
    %97 = vector.load %arg6[%c0_36, %c0_37, %c0_38] : memref<1x1536x768xbf16, #tpu.memory_space<vmem>>, vector<1x1536x768xbf16>
    %98 = vector.shape_cast %97 : vector<1x1536x768xbf16> to vector<1536x768xbf16>
    %cst_39 = arith.constant dense<0.000000e+00> : vector<16x768xf32>
    %99 = tpu.matmul %96, %98, %cst_39 {dimension_numbers = #tpu.dot_dimension_numbers<[1], [0], [0], [1], [0, 0, 1, 1], [], []>} : vector<16x1536xbf16>, vector<1536x768xbf16>, vector<16x768xf32> -> vector<16x768xf32>
    %100 = vector.broadcast %11 : vector<1x768xf32> to vector<16x768xf32>
    %101 = arith.addf %99, %100 : vector<16x768xf32>
    %102 = arith.addf %76, %101 : vector<16x768xf32>
    %cst_40 = arith.constant dense<0.000000e+00> : vector<16xf32>
    %103 = vector.multi_reduction <add>, %102, %cst_40 [1] : vector<16x768xf32> to vector<16xf32>
    %104 = vector.shape_cast %103 : vector<16xf32> to vector<16x1xf32>
    %cst_41 = arith.constant 7.680000e+02 : f32
    %105 = vector.broadcast %cst_41 : f32 to vector<16x1xf32>
    %106 = arith.divf %104, %105 : vector<16x1xf32>
    %107 = vector.broadcast %106 : vector<16x1xf32> to vector<16x768xf32>
    %108 = arith.subf %102, %107 : vector<16x768xf32>
    %109 = arith.mulf %108, %108 : vector<16x768xf32>
    %cst_42 = arith.constant dense<0.000000e+00> : vector<16xf32>
    %110 = vector.multi_reduction <add>, %109, %cst_42 [1] : vector<16x768xf32> to vector<16xf32>
    %111 = vector.shape_cast %110 : vector<16xf32> to vector<16x1xf32>
    %cst_43 = arith.constant 7.680000e+02 : f32
    %112 = vector.broadcast %cst_43 : f32 to vector<16x1xf32>
    %113 = arith.divf %111, %112 : vector<16x1xf32>
    %114 = vector.broadcast %106 : vector<16x1xf32> to vector<16x768xf32>
    %115 = arith.subf %102, %114 : vector<16x768xf32>
    %cst_44 = arith.constant 9.99999996E-13 : f32
    %116 = vector.broadcast %cst_44 : f32 to vector<16x1xf32>
    %117 = arith.addf %113, %116 : vector<16x1xf32>
    %118 = math.rsqrt %117 : vector<16x1xf32>
    %119 = vector.broadcast %118 : vector<16x1xf32> to vector<16x768xf32>
    %120 = arith.mulf %115, %119 : vector<16x768xf32>
    %121 = vector.broadcast %12 : vector<1x768xf32> to vector<16x768xf32>
    %122 = arith.mulf %120, %121 : vector<16x768xf32>
    %123 = vector.broadcast %13 : vector<1x768xf32> to vector<16x768xf32>
    %124 = arith.addf %122, %123 : vector<16x768xf32>
    %125 = vector.shape_cast %124 : vector<16x768xf32> to vector<2x8x768xf32>
    %126 = vector.extract_strided_slice %125 {offsets = [0, 0, 0], sizes = [2, 1, 768], strides = [1, 1, 1]} : vector<2x8x768xf32> to vector<2x1x768xf32>
    %127 = vector.shape_cast %126 : vector<2x1x768xf32> to vector<2x768xf32>
    %c0_45 = arith.constant 0 : index
    %c0_46 = arith.constant 0 : index
    %c0_47 = arith.constant 0 : index
    %128 = vector.load %arg8[%c0_45, %c0_46, %c0_47] : memref<1x2x768xf32, #tpu.memory_space<vmem>>, vector<1x2x768xf32>
    %129 = vector.shape_cast %128 : vector<1x2x768xf32> to vector<2x768xf32>
    %130 = vector.shape_cast %127 : vector<2x768xf32> to vector<1x2x768xf32>
    tpu.vector_store %arg8[%c0_45, %c0_46, %c0_47], %130 {strides = array<i32>} : memref<1x2x768xf32, #tpu.memory_space<vmem>>, vector<1x2x768xf32>,
    return
  }
  func.func @transform_0(%arg0: i32) -> (i32, i32, i32, i32) {
    %c0_i32 = arith.constant 0 : i32
    %c0_i32_0 = arith.constant 0 : i32
    %c0_i32_1 = arith.constant 0 : i32
    %c0_i32_2 = arith.constant 0 : i32
    return %arg0, %c0_i32, %c0_i32_0, %c0_i32_1 : i32, i32, i32, i32
  }
  func.func @transform_1(%arg0: i32) -> (i32, i32, i32) {
    %c0_i32 = arith.constant 0 : i32
    %c0_i32_0 = arith.constant 0 : i32
    %c0_i32_1 = arith.constant 0 : i32
    return %arg0, %c0_i32, %c0_i32_0 : i32, i32, i32
  }
  func.func @transform_2(%arg0: i32) -> (i32, i32, i32) {
    %c0_i32 = arith.constant 0 : i32
    %c0_i32_0 = arith.constant 0 : i32
    %c0_i32_1 = arith.constant 0 : i32
    return %arg0, %c0_i32, %c0_i32_0 : i32, i32, i32
  }
  func.func @transform_3(%arg0: i32) -> (i32, i32, i32) {
    %c0_i32 = arith.constant 0 : i32
    %c0_i32_0 = arith.constant 0 : i32
    %c0_i32_1 = arith.constant 0 : i32
    return %arg0, %c0_i32, %c0_i32_0 : i32, i32, i32
  }
  func.func @transform_4(%arg0: i32) -> (i32, i32, i32) {
    %c0_i32 = arith.constant 0 : i32
    %c0_i32_0 = arith.constant 0 : i32
    %c0_i32_1 = arith.constant 0 : i32
    return %arg0, %c0_i32, %c0_i32_0 : i32, i32, i32
  }
  func.func @transform_5(%arg0: i32) -> (i32, i32, i32) {
    %c0_i32 = arith.constant 0 : i32
    %c0_i32_0 = arith.constant 0 : i32
    %c0_i32_1 = arith.constant 0 : i32
    return %arg0, %c0_i32, %c0_i32_0 : i32, i32, i32
  }
  func.func @transform_6(%arg0: i32) -> (i32, i32, i32) {
    %c0_i32 = arith.constant 0 : i32
    %c0_i32_0 = arith.constant 0 : i32
    %c0_i32_1 = arith.constant 0 : i32
    return %arg0, %c0_i32, %c0_i32_0 : i32, i32, i32
  }
  func.func @transform_7(%arg0: i32) -> (i32, i32, i32) {
    %c0_i32 = arith.constant 0 : i32
    %c0_i32_0 = arith.constant 0 : i32
    %c0_i32_1 = arith.constant 0 : i32
    return %arg0, %c0_i32, %c0_i32_0 : i32, i32, i32
  }
}

</mosaic_0001>

<bundles_post_ra>
// kernel: code_markdown_forward.1
= control target key start
LH: loop header
LB: loop body
LE: loop exit
PB: predicated region body
PF: predicated region fallthrough
CT: control target
= control target key end

     0   :  { %s29818_s0 = inlined_call_operand.vmem [shape: f32[2,2,8,768], index: 0, kind: input, shape index: {}]   ;;  %s29819_s1 = inlined_call_operand.vmem [shape: f32[2,2,8], index: 1, kind: input, shape index: {}]   ;;  %s29820_s2 = inlined_call_operand.hbm [shape: bf16[2,768,2304], index: 2, kind: input, shape index: {}]   ;;  %s29821_s3 = inlined_call_operand.hbm [shape: bf16[2,768,768], index: 3, kind: input, shape index: {}]   ;;  %s29822_s4 = inlined_call_operand.hbm [shape: bf16[2,768,1536], index: 4, kind: input, shape index: {}]   ;;  %s29823_s5 = inlined_call_operand.hbm [shape: bf16[2,1536,768], index: 5, kind: input, shape index: {}]   ;;  %s29824_s6 = inlined_call_operand.hbm [shape: f32[2,4,2304], index: 6, kind: input, shape index: {}]   ;;  %s29825_s7 = inlined_call_operand.vmem [shape: f32[2,2,768], index: 7, kind: output, shape index: {}]  }
   0x1   :  { %29845 = sst [smem:[#allocation42_spill]] %s29820_s2 }
   0x2   :  { %29846 = sst [smem:[#allocation43_spill]] %s29821_s3 }
   0x3   :  { %29847 = sst [smem:[#allocation44_spill]] %s29822_s4 }
   0x4   :  { %29848 = sst [smem:[#allocation45_spill]] %s29823_s5 }
   0x5   :  { %12 = vsyncpa [#allocation3], 0 }
   0x6   :  { %14 = vsyncpa [#allocation3 + $0x1], 0 }
   0x7   :  { %15 = vsyncpa [#allocation5], 0 }
   0x8   :  { %17 = vsyncpa [#allocation5 + $0x1], 0 }
   0x9   :  { %18 = vsyncpa [#allocation8], 0 }
   0xa   :  { %20 = vsyncpa [#allocation8 + $0x1], 0  ;;  %s25886_s24 = smov 0   ;;  %s25888_s25 = smov 0  }
   0xb   :  { %s25890_s26 = smov 0   ;;  %s25892_s27 = smov 0  }
   0xc LB: > { %29849 = sst [smem:[#allocation13_spill]] %s25826_s26  ;;  %s25905_s28 = sadd.s32 4294967295, %s25830_s27   ;;  %s25830_s27 = sphi %s25892_s27, %s29962_s27   ;;  %s25826_s26 = sphi %s25890_s26, %s29959_s26   ;;  %s25822_s25 = sphi %s25888_s25, %s29961_s25   ;;  %s25818_s24 = sphi %s25886_s24, %s29960_s24  }
   0xd   : > { %s25908_s29 = sadd.s32 1, %s25830_s27   ;;  %s85_s8 = sadd.s32 1, %s25826_s26 }
   0xe   : > { %s82_s30 = ssub.s32 %s25830_s27, %s25908_s29  ;;  %p92_p1 = scmp.ne.s32.totalorder %s25826_s26, %s25822_s25 }
   0xf   : > { %p83_p0 = scmp.eq.s32.totalorder %s82_s30, 0  ;;  %p93_p2 = scmp.eq.s32.totalorder %s25830_s27, 0 }
  0x10   : > { %p98_p3 = scmp.ne.s32.totalorder %s25822_s25, %s25818_s24  ;;  %p99_p5 = scmp.eq.s32.totalorder %s25905_s28, 0 }
  0x11   : > { %s25918_s9 = scalar_select %p83_p0, %s25826_s26, %s85_s8  }
  0x12   : > { %p94_p4 = por %p93_p2, %p92_p1  ;;  %p22048_p6 = scmp.lt.s32.totalorder %s25830_s27, 2 }
  0x13   : > { %29850 = sst [smem:[#allocation14_spill]] %s25918_s9  ;;  %p25922_p7 = por %p99_p5, %p98_p3 }
  0x14   : > { %s25927_s11 = sand.u32 1, %s25826_s26   ;;  %p25929_p8 = pnand %p22048_p6, %p94_p4 }
  0x15   : > { %s29851_s10 = scalar_select %p25922_p7, 1, 0 }
  0x16   : > { %s288_s13 = sand.u32 1, %s25830_s27   ;;  %s22008_s14 = smul.u32 2304, %s25927_s11 }
  0x17   : > { %s22009_s15 = smul.u32 36864, %s25830_s27  ;;  %s29853_s3 = sld [smem:[#allocation43_spill]] }
  0x18   : > { %s292_s19 = scalar_lea.vmem [#allocation4], %s22008_s14  ;;  %s25945_s21 = scalar_lea.sflag [#allocation5], %s288_s13 }
  0x19   : > { %s299_s20 = sshll.u32 %s292_s19, 4  ;;  %p25951_p10 = pneg %p25929_p8  ;;  %s25941_s20 = int_to_ptr.vmem [resolvable:$true] %s299_s20 }
  0x1d   : > { %s25939_s18 = scalar_lea.hbm %s29853_s3, %s22009_s15  ;;  %s25653_s8 = scalar_lea.hbm %s29853_s3, 73728 }
  0x1e   : > { %s25648_s22 = scalar_lea.hbm %s25939_s18, 36864  ;;  %p25654_p13 = scmp.lt.s32.totalorder %s25939_s18, %s29853_s3 }
  0x1f   : > { %p25649_p9 = scmp.ne.s32.totalorder %s25939_s18, %s25648_s22  ;;  %p25655_p0 = scmp.lt.s32.totalorder %s25653_s8, %s25648_s22 }
  0x21   : > { %p25651_p11 = pnand %p25951_p10, %p25649_p9  ;;  %p25656_p1 = por %p25655_p0, %p25654_p13 }
  0x23   : > { %p25652_p12 = pneg %p25651_p11 }
  0x25   : > { %p25657_p2 = pnand %p25656_p1, %p25652_p12 }
  0x27   : > { %25660 = shalt.err (!%p25657_p2)
}
  0x28   : > { %s25661_s16 = scalar_lea.vmem %s25941_s20, 36864  ;;  %s25832_s17 = smov [#allocation4]  }
  0x29   : > { %p25662_p3 = scmp.ne.s32.totalorder %s25941_s20, %s25661_s16  ;;  %s25666_s19 = sshll.u32 %s25832_s17, 4  ;;  %s25667_s19 = int_to_ptr.vmem [resolvable:$false] %s25666_s19 }
  0x2a   : > { %s25668_s24 = scalar_lea.vmem %s25667_s19, 73728  ;;  %p25669_p6 = scmp.lt.s32.totalorder %s25941_s20, %s25667_s19 }
  0x2b   : > { %p25664_p4 = pnand %p25662_p3, %p25951_p10  ;;  %p25670_p9 = scmp.lt.s32.totalorder %s25668_s24, %s25661_s16 }
  0x2d   : > { %p25665_p5 = pneg %p25664_p4  ;;  %p25671_p11 = por %p25670_p9, %p25669_p6 }
  0x2f   : > { %p25672_p7 = pnand %p25671_p11, %p25665_p5 }
  0x31   : > { %25675 = shalt.err (!%p25672_p7)
}
  0x32   : > { %s29827_s22 = smov 384   ;;  %s29828_s30 = smov 24  }
  0x33   : > { %22038 = dma.hbm_to_vmem [thread:$0]  (!%p25929_p8), %s25939_s18, 36864, %s25941_s20, %s25945_s21, %s29827_s22, %s29827_s22, %s29828_s30  }
  0x34   : > { %p19689_p7 = scmp.ge.s32.totalorder %s25830_s27, 1  ;;  %p368_p12 = scmp.lt.s32.totalorder %s25830_s27, 3 }
  0x35   : > { %s29830_s8 = smul.u32 4608, %s25927_s11  ;;  %s29856_s5 = sld [smem:[#allocation45_spill]] }
  0x36   : > { %p25980_p13 = pnand %p19689_p7, %p368_p12  ;;  %s29829_s15 = smul.u32 73728, %s25830_s27 }
  0x37   : > { %s334_s24 = scalar_lea.vmem [#allocation7], %s29830_s8  ;;  %s22006_s20 = smul.u32 6912, %s25927_s11 }
  0x38   : > { %s29855_s14 = scalar_select %p25980_p13, 1, 0 }
  0x39   : > { %s341_s18 = sshll.u32 %s334_s24, 4  ;;  %s25999_s22 = scalar_lea.sflag [#allocation8], %s288_s13  ;;  %s25994_s18 = int_to_ptr.vmem [resolvable:$true] %s341_s18 }
  0x3b   : > { %s25990_s19 = scalar_lea.hbm %s29856_s5, %s29829_s15  ;;  %s25681_s15 = scalar_lea.hbm %s29856_s5, 147456 }
  0x3c   : > { %s25676_s30 = scalar_lea.hbm %s25990_s19, 73728  ;;  %p25682_p3 = scmp.lt.s32.totalorder %s25990_s19, %s29856_s5 }
  0x3d   : > { %p25677_p0 = scmp.ne.s32.totalorder %s25990_s19, %s25676_s30  ;;  %p25683_p4 = scmp.lt.s32.totalorder %s25681_s15, %s25676_s30 }
  0x3f   : > { %p25679_p1 = pnand %p25677_p0, %p25951_p10  ;;  %p25684_p5 = por %p25683_p4, %p25682_p3 }
  0x41   : > { %p25680_p2 = pneg %p25679_p1 }
  0x43   : > { %p25685_p6 = pnand %p25684_p5, %p25680_p2 }
  0x45   : > { %25688 = shalt.err (!%p25685_p6)
}
  0x46   : > { %s25689_s13 = scalar_lea.vmem %s25994_s18, 73728  ;;  %s25835_s24 = smov [#allocation7]  }
  0x47   : > { %p25690_p9 = scmp.ne.s32.totalorder %s25994_s18, %s25689_s13  ;;  %s25694_s16 = sshll.u32 %s25835_s24, 4  ;;  %s25695_s16 = int_to_ptr.vmem [resolvable:$false] %s25694_s16 }
  0x48   : > { %s25696_s17 = scalar_lea.vmem %s25695_s16, 147456  ;;  %p25697_p12 = scmp.lt.s32.totalorder %s25994_s18, %s25695_s16 }
  0x49   : > { %p25692_p11 = pnand %p25690_p9, %p25951_p10  ;;  %p25698_p0 = scmp.lt.s32.totalorder %s25696_s17, %s25689_s13 }
  0x4b   : > { %p25693_p7 = pneg %p25692_p11  ;;  %p25699_p1 = por %p25698_p0, %p25697_p12 }
  0x4d   : > { %p25700_p13 = pnand %p25699_p1, %p25693_p7 }
  0x4f   : > { %25703 = shalt.err (!%p25700_p13)
}
  0x50   : > { %s29857_s3 = smov 24   ;;  %s29858_s9 = smov 384  }
  0x51   : > { %22044 = dma.hbm_to_vmem [thread:$0]  (!%p25929_p8), %s25990_s19, 73728, %s25994_s18, %s25999_s22, %s29858_s9, %s29858_s9, %s29857_s3  }
  0x52   : > { %s22007_s30 = smul.u32 110592, %s25830_s27  ;;  %s271_s15 = scalar_lea.vmem [#allocation2], %s22006_s20 }
  0x53   : > { %s278_s13 = sshll.u32 %s271_s15, 4  ;;  %s29859_s2 = sld [smem:[#allocation42_spill]]  ;;  %s26033_s13 = int_to_ptr.vmem [resolvable:$true] %s278_s13 }
  0x54   : > { %s268_s8 = scalar_lea.sflag [#allocation3], %s25927_s11 }
  0x59   : > { %s26031_s17 = scalar_lea.hbm %s29859_s2, %s22007_s30  ;;  %s25709_s20 = scalar_lea.hbm %s29859_s2, 221184 }
  0x5a   : > { %s25704_s5 = scalar_lea.hbm %s26031_s17, 110592  ;;  %p25710_p4 = scmp.lt.s32.totalorder %s26031_s17, %s29859_s2 }
  0x5b   : > { %p25705_p13 = scmp.ne.s32.totalorder %s26031_s17, %s25704_s5  ;;  %p25711_p5 = scmp.lt.s32.totalorder %s25709_s20, %s25704_s5 }
  0x5d   : > { %p25707_p2 = pnand %p25705_p13, %p25951_p10  ;;  %p25712_p6 = por %p25711_p5, %p25710_p4 }
  0x5f   : > { %p25708_p3 = pneg %p25707_p2 }
  0x61   : > { %p25713_p9 = pnand %p25712_p6, %p25708_p3 }
  0x63   : > { %25716 = shalt.err (!%p25713_p9)
}
  0x64   : > { %s25717_s30 = scalar_lea.vmem %s26033_s13, 110592  ;;  %s25836_s15 = smov [#allocation2]  }
  0x65   : > { %p25718_p11 = scmp.ne.s32.totalorder %s26033_s13, %s25717_s30  ;;  %s25722_s24 = sshll.u32 %s25836_s15, 4  ;;  %s25723_s24 = int_to_ptr.vmem [resolvable:$false] %s25722_s24 }
  0x66   : > { %s25724_s16 = scalar_lea.vmem %s25723_s24, 221184  ;;  %p25725_p0 = scmp.lt.s32.totalorder %s26033_s13, %s25723_s24 }
  0x67   : > { %p25720_p7 = pnand %p25718_p11, %p25951_p10  ;;  %p25726_p1 = scmp.lt.s32.totalorder %s25724_s16, %s25717_s30 }
  0x69   : > { %p25721_p12 = pneg %p25720_p7  ;;  %p25727_p13 = por %p25726_p1, %p25725_p0 }
  0x6b   : > { %p25728_p2 = pnand %p25727_p13, %p25721_p12 }
  0x6d   : > { %25731 = shalt.err (!%p25728_p2)
}
  0x6e   : > { %s25837_s5 = smov 1152   ;;  %s25838_s19 = smov 72  }
  0x6f   : > { %22035 = dma.hbm_to_vmem [thread:$0]  (!%p25929_p8), %s26031_s17, 110592, %s26033_s13, %s268_s8, %s25837_s5, %s25837_s5, %s25838_s19  }
  0x70   : > { %s29860_s18 = smul.u32 73728, %s25830_s27  ;;  %s29861_s4 = sld [smem:[#allocation44_spill]] }
  0x71   : > { %s29862_s30 = smul.u32 4608, %s25927_s11 }
  0x72   : > { %s22014_s16 = smul.u32 72, %s25927_s11 }
  0x73   : > { %s313_s15 = scalar_lea.vmem [#allocation6], %s29862_s30 }
  0x74   : > { %s320_s24 = sshll.u32 %s313_s15, 4  ;;  %s26067_s24 = int_to_ptr.vmem [resolvable:$true] %s320_s24 }
  0x76   : > { %s26063_s9 = scalar_lea.hbm %s29861_s4, %s29860_s18  ;;  %s25737_s17 = scalar_lea.hbm %s29861_s4, 147456 }
  0x77   : > { %s25732_s2 = scalar_lea.hbm %s26063_s9, 73728  ;;  %p25738_p6 = scmp.lt.s32.totalorder %s26063_s9, %s29861_s4 }
  0x78   : > { %p25733_p3 = scmp.ne.s32.totalorder %s26063_s9, %s25732_s2  ;;  %p25739_p9 = scmp.lt.s32.totalorder %s25737_s17, %s25732_s2 }
  0x7a   : > { %p25735_p4 = pnand %p25733_p3, %p25951_p10  ;;  %p25740_p11 = por %p25739_p9, %p25738_p6 }
  0x7c   : > { %p25736_p5 = pneg %p25735_p4 }
  0x7e   : > { %p25741_p7 = pnand %p25740_p11, %p25736_p5 }
  0x80   : > { %25744 = shalt.err (!%p25741_p7)
}
  0x81   : > { %s25745_s18 = scalar_lea.vmem %s26067_s24, 73728  ;;  %s25839_s20 = smov [#allocation6]  }
  0x82   : > { %p25746_p12 = scmp.ne.s32.totalorder %s26067_s24, %s25745_s18  ;;  %s25750_s3 = sshll.u32 %s25839_s20, 4  ;;  %s25751_s3 = int_to_ptr.vmem [resolvable:$false] %s25750_s3 }
  0x83   : > { %s25752_s30 = scalar_lea.vmem %s25751_s3, 147456  ;;  %p25753_p13 = scmp.lt.s32.totalorder %s26067_s24, %s25751_s3 }
  0x84   : > { %p25748_p0 = pnand %p25746_p12, %p25951_p10  ;;  %p25754_p2 = scmp.lt.s32.totalorder %s25752_s30, %s25745_s18 }
  0x86   : > { %p25749_p1 = pneg %p25748_p0  ;;  %p25755_p3 = por %p25754_p2, %p25753_p13 }
  0x88   : > { %p25756_p4 = pnand %p25755_p3, %p25749_p1 }
  0x8a   : > { %25759 = shalt.err (!%p25756_p4)
}
  0x8b   : > { %s25840_s2 = smov 768   ;;  %s25841_s15 = smov 48  }
  0x8c   : > { %22041 = dma.hbm_to_vmem [thread:$0]  (!%p25929_p8), %s26063_s9, 73728, %s26067_s24, %s25945_s21, %s25840_s2, %s25840_s2, %s25841_s15  }
  0x8d   : > { %s22015_s8 = smul.u32 1152, %s25830_s27  ;;  %s355_s13 = scalar_lea.vmem [#allocation9], %s22014_s16 }
  0x8e   : > { %s363_s17 = sshll.u32 %s355_s13, 4  ;;  %s25765_s4 = scalar_lea.hbm %s29824_s6, 2304  ;;  %s364_s17 = int_to_ptr.vmem [resolvable:$true] %s363_s17 }
  0x8f   : > { %s361_s18 = scalar_lea.hbm %s29824_s6, %s22015_s8 }
  0x90   : > { %s25760_s20 = scalar_lea.hbm %s361_s18, 1152  ;;  %p25766_p11 = scmp.lt.s32.totalorder %s361_s18, %s29824_s6 }
  0x91   : > { %p25761_p5 = scmp.ne.s32.totalorder %s361_s18, %s25760_s20  ;;  %p25767_p7 = scmp.lt.s32.totalorder %s25765_s4, %s25760_s20 }
  0x93   : > { %p25763_p6 = pnand %p25761_p5, %p25951_p10  ;;  %p25768_p12 = por %p25767_p7, %p25766_p11 }
  0x95   : > { %p25764_p9 = pneg %p25763_p6 }
  0x97   : > { %p25769_p0 = pnand %p25768_p12, %p25764_p9 }
  0x99   : > { %25772 = shalt.err (!%p25769_p0)
}
  0x9a   : > { %s25773_s27 = scalar_lea.vmem %s364_s17, 1152  ;;  %s25842_s11 = smov [#allocation9]  }
  0x9b   : > { %p25774_p1 = scmp.ne.s32.totalorder %s364_s17, %s25773_s27  ;;  %s25778_s9 = sshll.u32 %s25842_s11, 4  ;;  %s25779_s9 = int_to_ptr.vmem [resolvable:$false] %s25778_s9 }
  0x9c   : > { %s25780_s24 = scalar_lea.vmem %s25779_s9, 2304  ;;  %p25781_p3 = scmp.lt.s32.totalorder %s364_s17, %s25779_s9 }
  0x9d   : > { %p25776_p13 = pnand %p25774_p1, %p25951_p10  ;;  %p25782_p4 = scmp.lt.s32.totalorder %s25780_s24, %s25773_s27 }
  0x9f   : > { %p25777_p2 = pneg %p25776_p13  ;;  %p25783_p5 = por %p25782_p4, %p25781_p3 }
  0xa1   : > { %p25784_p6 = pnand %p25783_p5, %p25777_p2 }
  0xa3   : > { %25787 = shalt.err (!%p25784_p6)
}
  0xa4   : > { %22047 = dma.hbm_to_vmem [thread:$0]  (!%p25929_p8), %s361_s18, 1152, %s364_s17, %s25999_s22  }
  0xa5   : > { %p29863_p9 = scmp.ne.s32.totalorder %s29855_s14, 0 }
  0xa7   : > { %372 = sbr.rel (%p29863_p9) target bundleno = 4262 (0x10a6), region = 48 }
  0xac   : > { %s26113_s4 = sand.u32 1, %s25822_s25   ;;  %p29864_p10 = scmp.ne.s32.totalorder %s29851_s10, 0 }
  0xad   : > { %s22016_s26 = smul.u32 6912, %s26113_s4  ;;  %s375_s23 = scalar_lea.sflag [#allocation3], %s26113_s4 }
  0xaf   : > { %s26117_s16 = scalar_lea.vmem [#allocation2], %s22016_s26 }
  0xb0   : > { %25805 = dma.done.wait (%p29864_p10), %s375_s23, 110592  }
  0xb1   : > { %25807 = vsyncadd (%p29864_p10), %s375_s23, 4294856704  ;;  %s383_s12 = sand.u32 1, %s25905_s28   ;;  %s22017_s22 = smul.u32 2304, %s26113_s4 }
  0xb2   : > { %s384_s14 = scalar_lea.sflag [#allocation5], %s383_s12 }
  0xb3   : > { %s26125_s2 = scalar_lea.vmem [#allocation4], %s22017_s22 }
  0xb4   : > { %25809 = dma.done.wait (%p29864_p10), %s384_s14, 110592  }
  0xb5   : > { %25811 = vsyncadd (%p29864_p10), %s384_s14, 4294856704  ;;  %s22018_s15 = smul.u32 4608, %s26113_s4  ;;  %s402_s13 = scalar_lea.sflag [#allocation8], %s383_s12 }
  0xb7   : > { %s26132_s8 = scalar_lea.vmem [#allocation6], %s22018_s15  ;;  %s26134_s17 = scalar_lea.vmem [#allocation7], %s22018_s15 }
  0xb8   : > { %25813 = dma.done.wait (%p29864_p10), %s402_s13, 74880  }
  0xb9   : > { %25815 = vsyncadd (%p29864_p10), %s402_s13, 4294892416  ;;  %v22090_v0 = vld [vmem:[%s26117_s16 + $0x3f4] ss:$72 sps:$4 sm:$0xff]   ;;  %v22092_v1 = vld [vmem:[%s26117_s16 + $0x3f0] ss:$72 sps:$4 sm:$0xff]   ;;  %p474_p8 = scmp.lt.s32.totalorder %s25905_s28, 1 }
  0xba   : > { %5871 = vmatprep.subr.bf16.mxu0 %v22090_v0  ;;  %v22093_v2 = vld [vmem:[%s26117_s16 + $0xcf4] ss:$72 sps:$4 sm:$0xff]   ;;  %v22095_v3 = vld [vmem:[%s26117_s16 + $0xcf0] ss:$72 sps:$4 sm:$0xff]   ;;  %v22096_v4 = vld [vmem:[%s26117_s16 + $0x364] ss:$72 sps:$4 sm:$0xff]  }
  0xbb   : > { %5872 = vmatpush1.bf16.msra.mxu0 %v22092_v1  ;;  %v22098_v5 = vld [vmem:[%s26117_s16 + $0x360] ss:$72 sps:$4 sm:$0xff]   ;;  %5914 = vmatprep.subr.bf16.mxu1 %v22093_v2  ;;  %v22099_v6 = vld [vmem:[%s26117_s16 + $0xc64] ss:$72 sps:$4 sm:$0xff]   ;;  %v22102_v8 = vld [vmem:[%s26117_s16 + $0x2d4] ss:$72 sps:$4 sm:$0xff]  }
  0xbc   : > { %5915 = vmatpush1.bf16.msra.mxu1 %v22095_v3  ;;  %5873 = vmatprep.subr.bf16.mxu0 %v22096_v4  ;;  %v22101_v7 = vld [vmem:[%s26117_s16 + $0xc60] ss:$72 sps:$4 sm:$0xff]   ;;  %v22104_v9 = vld [vmem:[%s26117_s16 + $0x2d0] ss:$72 sps:$4 sm:$0xff]   ;;  %v22105_v10 = vld [vmem:[%s26117_s16 + $0xbd4] ss:$72 sps:$4 sm:$0xff]  }
  0xbd   : > { %5916 = vmatprep.subr.bf16.mxu1 %v22099_v6  ;;  %v22108_v11 = vld [vmem:[%s26117_s16 + $0x244] ss:$72 sps:$4 sm:$0xff]   ;;  %v22107_v12 = vld [vmem:[%s26117_s16 + $0xbd0] ss:$72 sps:$4 sm:$0xff]   ;;  %v22110_v14 = vld [vmem:[%s26117_s16 + $0x240] ss:$72 sps:$4 sm:$0xff]  }
  0xbe   : > { %v22111_v13 = vld [vmem:[%s26117_s16 + $0xb44] ss:$72 sps:$4 sm:$0xff]   ;;  %v22114_v15 = vld [vmem:[%s26117_s16 + $0x1b4] ss:$72 sps:$4 sm:$0xff]   ;;  %v22113_v16 = vld [vmem:[%s26117_s16 + $0xb40] ss:$72 sps:$4 sm:$0xff]  }
  0xbf   : > { %5874 = vmatpush1.bf16.msra.mxu0 %v22098_v5  ;;  %v22117_v17 = vld [vmem:[%s26117_s16 + $0xab4] ss:$72 sps:$4 sm:$0xff]   ;;  %v22116_v18 = vld [vmem:[%s26117_s16 + $0x1b0] ss:$72 sps:$4 sm:$0xff]   ;;  %v22120_v19 = vld [vmem:[%s26117_s16 + $0x124] ss:$72 sps:$4 sm:$0xff]  }
  0xc0   : > { %5875 = vmatprep.subr.bf16.mxu0 %v22102_v8  ;;  %5917 = vmatpush1.bf16.msra.mxu1 %v22101_v7  ;;  %v22119_v20 = vld [vmem:[%s26117_s16 + $0xab0] ss:$72 sps:$4 sm:$0xff]   ;;  %v22123_v21 = vld [vmem:[%s26117_s16 + $0xa24] ss:$72 sps:$4 sm:$0xff]   ;;  %v22122_v22 = vld [vmem:[%s26117_s16 + $0x120] ss:$72 sps:$4 sm:$0xff]  }
  0xc1   : > { %5918 = vmatprep.subr.bf16.mxu1 %v22105_v10  ;;  %v22126_v23 = vld [vmem:[%s26117_s16 + $0x94] ss:$72 sps:$4 sm:$0xff]   ;;  %v22125_v24 = vld [vmem:[%s26117_s16 + $0xa20] ss:$72 sps:$4 sm:$0xff]   ;;  %v22128_v26 = vld [vmem:[%s26117_s16 + $0x90] ss:$72 sps:$4 sm:$0xff]  }
  0xc2   : > { %v22129_v25 = vld [vmem:[%s26117_s16 + $0x994] ss:$72 sps:$4 sm:$0xff]   ;;  %v22132_v27 = vld [vmem:[%s26117_s16 + $0x4] ss:$72 sps:$4 sm:$0xff]   ;;  %v22131_v28 = vld [vmem:[%s26117_s16 + $0x990] ss:$72 sps:$4 sm:$0xff]  }
  0xc3   : > { %5876 = vmatpush1.bf16.msra.mxu0 %v22104_v9  ;;  %v22135_v29 = vld [vmem:[%s26117_s16 + $0x904] ss:$72 sps:$4 sm:$0xff]   ;;  %v22134_v30 = vld [vmem:[%s26117_s16] ss:$72 sps:$4 sm:$0xff]   ;;  %v22138_v31 = vld [vmem:[%s26117_s16 + $0x874] ss:$72 sps:$4 sm:$0xff]  }
  0xc4   : > { %5877 = vmatprep.subr.bf16.mxu0 %v22108_v11  ;;  %5919 = vmatpush1.bf16.msra.mxu1 %v22107_v12  ;;  %v22137_v32 = vld [vmem:[%s26117_s16 + $0x900] ss:$72 sps:$4 sm:$0xff]   ;;  %v22141_v33 = vld [vmem:[%s26117_s16 + $0x1174] ss:$72 sps:$4 sm:$0xff]   ;;  %v22140_v34 = vld [vmem:[%s26117_s16 + $0x870] ss:$72 sps:$4 sm:$0xff]  }
  0xc5   : > { %5920 = vmatprep.subr.bf16.mxu1 %v22111_v13  ;;  %s29964_s28 = smov (!%p474_p8, %s25905_s28), 1  ;;  %v22144_v35 = vld [vmem:[%s26117_s16 + $0x7e4] ss:$72 sps:$4 sm:$0xff]   ;;  %v22143_v36 = vld [vmem:[%s26117_s16 + $0x1170] ss:$72 sps:$4 sm:$0xff]   ;;  %s22019_s20 = smul.u32 72, %s26113_s4 }
  0xc6   : > { %v22147_v37 = vld [vmem:[%s26117_s16 + $0x10e4] ss:$72 sps:$4 sm:$0xff]   ;;  %v22146_v38 = vld [vmem:[%s26117_s16 + $0x7e0] ss:$72 sps:$4 sm:$0xff]   ;;  %s22020_s10 = smul.u32 96, %s29964_s28  ;;  %s19691_s30 = sshll.u32 %s29964_s28, 1 }
  0xc7   : > { %5878 = vmatpush1.bf16.msra.mxu0 %v22110_v14  ;;  %v22150_v39 = vld [vmem:[%s26117_s16 + $0x754] ss:$72 sps:$4 sm:$0xff]   ;;  %v22149_v40 = vld [vmem:[%s26117_s16 + $0x10e0] ss:$72 sps:$4 sm:$0xff]   ;;  %v22152_v42 = vld [vmem:[%s26117_s16 + $0x750] ss:$72 sps:$4 sm:$0xff]   ;;  %s482_s11 = scalar_lea.vmem %s29819_s1, %s19691_s30 }
  0xc8   : > { %5879 = vmatprep.subr.bf16.mxu0 %v22114_v15  ;;  %5921 = vmatpush1.bf16.msra.mxu1 %v22113_v16  ;;  %v22153_v41 = vld [vmem:[%s26117_s16 + $0x1054] ss:$72 sps:$4 sm:$0xff]   ;;  %s26191_s18 = scalar_lea.vmem %s29818_s0, %s22020_s10  ;;  %v22156_v43 = vld [vmem:[%s26117_s16 + $0x6c4] ss:$72 sps:$4 sm:$0xff]   ;;  %v22155_v44 = vld [vmem:[%s26117_s16 + $0x1050] ss:$72 sps:$4 sm:$0xff]  }
  0xc9   : > { %5922 = vmatprep.subr.bf16.mxu1 %v22117_v17  ;;  %v22159_v45 = vld [vmem:[%s26117_s16 + $0xfc4] ss:$72 sps:$4 sm:$0xff]   ;;  %v495_v47 = vld [vmem:[%s26191_s18 + $0x38] sm:$0xff]  ;;  %v22158_v48 = vld [vmem:[%s26117_s16 + $0x6c0] ss:$72 sps:$4 sm:$0xff]   ;;  %s26446_s3 = scalar_lea.vmem [#allocation9], %s22019_s20 }
  0xca   : > { %v489_v46 = vld [vmem:[%s26191_s18 + $0x8] sm:$0xff]  ;;  %v22162_v50 = vld [vmem:[%s26117_s16 + $0x634] ss:$72 sps:$4 sm:$0xff]   ;;  %v22164_v56 = vld [vmem:[%s26117_s16 + $0x630] ss:$72 sps:$4 sm:$0xff]   ;;  %vm7499_vm0 = vcmask 64512  }
  0xcb   : > { %5880 = vmatpush1.bf16.msra.mxu0 %v22116_v18  ;;  %v26199_v49 = vpack.c.bf16 %v495_v47, %v489_v46  ;;  %v22161_v51 = vld [vmem:[%s26117_s16 + $0xfc0] ss:$72 sps:$4 sm:$0xff]   ;;  %v491_v52 = vld [vmem:[%s26191_s18 + $0x18] sm:$0xff]  ;;  %v22168_v57 = vld [vmem:[%s26117_s16 + $0x5a4] ss:$72 sps:$4 sm:$0xff]   ;;  %s22021_s9 = smul.u32 12, %s29964_s28 }
  0xcc   : > { %5881 = vmatprep.subr.bf16.mxu0 %v22120_v19  ;;  %5923 = vmatpush1.bf16.msra.mxu1 %v22119_v20  ;;  %v497_v53 = vld [vmem:[%s26191_s18 + $0x48] sm:$0xff]  ;;  %v22165_v54 = vld [vmem:[%s26117_s16 + $0xf34] ss:$72 sps:$4 sm:$0xff]   ;;  %v22167_v58 = vld [vmem:[%s26117_s16 + $0xf30] ss:$72 sps:$4 sm:$0xff]   ;;  %vm19485_vm1 = vcmask 1041409  }
  0xcd   : > { %5924 = vmatprep.subr.bf16.mxu1 %v22123_v21  ;;  %5903 = vmatprep.mubr.bf16.mxu0 %v26199_v49  ;;  %v26207_v55 = vpack.c.bf16 %v497_v53, %v491_v52  ;;  %v22171_v59 = vld [vmem:[%s26117_s16 + $0xea4] ss:$72 sps:$4 sm:$0xff]   ;;  %v22170_v60 = vld [vmem:[%s26117_s16 + $0x5a0] ss:$72 sps:$4 sm:$0xff]   ;;  %v22174_v61 = vld [vmem:[%s26117_s16 + $0x514] ss:$72 sps:$4 sm:$0xff]   ;;  %s487_s26 = scalar_lea.vmem %s29825_s7, %s22021_s9 }
  0xce   : > { %v22173_v62 = vld [vmem:[%s26117_s16 + $0xea0] ss:$72 sps:$4 sm:$0xff]   ;;  %v22177_v63 = vld [vmem:[%s26117_s16 + $0xe14] ss:$72 sps:$4 sm:$0xff]   ;;  %v22176_v0 = vld [vmem:[%s26117_s16 + $0x510] ss:$72 sps:$4 sm:$0xff]  }
  0xcf   : > { %5882 = vmatpush1.bf16.msra.mxu0 %v22122_v22  ;;  %5946 = vmatprep.mubr.bf16.mxu1 %v26207_v55  ;;  %v22179_v1 = vld [vmem:[%s26117_s16 + $0xe10] ss:$72 sps:$4 sm:$0xff]   ;;  %v22180_v2 = vld [vmem:[%s26117_s16 + $0x484] ss:$72 sps:$4 sm:$0xff]   ;;  %v22182_v3 = vld [vmem:[%s26117_s16 + $0x480] ss:$72 sps:$4 sm:$0xff]  }
  0xd0   : > { %5883 = vmatprep.subr.bf16.mxu0 %v22126_v23  ;;  %5925 = vmatpush1.bf16.msra.mxu1 %v22125_v24  ;;  %v22183_v4 = vld [vmem:[%s26117_s16 + $0xd84] ss:$72 sps:$4 sm:$0xff]   ;;  %v22185_v6 = vld [vmem:[%s26117_s16 + $0xd80] ss:$72 sps:$4 sm:$0xff]   ;;  %v494_v7 = vld [vmem:[%s26191_s18 + $0x30] sm:$0xff]  ;;  %vm19487_vm2 = vcmask 1043459  }
  0xd1   : > { %5926 = vmatprep.subr.bf16.mxu1 %v22129_v25  ;;  %v488_v5 = vld [vmem:[%s26191_s18] sm:$0xff]  ;;  %v22188_v8 = vld [vmem:[%s26117_s16 + $0x15f4] ss:$72 sps:$4 sm:$0xff]   ;;  %v22186_v13 = vld [vmem:[%s26117_s16 + $0x15f0] ss:$72 sps:$4 sm:$0xff]   ;;  %vm19489_vm3 = vcmask 1045509  }
  0xd2   : > { %v490_v9 = vld [vmem:[%s26191_s18 + $0x10] sm:$0xff]  ;;  %v496_v10 = vld [vmem:[%s26191_s18 + $0x40] sm:$0xff]  ;;  %v26229_v11 = vpack.c.bf16 %v494_v7, %v488_v5  ;;  %vm19491_vm4 = vcmask 1047559  }
  0xd3   : > { %5884 = vmatpush1.bf16.msra.mxu0 %v22128_v26  ;;  %v22191_v12 = vld [vmem:[%s26117_s16 + $0x3fc] ss:$72 sps:$4 sm:$0xff]   ;;  %v26233_v14 = vpack.c.bf16 %v496_v10, %v490_v9  ;;  %v22189_v16 = vld [vmem:[%s26117_s16 + $0x3f8] ss:$72 sps:$4 sm:$0xff]   ;;  %v22197_v17 = vld [vmem:[%s26117_s16 + $0x36c] ss:$72 sps:$4 sm:$0xff]  }
  0xd4   : > { %5885 = vmatprep.subr.bf16.mxu0 %v22132_v27  ;;  %5927 = vmatpush1.bf16.msra.mxu1 %v22131_v28  ;;  %v22194_v15 = vld [vmem:[%s26117_s16 + $0x1564] ss:$72 sps:$4 sm:$0xff]   ;;  %v22192_v18 = vld [vmem:[%s26117_s16 + $0x1560] ss:$72 sps:$4 sm:$0xff]   ;;  %v22200_v19 = vld [vmem:[%s26117_s16 + $0x14d4] ss:$72 sps:$4 sm:$0xff]  }
  0xd5   : > { %5928 = vmatprep.subr.bf16.mxu1 %v22135_v29  ;;  %v22195_v20 = vld [vmem:[%s26117_s16 + $0x368] ss:$72 sps:$4 sm:$0xff]   ;;  %v22203_v21 = vld [vmem:[%s26117_s16 + $0x2dc] ss:$72 sps:$4 sm:$0xff]   ;;  %v22201_v24 = vld [vmem:[%s26117_s16 + $0x2d8] ss:$72 sps:$4 sm:$0xff]  }
  0xd6   : > { %v22198_v22 = vld [vmem:[%s26117_s16 + $0x14d0] ss:$72 sps:$4 sm:$0xff]   ;;  %v22206_v23 = vld [vmem:[%s26117_s16 + $0x1444] ss:$72 sps:$4 sm:$0xff]   ;;  %v22204_v26 = vld [vmem:[%s26117_s16 + $0x1440] ss:$72 sps:$4 sm:$0xff]  }
  0xd7   : > { %5886 = vmatpush1.bf16.msra.mxu0 %v22134_v30  ;;  %v22209_v25 = vld [vmem:[%s26117_s16 + $0x24c] ss:$72 sps:$4 sm:$0xff]   ;;  %v22207_v28 = vld [vmem:[%s26117_s16 + $0x248] ss:$72 sps:$4 sm:$0xff]   ;;  %v22215_v29 = vld [vmem:[%s26117_s16 + $0x1bc] ss:$72 sps:$4 sm:$0xff]  }
  0xd8   : > { %5887 = vmatprep.subr.bf16.mxu0 %v22138_v31  ;;  %5929 = vmatpush1.bf16.msra.mxu1 %v22137_v32  ;;  %v22212_v27 = vld [vmem:[%s26117_s16 + $0x13b4] ss:$72 sps:$4 sm:$0xff]   ;;  %v22210_v30 = vld [vmem:[%s26117_s16 + $0x13b0] ss:$72 sps:$4 sm:$0xff]   ;;  %v22218_v31 = vld [vmem:[%s26117_s16 + $0x1324] ss:$72 sps:$4 sm:$0xff]  }
  0xd9   : > { %5930 = vmatprep.subr.bf16.mxu1 %v22141_v33  ;;  %v22213_v32 = vld [vmem:[%s26117_s16 + $0x1b8] ss:$72 sps:$4 sm:$0xff]   ;;  %v22221_v33 = vld [vmem:[%s26117_s16 + $0x12c] ss:$72 sps:$4 sm:$0xff]   ;;  %v22231_v47 = vld [vmem:[%s26117_s16 + $0x8] ss:$72 sps:$4 sm:$0xff]  }
  0xda   : > { %v22236_v46 = vld [vmem:[%s26117_s16 + $0x1a74] ss:$72 sps:$4 sm:$0xff]   ;;  %v22237_v52 = vld [vmem:[%s26117_s16 + $0x878] ss:$72 sps:$4 sm:$0xff]   ;;  %v22267_v9 = vld [vmem:[%s26117_s16 + $0x5a8] ss:$72 sps:$4 sm:$0xff]  }
  0xdb   : > { %5888 = vmatpush2.bf16.msra.mxu0 %v22140_v34  ;;  %v22216_v34 = vld [vmem:[%s26117_s16 + $0x1320] ss:$72 sps:$4 sm:$0xff]   ;;  %v22245_v53 = vld [vmem:[%s26117_s16 + $0x7ec] ss:$72 sps:$4 sm:$0xff]   ;;  %v22275_v10 = vld [vmem:[%s26117_s16 + $0x51c] ss:$72 sps:$4 sm:$0xff]  }
  0xdc   : > { %5889 = vmatprep.subr.bf16.mxu0 %v22144_v35  ;;  %5931 = vmatpush2.bf16.msra.mxu1 %v22143_v36  ;;  %v22224_v35 = vld [vmem:[%s26117_s16 + $0x1294] ss:$72 sps:$4 sm:$0xff]   ;;  %v22219_v36 = vld [vmem:[%s26117_s16 + $0x128] ss:$72 sps:$4 sm:$0xff]   ;;  %v22261_v5 = vld [vmem:[%s26117_s16 + $0x638] ss:$72 sps:$4 sm:$0xff]  }
  0xdd   : > { %5932 = vmatprep.subr.bf16.mxu1 %v22147_v37  ;;  %v22227_v37 = vld [vmem:[%s26117_s16 + $0x9c] ss:$72 sps:$4 sm:$0xff]   ;;  %v22264_v7 = vld [vmem:[%s26117_s16 + $0x17a0] ss:$72 sps:$4 sm:$0xff]  }
  0xdf   : > { %5890 = vmatpush2.bf16.msra.mxu0 %v22146_v38  ;;  %v22222_v38 = vld [vmem:[%s26117_s16 + $0x1290] ss:$72 sps:$4 sm:$0xff]  }
  0xe0   : > { %5891 = vmatprep.subr.bf16.mxu0 %v22150_v39  ;;  %5933 = vmatpush2.bf16.msra.mxu1 %v22149_v40  ;;  %v22230_v39 = vld [vmem:[%s26117_s16 + $0x1204] ss:$72 sps:$4 sm:$0xff]  }
  0xe1   : > { %5934 = vmatprep.subr.bf16.mxu1 %v22153_v41  ;;  %v493_v40 = vld [vmem:[%s26191_s18 + $0x28] sm:$0xff]  ;;  %v499_v41 = vld [vmem:[%s26191_s18 + $0x58] sm:$0xff] }
  0xe3   : > { %5892 = vmatpush2.bf16.msra.mxu0 %v22152_v42  ;;  %v22225_v42 = vld [vmem:[%s26117_s16 + $0x98] ss:$72 sps:$4 sm:$0xff]  }
  0xe4   : > { %5893 = vmatprep.subr.bf16.mxu0 %v22156_v43  ;;  %5935 = vmatpush2.bf16.msra.mxu1 %v22155_v44  ;;  %v26266_v43 = vpack.c.bf16 %v499_v41, %v493_v40  ;;  %v22233_v44 = vld [vmem:[%s26117_s16 + $0xc] ss:$72 sps:$4 sm:$0xff]   ;;  %v22306_v40 = vld [vmem:[%s26117_s16 + $0xab8] ss:$72 sps:$4 sm:$0xff]  }
  0xe5   : > { %5936 = vmatprep.subr.bf16.mxu1 %v22159_v45  ;;  %v22228_v45 = vld [vmem:[%s26117_s16 + $0x1200] ss:$72 sps:$4 sm:$0xff]   ;;  %v22314_v41 = vld [vmem:[%s26117_s16 + $0xa2c] ss:$72 sps:$4 sm:$0xff]  }
  0xe7   : > { %5894 = vmatpush2.bf16.msra.mxu0 %v22158_v48  ;;  %v22239_v48 = vld [vmem:[%s26117_s16 + $0x87c] ss:$72 sps:$4 sm:$0xff]  }
  0xe8   : > { %5895 = vmatprep.subr.bf16.mxu0 %v22162_v50  ;;  %5937 = vmatpush2.bf16.msra.mxu1 %v22161_v51  ;;  %v22234_v50 = vld [vmem:[%s26117_s16 + $0x1a70] ss:$72 sps:$4 sm:$0xff]   ;;  %v22242_v51 = vld [vmem:[%s26117_s16 + $0x19e4] ss:$72 sps:$4 sm:$0xff]  }
  0xe9   : > { %5938 = vmatprep.subr.bf16.mxu1 %v22165_v54  ;;  %v22240_v54 = vld [vmem:[%s26117_s16 + $0x19e0] ss:$72 sps:$4 sm:$0xff]  }
  0xeb   : > { %5896 = vmatpush2.bf16.msra.mxu0 %v22164_v56  ;;  %v22248_v56 = vld [vmem:[%s26117_s16 + $0x1954] ss:$72 sps:$4 sm:$0xff]  }
  0xec   : > { %5897 = vmatprep.subr.bf16.mxu0 %v22168_v57  ;;  %5939 = vmatpush2.bf16.msra.mxu1 %v22167_v58  ;;  %v22243_v57 = vld [vmem:[%s26117_s16 + $0x7e8] ss:$72 sps:$4 sm:$0xff]   ;;  %v22251_v58 = vld [vmem:[%s26117_s16 + $0x75c] ss:$72 sps:$4 sm:$0xff]  }
  0xed   : > { %5940 = vmatprep.subr.bf16.mxu1 %v22171_v59  ;;  %v22246_v59 = vld [vmem:[%s26117_s16 + $0x1950] ss:$72 sps:$4 sm:$0xff]  }
  0xef   : > { %5898 = vmatpush2.bf16.msra.mxu0 %v22170_v60  ;;  %v22254_v60 = vld [vmem:[%s26117_s16 + $0x18c4] ss:$72 sps:$4 sm:$0xff]  }
  0xf0   : > { %5899 = vmatprep.subr.bf16.mxu0 %v22174_v61  ;;  %5941 = vmatpush2.bf16.msra.mxu1 %v22173_v62  ;;  %v22249_v61 = vld [vmem:[%s26117_s16 + $0x758] ss:$72 sps:$4 sm:$0xff]   ;;  %v22257_v62 = vld [vmem:[%s26117_s16 + $0x6cc] ss:$72 sps:$4 sm:$0xff]  }
  0xf1   : > { %5942 = vmatprep.subr.bf16.mxu1 %v22177_v63  ;;  %v22252_v63 = vld [vmem:[%s26117_s16 + $0x18c0] ss:$72 sps:$4 sm:$0xff]  }
  0xf3   : > { %5900 = vmatpush2.bf16.msra.mxu0 %v22176_v0  ;;  %v22260_v0 = vld [vmem:[%s26117_s16 + $0x1834] ss:$72 sps:$4 sm:$0xff]  }
  0xf4   : > { %5901 = vmatprep.subr.bf16.mxu0 %v22180_v2  ;;  %5943 = vmatpush2.bf16.msra.mxu1 %v22179_v1  ;;  %v22255_v1 = vld [vmem:[%s26117_s16 + $0x6c8] ss:$72 sps:$4 sm:$0xff]   ;;  %v22263_v2 = vld [vmem:[%s26117_s16 + $0x63c] ss:$72 sps:$4 sm:$0xff]  }
  0xf5   : > { %5944 = vmatprep.subr.bf16.mxu1 %v22183_v4  ;;  %v22266_v4 = vld [vmem:[%s26117_s16 + $0x17a4] ss:$72 sps:$4 sm:$0xff]  }
  0xf7   : > { %5902 = vmatpush2.bf16.msra.mxu0 %v22182_v3  ;;  %v22258_v3 = vld [vmem:[%s26117_s16 + $0x1830] ss:$72 sps:$4 sm:$0xff]  }
  0xf8   : > { %5957 = vmatprep.subr.bf16.mxu0 %v22188_v8  ;;  %5945 = vmatpush2.bf16.msra.mxu1 %v22185_v6  ;;  %v22269_v6 = vld [vmem:[%s26117_s16 + $0x5ac] ss:$72 sps:$4 sm:$0xff]  }
  0xf9   : > { %6000 = vmatprep.subr.bf16.mxu1 %v22191_v12  ;;  %v22272_v8 = vld [vmem:[%s26117_s16 + $0x1714] ss:$72 sps:$4 sm:$0xff]   ;;  %v22270_v12 = vld [vmem:[%s26117_s16 + $0x1710] ss:$72 sps:$4 sm:$0xff]  }
  0xfa   : > { %5904 = vmatmul.mubr.bf16.vlgmr.msra.gmra.mxu0 %v26229_v11 }
  0xfb   : > { %5958 = vmatpush1.bf16.msra.mxu0 %v22186_v13  ;;  %5947 = vmatmul.mubr.bf16.vlgmr.msra.gmra.mxu1 %v26233_v14  ;;  %v22278_v13 = vld [vmem:[%s26117_s16 + $0x1684] ss:$72 sps:$4 sm:$0xff]  }
  0xfc   : > { %5959 = vmatprep.subr.bf16.mxu0 %v22194_v15  ;;  %6001 = vmatpush1.bf16.msra.mxu1 %v22189_v16  ;;  %v22273_v15 = vld [vmem:[%s26117_s16 + $0x518] ss:$72 sps:$4 sm:$0xff]  }
  0xfd   : > { %6032 = vmatprep.mubr.bf16.mxu1 %v26199_v49  ;;  %6002 = vmatprep.subr.bf16.mxu1 %v22197_v17  ;;  %v22276_v16 = vld [vmem:[%s26117_s16 + $0x1680] ss:$72 sps:$4 sm:$0xff]   ;;  %v22281_v17 = vld [vmem:[%s26117_s16 + $0x48c] ss:$72 sps:$4 sm:$0xff]  }
  0xfe   : > { %5989 = vmatprep.mubr.bf16.mxu0 %v26266_v43 }
  0xff   : > { %5960 = vmatpush1.bf16.msra.mxu0 %v22192_v18  ;;  %v492_v18 = vld [vmem:[%s26191_s18 + $0x20] sm:$0xff] }
 0x100   : > { %5961 = vmatprep.subr.bf16.mxu0 %v22200_v19  ;;  %6003 = vmatpush1.bf16.msra.mxu1 %v22195_v20  ;;  %v498_v19 = vld [vmem:[%s26191_s18 + $0x50] sm:$0xff]  ;;  %v22284_v20 = vld [vmem:[%s26117_s16 + $0xcfc] ss:$72 sps:$4 sm:$0xff]  }
 0x101   : > { %6004 = vmatprep.subr.bf16.mxu1 %v22203_v21  ;;  %v22279_v21 = vld [vmem:[%s26117_s16 + $0x488] ss:$72 sps:$4 sm:$0xff]  }
 0x103   : > { %5962 = vmatpush1.bf16.msra.mxu0 %v22198_v22  ;;  %v26307_v22 = vpack.c.bf16 %v498_v19, %v492_v18  ;;  %v22368_v18 = vld [vmem:[%s26117_s16 + $0xe1c] ss:$72 sps:$4 sm:$0xff]   ;;  %v22363_v19 = vld [vmem:[%s26117_s16 + $0x17a8] ss:$72 sps:$4 sm:$0xff]  }
 0x104   : > { %5963 = vmatprep.subr.bf16.mxu0 %v22206_v23  ;;  %6005 = vmatpush1.bf16.msra.mxu1 %v22201_v24  ;;  %v22287_v23 = vld [vmem:[%s26117_s16 + $0x15fc] ss:$72 sps:$4 sm:$0xff]   ;;  %v22282_v24 = vld [vmem:[%s26117_s16 + $0xcf8] ss:$72 sps:$4 sm:$0xff]  }
 0x105   : > { %6006 = vmatprep.subr.bf16.mxu1 %v22209_v25  ;;  %v22290_v25 = vld [vmem:[%s26117_s16 + $0xc6c] ss:$72 sps:$4 sm:$0xff]  }
 0x107   : > { %5964 = vmatpush1.bf16.msra.mxu0 %v22204_v26  ;;  %v22285_v26 = vld [vmem:[%s26117_s16 + $0x15f8] ss:$72 sps:$4 sm:$0xff]  }
 0x108   : > { %5965 = vmatprep.subr.bf16.mxu0 %v22212_v27  ;;  %6007 = vmatpush1.bf16.msra.mxu1 %v22207_v28  ;;  %v22293_v27 = vld [vmem:[%s26117_s16 + $0x156c] ss:$72 sps:$4 sm:$0xff]   ;;  %v22288_v28 = vld [vmem:[%s26117_s16 + $0xc68] ss:$72 sps:$4 sm:$0xff]  }
 0x109   : > { %6008 = vmatprep.subr.bf16.mxu1 %v22215_v29  ;;  %v22296_v29 = vld [vmem:[%s26117_s16 + $0xbdc] ss:$72 sps:$4 sm:$0xff]  }
 0x10b   : > { %5966 = vmatpush1.bf16.msra.mxu0 %v22210_v30  ;;  %v22291_v30 = vld [vmem:[%s26117_s16 + $0x1568] ss:$72 sps:$4 sm:$0xff]  }
 0x10c   : > { %5967 = vmatprep.subr.bf16.mxu0 %v22218_v31  ;;  %6009 = vmatpush1.bf16.msra.mxu1 %v22213_v32  ;;  %v22299_v31 = vld [vmem:[%s26117_s16 + $0x14dc] ss:$72 sps:$4 sm:$0xff]   ;;  %v22294_v32 = vld [vmem:[%s26117_s16 + $0xbd8] ss:$72 sps:$4 sm:$0xff]  }
 0x10d   : > { %6010 = vmatprep.subr.bf16.mxu1 %v22221_v33  ;;  %v22302_v33 = vld [vmem:[%s26117_s16 + $0xb4c] ss:$72 sps:$4 sm:$0xff]  }
 0x10f   : > { %5968 = vmatpush1.bf16.msra.mxu0 %v22216_v34  ;;  %v22297_v34 = vld [vmem:[%s26117_s16 + $0x14d8] ss:$72 sps:$4 sm:$0xff]  }
 0x110   : > { %5969 = vmatprep.subr.bf16.mxu0 %v22224_v35  ;;  %6011 = vmatpush1.bf16.msra.mxu1 %v22219_v36  ;;  %v22305_v35 = vld [vmem:[%s26117_s16 + $0x144c] ss:$72 sps:$4 sm:$0xff]   ;;  %v22300_v36 = vld [vmem:[%s26117_s16 + $0xb48] ss:$72 sps:$4 sm:$0xff]  }
 0x111   : > { %6012 = vmatprep.subr.bf16.mxu1 %v22227_v37  ;;  %v22308_v37 = vld [vmem:[%s26117_s16 + $0xabc] ss:$72 sps:$4 sm:$0xff]  }
 0x113   : > { %5970 = vmatpush1.bf16.msra.mxu0 %v22222_v38  ;;  %v22303_v38 = vld [vmem:[%s26117_s16 + $0x1448] ss:$72 sps:$4 sm:$0xff]  }
 0x114   : > { %5971 = vmatprep.subr.bf16.mxu0 %v22230_v39  ;;  %6013 = vmatpush1.bf16.msra.mxu1 %v22225_v42  ;;  %v22311_v39 = vld [vmem:[%s26117_s16 + $0x13bc] ss:$72 sps:$4 sm:$0xff]   ;;  %v22309_v42 = vld [vmem:[%s26117_s16 + $0x13b8] ss:$72 sps:$4 sm:$0xff]  }
 0x115   : > { %6014 = vmatprep.subr.bf16.mxu1 %v22233_v44  ;;  %v22317_v44 = vld [vmem:[%s26117_s16 + $0x132c] ss:$72 sps:$4 sm:$0xff]  }
 0x117   : > { %5972 = vmatpush1.bf16.msra.mxu0 %v22228_v45  ;;  %v22312_v45 = vld [vmem:[%s26117_s16 + $0xa28] ss:$72 sps:$4 sm:$0xff]  }
 0x118   : > { %5973 = vmatprep.subr.bf16.mxu0 %v22236_v46  ;;  %6015 = vmatpush1.bf16.msra.mxu1 %v22231_v47  ;;  %v22320_v46 = vld [vmem:[%s26117_s16 + $0x99c] ss:$72 sps:$4 sm:$0xff]   ;;  %v22315_v47 = vld [vmem:[%s26117_s16 + $0x1328] ss:$72 sps:$4 sm:$0xff]  }
 0x119   : > { %6016 = vmatprep.subr.bf16.mxu1 %v22239_v48  ;;  %v22323_v48 = vld [vmem:[%s26117_s16 + $0x129c] ss:$72 sps:$4 sm:$0xff]  }
 0x11b   : > { %5974 = vmatpush2.bf16.msra.mxu0 %v22234_v50  ;;  %v22318_v50 = vld [vmem:[%s26117_s16 + $0x998] ss:$72 sps:$4 sm:$0xff]  }
 0x11c   : > { %5975 = vmatprep.subr.bf16.mxu0 %v22242_v51  ;;  %6017 = vmatpush2.bf16.msra.mxu1 %v22237_v52  ;;  %v22326_v51 = vld [vmem:[%s26117_s16 + $0x90c] ss:$72 sps:$4 sm:$0xff]   ;;  %v22321_v52 = vld [vmem:[%s26117_s16 + $0x1298] ss:$72 sps:$4 sm:$0xff]  }
 0x11d   : > { %6018 = vmatprep.subr.bf16.mxu1 %v22245_v53  ;;  %v22329_v53 = vld [vmem:[%s26117_s16 + $0x120c] ss:$72 sps:$4 sm:$0xff]  }
 0x11f   : > { %5976 = vmatpush2.bf16.msra.mxu0 %v22240_v54  ;;  %v22324_v54 = vld [vmem:[%s26117_s16 + $0x908] ss:$72 sps:$4 sm:$0xff]  }
 0x120   : > { %5977 = vmatprep.subr.bf16.mxu0 %v22248_v56  ;;  %6019 = vmatpush2.bf16.msra.mxu1 %v22243_v57  ;;  %v22332_v56 = vld [vmem:[%s26117_s16 + $0x117c] ss:$72 sps:$4 sm:$0xff]   ;;  %v22327_v57 = vld [vmem:[%s26117_s16 + $0x1208] ss:$72 sps:$4 sm:$0xff]  }
 0x121   : > { %6020 = vmatprep.subr.bf16.mxu1 %v22251_v58  ;;  %v22335_v58 = vld [vmem:[%s26117_s16 + $0x1a7c] ss:$72 sps:$4 sm:$0xff]  }
 0x123   : > { %5978 = vmatpush2.bf16.msra.mxu0 %v22246_v59  ;;  %v22330_v59 = vld [vmem:[%s26117_s16 + $0x1178] ss:$72 sps:$4 sm:$0xff]  }
 0x124   : > { %5979 = vmatprep.subr.bf16.mxu0 %v22254_v60  ;;  %6021 = vmatpush2.bf16.msra.mxu1 %v22249_v61  ;;  %v22338_v60 = vld [vmem:[%s26117_s16 + $0x10ec] ss:$72 sps:$4 sm:$0xff]   ;;  %v22333_v61 = vld [vmem:[%s26117_s16 + $0x1a78] ss:$72 sps:$4 sm:$0xff]  }
 0x125   : > { %6022 = vmatprep.subr.bf16.mxu1 %v22257_v62  ;;  %v22341_v62 = vld [vmem:[%s26117_s16 + $0x19ec] ss:$72 sps:$4 sm:$0xff]  }
 0x127   : > { %5980 = vmatpush2.bf16.msra.mxu0 %v22252_v63  ;;  %v22336_v63 = vld [vmem:[%s26117_s16 + $0x10e8] ss:$72 sps:$4 sm:$0xff]  }
 0x128   : > { %5981 = vmatprep.subr.bf16.mxu0 %v22260_v0  ;;  %6023 = vmatpush2.bf16.msra.mxu1 %v22255_v1  ;;  %v22344_v0 = vld [vmem:[%s26117_s16 + $0x105c] ss:$72 sps:$4 sm:$0xff]   ;;  %v22339_v1 = vld [vmem:[%s26117_s16 + $0x19e8] ss:$72 sps:$4 sm:$0xff]  }
 0x129   : > { %6024 = vmatprep.subr.bf16.mxu1 %v22263_v2  ;;  %v22347_v2 = vld [vmem:[%s26117_s16 + $0x195c] ss:$72 sps:$4 sm:$0xff]  }
 0x12b   : > { %5982 = vmatpush2.bf16.msra.mxu0 %v22258_v3  ;;  %v22342_v3 = vld [vmem:[%s26117_s16 + $0x1058] ss:$72 sps:$4 sm:$0xff]  }
 0x12c   : > { %5983 = vmatprep.subr.bf16.mxu0 %v22266_v4  ;;  %6025 = vmatpush2.bf16.msra.mxu1 %v22261_v5  ;;  %v22350_v4 = vld [vmem:[%s26117_s16 + $0xfcc] ss:$72 sps:$4 sm:$0xff]   ;;  %v22345_v5 = vld [vmem:[%s26117_s16 + $0x1958] ss:$72 sps:$4 sm:$0xff]  }
 0x12d   : > { %6026 = vmatprep.subr.bf16.mxu1 %v22269_v6  ;;  %v22353_v6 = vld [vmem:[%s26117_s16 + $0x18cc] ss:$72 sps:$4 sm:$0xff]  }
 0x12f   : > { %5984 = vmatpush2.bf16.msra.mxu0 %v22264_v7  ;;  %v22348_v7 = vld [vmem:[%s26117_s16 + $0xfc8] ss:$72 sps:$4 sm:$0xff]  }
 0x130   : > { %5985 = vmatprep.subr.bf16.mxu0 %v22272_v8  ;;  %6027 = vmatpush2.bf16.msra.mxu1 %v22267_v9  ;;  %v22356_v8 = vld [vmem:[%s26117_s16 + $0xf3c] ss:$72 sps:$4 sm:$0xff]   ;;  %v22351_v9 = vld [vmem:[%s26117_s16 + $0x18c8] ss:$72 sps:$4 sm:$0xff]  }
 0x131   : > { %6028 = vmatprep.subr.bf16.mxu1 %v22275_v10  ;;  %v22359_v10 = vld [vmem:[%s26117_s16 + $0x183c] ss:$72 sps:$4 sm:$0xff]  }
 0x133   : > { %5986 = vmatpush2.bf16.msra.mxu0 %v22270_v12  ;;  %v22354_v12 = vld [vmem:[%s26117_s16 + $0xf38] ss:$72 sps:$4 sm:$0xff]  }
 0x134   : > { %5987 = vmatprep.subr.bf16.mxu0 %v22278_v13  ;;  %6029 = vmatpush2.bf16.msra.mxu1 %v22273_v15  ;;  %v22362_v13 = vld [vmem:[%s26117_s16 + $0xeac] ss:$72 sps:$4 sm:$0xff]   ;;  %v22357_v15 = vld [vmem:[%s26117_s16 + $0x1838] ss:$72 sps:$4 sm:$0xff]  }
 0x135   : > { %6030 = vmatprep.subr.bf16.mxu1 %v22281_v17  ;;  %v22360_v17 = vld [vmem:[%s26117_s16 + $0xea8] ss:$72 sps:$4 sm:$0xff]  }
 0x137   : > { %5988 = vmatpush2.bf16.msra.mxu0 %v22276_v16  ;;  %v22365_v16 = vld [vmem:[%s26117_s16 + $0x17ac] ss:$72 sps:$4 sm:$0xff]  }
 0x138   : > { %6043 = vmatprep.subr.bf16.mxu0 %v22284_v20  ;;  %6031 = vmatpush2.bf16.msra.mxu1 %v22279_v21  ;;  %v22371_v20 = vld [vmem:[%s26117_s16 + $0x171c] ss:$72 sps:$4 sm:$0xff]   ;;  %v22366_v21 = vld [vmem:[%s26117_s16 + $0xe18] ss:$72 sps:$4 sm:$0xff]  }
 0x139   : > { %6086 = vmatprep.subr.bf16.mxu1 %v22287_v23  ;;  %v22374_v23 = vld [vmem:[%s26117_s16 + $0xd8c] ss:$72 sps:$4 sm:$0xff]  }
 0x13a   : > { %5990 = vmatmul.mubr.bf16.vlgmr.msra.gmra.mxu0 %v26307_v22 }
 0x13b   : > { %6044 = vmatpush1.bf16.msra.mxu0 %v22282_v24  ;;  %6075 = vmatprep.mubr.bf16.mxu0 %v26207_v55  ;;  %v22369_v24 = vld [vmem:[%s26117_s16 + $0x1718] ss:$72 sps:$4 sm:$0xff]  }
 0x13c   : > { %6033 = vmatmul.mubr.bf16.vlgmr.msra.gmra.mxu1 %v26229_v11  ;;  %6045 = vmatprep.subr.bf16.mxu0 %v22290_v25  ;;  %v22377_v25 = vld [vmem:[%s26117_s16 + $0x168c] ss:$72 sps:$4 sm:$0xff]  }
 0x13d   : > { %6087 = vmatpush1.bf16.msra.mxu1 %v22285_v26  ;;  %6118 = vmatprep.mubr.bf16.mxu1 %v26266_v43  ;;  %v22372_v26 = vld [vmem:[%s26117_s16 + $0xd88] ss:$72 sps:$4 sm:$0xff]  }
 0x13e   : > { %6088 = vmatprep.subr.bf16.mxu1 %v22293_v27  ;;  %v22380_v27 = vld [vmem:[%s26117_s16 + $0x404] ss:$72 sps:$4 sm:$0xff]  }
 0x13f   : > { %6046 = vmatpush1.bf16.msra.mxu0 %v22288_v28  ;;  %v22375_v28 = vld [vmem:[%s26117_s16 + $0x1688] ss:$72 sps:$4 sm:$0xff]  }
 0x140   : > { %6047 = vmatprep.subr.bf16.mxu0 %v22296_v29  ;;  %v22383_v29 = vld [vmem:[%s26117_s16 + $0xd04] ss:$72 sps:$4 sm:$0xff]  }
 0x141   : > { %6089 = vmatpush1.bf16.msra.mxu1 %v22291_v30  ;;  %v22378_v30 = vld [vmem:[%s26117_s16 + $0x400] ss:$72 sps:$4 sm:$0xff]  }
 0x142   : > { %6090 = vmatprep.subr.bf16.mxu1 %v22299_v31  ;;  %v22386_v31 = vld [vmem:[%s26117_s16 + $0x374] ss:$72 sps:$4 sm:$0xff]  }
 0x143   : > { %6048 = vmatpush1.bf16.msra.mxu0 %v22294_v32  ;;  %v22381_v32 = vld [vmem:[%s26117_s16 + $0xd00] ss:$72 sps:$4 sm:$0xff]  }
 0x144   : > { %6049 = vmatprep.subr.bf16.mxu0 %v22302_v33  ;;  %v22389_v33 = vld [vmem:[%s26117_s16 + $0xc74] ss:$72 sps:$4 sm:$0xff]  }
 0x145   : > { %6091 = vmatpush1.bf16.msra.mxu1 %v22297_v34  ;;  %v22384_v34 = vld [vmem:[%s26117_s16 + $0x370] ss:$72 sps:$4 sm:$0xff]  }
 0x146   : > { %6092 = vmatprep.subr.bf16.mxu1 %v22305_v35  ;;  %v22392_v35 = vld [vmem:[%s26117_s16 + $0x2e4] ss:$72 sps:$4 sm:$0xff]  }
 0x147   : > { %6050 = vmatpush1.bf16.msra.mxu0 %v22300_v36  ;;  %v22387_v36 = vld [vmem:[%s26117_s16 + $0xc70] ss:$72 sps:$4 sm:$0xff]  }
 0x148   : > { %6051 = vmatprep.subr.bf16.mxu0 %v22308_v37  ;;  %v22395_v37 = vld [vmem:[%s26117_s16 + $0xbe4] ss:$72 sps:$4 sm:$0xff]  }
 0x149   : > { %6093 = vmatpush1.bf16.msra.mxu1 %v22303_v38  ;;  %v22390_v38 = vld [vmem:[%s26117_s16 + $0x2e0] ss:$72 sps:$4 sm:$0xff]  }
 0x14a   : > { %6094 = vmatprep.subr.bf16.mxu1 %v22311_v39  ;;  %v22398_v39 = vld [vmem:[%s26117_s16 + $0x254] ss:$72 sps:$4 sm:$0xff]  }
 0x14b   : > { %6052 = vmatpush1.bf16.msra.mxu0 %v22306_v40  ;;  %v22393_v40 = vld [vmem:[%s26117_s16 + $0xbe0] ss:$72 sps:$4 sm:$0xff]  }
 0x14c   : > { %6053 = vmatprep.subr.bf16.mxu0 %v22314_v41  ;;  %v22401_v41 = vld [vmem:[%s26117_s16 + $0xb54] ss:$72 sps:$4 sm:$0xff]  }
 0x14d   : > { %6095 = vmatpush1.bf16.msra.mxu1 %v22309_v42  ;;  %v22396_v42 = vld [vmem:[%s26117_s16 + $0x250] ss:$72 sps:$4 sm:$0xff]  }
 0x14e   : > { %6096 = vmatprep.subr.bf16.mxu1 %v22317_v44  ;;  %v22404_v44 = vld [vmem:[%s26117_s16 + $0x1c4] ss:$72 sps:$4 sm:$0xff]  }
 0x14f   : > { %6054 = vmatpush1.bf16.msra.mxu0 %v22312_v45  ;;  %v22399_v45 = vld [vmem:[%s26117_s16 + $0xb50] ss:$72 sps:$4 sm:$0xff]  }
 0x150   : > { %6055 = vmatprep.subr.bf16.mxu0 %v22320_v46  ;;  %v22407_v46 = vld [vmem:[%s26117_s16 + $0xac4] ss:$72 sps:$4 sm:$0xff]  }
 0x151   : > { %6097 = vmatpush1.bf16.msra.mxu1 %v22315_v47  ;;  %v22402_v47 = vld [vmem:[%s26117_s16 + $0x1c0] ss:$72 sps:$4 sm:$0xff]  }
 0x152   : > { %6098 = vmatprep.subr.bf16.mxu1 %v22323_v48  ;;  %v22410_v48 = vld [vmem:[%s26117_s16 + $0x134] ss:$72 sps:$4 sm:$0xff]  }
 0x153   : > { %6056 = vmatpush1.bf16.msra.mxu0 %v22318_v50  ;;  %v22405_v50 = vld [vmem:[%s26117_s16 + $0xac0] ss:$72 sps:$4 sm:$0xff]  }
 0x154   : > { %6057 = vmatprep.subr.bf16.mxu0 %v22326_v51  ;;  %v22413_v51 = vld [vmem:[%s26117_s16 + $0xa34] ss:$72 sps:$4 sm:$0xff]  }
 0x155   : > { %6099 = vmatpush1.bf16.msra.mxu1 %v22321_v52  ;;  %v22408_v52 = vld [vmem:[%s26117_s16 + $0x130] ss:$72 sps:$4 sm:$0xff]  }
 0x156   : > { %6100 = vmatprep.subr.bf16.mxu1 %v22329_v53  ;;  %v22416_v53 = vld [vmem:[%s26117_s16 + $0xa4] ss:$72 sps:$4 sm:$0xff]  }
 0x157   : > { %6058 = vmatpush1.bf16.msra.mxu0 %v22324_v54  ;;  %v22411_v54 = vld [vmem:[%s26117_s16 + $0xa30] ss:$72 sps:$4 sm:$0xff]  }
 0x158   : > { %6059 = vmatprep.subr.bf16.mxu0 %v22332_v56  ;;  %v22419_v56 = vld [vmem:[%s26117_s16 + $0x9a4] ss:$72 sps:$4 sm:$0xff]  }
 0x159   : > { %6101 = vmatpush1.bf16.msra.mxu1 %v22327_v57  ;;  %v22414_v57 = vld [vmem:[%s26117_s16 + $0xa0] ss:$72 sps:$4 sm:$0xff]  }
 0x15a   : > { %6102 = vmatprep.subr.bf16.mxu1 %v22335_v58  ;;  %v22422_v58 = vld [vmem:[%s26117_s16 + $0x14] ss:$72 sps:$4 sm:$0xff]  }
 0x15b   : > { %6060 = vmatpush2.bf16.msra.mxu0 %v22330_v59  ;;  %v22417_v59 = vld [vmem:[%s26117_s16 + $0x9a0] ss:$72 sps:$4 sm:$0xff]  }
 0x15c   : > { %6061 = vmatprep.subr.bf16.mxu0 %v22338_v60  ;;  %v22425_v60 = vld [vmem:[%s26117_s16 + $0x914] ss:$72 sps:$4 sm:$0xff]  }
 0x15d   : > { %6103 = vmatpush2.bf16.msra.mxu1 %v22333_v61  ;;  %v22420_v61 = vld [vmem:[%s26117_s16 + $0x10] ss:$72 sps:$4 sm:$0xff]  }
 0x15e   : > { %6104 = vmatprep.subr.bf16.mxu1 %v22341_v62  ;;  %v22428_v62 = vld [vmem:[%s26117_s16 + $0x884] ss:$72 sps:$4 sm:$0xff]  }
 0x15f   : > { %6062 = vmatpush2.bf16.msra.mxu0 %v22336_v63  ;;  %v22423_v63 = vld [vmem:[%s26117_s16 + $0x910] ss:$72 sps:$4 sm:$0xff]  }
 0x160   : > { %6063 = vmatprep.subr.bf16.mxu0 %v22344_v0  ;;  %v22431_v0 = vld [vmem:[%s26117_s16 + $0x1184] ss:$72 sps:$4 sm:$0xff]  }
 0x161   : > { %6105 = vmatpush2.bf16.msra.mxu1 %v22339_v1  ;;  %v22426_v1 = vld [vmem:[%s26117_s16 + $0x880] ss:$72 sps:$4 sm:$0xff]  }
 0x162   : > { %6106 = vmatprep.subr.bf16.mxu1 %v22347_v2  ;;  %v22434_v2 = vld [vmem:[%s26117_s16 + $0x7f4] ss:$72 sps:$4 sm:$0xff]  }
 0x163   : > { %6064 = vmatpush2.bf16.msra.mxu0 %v22342_v3  ;;  %v22429_v3 = vld [vmem:[%s26117_s16 + $0x1180] ss:$72 sps:$4 sm:$0xff]  }
 0x164   : > { %6065 = vmatprep.subr.bf16.mxu0 %v22350_v4  ;;  %v22437_v4 = vld [vmem:[%s26117_s16 + $0x10f4] ss:$72 sps:$4 sm:$0xff]  }
 0x165   : > { %6107 = vmatpush2.bf16.msra.mxu1 %v22345_v5  ;;  %v22432_v5 = vld [vmem:[%s26117_s16 + $0x7f0] ss:$72 sps:$4 sm:$0xff]  }
 0x166   : > { %6108 = vmatprep.subr.bf16.mxu1 %v22353_v6  ;;  %v22440_v6 = vld [vmem:[%s26117_s16 + $0x764] ss:$72 sps:$4 sm:$0xff]  }
 0x167   : > { %6066 = vmatpush2.bf16.msra.mxu0 %v22348_v7  ;;  %v22435_v7 = vld [vmem:[%s26117_s16 + $0x10f0] ss:$72 sps:$4 sm:$0xff]  }
 0x168   : > { %6067 = vmatprep.subr.bf16.mxu0 %v22356_v8  ;;  %v22443_v8 = vld [vmem:[%s26117_s16 + $0x1064] ss:$72 sps:$4 sm:$0xff]  }
 0x169   : > { %6109 = vmatpush2.bf16.msra.mxu1 %v22351_v9  ;;  %v22438_v9 = vld [vmem:[%s26117_s16 + $0x760] ss:$72 sps:$4 sm:$0xff]  }
 0x16a   : > { %6110 = vmatprep.subr.bf16.mxu1 %v22359_v10  ;;  %v22446_v10 = vld [vmem:[%s26117_s16 + $0x6d4] ss:$72 sps:$4 sm:$0xff]  }
 0x16b   : > { %6068 = vmatpush2.bf16.msra.mxu0 %v22354_v12  ;;  %v22441_v12 = vld [vmem:[%s26117_s16 + $0x1060] ss:$72 sps:$4 sm:$0xff]  }
 0x16c   : > { %6069 = vmatprep.subr.bf16.mxu0 %v22362_v13  ;;  %v22449_v13 = vld [vmem:[%s26117_s16 + $0xfd4] ss:$72 sps:$4 sm:$0xff]  }
 0x16d   : > { %6111 = vmatpush2.bf16.msra.mxu1 %v22357_v15  ;;  %v22444_v15 = vld [vmem:[%s26117_s16 + $0x6d0] ss:$72 sps:$4 sm:$0xff]  }
 0x16e   : > { %6112 = vmatprep.subr.bf16.mxu1 %v22365_v16  ;;  %v22452_v16 = vld [vmem:[%s26117_s16 + $0x644] ss:$72 sps:$4 sm:$0xff]  }
 0x16f   : > { %6070 = vmatpush2.bf16.msra.mxu0 %v22360_v17  ;;  %v22447_v17 = vld [vmem:[%s26117_s16 + $0xfd0] ss:$72 sps:$4 sm:$0xff]  }
 0x170   : > { %6071 = vmatprep.subr.bf16.mxu0 %v22368_v18  ;;  %v22455_v18 = vld [vmem:[%s26117_s16 + $0xf44] ss:$72 sps:$4 sm:$0xff]  }
 0x171   : > { %6113 = vmatpush2.bf16.msra.mxu1 %v22363_v19  ;;  %v22450_v19 = vld [vmem:[%s26117_s16 + $0x640] ss:$72 sps:$4 sm:$0xff]  }
 0x172   : > { %6114 = vmatprep.subr.bf16.mxu1 %v22371_v20  ;;  %v1389_v20 = vlaneseq }
 0x173   : > { %6072 = vmatpush2.bf16.msra.mxu0 %v22366_v21  ;;  %v22458_v21 = vld [vmem:[%s26117_s16 + $0x5b4] ss:$72 sps:$4 sm:$0xff]  }
 0x174   : > { %6073 = vmatprep.subr.bf16.mxu0 %v22374_v23  ;;  %v22453_v23 = vld [vmem:[%s26117_s16 + $0xf40] ss:$72 sps:$4 sm:$0xff]  }
 0x175   : > { %6115 = vmatpush2.bf16.msra.mxu1 %v22369_v24  ;;  %v22461_v24 = vld [vmem:[%s26117_s16 + $0xeb4] ss:$72 sps:$4 sm:$0xff]  }
 0x176   : > { %6116 = vmatprep.subr.bf16.mxu1 %v22377_v25  ;;  %v22456_v25 = vld [vmem:[%s26117_s16 + $0x5b0] ss:$72 sps:$4 sm:$0xff]  }
 0x177   : > { %6074 = vmatpush2.bf16.msra.mxu0 %v22372_v26  ;;  %v26436_v26 = vshrl.u32 %v1389_v20, 7  ;;  %v22507_v20 = vld [vmem:[%s26117_s16 + $0x138] ss:$72 sps:$4 sm:$0xff]  }
 0x178   : > { %6129 = vmatprep.subr.bf16.mxu0 %v22380_v27  ;;  %v22464_v27 = vld [vmem:[%s26117_s16 + $0x524] ss:$72 sps:$4 sm:$0xff]  }
 0x179   : > { %6117 = vmatpush2.bf16.msra.mxu1 %v22375_v28  ;;  %29865 = vst [vmem:[#allocation15_spill] sm:$0xff] %v26436_v26  ;;  %v22459_v28 = vld [vmem:[%s26117_s16 + $0xeb0] ss:$72 sps:$4 sm:$0xff]  }
 0x17a   : > { %6076 = vmatmul.mubr.bf16.vlgmr.msra.gmra.mxu0 %v26233_v14  ;;  %6172 = vmatprep.subr.bf16.mxu1 %v22383_v29  ;;  %v22462_v29 = vld [vmem:[%s26117_s16 + $0x520] ss:$72 sps:$4 sm:$0xff]  }
 0x17b   : > { %6130 = vmatpush1.bf16.msra.mxu0 %v22378_v30  ;;  %6161 = vmatprep.mubr.bf16.mxu0 %v26199_v49  ;;  %v22467_v30 = vld [vmem:[%s26117_s16 + $0xe24] ss:$72 sps:$4 sm:$0xff]  }
 0x17c   : > { %6119 = vmatmul.mubr.bf16.vlgmr.msra.gmra.mxu1 %v26307_v22  ;;  %6131 = vmatprep.subr.bf16.mxu0 %v22386_v31  ;;  %v22470_v31 = vld [vmem:[%s26117_s16 + $0x494] ss:$72 sps:$4 sm:$0xff]  }
 0x17d   : > { %6173 = vmatpush1.bf16.msra.mxu1 %v22381_v32  ;;  %6204 = vmatprep.mubr.bf16.mxu1 %v26207_v55  ;;  %v26444_v32 = vsub.s32 0, %v26436_v26 }
 0x17e   : > { %6174 = vmatprep.subr.bf16.mxu1 %v22389_v33  ;;  %v501_v33 = vld [vmem:[%s26446_s3] sm:$0xff] }
 0x17f   : > { %6132 = vmatpush1.bf16.msra.mxu0 %v22384_v34  ;;  %v22465_v34 = vld [vmem:[%s26117_s16 + $0xe20] ss:$72 sps:$4 sm:$0xff]  }
 0x180   : > { %6133 = vmatprep.subr.bf16.mxu0 %v22392_v35  ;;  %v26451_v35 = vsub.s32 4, %v26436_v26 }
 0x181   : > { %6175 = vmatpush1.bf16.msra.mxu1 %v22387_v36  ;;  %v22473_v36 = vld [vmem:[%s26117_s16 + $0xd94] ss:$72 sps:$4 sm:$0xff]  }
 0x182   : > { %6176 = vmatprep.subr.bf16.mxu1 %v22395_v37  ;;  %v22468_v37 = vld [vmem:[%s26117_s16 + $0x490] ss:$72 sps:$4 sm:$0xff]  }
 0x183   : > { %6134 = vmatpush1.bf16.msra.mxu0 %v22390_v38  ;;  %v1392_v38 = vrot.slane %v501_v33, %v26444_v32 }
 0x184   : > { %6135 = vmatprep.subr.bf16.mxu0 %v22398_v39  ;;  %v22476_v39 = vld [vmem:[%s26117_s16 + $0x1604] ss:$72 sps:$4 sm:$0xff]  }
 0x185   : > { %6177 = vmatpush1.bf16.msra.mxu1 %v22393_v40  ;;  %v22471_v40 = vld [vmem:[%s26117_s16 + $0xd90] ss:$72 sps:$4 sm:$0xff]  }
 0x186   : > { %6178 = vmatprep.subr.bf16.mxu1 %v22401_v41  ;;  %v1396_v41 = vrot.slane %v501_v33, %v26451_v35  ;;  %v22522_v33 = vld [vmem:[%s26117_s16 + $0x1a80] ss:$72 sps:$4 sm:$0xff]  }
 0x187   : > { %6136 = vmatpush1.bf16.msra.mxu0 %v22396_v42  ;;  %v22479_v42 = vld [vmem:[%s26117_s16 + $0x40c] ss:$72 sps:$4 sm:$0xff]  }
 0x188   : > { %6137 = vmatprep.subr.bf16.mxu0 %v22404_v44  ;;  %v1482_v44 = vrot.slane %v1392_v38, %v26444_v32  ;;  %v22528_v38 = vld [vmem:[%s26117_s16 + $0x19f0] ss:$72 sps:$4 sm:$0xff]  }
 0x189   : > { %6179 = vmatpush1.bf16.msra.mxu1 %v22399_v45  ;;  %v22474_v45 = vld [vmem:[%s26117_s16 + $0x1600] ss:$72 sps:$4 sm:$0xff]  }
 0x18a   : > { %6180 = vmatprep.subr.bf16.mxu1 %v22407_v46  ;;  %v22482_v46 = vld [vmem:[%s26117_s16 + $0x1574] ss:$72 sps:$4 sm:$0xff]  }
 0x18b   : > { %6138 = vmatpush1.bf16.msra.mxu0 %v22402_v47  ;;  %v26464_v47 = vrot.slane %v1396_v41, %v26444_v32  ;;  %v22539_v41 = vld [vmem:[%s26117_s16 + $0x76c] ss:$72 sps:$4 sm:$0xff]  }
 0x18c   : > { %6139 = vmatprep.subr.bf16.mxu0 %v22410_v48  ;;  %v22477_v48 = vld [vmem:[%s26117_s16 + $0x408] ss:$72 sps:$4 sm:$0xff]  }
 0x18d   : > { %6181 = vmatpush1.bf16.msra.mxu1 %v22405_v50 }
 0x18e   : > { %6182 = vmatprep.subr.bf16.mxu1 %v22413_v51  ;;  %v22485_v51 = vld [vmem:[%s26117_s16 + $0x37c] ss:$72 sps:$4 sm:$0xff]  }
 0x18f   : > { %6140 = vmatpush1.bf16.msra.mxu0 %v22408_v52 }
 0x190   : > { %6141 = vmatprep.subr.bf16.mxu0 %v22416_v53  ;;  %v22480_v53 = vld [vmem:[%s26117_s16 + $0x1570] ss:$72 sps:$4 sm:$0xff]  }
 0x191   : > { %6183 = vmatpush1.bf16.msra.mxu1 %v22411_v54 }
 0x192   : > { %6184 = vmatprep.subr.bf16.mxu1 %v22419_v56 }
 0x193   : > { %6142 = vmatpush1.bf16.msra.mxu0 %v22414_v57  ;;  %v22488_v57 = vld [vmem:[%s26117_s16 + $0x14e4] ss:$72 sps:$4 sm:$0xff]  }
 0x194   : > { %6143 = vmatprep.subr.bf16.mxu0 %v22422_v58 }
 0x195   : > { %6185 = vmatpush1.bf16.msra.mxu1 %v22417_v59 }
 0x196   : > { %6186 = vmatprep.subr.bf16.mxu1 %v22425_v60  ;;  %v22483_v60 = vld [vmem:[%s26117_s16 + $0x378] ss:$72 sps:$4 sm:$0xff]  }
 0x197   : > { %6144 = vmatpush1.bf16.msra.mxu0 %v22420_v61 }
 0x198   : > { %6145 = vmatprep.subr.bf16.mxu0 %v22428_v62 }
 0x199   : > { %6187 = vmatpush1.bf16.msra.mxu1 %v22423_v63  ;;  %v22491_v63 = vld [vmem:[%s26117_s16 + $0x2ec] ss:$72 sps:$4 sm:$0xff]  }
 0x19a   : > { %6188 = vmatprep.subr.bf16.mxu1 %v22431_v0 }
 0x19b   : > { %6146 = vmatpush2.bf16.msra.mxu0 %v22426_v1 }
 0x19c   : > { %6147 = vmatprep.subr.bf16.mxu0 %v22434_v2  ;;  %v22486_v2 = vld [vmem:[%s26117_s16 + $0x14e0] ss:$72 sps:$4 sm:$0xff]  }
 0x19d   : > { %6189 = vmatpush2.bf16.msra.mxu1 %v22429_v3 }
 0x19e   : > { %6190 = vmatprep.subr.bf16.mxu1 %v22437_v4  ;;  %v22494_v4 = vld [vmem:[%s26117_s16 + $0x1454] ss:$72 sps:$4 sm:$0xff]  }
 0x19f   : > { %6148 = vmatpush2.bf16.msra.mxu0 %v22432_v5 }
 0x1a0   : > { %6149 = vmatprep.subr.bf16.mxu0 %v22440_v6  ;;  %v22489_v6 = vld [vmem:[%s26117_s16 + $0x2e8] ss:$72 sps:$4 sm:$0xff]  }
 0x1a1   : > { %6191 = vmatpush2.bf16.msra.mxu1 %v22435_v7  ;;  %v22497_v7 = vld [vmem:[%s26117_s16 + $0x25c] ss:$72 sps:$4 sm:$0xff]  }
 0x1a2   : > { %6192 = vmatprep.subr.bf16.mxu1 %v22443_v8  ;;  %v22492_v8 = vld [vmem:[%s26117_s16 + $0x1450] ss:$72 sps:$4 sm:$0xff]  }
 0x1a3   : > { %6150 = vmatpush2.bf16.msra.mxu0 %v22438_v9  ;;  %v22500_v9 = vld [vmem:[%s26117_s16 + $0x13c4] ss:$72 sps:$4 sm:$0xff]  }
 0x1a4   : > { %6151 = vmatprep.subr.bf16.mxu0 %v22446_v10  ;;  %v22495_v10 = vld [vmem:[%s26117_s16 + $0x258] ss:$72 sps:$4 sm:$0xff]  }
 0x1a5   : > { %6193 = vmatpush2.bf16.msra.mxu1 %v22441_v12  ;;  %v22503_v12 = vld [vmem:[%s26117_s16 + $0x1cc] ss:$72 sps:$4 sm:$0xff]  }
 0x1a6   : > { %6194 = vmatprep.subr.bf16.mxu1 %v22449_v13  ;;  %v22498_v13 = vld [vmem:[%s26117_s16 + $0x13c0] ss:$72 sps:$4 sm:$0xff]  }
 0x1a7   : > { %6152 = vmatpush2.bf16.msra.mxu0 %v22444_v15  ;;  %v22506_v15 = vld [vmem:[%s26117_s16 + $0x1334] ss:$72 sps:$4 sm:$0xff]  }
 0x1a8   : > { %6153 = vmatprep.subr.bf16.mxu0 %v22452_v16  ;;  %v22501_v16 = vld [vmem:[%s26117_s16 + $0x1c8] ss:$72 sps:$4 sm:$0xff]  }
 0x1a9   : > { %6195 = vmatpush2.bf16.msra.mxu1 %v22447_v17  ;;  %v22509_v17 = vld [vmem:[%s26117_s16 + $0x13c] ss:$72 sps:$4 sm:$0xff]  }
 0x1aa   : > { %6196 = vmatprep.subr.bf16.mxu1 %v22455_v18  ;;  %v22504_v18 = vld [vmem:[%s26117_s16 + $0x1330] ss:$72 sps:$4 sm:$0xff]  }
 0x1ab   : > { %6154 = vmatpush2.bf16.msra.mxu0 %v22450_v19  ;;  %v22512_v19 = vld [vmem:[%s26117_s16 + $0x12a4] ss:$72 sps:$4 sm:$0xff]  }
 0x1ac   : > { %6155 = vmatprep.subr.bf16.mxu0 %v22458_v21  ;;  %v22515_v21 = vld [vmem:[%s26117_s16 + $0xac] ss:$72 sps:$4 sm:$0xff]  }
 0x1ad   : > { %6197 = vmatpush2.bf16.msra.mxu1 %v22453_v23  ;;  %v22510_v23 = vld [vmem:[%s26117_s16 + $0x12a0] ss:$72 sps:$4 sm:$0xff]  }
 0x1ae   : > { %6198 = vmatprep.subr.bf16.mxu1 %v22461_v24  ;;  %v22518_v24 = vld [vmem:[%s26117_s16 + $0x1214] ss:$72 sps:$4 sm:$0xff]  }
 0x1af   : > { %6156 = vmatpush2.bf16.msra.mxu0 %v22456_v25  ;;  %v22513_v25 = vld [vmem:[%s26117_s16 + $0xa8] ss:$72 sps:$4 sm:$0xff]  }
 0x1b0   : > { %6157 = vmatprep.subr.bf16.mxu0 %v22464_v27  ;;  %v22521_v27 = vld [vmem:[%s26117_s16 + $0x1c] ss:$72 sps:$4 sm:$0xff]  }
 0x1b1   : > { %6199 = vmatpush2.bf16.msra.mxu1 %v22459_v28  ;;  %v22516_v28 = vld [vmem:[%s26117_s16 + $0x1210] ss:$72 sps:$4 sm:$0xff]  }
 0x1b2   : > { %6200 = vmatprep.subr.bf16.mxu1 %v22467_v30  ;;  %v22519_v30 = vld [vmem:[%s26117_s16 + $0x18] ss:$72 sps:$4 sm:$0xff]  }
 0x1b3   : > { %6158 = vmatpush2.bf16.msra.mxu0 %v22462_v29  ;;  %v22524_v29 = vld [vmem:[%s26117_s16 + $0x1a84] ss:$72 sps:$4 sm:$0xff]  }
 0x1b4   : > { %6159 = vmatprep.subr.bf16.mxu0 %v22470_v31  ;;  %v22527_v31 = vld [vmem:[%s26117_s16 + $0x88c] ss:$72 sps:$4 sm:$0xff]  }
 0x1b5   : > { %6201 = vmatpush2.bf16.msra.mxu1 %v22465_v34  ;;  %v22530_v34 = vld [vmem:[%s26117_s16 + $0x19f4] ss:$72 sps:$4 sm:$0xff]  }
 0x1b6   : > { %6202 = vmatprep.subr.bf16.mxu1 %v22473_v36  ;;  %v22525_v36 = vld [vmem:[%s26117_s16 + $0x888] ss:$72 sps:$4 sm:$0xff]  }
 0x1b7   : > { %6160 = vmatpush2.bf16.msra.mxu0 %v22468_v37  ;;  %v22533_v37 = vld [vmem:[%s26117_s16 + $0x7fc] ss:$72 sps:$4 sm:$0xff]  }
 0x1b8   : > { %6215 = vmatprep.subr.bf16.mxu0 %v22476_v39  ;;  %v22536_v39 = vld [vmem:[%s26117_s16 + $0x1964] ss:$72 sps:$4 sm:$0xff]  }
 0x1b9   : > { %6203 = vmatpush2.bf16.msra.mxu1 %v22471_v40  ;;  %v22531_v40 = vld [vmem:[%s26117_s16 + $0x7f8] ss:$72 sps:$4 sm:$0xff]  }
 0x1ba   : > { %v5905_v50 = vpop.f32.mrf.mxu0  ;;  %6162 = vmatmul.mubr.bf16.vlgmr.msra.gmra.mxu0 %v26229_v11  ;;  %6258 = vmatprep.subr.bf16.mxu1 %v22479_v42  ;;  %v22534_v42 = vld [vmem:[%s26117_s16 + $0x1960] ss:$72 sps:$4 sm:$0xff]  }
 0x1bb   : > { %v5906_v52 = vadd.f32 %v5905_v50, %v1482_v44  ;;  %6216 = vmatpush1.bf16.msra.mxu0 %v22474_v45  ;;  %6247 = vmatprep.mubr.bf16.mxu0 %v26266_v43  ;;  %v5948_v56 = vpop.f32.mrf.mxu1  ;;  %v22537_v45 = vld [vmem:[%s26117_s16 + $0x768] ss:$72 sps:$4 sm:$0xff]   ;;  %v22548_v50 = vld [vmem:[%s26117_s16 + $0x1844] ss:$72 sps:$4 sm:$0xff]  }
 0x1bc   : > { %v5907_v54 = vpop.f32.mrf.mxu0  ;;  %6205 = vmatmul.mubr.bf16.vlgmr.msra.gmra.mxu1 %v26233_v14  ;;  %6217 = vmatprep.subr.bf16.mxu0 %v22482_v46  ;;  %v22545_v46 = vld [vmem:[%s26117_s16 + $0x6dc] ss:$72 sps:$4 sm:$0xff]  }
 0x1bd   : > { %v5908_v58 = vadd.f32 %v5907_v54, %v26464_v47  ;;  %v26474_v59 = vadd.f32 %v5948_v56, %v5906_v52  ;;  %6259 = vmatpush1.bf16.msra.mxu1 %v22477_v48  ;;  %6290 = vmatprep.mubr.bf16.mxu1 %v26199_v49  ;;  %v5950_v62 = vpop.f32.mrf.mxu1  ;;  %v22540_v48 = vld [vmem:[%s26117_s16 + $0x18d0] ss:$72 sps:$4 sm:$0xff]   ;;  %v22551_v52 = vld [vmem:[%s26117_s16 + $0x64c] ss:$72 sps:$4 sm:$0xff]  }
 0x1be   : > { %v5909_v61 = vpop.f32.mrf.mxu0  ;;  %6260 = vmatprep.subr.bf16.mxu1 %v22485_v51  ;;  %v22543_v51 = vld [vmem:[%s26117_s16 + $0x6d8] ss:$72 sps:$4 sm:$0xff]   ;;  %v22554_v54 = vld [vmem:[%s26117_s16 + $0x17b4] ss:$72 sps:$4 sm:$0xff]   ;;  %v22549_v56 = vld [vmem:[%s26117_s16 + $0x648] ss:$72 sps:$4 sm:$0xff]  }
 0x1bf   : > { %v5910_v0 = vadd.f32 %v5909_v61, %v1482_v44  ;;  %v26479_v1 = vadd.f32 %v5950_v62, %v5908_v58  ;;  %6218 = vmatpush1.bf16.msra.mxu0 %v22480_v53  ;;  %v5952_v3 = vpop.f32.mrf.mxu1  ;;  %v22542_v44 = vld [vmem:[%s26117_s16 + $0x18d4] ss:$72 sps:$4 sm:$0xff]   ;;  %v22546_v53 = vld [vmem:[%s26117_s16 + $0x1840] ss:$72 sps:$4 sm:$0xff]   ;;  %v22552_v58 = vld [vmem:[%s26117_s16 + $0x17b0] ss:$72 sps:$4 sm:$0xff]  }
 0x1c0   : > { %6219 = vmatprep.subr.bf16.mxu0 %v22488_v57  ;;  %v22557_v57 = vld [vmem:[%s26117_s16 + $0x5bc] ss:$72 sps:$4 sm:$0xff]   ;;  %v22555_v61 = vld [vmem:[%s26117_s16 + $0x5b8] ss:$72 sps:$4 sm:$0xff]   ;;  %v22563_v62 = vld [vmem:[%s26117_s16 + $0x52c] ss:$72 sps:$4 sm:$0xff]  }
 0x1c1   : > { %v26483_v5 = vadd.f32 %v5952_v3, %v5910_v0  ;;  %6261 = vmatpush1.bf16.msra.mxu1 %v22483_v60  ;;  %v22560_v60 = vld [vmem:[%s26117_s16 + $0x1724] ss:$72 sps:$4 sm:$0xff]   ;;  %v22566_v0 = vld [vmem:[%s26117_s16 + $0x1694] ss:$72 sps:$4 sm:$0xff]  }
 0x1c2   : > { %6262 = vmatprep.subr.bf16.mxu1 %v22491_v63  ;;  %v22558_v63 = vld [vmem:[%s26117_s16 + $0x1720] ss:$72 sps:$4 sm:$0xff]   ;;  %v22569_v3 = vld [vmem:[%s26117_s16 + $0x49c] ss:$72 sps:$4 sm:$0xff]  }
 0x1c3   : > { %6220 = vmatpush1.bf16.msra.mxu0 %v22486_v2  ;;  %v22561_v2 = vld [vmem:[%s26117_s16 + $0x528] ss:$72 sps:$4 sm:$0xff]  }
 0x1c4   : > { %6221 = vmatprep.subr.bf16.mxu0 %v22494_v4  ;;  %v22564_v4 = vld [vmem:[%s26117_s16 + $0x1690] ss:$72 sps:$4 sm:$0xff]  }
 0x1c5   : > { %6263 = vmatpush1.bf16.msra.mxu1 %v22489_v6  ;;  %v22572_v6 = vld [vmem:[%s26117_s16 + $0xd0c] ss:$72 sps:$4 sm:$0xff]  }
 0x1c6   : > { %6264 = vmatprep.subr.bf16.mxu1 %v22497_v7  ;;  %v22567_v7 = vld [vmem:[%s26117_s16 + $0x498] ss:$72 sps:$4 sm:$0xff]  }
 0x1c7   : > { %6222 = vmatpush1.bf16.msra.mxu0 %v22492_v8  ;;  %v22575_v8 = vld [vmem:[%s26117_s16 + $0x160c] ss:$72 sps:$4 sm:$0xff]  }
 0x1c8   : > { %6223 = vmatprep.subr.bf16.mxu0 %v22500_v9  ;;  %v22570_v9 = vld [vmem:[%s26117_s16 + $0xd08] ss:$72 sps:$4 sm:$0xff]  }
 0x1c9   : > { %6265 = vmatpush1.bf16.msra.mxu1 %v22495_v10  ;;  %v22573_v10 = vld [vmem:[%s26117_s16 + $0x1608] ss:$72 sps:$4 sm:$0xff]  }
 0x1ca   : > { %6266 = vmatprep.subr.bf16.mxu1 %v22503_v12  ;;  %v26541_v12 = vpop.f32.mrf.mxu0 }
 0x1cb   : > { %6224 = vmatpush1.bf16.msra.mxu0 %v22498_v13  ;;  %v22578_v13 = vld [vmem:[%s26117_s16 + $0xc7c] ss:$72 sps:$4 sm:$0xff]  }
 0x1cc   : > { %6225 = vmatprep.subr.bf16.mxu0 %v22506_v15  ;;  %v22576_v15 = vld [vmem:[%s26117_s16 + $0xc78] ss:$72 sps:$4 sm:$0xff]  }
 0x1cd   : > { %6267 = vmatpush1.bf16.msra.mxu1 %v22501_v16 }
 0x1ce   : > { %6268 = vmatprep.subr.bf16.mxu1 %v22509_v17  ;;  %v22581_v17 = vld [vmem:[%s26117_s16 + $0x157c] ss:$72 sps:$4 sm:$0xff]  }
 0x1cf   : > { %6226 = vmatpush1.bf16.msra.mxu0 %v22504_v18 }
 0x1d0   : > { %6227 = vmatprep.subr.bf16.mxu0 %v22512_v19  ;;  %v22579_v19 = vld [vmem:[%s26117_s16 + $0x1578] ss:$72 sps:$4 sm:$0xff]  }
 0x1d1   : > { %6269 = vmatpush1.bf16.msra.mxu1 %v22507_v20 }
 0x1d2   : > { %6270 = vmatprep.subr.bf16.mxu1 %v22515_v21  ;;  %v22584_v21 = vld [vmem:[%s26117_s16 + $0xbec] ss:$72 sps:$4 sm:$0xff]  }
 0x1d3   : > { %6228 = vmatpush1.bf16.msra.mxu0 %v22510_v23 }
 0x1d4   : > { %6229 = vmatprep.subr.bf16.mxu0 %v22518_v24 }
 0x1d5   : > { %6271 = vmatpush1.bf16.msra.mxu1 %v22513_v25  ;;  %v22587_v25 = vld [vmem:[%s26117_s16 + $0x14ec] ss:$72 sps:$4 sm:$0xff]  }
 0x1d6   : > { %6272 = vmatprep.subr.bf16.mxu1 %v22521_v27 }
 0x1d7   : > { %6230 = vmatpush1.bf16.msra.mxu0 %v22516_v28  ;;  %v22585_v28 = vld [vmem:[%s26117_s16 + $0x14e8] ss:$72 sps:$4 sm:$0xff]  }
 0x1d8   : > { %6231 = vmatprep.subr.bf16.mxu0 %v22524_v29  ;;  %v22588_v29 = vld [vmem:[%s26117_s16 + $0xb58] ss:$72 sps:$4 sm:$0xff]  }
 0x1d9   : > { %6273 = vmatpush1.bf16.msra.mxu1 %v22519_v30  ;;  %v22593_v30 = vld [vmem:[%s26117_s16 + $0x145c] ss:$72 sps:$4 sm:$0xff]  }
 0x1da   : > { %6274 = vmatprep.subr.bf16.mxu1 %v22527_v31  ;;  %v22591_v31 = vld [vmem:[%s26117_s16 + $0x1458] ss:$72 sps:$4 sm:$0xff]  }
 0x1db   : > { %6232 = vmatpush2.bf16.msra.mxu0 %v22522_v33  ;;  %v22596_v33 = vld [vmem:[%s26117_s16 + $0xacc] ss:$72 sps:$4 sm:$0xff]  }
 0x1dc   : > { %6233 = vmatprep.subr.bf16.mxu0 %v22530_v34  ;;  %v22599_v34 = vld [vmem:[%s26117_s16 + $0x13cc] ss:$72 sps:$4 sm:$0xff]  }
 0x1dd   : > { %6275 = vmatpush2.bf16.msra.mxu1 %v22525_v36  ;;  %v22597_v36 = vld [vmem:[%s26117_s16 + $0x13c8] ss:$72 sps:$4 sm:$0xff]  }
 0x1de   : > { %6276 = vmatprep.subr.bf16.mxu1 %v22533_v37  ;;  %v22602_v37 = vld [vmem:[%s26117_s16 + $0xa3c] ss:$72 sps:$4 sm:$0xff]  }
 0x1df   : > { %6234 = vmatpush2.bf16.msra.mxu0 %v22528_v38  ;;  %v22600_v38 = vld [vmem:[%s26117_s16 + $0xa38] ss:$72 sps:$4 sm:$0xff]  }
 0x1e0   : > { %6235 = vmatprep.subr.bf16.mxu0 %v22536_v39  ;;  %v22605_v39 = vld [vmem:[%s26117_s16 + $0x133c] ss:$72 sps:$4 sm:$0xff]  }
 0x1e1   : > { %6277 = vmatpush2.bf16.msra.mxu1 %v22531_v40  ;;  %v22603_v40 = vld [vmem:[%s26117_s16 + $0x1338] ss:$72 sps:$4 sm:$0xff]  }
 0x1e2   : > { %6278 = vmatprep.subr.bf16.mxu1 %v22539_v41  ;;  %v22608_v41 = vld [vmem:[%s26117_s16 + $0x9ac] ss:$72 sps:$4 sm:$0xff]  }
 0x1e3   : > { %6236 = vmatpush2.bf16.msra.mxu0 %v22534_v42  ;;  %v22606_v42 = vld [vmem:[%s26117_s16 + $0x9a8] ss:$72 sps:$4 sm:$0xff]  }
 0x1e4   : > { %6237 = vmatprep.subr.bf16.mxu0 %v22542_v44  ;;  %v22611_v44 = vld [vmem:[%s26117_s16 + $0x12ac] ss:$72 sps:$4 sm:$0xff]  }
 0x1e5   : > { %6279 = vmatpush2.bf16.msra.mxu1 %v22537_v45  ;;  %v22609_v45 = vld [vmem:[%s26117_s16 + $0x12a8] ss:$72 sps:$4 sm:$0xff]  }
 0x1e6   : > { %6280 = vmatprep.subr.bf16.mxu1 %v22545_v46  ;;  %v22614_v46 = vld [vmem:[%s26117_s16 + $0x91c] ss:$72 sps:$4 sm:$0xff]  }
 0x1e7   : > { %6238 = vmatpush2.bf16.msra.mxu0 %v22540_v48  ;;  %v22612_v48 = vld [vmem:[%s26117_s16 + $0x918] ss:$72 sps:$4 sm:$0xff]  }
 0x1e8   : > { %6239 = vmatprep.subr.bf16.mxu0 %v22548_v50  ;;  %v22617_v50 = vld [vmem:[%s26117_s16 + $0x121c] ss:$72 sps:$4 sm:$0xff]  }
 0x1e9   : > { %6281 = vmatpush2.bf16.msra.mxu1 %v22543_v51  ;;  %v22615_v51 = vld [vmem:[%s26117_s16 + $0x1218] ss:$72 sps:$4 sm:$0xff]  }
 0x1ea   : > { %6282 = vmatprep.subr.bf16.mxu1 %v22551_v52  ;;  %v22620_v52 = vld [vmem:[%s26117_s16 + $0x118c] ss:$72 sps:$4 sm:$0xff]  }
 0x1eb   : > { %6240 = vmatpush2.bf16.msra.mxu0 %v22546_v53  ;;  %v22618_v53 = vld [vmem:[%s26117_s16 + $0x1188] ss:$72 sps:$4 sm:$0xff]  }
 0x1ec   : > { %6241 = vmatprep.subr.bf16.mxu0 %v22554_v54  ;;  %v22623_v54 = vld [vmem:[%s26117_s16 + $0x1a8c] ss:$72 sps:$4 sm:$0xff]  }
 0x1ed   : > { %6283 = vmatpush2.bf16.msra.mxu1 %v22549_v56  ;;  %v22621_v56 = vld [vmem:[%s26117_s16 + $0x1a88] ss:$72 sps:$4 sm:$0xff]  }
 0x1ee   : > { %6284 = vmatprep.subr.bf16.mxu1 %v22557_v57  ;;  %v22626_v57 = vld [vmem:[%s26117_s16 + $0x10fc] ss:$72 sps:$4 sm:$0xff]  }
 0x1ef   : > { %6242 = vmatpush2.bf16.msra.mxu0 %v22552_v58  ;;  %v22624_v58 = vld [vmem:[%s26117_s16 + $0x10f8] ss:$72 sps:$4 sm:$0xff]  }
 0x1f0   : > { %6243 = vmatprep.subr.bf16.mxu0 %v22560_v60  ;;  %v22629_v60 = vld [vmem:[%s26117_s16 + $0x19fc] ss:$72 sps:$4 sm:$0xff]  }
 0x1f1   : > { %6285 = vmatpush2.bf16.msra.mxu1 %v22555_v61  ;;  %v22627_v61 = vld [vmem:[%s26117_s16 + $0x19f8] ss:$72 sps:$4 sm:$0xff]  }
 0x1f2   : > { %6286 = vmatprep.subr.bf16.mxu1 %v22563_v62  ;;  %v22632_v62 = vld [vmem:[%s26117_s16 + $0x106c] ss:$72 sps:$4 sm:$0xff]  }
 0x1f3   : > { %6244 = vmatpush2.bf16.msra.mxu0 %v22558_v63  ;;  %v22630_v63 = vld [vmem:[%s26117_s16 + $0x1068] ss:$72 sps:$4 sm:$0xff]  }
 0x1f4   : > { %6245 = vmatprep.subr.bf16.mxu0 %v22566_v0  ;;  %v22635_v0 = vld [vmem:[%s26117_s16 + $0x196c] ss:$72 sps:$4 sm:$0xff]  }
 0x1f5   : > { %6287 = vmatpush2.bf16.msra.mxu1 %v22561_v2  ;;  %v22633_v2 = vld [vmem:[%s26117_s16 + $0x1968] ss:$72 sps:$4 sm:$0xff]  }
 0x1f6   : > { %6288 = vmatprep.subr.bf16.mxu1 %v22569_v3  ;;  %v22638_v3 = vld [vmem:[%s26117_s16 + $0xfdc] ss:$72 sps:$4 sm:$0xff]  }
 0x1f7   : > { %6246 = vmatpush2.bf16.msra.mxu0 %v22564_v4  ;;  %v22636_v4 = vld [vmem:[%s26117_s16 + $0xfd8] ss:$72 sps:$4 sm:$0xff]  }
 0x1f8   : > { %6301 = vmatprep.subr.bf16.mxu0 %v22572_v6  ;;  %v22641_v6 = vld [vmem:[%s26117_s16 + $0x18dc] ss:$72 sps:$4 sm:$0xff]  }
 0x1f9   : > { %6289 = vmatpush2.bf16.msra.mxu1 %v22567_v7  ;;  %v22639_v7 = vld [vmem:[%s26117_s16 + $0x18d8] ss:$72 sps:$4 sm:$0xff]  }
 0x1fa   : > { %v5991_v16 = vpop.f32.mrf.mxu0  ;;  %6248 = vmatmul.mubr.bf16.vlgmr.msra.gmra.mxu0 %v26307_v22  ;;  %6344 = vmatprep.subr.bf16.mxu1 %v22575_v8  ;;  %v22644_v8 = vld [vmem:[%s26117_s16 + $0xf4c] ss:$72 sps:$4 sm:$0xff]  }
 0x1fb   : > { %v26548_v18 = vadd.f32 %v5991_v16, %v26474_v59  ;;  %6302 = vmatpush1.bf16.msra.mxu0 %v22570_v9  ;;  %6333 = vmatprep.mubr.bf16.mxu0 %v26207_v55  ;;  %v22582_v59 = vld [vmem:[%s26117_s16 + $0xbe8] ss:$72 sps:$4 sm:$0xff]   ;;  %v22648_v16 = vld [vmem:[%s26117_s16 + $0xeb8] ss:$72 sps:$4 sm:$0xff]  }
 0x1fc   : > { %v5993_v20 = vpop.f32.mrf.mxu0  ;;  %6291 = vmatmul.mubr.bf16.vlgmr.msra.gmra.mxu1 %v26229_v11  ;;  %6303 = vmatprep.subr.bf16.mxu0 %v22578_v13  ;;  %v22642_v9 = vld [vmem:[%s26117_s16 + $0xf48] ss:$72 sps:$4 sm:$0xff]  }
 0x1fd   : > { %v26555_v23 = vadd.f32 %v5993_v20, %v26479_v1  ;;  %6345 = vmatpush1.bf16.msra.mxu1 %v22573_v10  ;;  %6376 = vmatprep.mubr.bf16.mxu1 %v26266_v43  ;;  %v22590_v1 = vld [vmem:[%s26117_s16 + $0xb5c] ss:$72 sps:$4 sm:$0xff]   ;;  %v22647_v10 = vld [vmem:[%s26117_s16 + $0x184c] ss:$72 sps:$4 sm:$0xff]   ;;  %v22645_v13 = vld [vmem:[%s26117_s16 + $0x1848] ss:$72 sps:$4 sm:$0xff]  }
 0x1fe   : > { %v5995_v24 = vpop.f32.mrf.mxu0  ;;  %6346 = vmatprep.subr.bf16.mxu1 %v22581_v17  ;;  %v26606_v17 = vpop.f32.mrf.mxu1  ;;  %v22656_v20 = vld [vmem:[%s26117_s16 + $0xe2c] ss:$72 sps:$4 sm:$0xff]  }
 0x1ff   : > { %v26561_v27 = vadd.f32 %v5995_v24, %v26483_v5  ;;  %6304 = vmatpush1.bf16.msra.mxu0 %v22576_v15  ;;  %v22594_v5 = vld [vmem:[%s26117_s16 + $0xac8] ss:$72 sps:$4 sm:$0xff]   ;;  %v22650_v15 = vld [vmem:[%s26117_s16 + $0xebc] ss:$72 sps:$4 sm:$0xff]   ;;  %v22651_v24 = vld [vmem:[%s26117_s16 + $0x17b8] ss:$72 sps:$4 sm:$0xff]  }
 0x200   : > { %6305 = vmatprep.subr.bf16.mxu0 %v22584_v21  ;;  %v502_v21 = vld [vmem:[%s26446_s3 + $0x8] sm:$0xff] }
 0x201   : > { %29866 = vst [vmem:[#allocation16_spill] sm:$0xff] %v26561_v27  ;;  %6347 = vmatpush1.bf16.msra.mxu1 %v22579_v19  ;;  %v22653_v19 = vld [vmem:[%s26117_s16 + $0x17bc] ss:$72 sps:$4 sm:$0xff]  }
 0x202   : > { %6348 = vmatprep.subr.bf16.mxu1 %v22587_v25  ;;  %v22659_v25 = vld [vmem:[%s26117_s16 + $0x172c] ss:$72 sps:$4 sm:$0xff]  }
 0x203   : > { %6306 = vmatpush1.bf16.msra.mxu0 %v22582_v59  ;;  %v6034_v59 = vpop.f32.mrf.mxu1  ;;  %v23319_v27 = vld [vmem:[%s26117_s16 + $0xf74] ss:$72 sps:$4 sm:$0xff]  }
 0x204   : > { %6307 = vmatprep.subr.bf16.mxu0 %v22590_v1  ;;  %v1400_v1 = vrot.slane %v502_v21, %v26444_v32 }
 0x205   : > { %6349 = vmatpush1.bf16.msra.mxu1 %v22585_v28  ;;  %v22654_v28 = vld [vmem:[%s26117_s16 + $0xe28] ss:$72 sps:$4 sm:$0xff]  }
 0x206   : > { %6350 = vmatprep.subr.bf16.mxu1 %v22593_v30  ;;  %v22662_v30 = vld [vmem:[%s26117_s16 + $0xd9c] ss:$72 sps:$4 sm:$0xff]  }
 0x207   : > { %6308 = vmatpush1.bf16.msra.mxu0 %v22588_v29  ;;  %v6036_v29 = vpop.f32.mrf.mxu1 }
 0x208   : > { %6309 = vmatprep.subr.bf16.mxu0 %v22596_v33  ;;  %v1404_v33 = vrot.slane %v502_v21, %v26451_v35  ;;  %v22695_v21 = vld [vmem:[%s26117_s16 + $0xad4] ss:$72 sps:$4 sm:$0xff]  }
 0x209   : > { %6351 = vmatpush1.bf16.msra.mxu1 %v22591_v31  ;;  %v22657_v31 = vld [vmem:[%s26117_s16 + $0x1728] ss:$72 sps:$4 sm:$0xff]  }
 0x20a   : > { %6352 = vmatprep.subr.bf16.mxu1 %v22599_v34  ;;  %v1490_v34 = vrot.slane %v1400_v1, %v26444_v32  ;;  %v22696_v1 = vld [vmem:[%s26117_s16 + $0x140] ss:$72 sps:$4 sm:$0xff]  }
 0x20b   : > { %6310 = vmatpush1.bf16.msra.mxu0 %v22594_v5  ;;  %v22665_v5 = vld [vmem:[%s26117_s16 + $0x169c] ss:$72 sps:$4 sm:$0xff]  }
 0x20c   : > { %6311 = vmatprep.subr.bf16.mxu0 %v22602_v37  ;;  %v6038_v37 = vpop.f32.mrf.mxu1 }
 0x20d   : > { %6353 = vmatpush1.bf16.msra.mxu1 %v22597_v36  ;;  %v22660_v36 = vld [vmem:[%s26117_s16 + $0xd98] ss:$72 sps:$4 sm:$0xff]  }
 0x20e   : > { %6354 = vmatprep.subr.bf16.mxu1 %v22605_v39  ;;  %v26623_v39 = vrot.slane %v1404_v33, %v26444_v32  ;;  %v22702_v33 = vld [vmem:[%s26117_s16 + $0xb0] ss:$72 sps:$4 sm:$0xff]  }
 0x20f   : > { %6312 = vmatpush1.bf16.msra.mxu0 %v22600_v38  ;;  %v22668_v38 = vld [vmem:[%s26117_s16 + $0x414] ss:$72 sps:$4 sm:$0xff]  }
 0x210   : > { %6313 = vmatprep.subr.bf16.mxu0 %v22608_v41  ;;  %v22671_v41 = vld [vmem:[%s26117_s16 + $0xd14] ss:$72 sps:$4 sm:$0xff]  }
 0x211   : > { %6355 = vmatpush1.bf16.msra.mxu1 %v22603_v40  ;;  %v22663_v40 = vld [vmem:[%s26117_s16 + $0x1698] ss:$72 sps:$4 sm:$0xff]  }
 0x212   : > { %6356 = vmatprep.subr.bf16.mxu1 %v22611_v44  ;;  %v22666_v44 = vld [vmem:[%s26117_s16 + $0x410] ss:$72 sps:$4 sm:$0xff]  }
 0x213   : > { %6314 = vmatpush1.bf16.msra.mxu0 %v22606_v42  ;;  %v6035_v42 = vadd.f32 %v6034_v59, %v1490_v34  ;;  %v22690_v59 = vld [vmem:[%s26117_s16 + $0x1d0] ss:$72 sps:$4 sm:$0xff]  }
 0x214   : > { %6315 = vmatprep.subr.bf16.mxu0 %v22614_v46  ;;  %v26630_v46 = vpop.f32.mrf.mxu1 }
 0x215   : > { %6357 = vmatpush1.bf16.msra.mxu1 %v22609_v45  ;;  %v26628_v45 = vpop.f32.mrf.mxu0 }
 0x216   : > { %6358 = vmatprep.subr.bf16.mxu1 %v22617_v50  ;;  %v6037_v50 = vadd.f32 %v6036_v29, %v26623_v39  ;;  %v22704_v29 = vld [vmem:[%s26117_s16 + $0xb4] ss:$72 sps:$4 sm:$0xff]  }
 0x217   : > { %6316 = vmatpush1.bf16.msra.mxu0 %v22612_v48  ;;  %v22674_v48 = vld [vmem:[%s26117_s16 + $0x384] ss:$72 sps:$4 sm:$0xff]  }
 0x218   : > { %6317 = vmatprep.subr.bf16.mxu0 %v22620_v52 }
 0x219   : > { %6359 = vmatpush1.bf16.msra.mxu1 %v22615_v51  ;;  %v22669_v51 = vld [vmem:[%s26117_s16 + $0xd10] ss:$72 sps:$4 sm:$0xff]  }
 0x21a   : > { %6360 = vmatprep.subr.bf16.mxu1 %v22623_v54  ;;  %v6039_v54 = vadd.f32 %v6038_v37, %v1490_v34  ;;  %v22705_v34 = vld [vmem:[%s26117_s16 + $0x9b0] ss:$72 sps:$4 sm:$0xff]   ;;  %v22708_v37 = vld [vmem:[%s26117_s16 + $0x20] ss:$72 sps:$4 sm:$0xff]  }
 0x21b   : > { %6318 = vmatpush2.bf16.msra.mxu0 %v22618_v53  ;;  %v22677_v53 = vld [vmem:[%s26117_s16 + $0xc84] ss:$72 sps:$4 sm:$0xff]  }
 0x21c   : > { %6319 = vmatprep.subr.bf16.mxu0 %v22626_v57  ;;  %v22672_v57 = vld [vmem:[%s26117_s16 + $0x380] ss:$72 sps:$4 sm:$0xff]  }
 0x21d   : > { %6361 = vmatpush2.bf16.msra.mxu1 %v22621_v56 }
 0x21e   : > { %6362 = vmatprep.subr.bf16.mxu1 %v22629_v60 }
 0x21f   : > { %6320 = vmatpush2.bf16.msra.mxu0 %v22624_v58 }
 0x220   : > { %6321 = vmatprep.subr.bf16.mxu0 %v22632_v62 }
 0x221   : > { %6363 = vmatpush2.bf16.msra.mxu1 %v22627_v61  ;;  %v22680_v61 = vld [vmem:[%s26117_s16 + $0x2f4] ss:$72 sps:$4 sm:$0xff]  }
 0x222   : > { %6364 = vmatprep.subr.bf16.mxu1 %v22635_v0  ;;  %v22675_v0 = vld [vmem:[%s26117_s16 + $0xc80] ss:$72 sps:$4 sm:$0xff]  }
 0x223   : > { %6322 = vmatpush2.bf16.msra.mxu0 %v22630_v63 }
 0x224   : > { %6323 = vmatprep.subr.bf16.mxu0 %v22638_v3 }
 0x225   : > { %6365 = vmatpush2.bf16.msra.mxu1 %v22633_v2 }
 0x226   : > { %6366 = vmatprep.subr.bf16.mxu1 %v22641_v6 }
 0x227   : > { %6324 = vmatpush2.bf16.msra.mxu0 %v22636_v4  ;;  %v22683_v4 = vld [vmem:[%s26117_s16 + $0xbf4] ss:$72 sps:$4 sm:$0xff]  }
 0x228   : > { %6325 = vmatprep.subr.bf16.mxu0 %v22644_v8 }
 0x229   : > { %6367 = vmatpush2.bf16.msra.mxu1 %v22639_v7  ;;  %v22678_v7 = vld [vmem:[%s26117_s16 + $0x2f0] ss:$72 sps:$4 sm:$0xff]  }
 0x22a   : > { %6368 = vmatprep.subr.bf16.mxu1 %v22647_v10 }
 0x22b   : > { %6326 = vmatpush2.bf16.msra.mxu0 %v22642_v9  ;;  %v22686_v9 = vld [vmem:[%s26117_s16 + $0x264] ss:$72 sps:$4 sm:$0xff]  }
 0x22c   : > { %6327 = vmatprep.subr.bf16.mxu0 %v22650_v15  ;;  %v22689_v15 = vld [vmem:[%s26117_s16 + $0xb64] ss:$72 sps:$4 sm:$0xff]  }
 0x22d   : > { %6369 = vmatpush2.bf16.msra.mxu1 %v22645_v13  ;;  %v22681_v13 = vld [vmem:[%s26117_s16 + $0xbf0] ss:$72 sps:$4 sm:$0xff]  }
 0x22e   : > { %6370 = vmatprep.subr.bf16.mxu1 %v22653_v19  ;;  %v22692_v19 = vld [vmem:[%s26117_s16 + $0x1d4] ss:$72 sps:$4 sm:$0xff]  }
 0x22f   : > { %6328 = vmatpush2.bf16.msra.mxu0 %v22648_v16  ;;  %v22684_v16 = vld [vmem:[%s26117_s16 + $0x260] ss:$72 sps:$4 sm:$0xff]  }
 0x230   : > { %6329 = vmatprep.subr.bf16.mxu0 %v22656_v20  ;;  %v22687_v20 = vld [vmem:[%s26117_s16 + $0xb60] ss:$72 sps:$4 sm:$0xff]  }
 0x231   : > { %6371 = vmatpush2.bf16.msra.mxu1 %v22651_v24  ;;  %v22698_v24 = vld [vmem:[%s26117_s16 + $0x144] ss:$72 sps:$4 sm:$0xff]  }
 0x232   : > { %6372 = vmatprep.subr.bf16.mxu1 %v22659_v25  ;;  %v22693_v25 = vld [vmem:[%s26117_s16 + $0xad0] ss:$72 sps:$4 sm:$0xff]  }
 0x233   : > { %6330 = vmatpush2.bf16.msra.mxu0 %v22654_v28  ;;  %v22701_v28 = vld [vmem:[%s26117_s16 + $0xa44] ss:$72 sps:$4 sm:$0xff]  }
 0x234   : > { %6331 = vmatprep.subr.bf16.mxu0 %v22662_v30  ;;  %v22699_v30 = vld [vmem:[%s26117_s16 + $0xa40] ss:$72 sps:$4 sm:$0xff]  }
 0x235   : > { %6373 = vmatpush2.bf16.msra.mxu1 %v22657_v31  ;;  %v22707_v31 = vld [vmem:[%s26117_s16 + $0x9b4] ss:$72 sps:$4 sm:$0xff]  }
 0x236   : > { %6374 = vmatprep.subr.bf16.mxu1 %v22665_v5  ;;  %v22710_v5 = vld [vmem:[%s26117_s16 + $0x24] ss:$72 sps:$4 sm:$0xff]  }
 0x237   : > { %6332 = vmatpush2.bf16.msra.mxu0 %v22660_v36  ;;  %v22713_v36 = vld [vmem:[%s26117_s16 + $0x924] ss:$72 sps:$4 sm:$0xff]  }
 0x238   : > { %6387 = vmatprep.subr.bf16.mxu0 %v22668_v38  ;;  %v22716_v38 = vld [vmem:[%s26117_s16 + $0x894] ss:$72 sps:$4 sm:$0xff]  }
 0x239   : > { %6375 = vmatpush2.bf16.msra.mxu1 %v22663_v40  ;;  %v22711_v40 = vld [vmem:[%s26117_s16 + $0x920] ss:$72 sps:$4 sm:$0xff]  }
 0x23a   : > { %v6077_v52 = vpop.f32.mrf.mxu0  ;;  %6334 = vmatmul.mubr.bf16.vlgmr.msra.gmra.mxu0 %v26233_v14  ;;  %6430 = vmatprep.subr.bf16.mxu1 %v22671_v41  ;;  %v22719_v41 = vld [vmem:[%s26117_s16 + $0x1194] ss:$72 sps:$4 sm:$0xff]  }
 0x23b   : > { %v6078_v56 = vadd.f32 %v6077_v52, %v6035_v42  ;;  %6388 = vmatpush1.bf16.msra.mxu0 %v22666_v44  ;;  %6419 = vmatprep.mubr.bf16.mxu0 %v26199_v49  ;;  %v22714_v42 = vld [vmem:[%s26117_s16 + $0x890] ss:$72 sps:$4 sm:$0xff]   ;;  %v22722_v44 = vld [vmem:[%s26117_s16 + $0x804] ss:$72 sps:$4 sm:$0xff]   ;;  %v22728_v52 = vld [vmem:[%s26117_s16 + $0x774] ss:$72 sps:$4 sm:$0xff]  }
 0x23c   : > { %v6079_v58 = vpop.f32.mrf.mxu0  ;;  %v6120_v60 = vpop.f32.mrf.mxu1  ;;  %6377 = vmatmul.mubr.bf16.vlgmr.msra.gmra.mxu1 %v26307_v22  ;;  %6389 = vmatprep.subr.bf16.mxu0 %v22674_v48  ;;  %v22717_v48 = vld [vmem:[%s26117_s16 + $0x1190] ss:$72 sps:$4 sm:$0xff]  }
 0x23d   : > { %v26641_v62 = vadd.f32 %v6079_v58, %v6037_v50  ;;  %v26643_v63 = vadd.f32 %v6120_v60, %v6078_v56  ;;  %6431 = vmatpush1.bf16.msra.mxu1 %v22669_v51  ;;  %6462 = vmatprep.mubr.bf16.mxu1 %v26207_v55  ;;  %v22725_v50 = vld [vmem:[%s26117_s16 + $0x1104] ss:$72 sps:$4 sm:$0xff]   ;;  %v22720_v51 = vld [vmem:[%s26117_s16 + $0x800] ss:$72 sps:$4 sm:$0xff]   ;;  %v22726_v56 = vld [vmem:[%s26117_s16 + $0x770] ss:$72 sps:$4 sm:$0xff]  }
 0x23e   : > { %v6081_v2 = vpop.f32.mrf.mxu0  ;;  %v26647_v3 = vpop.f32.mrf.mxu1  ;;  %6432 = vmatprep.subr.bf16.mxu1 %v22677_v53  ;;  %v22723_v53 = vld [vmem:[%s26117_s16 + $0x1100] ss:$72 sps:$4 sm:$0xff]   ;;  %v22729_v58 = vld [vmem:[%s26117_s16 + $0x1070] ss:$72 sps:$4 sm:$0xff]   ;;  %v22737_v60 = vld [vmem:[%s26117_s16 + $0xfe4] ss:$72 sps:$4 sm:$0xff]  }
 0x23f   : > { %29867 = vst [vmem:[#allocation17_spill] sm:$0xff] %v26643_v63  ;;  %v6082_v6 = vadd.f32 %v6081_v2, %v6039_v54  ;;  %6390 = vmatpush1.bf16.msra.mxu0 %v22672_v57  ;;  %v22731_v54 = vld [vmem:[%s26117_s16 + $0x1074] ss:$72 sps:$4 sm:$0xff]   ;;  %v22734_v57 = vld [vmem:[%s26117_s16 + $0x6e4] ss:$72 sps:$4 sm:$0xff]  }
 0x240   : > { %v6124_v8 = vpop.f32.mrf.mxu1  ;;  %6391 = vmatprep.subr.bf16.mxu0 %v22680_v61  ;;  %v22732_v61 = vld [vmem:[%s26117_s16 + $0x6e0] ss:$72 sps:$4 sm:$0xff]  }
 0x241   : > { %v26652_v10 = vadd.f32 %v6124_v8, %v6082_v6  ;;  %6433 = vmatpush1.bf16.msra.mxu1 %v22675_v0  ;;  %v22740_v0 = vld [vmem:[%s26117_s16 + $0x654] ss:$72 sps:$4 sm:$0xff]   ;;  %v22735_v2 = vld [vmem:[%s26117_s16 + $0xfe0] ss:$72 sps:$4 sm:$0xff]   ;;  %v22738_v6 = vld [vmem:[%s26117_s16 + $0x650] ss:$72 sps:$4 sm:$0xff]  }
 0x242   : > { %6434 = vmatprep.subr.bf16.mxu1 %v22683_v4  ;;  %v22743_v4 = vld [vmem:[%s26117_s16 + $0xf54] ss:$72 sps:$4 sm:$0xff]   ;;  %v22741_v8 = vld [vmem:[%s26117_s16 + $0xf50] ss:$72 sps:$4 sm:$0xff]  }
 0x243   : > { %29868 = vst [vmem:[#allocation18_spill] sm:$0xff] %v26652_v10  ;;  %6392 = vmatpush1.bf16.msra.mxu0 %v22678_v7  ;;  %v22746_v7 = vld [vmem:[%s26117_s16 + $0x5c4] ss:$72 sps:$4 sm:$0xff]  }
 0x244   : > { %6393 = vmatprep.subr.bf16.mxu0 %v22686_v9  ;;  %v22749_v9 = vld [vmem:[%s26117_s16 + $0xec4] ss:$72 sps:$4 sm:$0xff]  }
 0x245   : > { %6435 = vmatpush1.bf16.msra.mxu1 %v22681_v13  ;;  %v22744_v13 = vld [vmem:[%s26117_s16 + $0x5c0] ss:$72 sps:$4 sm:$0xff]  }
 0x246   : > { %6436 = vmatprep.subr.bf16.mxu1 %v22689_v15  ;;  %v22752_v15 = vld [vmem:[%s26117_s16 + $0x534] ss:$72 sps:$4 sm:$0xff]  }
 0x247   : > { %6394 = vmatpush1.bf16.msra.mxu0 %v22684_v16  ;;  %v22747_v16 = vld [vmem:[%s26117_s16 + $0xec0] ss:$72 sps:$4 sm:$0xff]  }
 0x248   : > { %6395 = vmatprep.subr.bf16.mxu0 %v22692_v19  ;;  %v22755_v19 = vld [vmem:[%s26117_s16 + $0xe34] ss:$72 sps:$4 sm:$0xff]  }
 0x249   : > { %6437 = vmatpush1.bf16.msra.mxu1 %v22687_v20  ;;  %v22750_v20 = vld [vmem:[%s26117_s16 + $0x530] ss:$72 sps:$4 sm:$0xff]  }
 0x24a   : > { %6438 = vmatprep.subr.bf16.mxu1 %v22695_v21  ;;  %v22758_v21 = vld [vmem:[%s26117_s16 + $0x4a4] ss:$72 sps:$4 sm:$0xff]  }
 0x24b   : > { %6396 = vmatpush1.bf16.msra.mxu0 %v22690_v59  ;;  %v22753_v59 = vld [vmem:[%s26117_s16 + $0xe30] ss:$72 sps:$4 sm:$0xff]  }
 0x24c   : > { %6397 = vmatprep.subr.bf16.mxu0 %v22698_v24  ;;  %v22761_v24 = vld [vmem:[%s26117_s16 + $0xda4] ss:$72 sps:$4 sm:$0xff]  }
 0x24d   : > { %6439 = vmatpush1.bf16.msra.mxu1 %v22693_v25  ;;  %v22756_v25 = vld [vmem:[%s26117_s16 + $0x4a0] ss:$72 sps:$4 sm:$0xff]  }
 0x24e   : > { %6440 = vmatprep.subr.bf16.mxu1 %v22701_v28  ;;  %v22759_v28 = vld [vmem:[%s26117_s16 + $0xda0] ss:$72 sps:$4 sm:$0xff]  }
 0x24f   : > { %6398 = vmatpush1.bf16.msra.mxu0 %v22696_v1  ;;  %v22764_v1 = vld [vmem:[%s26117_s16 + $0x1614] ss:$72 sps:$4 sm:$0xff]  }
 0x250   : > { %6399 = vmatprep.subr.bf16.mxu0 %v22704_v29  ;;  %v503_v29 = vld [vmem:[%s26446_s3 + $0x10] sm:$0xff] }
 0x251   : > { %6441 = vmatpush1.bf16.msra.mxu1 %v22699_v30  ;;  %v22767_v30 = vld [vmem:[%s26117_s16 + $0x41c] ss:$72 sps:$4 sm:$0xff]  }
 0x252   : > { %6442 = vmatprep.subr.bf16.mxu1 %v22707_v31  ;;  %v22762_v31 = vld [vmem:[%s26117_s16 + $0x1610] ss:$72 sps:$4 sm:$0xff]  }
 0x253   : > { %6400 = vmatpush1.bf16.msra.mxu0 %v22702_v33  ;;  %v26710_v33 = vpop.f32.mrf.mxu0 }
 0x254   : > { %6401 = vmatprep.subr.bf16.mxu0 %v22710_v5  ;;  %29869 = vst [vmem:[#allocation19_spill] sm:$0xff] %v26710_v33  ;;  %v22770_v5 = vld [vmem:[%s26117_s16 + $0x1584] ss:$72 sps:$4 sm:$0xff]   ;;  %v23380_v33 = vld [vmem:[%s26117_s16 + $0x1750] ss:$72 sps:$4 sm:$0xff]  }
 0x255   : > { %6443 = vmatpush1.bf16.msra.mxu1 %v22705_v34  ;;  %v1408_v34 = vrot.slane %v503_v29, %v26444_v32  ;;  %v22804_v29 = vld [vmem:[%s26117_s16 + $0x1220] ss:$72 sps:$4 sm:$0xff]  }
 0x256   : > { %6444 = vmatprep.subr.bf16.mxu1 %v22713_v36  ;;  %v22765_v36 = vld [vmem:[%s26117_s16 + $0x418] ss:$72 sps:$4 sm:$0xff]  }
 0x257   : > { %6402 = vmatpush1.bf16.msra.mxu0 %v22708_v37  ;;  %v26715_v37 = vpop.f32.mrf.mxu1 }
 0x258   : > { %6403 = vmatprep.subr.bf16.mxu0 %v22716_v38  ;;  %29870 = vst [vmem:[#allocation20_spill] sm:$0xff] %v26715_v37 }
 0x259   : > { %6445 = vmatpush1.bf16.msra.mxu1 %v22711_v40  ;;  %v22773_v40 = vld [vmem:[%s26117_s16 + $0x38c] ss:$72 sps:$4 sm:$0xff]  }
 0x25a   : > { %6446 = vmatprep.subr.bf16.mxu1 %v22719_v41  ;;  %v22768_v41 = vld [vmem:[%s26117_s16 + $0x1580] ss:$72 sps:$4 sm:$0xff]  }
 0x25b   : > { %6404 = vmatpush2.bf16.msra.mxu0 %v22714_v42 }
 0x25c   : > { %6405 = vmatprep.subr.bf16.mxu0 %v22722_v44 }
 0x25d   : > { %6447 = vmatpush2.bf16.msra.mxu1 %v22717_v48  ;;  %v22776_v48 = vld [vmem:[%s26117_s16 + $0x14f4] ss:$72 sps:$4 sm:$0xff]  }
 0x25e   : > { %6448 = vmatprep.subr.bf16.mxu1 %v22725_v50  ;;  %v26730_v50 = vrot.slane %v1408_v34, %v26444_v32  ;;  %v22810_v34 = vld [vmem:[%s26117_s16 + $0x1a90] ss:$72 sps:$4 sm:$0xff]  }
 0x25f   : > { %6406 = vmatpush2.bf16.msra.mxu0 %v22720_v51  ;;  %v22771_v51 = vld [vmem:[%s26117_s16 + $0x388] ss:$72 sps:$4 sm:$0xff]  }
 0x260   : > { %6407 = vmatprep.subr.bf16.mxu0 %v22728_v52 }
 0x261   : > { %6449 = vmatpush2.bf16.msra.mxu1 %v22723_v53 }
 0x262   : > { %6450 = vmatprep.subr.bf16.mxu1 %v22731_v54  ;;  %v22779_v54 = vld [vmem:[%s26117_s16 + $0x2fc] ss:$72 sps:$4 sm:$0xff]  }
 0x263   : > { %6408 = vmatpush2.bf16.msra.mxu0 %v22726_v56 }
 0x264   : > { %6409 = vmatprep.subr.bf16.mxu0 %v22734_v57  ;;  %v22774_v57 = vld [vmem:[%s26117_s16 + $0x14f0] ss:$72 sps:$4 sm:$0xff]  }
 0x265   : > { %6451 = vmatpush2.bf16.msra.mxu1 %v22729_v58 }
 0x266   : > { %6452 = vmatprep.subr.bf16.mxu1 %v22737_v60  ;;  %v22782_v60 = vld [vmem:[%s26117_s16 + $0x1464] ss:$72 sps:$4 sm:$0xff]  }
 0x267   : > { %6410 = vmatpush2.bf16.msra.mxu0 %v22732_v61 }
 0x268   : > { %6411 = vmatprep.subr.bf16.mxu0 %v22740_v0  ;;  %v22777_v0 = vld [vmem:[%s26117_s16 + $0x2f8] ss:$72 sps:$4 sm:$0xff]  }
 0x269   : > { %6453 = vmatpush2.bf16.msra.mxu1 %v22735_v2  ;;  %v22785_v2 = vld [vmem:[%s26117_s16 + $0x26c] ss:$72 sps:$4 sm:$0xff]  }
 0x26a   : > { %6454 = vmatprep.subr.bf16.mxu1 %v22743_v4  ;;  %v22780_v4 = vld [vmem:[%s26117_s16 + $0x1460] ss:$72 sps:$4 sm:$0xff]  }
 0x26b   : > { %6412 = vmatpush2.bf16.msra.mxu0 %v22738_v6  ;;  %v22788_v6 = vld [vmem:[%s26117_s16 + $0x13d4] ss:$72 sps:$4 sm:$0xff]  }
 0x26c   : > { %6413 = vmatprep.subr.bf16.mxu0 %v22746_v7  ;;  %v22783_v7 = vld [vmem:[%s26117_s16 + $0x268] ss:$72 sps:$4 sm:$0xff]  }
 0x26d   : > { %6455 = vmatpush2.bf16.msra.mxu1 %v22741_v8  ;;  %v22791_v8 = vld [vmem:[%s26117_s16 + $0x1dc] ss:$72 sps:$4 sm:$0xff]  }
 0x26e   : > { %6456 = vmatprep.subr.bf16.mxu1 %v22749_v9  ;;  %v22786_v9 = vld [vmem:[%s26117_s16 + $0x13d0] ss:$72 sps:$4 sm:$0xff]  }
 0x26f   : > { %6414 = vmatpush2.bf16.msra.mxu0 %v22744_v13  ;;  %v22794_v13 = vld [vmem:[%s26117_s16 + $0x1344] ss:$72 sps:$4 sm:$0xff]  }
 0x270   : > { %6415 = vmatprep.subr.bf16.mxu0 %v22752_v15  ;;  %v22789_v15 = vld [vmem:[%s26117_s16 + $0x1d8] ss:$72 sps:$4 sm:$0xff]  }
 0x271   : > { %6457 = vmatpush2.bf16.msra.mxu1 %v22747_v16  ;;  %v22797_v16 = vld [vmem:[%s26117_s16 + $0x14c] ss:$72 sps:$4 sm:$0xff]  }
 0x272   : > { %6458 = vmatprep.subr.bf16.mxu1 %v22755_v19  ;;  %v22792_v19 = vld [vmem:[%s26117_s16 + $0x1340] ss:$72 sps:$4 sm:$0xff]  }
 0x273   : > { %6416 = vmatpush2.bf16.msra.mxu0 %v22750_v20  ;;  %v22800_v20 = vld [vmem:[%s26117_s16 + $0x12b4] ss:$72 sps:$4 sm:$0xff]  }
 0x274   : > { %6417 = vmatprep.subr.bf16.mxu0 %v22758_v21  ;;  %v22795_v21 = vld [vmem:[%s26117_s16 + $0x148] ss:$72 sps:$4 sm:$0xff]  }
 0x275   : > { %6459 = vmatpush2.bf16.msra.mxu1 %v22753_v59  ;;  %v22803_v59 = vld [vmem:[%s26117_s16 + $0xbc] ss:$72 sps:$4 sm:$0xff]  }
 0x276   : > { %6460 = vmatprep.subr.bf16.mxu1 %v22761_v24  ;;  %v22798_v24 = vld [vmem:[%s26117_s16 + $0x12b0] ss:$72 sps:$4 sm:$0xff]  }
 0x277   : > { %6418 = vmatpush2.bf16.msra.mxu0 %v22756_v25  ;;  %v22806_v25 = vld [vmem:[%s26117_s16 + $0x1224] ss:$72 sps:$4 sm:$0xff]  }
 0x278   : > { %6473 = vmatprep.subr.bf16.mxu0 %v22764_v1  ;;  %v22809_v1 = vld [vmem:[%s26117_s16 + $0x2c] ss:$72 sps:$4 sm:$0xff]  }
 0x279   : > { %6461 = vmatpush2.bf16.msra.mxu1 %v22759_v28  ;;  %v22801_v28 = vld [vmem:[%s26117_s16 + $0xb8] ss:$72 sps:$4 sm:$0xff]  }
 0x27a   : > { %v26717_v38 = vpop.f32.mrf.mxu0  ;;  %6420 = vmatmul.mubr.bf16.vlgmr.msra.gmra.mxu0 %v26229_v11  ;;  %6516 = vmatprep.subr.bf16.mxu1 %v22767_v30  ;;  %v22812_v30 = vld [vmem:[%s26117_s16 + $0x1a94] ss:$72 sps:$4 sm:$0xff]  }
 0x27b   : > { %6474 = vmatpush1.bf16.msra.mxu0 %v22762_v31  ;;  %6505 = vmatprep.mubr.bf16.mxu0 %v26266_v43  ;;  %v22807_v31 = vld [vmem:[%s26117_s16 + $0x28] ss:$72 sps:$4 sm:$0xff]  }
 0x27c   : > { %v26723_v42 = vpop.f32.mrf.mxu0  ;;  %v26725_v44 = vpop.f32.mrf.mxu1  ;;  %6463 = vmatmul.mubr.bf16.vlgmr.msra.gmra.mxu1 %v26233_v14  ;;  %6475 = vmatprep.subr.bf16.mxu0 %v22770_v5  ;;  %v22815_v5 = vld [vmem:[%s26117_s16 + $0x89c] ss:$72 sps:$4 sm:$0xff]  }
 0x27d   : > { %6517 = vmatpush1.bf16.msra.mxu1 %v22765_v36  ;;  %6548 = vmatprep.mubr.bf16.mxu1 %v26199_v49  ;;  %v22818_v36 = vld [vmem:[%s26117_s16 + $0x1a04] ss:$72 sps:$4 sm:$0xff]  }
 0x27e   : > { %v6167_v52 = vpop.f32.mrf.mxu0  ;;  %v26734_v53 = vpop.f32.mrf.mxu1  ;;  %6518 = vmatprep.subr.bf16.mxu1 %v22773_v40  ;;  %v22813_v40 = vld [vmem:[%s26117_s16 + $0x898] ss:$72 sps:$4 sm:$0xff]  }
 0x27f   : > { %v6168_v56 = vadd.f32 %v6167_v52, %v26730_v50  ;;  %6476 = vmatpush1.bf16.msra.mxu0 %v22768_v41  ;;  %v22821_v41 = vld [vmem:[%s26117_s16 + $0x80c] ss:$72 sps:$4 sm:$0xff]   ;;  %v22819_v52 = vld [vmem:[%s26117_s16 + $0x808] ss:$72 sps:$4 sm:$0xff]  }
 0x280   : > { %v6210_v58 = vpop.f32.mrf.mxu1  ;;  %6477 = vmatprep.subr.bf16.mxu0 %v22776_v48  ;;  %v22816_v48 = vld [vmem:[%s26117_s16 + $0x1a00] ss:$72 sps:$4 sm:$0xff]  }
 0x281   : > { %v26740_v61 = vadd.f32 %v6210_v58, %v6168_v56  ;;  %6519 = vmatpush1.bf16.msra.mxu1 %v22771_v51  ;;  %v22824_v51 = vld [vmem:[%s26117_s16 + $0x1974] ss:$72 sps:$4 sm:$0xff]   ;;  %v22822_v56 = vld [vmem:[%s26117_s16 + $0x1970] ss:$72 sps:$4 sm:$0xff]  }
 0x282   : > { %6520 = vmatprep.subr.bf16.mxu1 %v22779_v54  ;;  %v22827_v54 = vld [vmem:[%s26117_s16 + $0x77c] ss:$72 sps:$4 sm:$0xff]   ;;  %v22825_v58 = vld [vmem:[%s26117_s16 + $0x778] ss:$72 sps:$4 sm:$0xff]  }
 0x283   : > { %6478 = vmatpush1.bf16.msra.mxu0 %v22774_v57  ;;  %v22830_v57 = vld [vmem:[%s26117_s16 + $0x18e4] ss:$72 sps:$4 sm:$0xff]  }
 0x284   : > { %6479 = vmatprep.subr.bf16.mxu0 %v22782_v60  ;;  %v22833_v60 = vld [vmem:[%s26117_s16 + $0x6ec] ss:$72 sps:$4 sm:$0xff]  }
 0x285   : > { %6521 = vmatpush1.bf16.msra.mxu1 %v22777_v0  ;;  %v22828_v0 = vld [vmem:[%s26117_s16 + $0x18e0] ss:$72 sps:$4 sm:$0xff]  }
 0x286   : > { %6522 = vmatprep.subr.bf16.mxu1 %v22785_v2  ;;  %v22836_v2 = vld [vmem:[%s26117_s16 + $0x1854] ss:$72 sps:$4 sm:$0xff]  }
 0x287   : > { %6480 = vmatpush1.bf16.msra.mxu0 %v22780_v4  ;;  %v22831_v4 = vld [vmem:[%s26117_s16 + $0x6e8] ss:$72 sps:$4 sm:$0xff]  }
 0x288   : > { %6481 = vmatprep.subr.bf16.mxu0 %v22788_v6  ;;  %v22839_v6 = vld [vmem:[%s26117_s16 + $0x65c] ss:$72 sps:$4 sm:$0xff]  }
 0x289   : > { %6523 = vmatpush1.bf16.msra.mxu1 %v22783_v7  ;;  %v22834_v7 = vld [vmem:[%s26117_s16 + $0x1850] ss:$72 sps:$4 sm:$0xff]  }
 0x28a   : > { %6524 = vmatprep.subr.bf16.mxu1 %v22791_v8  ;;  %v22842_v8 = vld [vmem:[%s26117_s16 + $0x17c4] ss:$72 sps:$4 sm:$0xff]  }
 0x28b   : > { %6482 = vmatpush1.bf16.msra.mxu0 %v22786_v9  ;;  %v22837_v9 = vld [vmem:[%s26117_s16 + $0x658] ss:$72 sps:$4 sm:$0xff]  }
 0x28c   : > { %6483 = vmatprep.subr.bf16.mxu0 %v22794_v13  ;;  %v22845_v13 = vld [vmem:[%s26117_s16 + $0x5cc] ss:$72 sps:$4 sm:$0xff]  }
 0x28d   : > { %6525 = vmatpush1.bf16.msra.mxu1 %v22789_v15  ;;  %v22840_v15 = vld [vmem:[%s26117_s16 + $0x17c0] ss:$72 sps:$4 sm:$0xff]  }
 0x28e   : > { %6526 = vmatprep.subr.bf16.mxu1 %v22797_v16  ;;  %v22848_v16 = vld [vmem:[%s26117_s16 + $0x1734] ss:$72 sps:$4 sm:$0xff]  }
 0x28f   : > { %6484 = vmatpush1.bf16.msra.mxu0 %v22792_v19  ;;  %v22843_v19 = vld [vmem:[%s26117_s16 + $0x5c8] ss:$72 sps:$4 sm:$0xff]  }
 0x290   : > { %6485 = vmatprep.subr.bf16.mxu0 %v22800_v20  ;;  %v22851_v20 = vld [vmem:[%s26117_s16 + $0x53c] ss:$72 sps:$4 sm:$0xff]  }
 0x291   : > { %6527 = vmatpush1.bf16.msra.mxu1 %v22795_v21  ;;  %v22846_v21 = vld [vmem:[%s26117_s16 + $0x1730] ss:$72 sps:$4 sm:$0xff]  }
 0x292   : > { %6528 = vmatprep.subr.bf16.mxu1 %v22803_v59  ;;  %v22854_v59 = vld [vmem:[%s26117_s16 + $0x16a4] ss:$72 sps:$4 sm:$0xff]  }
 0x293   : > { %6486 = vmatpush1.bf16.msra.mxu0 %v22798_v24  ;;  %v22849_v24 = vld [vmem:[%s26117_s16 + $0x538] ss:$72 sps:$4 sm:$0xff]  }
 0x294   : > { %6487 = vmatprep.subr.bf16.mxu0 %v22806_v25  ;;  %v22857_v25 = vld [vmem:[%s26117_s16 + $0x4ac] ss:$72 sps:$4 sm:$0xff]  }
 0x295   : > { %6529 = vmatpush1.bf16.msra.mxu1 %v22801_v28  ;;  %v22852_v28 = vld [vmem:[%s26117_s16 + $0x16a0] ss:$72 sps:$4 sm:$0xff]  }
 0x296   : > { %6530 = vmatprep.subr.bf16.mxu1 %v22809_v1  ;;  %v22860_v1 = vld [vmem:[%s26117_s16 + $0xd1c] ss:$72 sps:$4 sm:$0xff]  }
 0x297   : > { %6488 = vmatpush1.bf16.msra.mxu0 %v22804_v29  ;;  %v22855_v29 = vld [vmem:[%s26117_s16 + $0x4a8] ss:$72 sps:$4 sm:$0xff]  }
 0x298   : > { %6489 = vmatprep.subr.bf16.mxu0 %v22812_v30  ;;  %v22863_v30 = vld [vmem:[%s26117_s16 + $0x161c] ss:$72 sps:$4 sm:$0xff]  }
 0x299   : > { %6531 = vmatpush1.bf16.msra.mxu1 %v22807_v31  ;;  %v22858_v31 = vld [vmem:[%s26117_s16 + $0xd18] ss:$72 sps:$4 sm:$0xff]  }
 0x29a   : > { %6532 = vmatprep.subr.bf16.mxu1 %v22815_v5  ;;  %v26797_v5 = vpop.f32.mrf.mxu0 }
 0x29b   : > { %6490 = vmatpush2.bf16.msra.mxu0 %v22810_v34  ;;  %29871 = vst [vmem:[#allocation21_spill] sm:$0xff] %v26797_v5  ;;  %v22866_v34 = vld [vmem:[%s26117_s16 + $0xc8c] ss:$72 sps:$4 sm:$0xff]  }
 0x29c   : > { %6491 = vmatprep.subr.bf16.mxu0 %v22818_v36  ;;  %v22861_v36 = vld [vmem:[%s26117_s16 + $0x1618] ss:$72 sps:$4 sm:$0xff]  }
 0x29d   : > { %6533 = vmatpush2.bf16.msra.mxu1 %v22813_v40 }
 0x29e   : > { %6534 = vmatprep.subr.bf16.mxu1 %v22821_v41  ;;  %v22869_v41 = vld [vmem:[%s26117_s16 + $0x158c] ss:$72 sps:$4 sm:$0xff]  }
 0x29f   : > { %6492 = vmatpush2.bf16.msra.mxu0 %v22816_v48  ;;  %v22864_v48 = vld [vmem:[%s26117_s16 + $0xc88] ss:$72 sps:$4 sm:$0xff]  }
 0x2a0   : > { %6493 = vmatprep.subr.bf16.mxu0 %v22824_v51 }
 0x2a1   : > { %6535 = vmatpush2.bf16.msra.mxu1 %v22819_v52  ;;  %v22872_v52 = vld [vmem:[%s26117_s16 + $0xbfc] ss:$72 sps:$4 sm:$0xff]  }
 0x2a2   : > { %6536 = vmatprep.subr.bf16.mxu1 %v22827_v54  ;;  %v22867_v54 = vld [vmem:[%s26117_s16 + $0x1588] ss:$72 sps:$4 sm:$0xff]  }
 0x2a3   : > { %6494 = vmatpush2.bf16.msra.mxu0 %v22822_v56 }
 0x2a4   : > { %6495 = vmatprep.subr.bf16.mxu0 %v22830_v57  ;;  %v22875_v57 = vld [vmem:[%s26117_s16 + $0x14fc] ss:$72 sps:$4 sm:$0xff]  }
 0x2a5   : > { %6537 = vmatpush2.bf16.msra.mxu1 %v22825_v58 }
 0x2a6   : > { %6538 = vmatprep.subr.bf16.mxu1 %v22833_v60  ;;  %v22870_v60 = vld [vmem:[%s26117_s16 + $0xbf8] ss:$72 sps:$4 sm:$0xff]  }
 0x2a7   : > { %6496 = vmatpush2.bf16.msra.mxu0 %v22828_v0  ;;  %v22878_v0 = vld [vmem:[%s26117_s16 + $0xb6c] ss:$72 sps:$4 sm:$0xff]  }
 0x2a8   : > { %6497 = vmatprep.subr.bf16.mxu0 %v22836_v2  ;;  %v22873_v2 = vld [vmem:[%s26117_s16 + $0x14f8] ss:$72 sps:$4 sm:$0xff]  }
 0x2a9   : > { %6539 = vmatpush2.bf16.msra.mxu1 %v22831_v4  ;;  %v22881_v4 = vld [vmem:[%s26117_s16 + $0x146c] ss:$72 sps:$4 sm:$0xff]  }
 0x2aa   : > { %6540 = vmatprep.subr.bf16.mxu1 %v22839_v6  ;;  %v22876_v6 = vld [vmem:[%s26117_s16 + $0xb68] ss:$72 sps:$4 sm:$0xff]  }
 0x2ab   : > { %6498 = vmatpush2.bf16.msra.mxu0 %v22834_v7  ;;  %v22884_v7 = vld [vmem:[%s26117_s16 + $0xadc] ss:$72 sps:$4 sm:$0xff]  }
 0x2ac   : > { %6499 = vmatprep.subr.bf16.mxu0 %v22842_v8  ;;  %v22887_v8 = vld [vmem:[%s26117_s16 + $0x13dc] ss:$72 sps:$4 sm:$0xff]  }
 0x2ad   : > { %6541 = vmatpush2.bf16.msra.mxu1 %v22837_v9  ;;  %v22882_v9 = vld [vmem:[%s26117_s16 + $0xad8] ss:$72 sps:$4 sm:$0xff]  }
 0x2ae   : > { %6542 = vmatprep.subr.bf16.mxu1 %v22845_v13  ;;  %v22890_v13 = vld [vmem:[%s26117_s16 + $0xa4c] ss:$72 sps:$4 sm:$0xff]  }
 0x2af   : > { %6500 = vmatpush2.bf16.msra.mxu0 %v22840_v15  ;;  %v22885_v15 = vld [vmem:[%s26117_s16 + $0x13d8] ss:$72 sps:$4 sm:$0xff]  }
 0x2b0   : > { %6501 = vmatprep.subr.bf16.mxu0 %v22848_v16  ;;  %v22893_v16 = vld [vmem:[%s26117_s16 + $0x134c] ss:$72 sps:$4 sm:$0xff]  }
 0x2b1   : > { %6543 = vmatpush2.bf16.msra.mxu1 %v22843_v19  ;;  %v22888_v19 = vld [vmem:[%s26117_s16 + $0xa48] ss:$72 sps:$4 sm:$0xff]  }
 0x2b2   : > { %6544 = vmatprep.subr.bf16.mxu1 %v22851_v20  ;;  %v22896_v20 = vld [vmem:[%s26117_s16 + $0x9bc] ss:$72 sps:$4 sm:$0xff]  }
 0x2b3   : > { %6502 = vmatpush2.bf16.msra.mxu0 %v22846_v21  ;;  %v22891_v21 = vld [vmem:[%s26117_s16 + $0x1348] ss:$72 sps:$4 sm:$0xff]  }
 0x2b4   : > { %6503 = vmatprep.subr.bf16.mxu0 %v22854_v59  ;;  %v22899_v59 = vld [vmem:[%s26117_s16 + $0x12bc] ss:$72 sps:$4 sm:$0xff]  }
 0x2b5   : > { %6545 = vmatpush2.bf16.msra.mxu1 %v22849_v24  ;;  %v22894_v24 = vld [vmem:[%s26117_s16 + $0x9b8] ss:$72 sps:$4 sm:$0xff]  }
 0x2b6   : > { %6546 = vmatprep.subr.bf16.mxu1 %v22857_v25  ;;  %v22902_v25 = vld [vmem:[%s26117_s16 + $0x92c] ss:$72 sps:$4 sm:$0xff]  }
 0x2b7   : > { %6504 = vmatpush2.bf16.msra.mxu0 %v22852_v28  ;;  %v22897_v28 = vld [vmem:[%s26117_s16 + $0x12b8] ss:$72 sps:$4 sm:$0xff]  }
 0x2b8   : > { %6559 = vmatprep.subr.bf16.mxu0 %v22860_v1  ;;  %v22905_v1 = vld [vmem:[%s26117_s16 + $0x122c] ss:$72 sps:$4 sm:$0xff]  }
 0x2b9   : > { %6547 = vmatpush2.bf16.msra.mxu1 %v22855_v29  ;;  %v22900_v29 = vld [vmem:[%s26117_s16 + $0x928] ss:$72 sps:$4 sm:$0xff]  }
 0x2ba   : > { %v26801_v40 = vpop.f32.mrf.mxu0  ;;  %6506 = vmatmul.mubr.bf16.vlgmr.msra.gmra.mxu0 %v26307_v22  ;;  %6602 = vmatprep.subr.bf16.mxu1 %v22863_v30  ;;  %v22908_v30 = vld [vmem:[%s26117_s16 + $0x119c] ss:$72 sps:$4 sm:$0xff]  }
 0x2bb   : > { %29872 = vst [vmem:[#allocation22_spill] sm:$0xff] %v26801_v40  ;;  %6560 = vmatpush1.bf16.msra.mxu0 %v22858_v31  ;;  %6591 = vmatprep.mubr.bf16.mxu0 %v26207_v55  ;;  %v22903_v31 = vld [vmem:[%s26117_s16 + $0x1228] ss:$72 sps:$4 sm:$0xff]  }
 0x2bc   : > { %v26807_v51 = vpop.f32.mrf.mxu0  ;;  %6549 = vmatmul.mubr.bf16.vlgmr.msra.gmra.mxu1 %v26229_v11  ;;  %6561 = vmatprep.subr.bf16.mxu0 %v22866_v34  ;;  %v22911_v34 = vld [vmem:[%s26117_s16 + $0x1a9c] ss:$72 sps:$4 sm:$0xff]  }
 0x2bd   : > { %6603 = vmatpush1.bf16.msra.mxu1 %v22861_v36  ;;  %6634 = vmatprep.mubr.bf16.mxu1 %v26266_v43  ;;  %v22906_v36 = vld [vmem:[%s26117_s16 + $0x1198] ss:$72 sps:$4 sm:$0xff]  }
 0x2be   : > { %v6253_v56 = vpop.f32.mrf.mxu0  ;;  %6604 = vmatprep.subr.bf16.mxu1 %v22869_v41  ;;  %v22914_v41 = vld [vmem:[%s26117_s16 + $0x110c] ss:$72 sps:$4 sm:$0xff]  }
 0x2bf   : > { %v26815_v58 = vadd.f32 %v6253_v56, %v26740_v61  ;;  %6562 = vmatpush1.bf16.msra.mxu0 %v22864_v48  ;;  %v22879_v61 = vld [vmem:[%s26117_s16 + $0x1468] ss:$72 sps:$4 sm:$0xff]   ;;  %v22909_v48 = vld [vmem:[%s26117_s16 + $0x1a98] ss:$72 sps:$4 sm:$0xff]   ;;  %v22920_v56 = vld [vmem:[%s26117_s16 + $0x107c] ss:$72 sps:$4 sm:$0xff]  }
 0x2c0   : > { %6563 = vmatprep.subr.bf16.mxu0 %v22872_v52  ;;  %v22917_v52 = vld [vmem:[%s26117_s16 + $0x1a0c] ss:$72 sps:$4 sm:$0xff]  }
 0x2c1   : > { %29873 = vst [vmem:[#allocation23_spill] sm:$0xff] %v26815_v58  ;;  %6605 = vmatpush1.bf16.msra.mxu1 %v22867_v54  ;;  %v22912_v54 = vld [vmem:[%s26117_s16 + $0x1108] ss:$72 sps:$4 sm:$0xff]   ;;  %v23313_v58 = vld [vmem:[%s26117_s16 + $0x1004] ss:$72 sps:$4 sm:$0xff]  }
 0x2c2   : > { %6606 = vmatprep.subr.bf16.mxu1 %v22875_v57  ;;  %v22915_v57 = vld [vmem:[%s26117_s16 + $0x1a08] ss:$72 sps:$4 sm:$0xff]  }
 0x2c3   : > { %6564 = vmatpush1.bf16.msra.mxu0 %v22870_v60  ;;  %v22923_v60 = vld [vmem:[%s26117_s16 + $0x197c] ss:$72 sps:$4 sm:$0xff]  }
 0x2c4   : > { %6565 = vmatprep.subr.bf16.mxu0 %v22878_v0  ;;  %v22918_v0 = vld [vmem:[%s26117_s16 + $0x1078] ss:$72 sps:$4 sm:$0xff]  }
 0x2c5   : > { %6607 = vmatpush1.bf16.msra.mxu1 %v22873_v2  ;;  %v22926_v2 = vld [vmem:[%s26117_s16 + $0xfec] ss:$72 sps:$4 sm:$0xff]  }
 0x2c6   : > { %6608 = vmatprep.subr.bf16.mxu1 %v22881_v4  ;;  %v22921_v4 = vld [vmem:[%s26117_s16 + $0x1978] ss:$72 sps:$4 sm:$0xff]  }
 0x2c7   : > { %6566 = vmatpush1.bf16.msra.mxu0 %v22876_v6  ;;  %v22929_v6 = vld [vmem:[%s26117_s16 + $0x18ec] ss:$72 sps:$4 sm:$0xff]  }
 0x2c8   : > { %6567 = vmatprep.subr.bf16.mxu0 %v22884_v7  ;;  %v22924_v7 = vld [vmem:[%s26117_s16 + $0xfe8] ss:$72 sps:$4 sm:$0xff]  }
 0x2c9   : > { %6609 = vmatpush1.bf16.msra.mxu1 %v22879_v61  ;;  %v22932_v61 = vld [vmem:[%s26117_s16 + $0xf5c] ss:$72 sps:$4 sm:$0xff]  }
 0x2ca   : > { %6610 = vmatprep.subr.bf16.mxu1 %v22887_v8  ;;  %v22927_v8 = vld [vmem:[%s26117_s16 + $0x18e8] ss:$72 sps:$4 sm:$0xff]  }
 0x2cb   : > { %6568 = vmatpush1.bf16.msra.mxu0 %v22882_v9  ;;  %v22935_v9 = vld [vmem:[%s26117_s16 + $0x185c] ss:$72 sps:$4 sm:$0xff]  }
 0x2cc   : > { %6569 = vmatprep.subr.bf16.mxu0 %v22890_v13  ;;  %v22930_v13 = vld [vmem:[%s26117_s16 + $0xf58] ss:$72 sps:$4 sm:$0xff]  }
 0x2cd   : > { %6611 = vmatpush1.bf16.msra.mxu1 %v22885_v15  ;;  %v22938_v15 = vld [vmem:[%s26117_s16 + $0xecc] ss:$72 sps:$4 sm:$0xff]  }
 0x2ce   : > { %6612 = vmatprep.subr.bf16.mxu1 %v22893_v16  ;;  %v22933_v16 = vld [vmem:[%s26117_s16 + $0x1858] ss:$72 sps:$4 sm:$0xff]  }
 0x2cf   : > { %6570 = vmatpush1.bf16.msra.mxu0 %v22888_v19  ;;  %v22941_v19 = vld [vmem:[%s26117_s16 + $0x17cc] ss:$72 sps:$4 sm:$0xff]  }
 0x2d0   : > { %6571 = vmatprep.subr.bf16.mxu0 %v22896_v20  ;;  %v22936_v20 = vld [vmem:[%s26117_s16 + $0xec8] ss:$72 sps:$4 sm:$0xff]  }
 0x2d1   : > { %6613 = vmatpush1.bf16.msra.mxu1 %v22891_v21  ;;  %v22944_v21 = vld [vmem:[%s26117_s16 + $0xe3c] ss:$72 sps:$4 sm:$0xff]  }
 0x2d2   : > { %6614 = vmatprep.subr.bf16.mxu1 %v22899_v59  ;;  %v22939_v59 = vld [vmem:[%s26117_s16 + $0x17c8] ss:$72 sps:$4 sm:$0xff]  }
 0x2d3   : > { %6572 = vmatpush1.bf16.msra.mxu0 %v22894_v24  ;;  %v22947_v24 = vld [vmem:[%s26117_s16 + $0x173c] ss:$72 sps:$4 sm:$0xff]  }
 0x2d4   : > { %6573 = vmatprep.subr.bf16.mxu0 %v22902_v25  ;;  %v22942_v25 = vld [vmem:[%s26117_s16 + $0xe38] ss:$72 sps:$4 sm:$0xff]  }
 0x2d5   : > { %6615 = vmatpush1.bf16.msra.mxu1 %v22897_v28  ;;  %v22950_v28 = vld [vmem:[%s26117_s16 + $0xdac] ss:$72 sps:$4 sm:$0xff]  }
 0x2d6   : > { %6616 = vmatprep.subr.bf16.mxu1 %v22905_v1  ;;  %v22945_v1 = vld [vmem:[%s26117_s16 + $0x1738] ss:$72 sps:$4 sm:$0xff]  }
 0x2d7   : > { %6574 = vmatpush1.bf16.msra.mxu0 %v22900_v29  ;;  %v22953_v29 = vld [vmem:[%s26117_s16 + $0x16ac] ss:$72 sps:$4 sm:$0xff]  }
 0x2d8   : > { %6575 = vmatprep.subr.bf16.mxu0 %v22908_v30  ;;  %v22948_v30 = vld [vmem:[%s26117_s16 + $0xda8] ss:$72 sps:$4 sm:$0xff]  }
 0x2d9   : > { %6617 = vmatpush1.bf16.msra.mxu1 %v22903_v31  ;;  %v22956_v31 = vld [vmem:[%s26117_s16 + $0x424] ss:$72 sps:$4 sm:$0xff]   ;;  %v25610_v40 = vld [vmem:[%s26446_s3 + $0x10] sm:$0xff] }
 0x2da   : > { %6618 = vmatprep.subr.bf16.mxu1 %v22911_v34  ;;  %v22951_v34 = vld [vmem:[%s26117_s16 + $0x16a8] ss:$72 sps:$4 sm:$0xff]  }
 0x2db   : > { %6576 = vmatpush2.bf16.msra.mxu0 %v22906_v36  ;;  %v22959_v36 = vld [vmem:[%s26117_s16 + $0xd24] ss:$72 sps:$4 sm:$0xff]  }
 0x2dc   : > { %6577 = vmatprep.subr.bf16.mxu0 %v22914_v41  ;;  %v22954_v41 = vld [vmem:[%s26117_s16 + $0x420] ss:$72 sps:$4 sm:$0xff]  }
 0x2dd   : > { %6619 = vmatpush2.bf16.msra.mxu1 %v22909_v48  ;;  %v22962_v48 = vld [vmem:[%s26117_s16 + $0x394] ss:$72 sps:$4 sm:$0xff]  }
 0x2de   : > { %6620 = vmatprep.subr.bf16.mxu1 %v22917_v52  ;;  %v22957_v52 = vld [vmem:[%s26117_s16 + $0xd20] ss:$72 sps:$4 sm:$0xff]  }
 0x2df   : > { %6578 = vmatpush2.bf16.msra.mxu0 %v22912_v54  ;;  %v22965_v54 = vld [vmem:[%s26117_s16 + $0xc94] ss:$72 sps:$4 sm:$0xff]  }
 0x2e0   : > { %6579 = vmatprep.subr.bf16.mxu0 %v22920_v56  ;;  %v22960_v56 = vld [vmem:[%s26117_s16 + $0x390] ss:$72 sps:$4 sm:$0xff]  }
 0x2e1   : > { %6621 = vmatpush2.bf16.msra.mxu1 %v22915_v57  ;;  %v22968_v57 = vld [vmem:[%s26117_s16 + $0x304] ss:$72 sps:$4 sm:$0xff]  }
 0x2e2   : > { %6622 = vmatprep.subr.bf16.mxu1 %v22923_v60  ;;  %v22963_v60 = vld [vmem:[%s26117_s16 + $0xc90] ss:$72 sps:$4 sm:$0xff]  }
 0x2e3   : > { %6580 = vmatpush2.bf16.msra.mxu0 %v22918_v0  ;;  %v22971_v0 = vld [vmem:[%s26117_s16 + $0xc04] ss:$72 sps:$4 sm:$0xff]  }
 0x2e4   : > { %6581 = vmatprep.subr.bf16.mxu0 %v22926_v2  ;;  %v22966_v2 = vld [vmem:[%s26117_s16 + $0x300] ss:$72 sps:$4 sm:$0xff]  }
 0x2e5   : > { %6623 = vmatpush2.bf16.msra.mxu1 %v22921_v4  ;;  %v22974_v4 = vld [vmem:[%s26117_s16 + $0x274] ss:$72 sps:$4 sm:$0xff]  }
 0x2e6   : > { %6624 = vmatprep.subr.bf16.mxu1 %v22929_v6  ;;  %v22969_v6 = vld [vmem:[%s26117_s16 + $0xc00] ss:$72 sps:$4 sm:$0xff]  }
 0x2e7   : > { %6582 = vmatpush2.bf16.msra.mxu0 %v22924_v7  ;;  %v22977_v7 = vld [vmem:[%s26117_s16 + $0xb74] ss:$72 sps:$4 sm:$0xff]  }
 0x2e8   : > { %6583 = vmatprep.subr.bf16.mxu0 %v22932_v61  ;;  %v22972_v61 = vld [vmem:[%s26117_s16 + $0x270] ss:$72 sps:$4 sm:$0xff]  }
 0x2e9   : > { %6625 = vmatpush2.bf16.msra.mxu1 %v22927_v8  ;;  %v22980_v8 = vld [vmem:[%s26117_s16 + $0x1e4] ss:$72 sps:$4 sm:$0xff]  }
 0x2ea   : > { %6626 = vmatprep.subr.bf16.mxu1 %v22935_v9  ;;  %v22975_v9 = vld [vmem:[%s26117_s16 + $0xb70] ss:$72 sps:$4 sm:$0xff]  }
 0x2eb   : > { %6584 = vmatpush2.bf16.msra.mxu0 %v22930_v13  ;;  %v22983_v13 = vld [vmem:[%s26117_s16 + $0xae4] ss:$72 sps:$4 sm:$0xff]  }
 0x2ec   : > { %6585 = vmatprep.subr.bf16.mxu0 %v22938_v15  ;;  %v22978_v15 = vld [vmem:[%s26117_s16 + $0x1e0] ss:$72 sps:$4 sm:$0xff]  }
 0x2ed   : > { %6627 = vmatpush2.bf16.msra.mxu1 %v22933_v16  ;;  %v22986_v16 = vld [vmem:[%s26117_s16 + $0x154] ss:$72 sps:$4 sm:$0xff]  }
 0x2ee   : > { %6628 = vmatprep.subr.bf16.mxu1 %v22941_v19  ;;  %v22981_v19 = vld [vmem:[%s26117_s16 + $0xae0] ss:$72 sps:$4 sm:$0xff]  }
 0x2ef   : > { %6586 = vmatpush2.bf16.msra.mxu0 %v22936_v20  ;;  %v22989_v20 = vld [vmem:[%s26117_s16 + $0xa54] ss:$72 sps:$4 sm:$0xff]  }
 0x2f0   : > { %6587 = vmatprep.subr.bf16.mxu0 %v22944_v21  ;;  %v22984_v21 = vld [vmem:[%s26117_s16 + $0x150] ss:$72 sps:$4 sm:$0xff]  }
 0x2f1   : > { %6629 = vmatpush2.bf16.msra.mxu1 %v22939_v59  ;;  %v22992_v59 = vld [vmem:[%s26117_s16 + $0xc4] ss:$72 sps:$4 sm:$0xff]  }
 0x2f2   : > { %6630 = vmatprep.subr.bf16.mxu1 %v22947_v24  ;;  %v22987_v24 = vld [vmem:[%s26117_s16 + $0xa50] ss:$72 sps:$4 sm:$0xff]  }
 0x2f3   : > { %6588 = vmatpush2.bf16.msra.mxu0 %v22942_v25  ;;  %v22995_v25 = vld [vmem:[%s26117_s16 + $0x9c4] ss:$72 sps:$4 sm:$0xff]  }
 0x2f4   : > { %6589 = vmatprep.subr.bf16.mxu0 %v22950_v28  ;;  %v22990_v28 = vld [vmem:[%s26117_s16 + $0xc0] ss:$72 sps:$4 sm:$0xff]  }
 0x2f5   : > { %6631 = vmatpush2.bf16.msra.mxu1 %v22945_v1  ;;  %v22998_v1 = vld [vmem:[%s26117_s16 + $0x34] ss:$72 sps:$4 sm:$0xff]  }
 0x2f6   : > { %6632 = vmatprep.subr.bf16.mxu1 %v22953_v29  ;;  %v22993_v29 = vld [vmem:[%s26117_s16 + $0x9c0] ss:$72 sps:$4 sm:$0xff]  }
 0x2f7   : > { %6590 = vmatpush2.bf16.msra.mxu0 %v22948_v30  ;;  %v23001_v30 = vld [vmem:[%s26117_s16 + $0x934] ss:$72 sps:$4 sm:$0xff]  }
 0x2f8   : > { %6645 = vmatprep.subr.bf16.mxu0 %v22956_v31  ;;  %v22996_v31 = vld [vmem:[%s26117_s16 + $0x30] ss:$72 sps:$4 sm:$0xff]  }
 0x2f9   : > { %6633 = vmatpush2.bf16.msra.mxu1 %v22951_v34  ;;  %v23004_v34 = vld [vmem:[%s26117_s16 + $0x8a4] ss:$72 sps:$4 sm:$0xff]  }
 0x2fa   : > { %6592 = vmatmul.mubr.bf16.vlgmr.msra.gmra.mxu0 %v26233_v14  ;;  %6688 = vmatprep.subr.bf16.mxu1 %v22959_v36  ;;  %v22999_v36 = vld [vmem:[%s26117_s16 + $0x930] ss:$72 sps:$4 sm:$0xff]  }
 0x2fb   : > { %6646 = vmatpush1.bf16.msra.mxu0 %v22954_v41  ;;  %6677 = vmatprep.mubr.bf16.mxu0 %v26199_v49  ;;  %v23007_v41 = vld [vmem:[%s26117_s16 + $0x11a4] ss:$72 sps:$4 sm:$0xff]  }
 0x2fc   : > { %6635 = vmatmul.mubr.bf16.vlgmr.msra.gmra.mxu1 %v26307_v22  ;;  %6647 = vmatprep.subr.bf16.mxu0 %v22962_v48  ;;  %v23002_v48 = vld [vmem:[%s26117_s16 + $0x8a0] ss:$72 sps:$4 sm:$0xff]  }
 0x2fd   : > { %6689 = vmatpush1.bf16.msra.mxu1 %v22957_v52  ;;  %6720 = vmatprep.mubr.bf16.mxu1 %v26207_v55  ;;  %v23010_v52 = vld [vmem:[%s26117_s16 + $0x814] ss:$72 sps:$4 sm:$0xff]  }
 0x2fe   : > { %6690 = vmatprep.subr.bf16.mxu1 %v22965_v54  ;;  %v23005_v54 = vld [vmem:[%s26117_s16 + $0x11a0] ss:$72 sps:$4 sm:$0xff]  }
 0x2ff   : > { %6648 = vmatpush1.bf16.msra.mxu0 %v22960_v56  ;;  %v23013_v56 = vld [vmem:[%s26117_s16 + $0x1114] ss:$72 sps:$4 sm:$0xff]  }
 0x300   : > { %6649 = vmatprep.subr.bf16.mxu0 %v22968_v57  ;;  %v23008_v57 = vld [vmem:[%s26117_s16 + $0x810] ss:$72 sps:$4 sm:$0xff]  }
 0x301   : > { %6691 = vmatpush1.bf16.msra.mxu1 %v22963_v60  ;;  %v23016_v60 = vld [vmem:[%s26117_s16 + $0x784] ss:$72 sps:$4 sm:$0xff]  }
 0x302   : > { %6692 = vmatprep.subr.bf16.mxu1 %v22971_v0  ;;  %v23011_v0 = vld [vmem:[%s26117_s16 + $0x1110] ss:$72 sps:$4 sm:$0xff]  }
 0x303   : > { %6650 = vmatpush1.bf16.msra.mxu0 %v22966_v2  ;;  %v23019_v2 = vld [vmem:[%s26117_s16 + $0x1084] ss:$72 sps:$4 sm:$0xff]  }
 0x304   : > { %6651 = vmatprep.subr.bf16.mxu0 %v22974_v4  ;;  %v23014_v4 = vld [vmem:[%s26117_s16 + $0x780] ss:$72 sps:$4 sm:$0xff]  }
 0x305   : > { %6693 = vmatpush1.bf16.msra.mxu1 %v22969_v6  ;;  %v23022_v6 = vld [vmem:[%s26117_s16 + $0x6f4] ss:$72 sps:$4 sm:$0xff]  }
 0x306   : > { %6694 = vmatprep.subr.bf16.mxu1 %v22977_v7  ;;  %v23017_v7 = vld [vmem:[%s26117_s16 + $0x1080] ss:$72 sps:$4 sm:$0xff]  }
 0x307   : > { %6652 = vmatpush1.bf16.msra.mxu0 %v22972_v61  ;;  %v23025_v61 = vld [vmem:[%s26117_s16 + $0xff4] ss:$72 sps:$4 sm:$0xff]  }
 0x308   : > { %6653 = vmatprep.subr.bf16.mxu0 %v22980_v8  ;;  %v23020_v8 = vld [vmem:[%s26117_s16 + $0x6f0] ss:$72 sps:$4 sm:$0xff]  }
 0x309   : > { %6695 = vmatpush1.bf16.msra.mxu1 %v22975_v9  ;;  %v23028_v9 = vld [vmem:[%s26117_s16 + $0x664] ss:$72 sps:$4 sm:$0xff]  }
 0x30a   : > { %6696 = vmatprep.subr.bf16.mxu1 %v22983_v13  ;;  %v23023_v13 = vld [vmem:[%s26117_s16 + $0xff0] ss:$72 sps:$4 sm:$0xff]  }
 0x30b   : > { %6654 = vmatpush1.bf16.msra.mxu0 %v22978_v15  ;;  %v23031_v15 = vld [vmem:[%s26117_s16 + $0xf64] ss:$72 sps:$4 sm:$0xff]  }
 0x30c   : > { %6655 = vmatprep.subr.bf16.mxu0 %v22986_v16  ;;  %v23026_v16 = vld [vmem:[%s26117_s16 + $0x660] ss:$72 sps:$4 sm:$0xff]  }
 0x30d   : > { %6697 = vmatpush1.bf16.msra.mxu1 %v22981_v19  ;;  %v23034_v19 = vld [vmem:[%s26117_s16 + $0x5d4] ss:$72 sps:$4 sm:$0xff]  }
 0x30e   : > { %6698 = vmatprep.subr.bf16.mxu1 %v22989_v20  ;;  %v23029_v20 = vld [vmem:[%s26117_s16 + $0xf60] ss:$72 sps:$4 sm:$0xff]  }
 0x30f   : > { %6656 = vmatpush1.bf16.msra.mxu0 %v22984_v21  ;;  %v23037_v21 = vld [vmem:[%s26117_s16 + $0xed4] ss:$72 sps:$4 sm:$0xff]  }
 0x310   : > { %6657 = vmatprep.subr.bf16.mxu0 %v22992_v59  ;;  %v23032_v59 = vld [vmem:[%s26117_s16 + $0x5d0] ss:$72 sps:$4 sm:$0xff]  }
 0x311   : > { %6699 = vmatpush1.bf16.msra.mxu1 %v22987_v24  ;;  %v23040_v24 = vld [vmem:[%s26117_s16 + $0x544] ss:$72 sps:$4 sm:$0xff]  }
 0x312   : > { %6700 = vmatprep.subr.bf16.mxu1 %v22995_v25  ;;  %v23035_v25 = vld [vmem:[%s26117_s16 + $0xed0] ss:$72 sps:$4 sm:$0xff]  }
 0x313   : > { %6658 = vmatpush1.bf16.msra.mxu0 %v22990_v28  ;;  %v23043_v28 = vld [vmem:[%s26117_s16 + $0xe44] ss:$72 sps:$4 sm:$0xff]  }
 0x314   : > { %6659 = vmatprep.subr.bf16.mxu0 %v22998_v1  ;;  %v23038_v1 = vld [vmem:[%s26117_s16 + $0x540] ss:$72 sps:$4 sm:$0xff]  }
 0x315   : > { %6701 = vmatpush1.bf16.msra.mxu1 %v22993_v29  ;;  %v23046_v29 = vld [vmem:[%s26117_s16 + $0x4b4] ss:$72 sps:$4 sm:$0xff]  }
 0x316   : > { %6702 = vmatprep.subr.bf16.mxu1 %v23001_v30  ;;  %v23041_v30 = vld [vmem:[%s26117_s16 + $0xe40] ss:$72 sps:$4 sm:$0xff]  }
 0x317   : > { %6660 = vmatpush1.bf16.msra.mxu0 %v22996_v31  ;;  %v23049_v31 = vld [vmem:[%s26117_s16 + $0xdb4] ss:$72 sps:$4 sm:$0xff]  }
 0x318   : > { %6661 = vmatprep.subr.bf16.mxu0 %v23004_v34  ;;  %v23044_v34 = vld [vmem:[%s26117_s16 + $0x4b0] ss:$72 sps:$4 sm:$0xff]  }
 0x319   : > { %6703 = vmatpush1.bf16.msra.mxu1 %v22999_v36  ;;  %v23052_v36 = vld [vmem:[%s26117_s16 + $0x1624] ss:$72 sps:$4 sm:$0xff]  }
 0x31a   : > { %6704 = vmatprep.subr.bf16.mxu1 %v23007_v41  ;;  %v23047_v41 = vld [vmem:[%s26117_s16 + $0xdb0] ss:$72 sps:$4 sm:$0xff]  }
 0x31b   : > { %6662 = vmatpush2.bf16.msra.mxu0 %v23002_v48  ;;  %v23055_v48 = vld [vmem:[%s26117_s16 + $0x42c] ss:$72 sps:$4 sm:$0xff]  }
 0x31c   : > { %6663 = vmatprep.subr.bf16.mxu0 %v23010_v52  ;;  %v23050_v52 = vld [vmem:[%s26117_s16 + $0x1620] ss:$72 sps:$4 sm:$0xff]  }
 0x31d   : > { %6705 = vmatpush2.bf16.msra.mxu1 %v23005_v54  ;;  %v23058_v54 = vld [vmem:[%s26117_s16 + $0x1594] ss:$72 sps:$4 sm:$0xff]  }
 0x31e   : > { %6706 = vmatprep.subr.bf16.mxu1 %v23013_v56  ;;  %v23053_v56 = vld [vmem:[%s26117_s16 + $0x428] ss:$72 sps:$4 sm:$0xff]  }
 0x31f   : > { %6664 = vmatpush2.bf16.msra.mxu0 %v23008_v57  ;;  %v23061_v57 = vld [vmem:[%s26117_s16 + $0x39c] ss:$72 sps:$4 sm:$0xff]  }
 0x320   : > { %6665 = vmatprep.subr.bf16.mxu0 %v23016_v60  ;;  %v23056_v60 = vld [vmem:[%s26117_s16 + $0x1590] ss:$72 sps:$4 sm:$0xff]  }
 0x321   : > { %6707 = vmatpush2.bf16.msra.mxu1 %v23011_v0  ;;  %v23064_v0 = vld [vmem:[%s26117_s16 + $0x1504] ss:$72 sps:$4 sm:$0xff]  }
 0x322   : > { %6708 = vmatprep.subr.bf16.mxu1 %v23019_v2  ;;  %v23059_v2 = vld [vmem:[%s26117_s16 + $0x398] ss:$72 sps:$4 sm:$0xff]  }
 0x323   : > { %6666 = vmatpush2.bf16.msra.mxu0 %v23014_v4  ;;  %v23067_v4 = vld [vmem:[%s26117_s16 + $0x30c] ss:$72 sps:$4 sm:$0xff]  }
 0x324   : > { %6667 = vmatprep.subr.bf16.mxu0 %v23022_v6  ;;  %v23062_v6 = vld [vmem:[%s26117_s16 + $0x1500] ss:$72 sps:$4 sm:$0xff]  }
 0x325   : > { %6709 = vmatpush2.bf16.msra.mxu1 %v23017_v7  ;;  %v23070_v7 = vld [vmem:[%s26117_s16 + $0x1474] ss:$72 sps:$4 sm:$0xff]  }
 0x326   : > { %6710 = vmatprep.subr.bf16.mxu1 %v23025_v61  ;;  %v23065_v61 = vld [vmem:[%s26117_s16 + $0x308] ss:$72 sps:$4 sm:$0xff]  }
 0x327   : > { %6668 = vmatpush2.bf16.msra.mxu0 %v23020_v8  ;;  %v23073_v8 = vld [vmem:[%s26117_s16 + $0x27c] ss:$72 sps:$4 sm:$0xff]  }
 0x328   : > { %6669 = vmatprep.subr.bf16.mxu0 %v23028_v9  ;;  %v23068_v9 = vld [vmem:[%s26117_s16 + $0x1470] ss:$72 sps:$4 sm:$0xff]  }
 0x329   : > { %6711 = vmatpush2.bf16.msra.mxu1 %v23023_v13  ;;  %v23076_v13 = vld [vmem:[%s26117_s16 + $0x13e4] ss:$72 sps:$4 sm:$0xff]  }
 0x32a   : > { %6712 = vmatprep.subr.bf16.mxu1 %v23031_v15  ;;  %v23071_v15 = vld [vmem:[%s26117_s16 + $0x278] ss:$72 sps:$4 sm:$0xff]  }
 0x32b   : > { %6670 = vmatpush2.bf16.msra.mxu0 %v23026_v16  ;;  %v23079_v16 = vld [vmem:[%s26117_s16 + $0x1ec] ss:$72 sps:$4 sm:$0xff]  }
 0x32c   : > { %6671 = vmatprep.subr.bf16.mxu0 %v23034_v19  ;;  %v23074_v19 = vld [vmem:[%s26117_s16 + $0x13e0] ss:$72 sps:$4 sm:$0xff]  }
 0x32d   : > { %6713 = vmatpush2.bf16.msra.mxu1 %v23029_v20  ;;  %v23082_v20 = vld [vmem:[%s26117_s16 + $0x1354] ss:$72 sps:$4 sm:$0xff]  }
 0x32e   : > { %6714 = vmatprep.subr.bf16.mxu1 %v23037_v21  ;;  %v23077_v21 = vld [vmem:[%s26117_s16 + $0x1e8] ss:$72 sps:$4 sm:$0xff]  }
 0x32f   : > { %6672 = vmatpush2.bf16.msra.mxu0 %v23032_v59  ;;  %v23085_v59 = vld [vmem:[%s26117_s16 + $0x15c] ss:$72 sps:$4 sm:$0xff]  }
 0x330   : > { %6673 = vmatprep.subr.bf16.mxu0 %v23040_v24  ;;  %v23080_v24 = vld [vmem:[%s26117_s16 + $0x1350] ss:$72 sps:$4 sm:$0xff]  }
 0x331   : > { %6715 = vmatpush2.bf16.msra.mxu1 %v23035_v25  ;;  %v23088_v25 = vld [vmem:[%s26117_s16 + $0x12c4] ss:$72 sps:$4 sm:$0xff]  }
 0x332   : > { %6716 = vmatprep.subr.bf16.mxu1 %v23043_v28  ;;  %v23083_v28 = vld [vmem:[%s26117_s16 + $0x158] ss:$72 sps:$4 sm:$0xff]  }
 0x333   : > { %6674 = vmatpush2.bf16.msra.mxu0 %v23038_v1  ;;  %v23091_v1 = vld [vmem:[%s26117_s16 + $0xcc] ss:$72 sps:$4 sm:$0xff]  }
 0x334   : > { %6675 = vmatprep.subr.bf16.mxu0 %v23046_v29  ;;  %v23086_v29 = vld [vmem:[%s26117_s16 + $0x12c0] ss:$72 sps:$4 sm:$0xff]  }
 0x335   : > { %6717 = vmatpush2.bf16.msra.mxu1 %v23041_v30  ;;  %v23094_v30 = vld [vmem:[%s26117_s16 + $0x1234] ss:$72 sps:$4 sm:$0xff]  }
 0x336   : > { %6718 = vmatprep.subr.bf16.mxu1 %v23049_v31  ;;  %v23089_v31 = vld [vmem:[%s26117_s16 + $0xc8] ss:$72 sps:$4 sm:$0xff]  }
 0x337   : > { %6676 = vmatpush2.bf16.msra.mxu0 %v23044_v34  ;;  %v23097_v34 = vld [vmem:[%s26117_s16 + $0x3c] ss:$72 sps:$4 sm:$0xff]  }
 0x338   : > { %6731 = vmatprep.subr.bf16.mxu0 %v23052_v36  ;;  %v23092_v36 = vld [vmem:[%s26117_s16 + $0x1230] ss:$72 sps:$4 sm:$0xff]  }
 0x339   : > { %6719 = vmatpush2.bf16.msra.mxu1 %v23047_v41  ;;  %v23100_v41 = vld [vmem:[%s26117_s16 + $0x1aa4] ss:$72 sps:$4 sm:$0xff]  }
 0x33a   : > { %6678 = vmatmul.mubr.bf16.vlgmr.msra.gmra.mxu0 %v26229_v11  ;;  %6774 = vmatprep.subr.bf16.mxu1 %v23055_v48  ;;  %v23095_v48 = vld [vmem:[%s26117_s16 + $0x38] ss:$72 sps:$4 sm:$0xff]  }
 0x33b   : > { %6732 = vmatpush1.bf16.msra.mxu0 %v23050_v52  ;;  %6763 = vmatprep.mubr.bf16.mxu0 %v26266_v43  ;;  %v23103_v52 = vld [vmem:[%s26117_s16 + $0x8ac] ss:$72 sps:$4 sm:$0xff]  }
 0x33c   : > { %6721 = vmatmul.mubr.bf16.vlgmr.msra.gmra.mxu1 %v26233_v14  ;;  %6733 = vmatprep.subr.bf16.mxu0 %v23058_v54  ;;  %v23098_v54 = vld [vmem:[%s26117_s16 + $0x1aa0] ss:$72 sps:$4 sm:$0xff]  }
 0x33d   : > { %6775 = vmatpush1.bf16.msra.mxu1 %v23053_v56  ;;  %6806 = vmatprep.mubr.bf16.mxu1 %v26199_v49  ;;  %v23106_v56 = vld [vmem:[%s26117_s16 + $0x1a14] ss:$72 sps:$4 sm:$0xff]  }
 0x33e   : > { %6776 = vmatprep.subr.bf16.mxu1 %v23061_v57  ;;  %v23101_v57 = vld [vmem:[%s26117_s16 + $0x8a8] ss:$72 sps:$4 sm:$0xff]  }
 0x33f   : > { %6734 = vmatpush1.bf16.msra.mxu0 %v23056_v60  ;;  %v23109_v60 = vld [vmem:[%s26117_s16 + $0x81c] ss:$72 sps:$4 sm:$0xff]  }
 0x340   : > { %6735 = vmatprep.subr.bf16.mxu0 %v23064_v0  ;;  %v23104_v0 = vld [vmem:[%s26117_s16 + $0x1a10] ss:$72 sps:$4 sm:$0xff]  }
 0x341   : > { %6777 = vmatpush1.bf16.msra.mxu1 %v23059_v2  ;;  %v23112_v2 = vld [vmem:[%s26117_s16 + $0x1984] ss:$72 sps:$4 sm:$0xff]  }
 0x342   : > { %6778 = vmatprep.subr.bf16.mxu1 %v23067_v4  ;;  %v23107_v4 = vld [vmem:[%s26117_s16 + $0x818] ss:$72 sps:$4 sm:$0xff]  }
 0x343   : > { %6736 = vmatpush1.bf16.msra.mxu0 %v23062_v6  ;;  %v23115_v6 = vld [vmem:[%s26117_s16 + $0x78c] ss:$72 sps:$4 sm:$0xff]  }
 0x344   : > { %6737 = vmatprep.subr.bf16.mxu0 %v23070_v7  ;;  %v23110_v7 = vld [vmem:[%s26117_s16 + $0x1980] ss:$72 sps:$4 sm:$0xff]  }
 0x345   : > { %6779 = vmatpush1.bf16.msra.mxu1 %v23065_v61  ;;  %v23118_v61 = vld [vmem:[%s26117_s16 + $0x18f4] ss:$72 sps:$4 sm:$0xff]  }
 0x346   : > { %6780 = vmatprep.subr.bf16.mxu1 %v23073_v8  ;;  %v23113_v8 = vld [vmem:[%s26117_s16 + $0x788] ss:$72 sps:$4 sm:$0xff]  }
 0x347   : > { %6738 = vmatpush1.bf16.msra.mxu0 %v23068_v9  ;;  %v23121_v9 = vld [vmem:[%s26117_s16 + $0x6fc] ss:$72 sps:$4 sm:$0xff]  }
 0x348   : > { %6739 = vmatprep.subr.bf16.mxu0 %v23076_v13  ;;  %v23116_v13 = vld [vmem:[%s26117_s16 + $0x18f0] ss:$72 sps:$4 sm:$0xff]  }
 0x349   : > { %6781 = vmatpush1.bf16.msra.mxu1 %v23071_v15  ;;  %v23124_v15 = vld [vmem:[%s26117_s16 + $0x1864] ss:$72 sps:$4 sm:$0xff]  }
 0x34a   : > { %6782 = vmatprep.subr.bf16.mxu1 %v23079_v16  ;;  %v23119_v16 = vld [vmem:[%s26117_s16 + $0x6f8] ss:$72 sps:$4 sm:$0xff]  }
 0x34b   : > { %6740 = vmatpush1.bf16.msra.mxu0 %v23074_v19  ;;  %v23127_v19 = vld [vmem:[%s26117_s16 + $0x66c] ss:$72 sps:$4 sm:$0xff]  }
 0x34c   : > { %6741 = vmatprep.subr.bf16.mxu0 %v23082_v20  ;;  %v23122_v20 = vld [vmem:[%s26117_s16 + $0x1860] ss:$72 sps:$4 sm:$0xff]  }
 0x34d   : > { %6783 = vmatpush1.bf16.msra.mxu1 %v23077_v21  ;;  %v23130_v21 = vld [vmem:[%s26117_s16 + $0x17d4] ss:$72 sps:$4 sm:$0xff]  }
 0x34e   : > { %6784 = vmatprep.subr.bf16.mxu1 %v23085_v59  ;;  %v23125_v59 = vld [vmem:[%s26117_s16 + $0x668] ss:$72 sps:$4 sm:$0xff]  }
 0x34f   : > { %6742 = vmatpush1.bf16.msra.mxu0 %v23080_v24  ;;  %v23133_v24 = vld [vmem:[%s26117_s16 + $0x5dc] ss:$72 sps:$4 sm:$0xff]  }
 0x350   : > { %6743 = vmatprep.subr.bf16.mxu0 %v23088_v25  ;;  %v23128_v25 = vld [vmem:[%s26117_s16 + $0x17d0] ss:$72 sps:$4 sm:$0xff]  }
 0x351   : > { %6785 = vmatpush1.bf16.msra.mxu1 %v23083_v28  ;;  %v23136_v28 = vld [vmem:[%s26117_s16 + $0x1744] ss:$72 sps:$4 sm:$0xff]  }
 0x352   : > { %6786 = vmatprep.subr.bf16.mxu1 %v23091_v1  ;;  %v23131_v1 = vld [vmem:[%s26117_s16 + $0x5d8] ss:$72 sps:$4 sm:$0xff]  }
 0x353   : > { %6744 = vmatpush1.bf16.msra.mxu0 %v23086_v29  ;;  %v23139_v29 = vld [vmem:[%s26117_s16 + $0x54c] ss:$72 sps:$4 sm:$0xff]  }
 0x354   : > { %6745 = vmatprep.subr.bf16.mxu0 %v23094_v30  ;;  %v23134_v30 = vld [vmem:[%s26117_s16 + $0x1740] ss:$72 sps:$4 sm:$0xff]  }
 0x355   : > { %6787 = vmatpush1.bf16.msra.mxu1 %v23089_v31  ;;  %v23142_v31 = vld [vmem:[%s26117_s16 + $0x16b4] ss:$72 sps:$4 sm:$0xff]  }
 0x356   : > { %6788 = vmatprep.subr.bf16.mxu1 %v23097_v34  ;;  %v23137_v34 = vld [vmem:[%s26117_s16 + $0x548] ss:$72 sps:$4 sm:$0xff]  }
 0x357   : > { %6746 = vmatpush1.bf16.msra.mxu0 %v23092_v36  ;;  %v23145_v36 = vld [vmem:[%s26117_s16 + $0x4bc] ss:$72 sps:$4 sm:$0xff]  }
 0x358   : > { %6747 = vmatprep.subr.bf16.mxu0 %v23100_v41  ;;  %v23140_v41 = vld [vmem:[%s26117_s16 + $0x16b0] ss:$72 sps:$4 sm:$0xff]  }
 0x359   : > { %6789 = vmatpush1.bf16.msra.mxu1 %v23095_v48  ;;  %v23148_v48 = vld [vmem:[%s26117_s16 + $0xd2c] ss:$72 sps:$4 sm:$0xff]  }
 0x35a   : > { %6790 = vmatprep.subr.bf16.mxu1 %v23103_v52  ;;  %v23143_v52 = vld [vmem:[%s26117_s16 + $0x4b8] ss:$72 sps:$4 sm:$0xff]  }
 0x35b   : > { %6748 = vmatpush2.bf16.msra.mxu0 %v23098_v54  ;;  %v23151_v54 = vld [vmem:[%s26117_s16 + $0x162c] ss:$72 sps:$4 sm:$0xff]  }
 0x35c   : > { %6749 = vmatprep.subr.bf16.mxu0 %v23106_v56  ;;  %v23146_v56 = vld [vmem:[%s26117_s16 + $0xd28] ss:$72 sps:$4 sm:$0xff]  }
 0x35d   : > { %6791 = vmatpush2.bf16.msra.mxu1 %v23101_v57  ;;  %v23149_v57 = vld [vmem:[%s26117_s16 + $0x1628] ss:$72 sps:$4 sm:$0xff]  }
 0x35e   : > { %6792 = vmatprep.subr.bf16.mxu1 %v23109_v60  ;;  %v23154_v60 = vld [vmem:[%s26117_s16 + $0xc9c] ss:$72 sps:$4 sm:$0xff]  }
 0x35f   : > { %6750 = vmatpush2.bf16.msra.mxu0 %v23104_v0  ;;  %v23152_v0 = vld [vmem:[%s26117_s16 + $0xc98] ss:$72 sps:$4 sm:$0xff]  }
 0x360   : > { %6751 = vmatprep.subr.bf16.mxu0 %v23112_v2  ;;  %v23157_v2 = vld [vmem:[%s26117_s16 + $0x159c] ss:$72 sps:$4 sm:$0xff]  }
 0x361   : > { %6793 = vmatpush2.bf16.msra.mxu1 %v23107_v4  ;;  %v23155_v4 = vld [vmem:[%s26117_s16 + $0x1598] ss:$72 sps:$4 sm:$0xff]  }
 0x362   : > { %6794 = vmatprep.subr.bf16.mxu1 %v23115_v6  ;;  %v23160_v6 = vld [vmem:[%s26117_s16 + $0xc0c] ss:$72 sps:$4 sm:$0xff]  }
 0x363   : > { %6752 = vmatpush2.bf16.msra.mxu0 %v23110_v7  ;;  %v23158_v7 = vld [vmem:[%s26117_s16 + $0xc08] ss:$72 sps:$4 sm:$0xff]  }
 0x364   : > { %6753 = vmatprep.subr.bf16.mxu0 %v23118_v61  ;;  %v23163_v61 = vld [vmem:[%s26117_s16 + $0x150c] ss:$72 sps:$4 sm:$0xff]  }
 0x365   : > { %6795 = vmatpush2.bf16.msra.mxu1 %v23113_v8  ;;  %v23161_v8 = vld [vmem:[%s26117_s16 + $0x1508] ss:$72 sps:$4 sm:$0xff]  }
 0x366   : > { %6796 = vmatprep.subr.bf16.mxu1 %v23121_v9  ;;  %v23166_v9 = vld [vmem:[%s26117_s16 + $0xb7c] ss:$72 sps:$4 sm:$0xff]  }
 0x367   : > { %6754 = vmatpush2.bf16.msra.mxu0 %v23116_v13  ;;  %v23164_v13 = vld [vmem:[%s26117_s16 + $0xb78] ss:$72 sps:$4 sm:$0xff]  }
 0x368   : > { %6755 = vmatprep.subr.bf16.mxu0 %v23124_v15  ;;  %v23169_v15 = vld [vmem:[%s26117_s16 + $0x147c] ss:$72 sps:$4 sm:$0xff]  }
 0x369   : > { %6797 = vmatpush2.bf16.msra.mxu1 %v23119_v16  ;;  %v23167_v16 = vld [vmem:[%s26117_s16 + $0x1478] ss:$72 sps:$4 sm:$0xff]  }
 0x36a   : > { %6798 = vmatprep.subr.bf16.mxu1 %v23127_v19  ;;  %v23172_v19 = vld [vmem:[%s26117_s16 + $0xaec] ss:$72 sps:$4 sm:$0xff]  }
 0x36b   : > { %6756 = vmatpush2.bf16.msra.mxu0 %v23122_v20  ;;  %v23175_v20 = vld [vmem:[%s26117_s16 + $0x13ec] ss:$72 sps:$4 sm:$0xff]  }
 0x36c   : > { %6757 = vmatprep.subr.bf16.mxu0 %v23130_v21  ;;  %v23170_v21 = vld [vmem:[%s26117_s16 + $0xae8] ss:$72 sps:$4 sm:$0xff]  }
 0x36d   : > { %6799 = vmatpush2.bf16.msra.mxu1 %v23125_v59  ;;  %v23173_v59 = vld [vmem:[%s26117_s16 + $0x13e8] ss:$72 sps:$4 sm:$0xff]  }
 0x36e   : > { %6800 = vmatprep.subr.bf16.mxu1 %v23133_v24  ;;  %v23178_v24 = vld [vmem:[%s26117_s16 + $0xa5c] ss:$72 sps:$4 sm:$0xff]  }
 0x36f   : > { %6758 = vmatpush2.bf16.msra.mxu0 %v23128_v25  ;;  %v23181_v25 = vld [vmem:[%s26117_s16 + $0x135c] ss:$72 sps:$4 sm:$0xff]  }
 0x370   : > { %6759 = vmatprep.subr.bf16.mxu0 %v23136_v28  ;;  %v23176_v28 = vld [vmem:[%s26117_s16 + $0xa58] ss:$72 sps:$4 sm:$0xff]  }
 0x371   : > { %6801 = vmatpush2.bf16.msra.mxu1 %v23131_v1  ;;  %v23179_v1 = vld [vmem:[%s26117_s16 + $0x1358] ss:$72 sps:$4 sm:$0xff]  }
 0x372   : > { %6802 = vmatprep.subr.bf16.mxu1 %v23139_v29  ;;  %v23184_v29 = vld [vmem:[%s26117_s16 + $0x9cc] ss:$72 sps:$4 sm:$0xff]  }
 0x373   : > { %6760 = vmatpush2.bf16.msra.mxu0 %v23134_v30  ;;  %v23187_v30 = vld [vmem:[%s26117_s16 + $0x12cc] ss:$72 sps:$4 sm:$0xff]  }
 0x374   : > { %6761 = vmatprep.subr.bf16.mxu0 %v23142_v31  ;;  %v23182_v31 = vld [vmem:[%s26117_s16 + $0x9c8] ss:$72 sps:$4 sm:$0xff]  }
 0x375   : > { %6803 = vmatpush2.bf16.msra.mxu1 %v23137_v34  ;;  %v23185_v34 = vld [vmem:[%s26117_s16 + $0x12c8] ss:$72 sps:$4 sm:$0xff]  }
 0x376   : > { %6804 = vmatprep.subr.bf16.mxu1 %v23145_v36  ;;  %v23190_v36 = vld [vmem:[%s26117_s16 + $0x93c] ss:$72 sps:$4 sm:$0xff]  }
 0x377   : > { %6762 = vmatpush2.bf16.msra.mxu0 %v23140_v41  ;;  %v23193_v41 = vld [vmem:[%s26117_s16 + $0x123c] ss:$72 sps:$4 sm:$0xff]  }
 0x378   : > { %6817 = vmatprep.subr.bf16.mxu0 %v23148_v48  ;;  %v23188_v48 = vld [vmem:[%s26117_s16 + $0x938] ss:$72 sps:$4 sm:$0xff]  }
 0x379   : > { %6805 = vmatpush2.bf16.msra.mxu1 %v23143_v52  ;;  %v23191_v52 = vld [vmem:[%s26117_s16 + $0x1238] ss:$72 sps:$4 sm:$0xff]  }
 0x37a   : > { %6764 = vmatmul.mubr.bf16.vlgmr.msra.gmra.mxu0 %v26307_v22  ;;  %6860 = vmatprep.subr.bf16.mxu1 %v23151_v54  ;;  %v23196_v54 = vld [vmem:[%s26117_s16 + $0x11ac] ss:$72 sps:$4 sm:$0xff]  }
 0x37b   : > { %6818 = vmatpush1.bf16.msra.mxu0 %v23146_v56  ;;  %6849 = vmatprep.mubr.bf16.mxu0 %v26207_v55  ;;  %v23199_v56 = vld [vmem:[%s26117_s16 + $0x1aac] ss:$72 sps:$4 sm:$0xff]  }
 0x37c   : > { %6807 = vmatmul.mubr.bf16.vlgmr.msra.gmra.mxu1 %v26229_v11  ;;  %6819 = vmatprep.subr.bf16.mxu0 %v23154_v60  ;;  %v23197_v60 = vld [vmem:[%s26117_s16 + $0x1aa8] ss:$72 sps:$4 sm:$0xff]  }
 0x37d   : > { %6861 = vmatpush1.bf16.msra.mxu1 %v23149_v57  ;;  %6892 = vmatprep.mubr.bf16.mxu1 %v26266_v43  ;;  %v23194_v57 = vld [vmem:[%s26117_s16 + $0x11a8] ss:$72 sps:$4 sm:$0xff]  }
 0x37e   : > { %6862 = vmatprep.subr.bf16.mxu1 %v23157_v2  ;;  %v23205_v2 = vld [vmem:[%s26117_s16 + $0x1a1c] ss:$72 sps:$4 sm:$0xff]  }
 0x37f   : > { %6820 = vmatpush1.bf16.msra.mxu0 %v23152_v0  ;;  %v23202_v0 = vld [vmem:[%s26117_s16 + $0x111c] ss:$72 sps:$4 sm:$0xff]  }
 0x380   : > { %6821 = vmatprep.subr.bf16.mxu0 %v23160_v6  ;;  %v23203_v6 = vld [vmem:[%s26117_s16 + $0x1a18] ss:$72 sps:$4 sm:$0xff]  }
 0x381   : > { %6863 = vmatpush1.bf16.msra.mxu1 %v23155_v4  ;;  %v23200_v4 = vld [vmem:[%s26117_s16 + $0x1118] ss:$72 sps:$4 sm:$0xff]  }
 0x382   : > { %6864 = vmatprep.subr.bf16.mxu1 %v23163_v61  ;;  %v23211_v61 = vld [vmem:[%s26117_s16 + $0x198c] ss:$72 sps:$4 sm:$0xff]  }
 0x383   : > { %6822 = vmatpush1.bf16.msra.mxu0 %v23158_v7  ;;  %v23208_v7 = vld [vmem:[%s26117_s16 + $0x108c] ss:$72 sps:$4 sm:$0xff]  }
 0x384   : > { %6823 = vmatprep.subr.bf16.mxu0 %v23166_v9  ;;  %v23209_v9 = vld [vmem:[%s26117_s16 + $0x1988] ss:$72 sps:$4 sm:$0xff]  }
 0x385   : > { %6865 = vmatpush1.bf16.msra.mxu1 %v23161_v8  ;;  %v23206_v8 = vld [vmem:[%s26117_s16 + $0x1088] ss:$72 sps:$4 sm:$0xff]  }
 0x386   : > { %6866 = vmatprep.subr.bf16.mxu1 %v23169_v15  ;;  %v23217_v15 = vld [vmem:[%s26117_s16 + $0x18fc] ss:$72 sps:$4 sm:$0xff]  }
 0x387   : > { %6824 = vmatpush1.bf16.msra.mxu0 %v23164_v13  ;;  %v23214_v13 = vld [vmem:[%s26117_s16 + $0xffc] ss:$72 sps:$4 sm:$0xff]  }
 0x388   : > { %6825 = vmatprep.subr.bf16.mxu0 %v23172_v19  ;;  %v23215_v19 = vld [vmem:[%s26117_s16 + $0x18f8] ss:$72 sps:$4 sm:$0xff]  }
 0x389   : > { %6867 = vmatpush1.bf16.msra.mxu1 %v23167_v16  ;;  %v23212_v16 = vld [vmem:[%s26117_s16 + $0xff8] ss:$72 sps:$4 sm:$0xff]  }
 0x38a   : > { %6868 = vmatprep.subr.bf16.mxu1 %v23175_v20  ;;  %v23220_v20 = vld [vmem:[%s26117_s16 + $0xf6c] ss:$72 sps:$4 sm:$0xff]  }
 0x38b   : > { %6826 = vmatpush1.bf16.msra.mxu0 %v23170_v21  ;;  %v23223_v21 = vld [vmem:[%s26117_s16 + $0x186c] ss:$72 sps:$4 sm:$0xff]  }
 0x38c   : > { %6827 = vmatprep.subr.bf16.mxu0 %v23178_v24  ;;  %v23221_v24 = vld [vmem:[%s26117_s16 + $0x1868] ss:$72 sps:$4 sm:$0xff]  }
 0x38d   : > { %6869 = vmatpush1.bf16.msra.mxu1 %v23173_v59  ;;  %v23218_v59 = vld [vmem:[%s26117_s16 + $0xf68] ss:$72 sps:$4 sm:$0xff]  }
 0x38e   : > { %6870 = vmatprep.subr.bf16.mxu1 %v23181_v25  ;;  %v23226_v25 = vld [vmem:[%s26117_s16 + $0xedc] ss:$72 sps:$4 sm:$0xff]  }
 0x38f   : > { %6828 = vmatpush1.bf16.msra.mxu0 %v23176_v28  ;;  %v23229_v28 = vld [vmem:[%s26117_s16 + $0x17dc] ss:$72 sps:$4 sm:$0xff]  }
 0x390   : > { %6829 = vmatprep.subr.bf16.mxu0 %v23184_v29  ;;  %v23227_v29 = vld [vmem:[%s26117_s16 + $0x17d8] ss:$72 sps:$4 sm:$0xff]  }
 0x391   : > { %6871 = vmatpush1.bf16.msra.mxu1 %v23179_v1  ;;  %v23224_v1 = vld [vmem:[%s26117_s16 + $0xed8] ss:$72 sps:$4 sm:$0xff]  }
 0x392   : > { %6872 = vmatprep.subr.bf16.mxu1 %v23187_v30  ;;  %v23232_v30 = vld [vmem:[%s26117_s16 + $0xe4c] ss:$72 sps:$4 sm:$0xff]  }
 0x393   : > { %6830 = vmatpush1.bf16.msra.mxu0 %v23182_v31  ;;  %v23235_v31 = vld [vmem:[%s26117_s16 + $0x174c] ss:$72 sps:$4 sm:$0xff]  }
 0x394   : > { %6831 = vmatprep.subr.bf16.mxu0 %v23190_v36  ;;  %v23233_v36 = vld [vmem:[%s26117_s16 + $0x1748] ss:$72 sps:$4 sm:$0xff]  }
 0x395   : > { %6873 = vmatpush1.bf16.msra.mxu1 %v23185_v34  ;;  %v23230_v34 = vld [vmem:[%s26117_s16 + $0xe48] ss:$72 sps:$4 sm:$0xff]  }
 0x396   : > { %6874 = vmatprep.subr.bf16.mxu1 %v23193_v41  ;;  %v23238_v41 = vld [vmem:[%s26117_s16 + $0xdbc] ss:$72 sps:$4 sm:$0xff]  }
 0x397   : > { %6832 = vmatpush1.bf16.msra.mxu0 %v23188_v48  ;;  %v27072_v48 = vpop.f32.mrf.mxu1 }
 0x398   : > { %6833 = vmatprep.subr.bf16.mxu0 %v23196_v54  ;;  %29874 = vst [vmem:[#allocation24_spill] sm:$0xff] %v27072_v48  ;;  %v23236_v54 = vld [vmem:[%s26117_s16 + $0xdb8] ss:$72 sps:$4 sm:$0xff]   ;;  %v23325_v48 = vld [vmem:[%s26117_s16 + $0xee4] ss:$72 sps:$4 sm:$0xff]  }
 0x399   : > { %6875 = vmatpush1.bf16.msra.mxu1 %v23191_v52  ;;  %v23241_v52 = vld [vmem:[%s26117_s16 + $0x16bc] ss:$72 sps:$4 sm:$0xff]  }
 0x39a   : > { %6876 = vmatprep.subr.bf16.mxu1 %v23199_v56  ;;  %v27076_v56 = vpop.f32.mrf.mxu1 }
 0x39b   : > { %6834 = vmatpush2.bf16.msra.mxu0 %v23194_v57  ;;  %v23239_v57 = vld [vmem:[%s26117_s16 + $0x16b8] ss:$72 sps:$4 sm:$0xff]  }
 0x39c   : > { %6835 = vmatprep.subr.bf16.mxu0 %v23202_v0  ;;  %v23247_v0 = vld [vmem:[%s26117_s16 + $0xd34] ss:$72 sps:$4 sm:$0xff]  }
 0x39d   : > { %6877 = vmatpush2.bf16.msra.mxu1 %v23197_v60  ;;  %v23244_v60 = vld [vmem:[%s26117_s16 + $0x434] ss:$72 sps:$4 sm:$0xff]  }
 0x39e   : > { %6878 = vmatprep.subr.bf16.mxu1 %v23205_v2  ;;  %v23242_v2 = vld [vmem:[%s26117_s16 + $0x430] ss:$72 sps:$4 sm:$0xff]  }
 0x39f   : > { %6836 = vmatpush2.bf16.msra.mxu0 %v23200_v4  ;;  %v27082_v4 = vpop.f32.mrf.mxu1 }
 0x3a0   : > { %6837 = vmatprep.subr.bf16.mxu0 %v23208_v7  ;;  %v23245_v7 = vld [vmem:[%s26117_s16 + $0xd30] ss:$72 sps:$4 sm:$0xff]  }
 0x3a1   : > { %6879 = vmatpush2.bf16.msra.mxu1 %v23203_v6  ;;  %v23250_v6 = vld [vmem:[%s26117_s16 + $0x3a4] ss:$72 sps:$4 sm:$0xff]  }
 0x3a2   : > { %6880 = vmatprep.subr.bf16.mxu1 %v23211_v61  ;;  %v23253_v61 = vld [vmem:[%s26117_s16 + $0xca4] ss:$72 sps:$4 sm:$0xff]  }
 0x3a3   : > { %6838 = vmatpush2.bf16.msra.mxu0 %v23206_v8  ;;  %v23248_v8 = vld [vmem:[%s26117_s16 + $0x3a0] ss:$72 sps:$4 sm:$0xff]  }
 0x3a4   : > { %6839 = vmatprep.subr.bf16.mxu0 %v23214_v13  ;;  %v23256_v13 = vld [vmem:[%s26117_s16 + $0x314] ss:$72 sps:$4 sm:$0xff]  }
 0x3a5   : > { %6881 = vmatpush2.bf16.msra.mxu1 %v23209_v9  ;;  %v27088_v9 = vpop.f32.mrf.mxu1 }
 0x3a6   : > { %6882 = vmatprep.subr.bf16.mxu1 %v23217_v15  ;;  %v23251_v15 = vld [vmem:[%s26117_s16 + $0xca0] ss:$72 sps:$4 sm:$0xff]  }
 0x3a7   : > { %6840 = vmatpush2.bf16.msra.mxu0 %v23212_v16  ;;  %v23259_v16 = vld [vmem:[%s26117_s16 + $0xc14] ss:$72 sps:$4 sm:$0xff]  }
 0x3a8   : > { %6841 = vmatprep.subr.bf16.mxu0 %v23220_v20  ;;  %v27098_v20 = vpop.f32.mrf.mxu1 }
 0x3a9   : > { %6883 = vmatpush2.bf16.msra.mxu1 %v23215_v19  ;;  %v23254_v19 = vld [vmem:[%s26117_s16 + $0x310] ss:$72 sps:$4 sm:$0xff]  }
 0x3aa   : > { %6884 = vmatprep.subr.bf16.mxu1 %v23223_v21  ;;  %v23262_v21 = vld [vmem:[%s26117_s16 + $0x284] ss:$72 sps:$4 sm:$0xff]  }
 0x3ab   : > { %6842 = vmatpush2.bf16.msra.mxu0 %v23218_v59  ;;  %v23257_v59 = vld [vmem:[%s26117_s16 + $0xc10] ss:$72 sps:$4 sm:$0xff]  }
 0x3ac   : > { %6843 = vmatprep.subr.bf16.mxu0 %v23226_v25  ;;  %v23260_v25 = vld [vmem:[%s26117_s16 + $0x280] ss:$72 sps:$4 sm:$0xff]  }
 0x3ad   : > { %6885 = vmatpush2.bf16.msra.mxu1 %v23221_v24  ;;  %v23265_v24 = vld [vmem:[%s26117_s16 + $0xb84] ss:$72 sps:$4 sm:$0xff]  }
 0x3ae   : > { %6886 = vmatprep.subr.bf16.mxu1 %v23229_v28 }
 0x3af   : > { %6844 = vmatpush2.bf16.msra.mxu0 %v23224_v1  ;;  %v23268_v1 = vld [vmem:[%s26117_s16 + $0x1f4] ss:$72 sps:$4 sm:$0xff]  }
 0x3b0   : > { %6845 = vmatprep.subr.bf16.mxu0 %v23232_v30  ;;  %v23271_v30 = vld [vmem:[%s26117_s16 + $0xaf4] ss:$72 sps:$4 sm:$0xff]  }
 0x3b1   : > { %6887 = vmatpush2.bf16.msra.mxu1 %v23227_v29  ;;  %v23263_v29 = vld [vmem:[%s26117_s16 + $0xb80] ss:$72 sps:$4 sm:$0xff]  }
 0x3b2   : > { %6888 = vmatprep.subr.bf16.mxu1 %v23235_v31  ;;  %v23266_v31 = vld [vmem:[%s26117_s16 + $0x1f0] ss:$72 sps:$4 sm:$0xff]  }
 0x3b3   : > { %6846 = vmatpush2.bf16.msra.mxu0 %v23230_v34 }
 0x3b4   : > { %6847 = vmatprep.subr.bf16.mxu0 %v23238_v41  ;;  %v23274_v41 = vld [vmem:[%s26117_s16 + $0x164] ss:$72 sps:$4 sm:$0xff]  }
 0x3b5   : > { %6889 = vmatpush2.bf16.msra.mxu1 %v23233_v36 }
 0x3b6   : > { %6890 = vmatprep.subr.bf16.mxu1 %v23241_v52  ;;  %v23269_v52 = vld [vmem:[%s26117_s16 + $0xaf0] ss:$72 sps:$4 sm:$0xff]  }
 0x3b7   : > { %6848 = vmatpush2.bf16.msra.mxu0 %v23236_v54  ;;  %v23277_v54 = vld [vmem:[%s26117_s16 + $0xa64] ss:$72 sps:$4 sm:$0xff]  }
 0x3b8   : > { %6903 = vmatprep.subr.bf16.mxu0 %v23244_v60 }
 0x3b9   : > { %6891 = vmatpush2.bf16.msra.mxu1 %v23239_v57  ;;  %v23272_v57 = vld [vmem:[%s26117_s16 + $0x160] ss:$72 sps:$4 sm:$0xff]  }
 0x3ba   : > { %6850 = vmatmul.mubr.bf16.vlgmr.msra.gmra.mxu0 %v26233_v14  ;;  %6946 = vmatprep.subr.bf16.mxu1 %v23247_v0 }
 0x3bb   : > { %6904 = vmatpush1.bf16.msra.mxu0 %v23242_v2  ;;  %6935 = vmatprep.mubr.bf16.mxu0 %v26199_v49  ;;  %v27102_v49 = vpop.f32.mrf.mxu0  ;;  %v23280_v2 = vld [vmem:[%s26117_s16 + $0xd4] ss:$72 sps:$4 sm:$0xff]  }
 0x3bc   : > { %6893 = vmatmul.mubr.bf16.vlgmr.msra.gmra.mxu1 %v26307_v22  ;;  %6905 = vmatprep.subr.bf16.mxu0 %v23250_v6  ;;  %29875 = vst [vmem:[#allocation25_spill] sm:$0xff] %v27102_v49  ;;  %v23275_v6 = vld [vmem:[%s26117_s16 + $0xa60] ss:$72 sps:$4 sm:$0xff]   ;;  %v23316_v49 = vld [vmem:[%s26117_s16 + $0x674] ss:$72 sps:$4 sm:$0xff]  }
 0x3bd   : > { %6947 = vmatpush1.bf16.msra.mxu1 %v23245_v7  ;;  %6978 = vmatprep.mubr.bf16.mxu1 %v26207_v55  ;;  %v27106_v28 = vpop.f32.mrf.mxu0  ;;  %v27108_v55 = vpop.f32.mrf.mxu1  ;;  %v23283_v7 = vld [vmem:[%s26117_s16 + $0x9d4] ss:$72 sps:$4 sm:$0xff]  }
 0x3be   : > { %6948 = vmatprep.subr.bf16.mxu1 %v23253_v61  ;;  %v23278_v61 = vld [vmem:[%s26117_s16 + $0xd0] ss:$72 sps:$4 sm:$0xff]  }
 0x3bf   : > { %6906 = vmatpush1.bf16.msra.mxu0 %v23248_v8  ;;  %v27114_v34 = vpop.f32.mrf.mxu0  ;;  %v27116_v36 = vpop.f32.mrf.mxu1 }
 0x3c0   : > { %6907 = vmatprep.subr.bf16.mxu0 %v23256_v13 }
 0x3c1   : > { %6949 = vmatpush1.bf16.msra.mxu1 %v23251_v15  ;;  %v27122_v60 = vpop.f32.mrf.mxu0  ;;  %v27124_v0 = vpop.f32.mrf.mxu1  ;;  %v23286_v15 = vld [vmem:[%s26117_s16 + $0x44] ss:$72 sps:$4 sm:$0xff]  }
 0x3c2   : > { %6950 = vmatprep.subr.bf16.mxu1 %v23259_v16  ;;  %29876 = vst [vmem:[#allocation26_spill] sm:$0xff] %v27122_v60  ;;  %29877 = vst [vmem:[#allocation27_spill] sm:$0xff] %v27124_v0  ;;  %v23281_v16 = vld [vmem:[%s26117_s16 + $0x9d0] ss:$72 sps:$4 sm:$0xff]  }
 0x3c3   : > { %6908 = vmatpush1.bf16.msra.mxu0 %v23254_v19  ;;  %v27130_v8 = vpop.f32.mrf.mxu0  ;;  %v27132_v13 = vpop.f32.mrf.mxu1  ;;  %v506_v60 = vld [vmem:[%s26446_s3 + $0x28] sm:$0xff] }
 0x3c4   : > { %6909 = vmatprep.subr.bf16.mxu0 %v23262_v21  ;;  %29878 = vst [vmem:[#allocation28_spill] sm:$0xff] %v27132_v13  ;;  %v23379_v13 = vld [vmem:[%s26117_s16 + $0x17e4] ss:$72 sps:$4 sm:$0xff]  }
 0x3c5   : > { %6951 = vmatpush1.bf16.msra.mxu1 %v23257_v59  ;;  %v27136_v19 = vpop.f32.mrf.mxu0  ;;  %v27138_v21 = vpop.f32.mrf.mxu1  ;;  %v23289_v59 = vld [vmem:[%s26117_s16 + $0x944] ss:$72 sps:$4 sm:$0xff]  }
 0x3c6   : > { %6952 = vmatprep.subr.bf16.mxu1 %v23265_v24  ;;  %v23284_v24 = vld [vmem:[%s26117_s16 + $0x40] ss:$72 sps:$4 sm:$0xff]  }
 0x3c7   : > { %6910 = vmatpush1.bf16.msra.mxu0 %v23260_v25  ;;  %v23292_v25 = vld [vmem:[%s26117_s16 + $0x8b4] ss:$72 sps:$4 sm:$0xff]  }
 0x3c8   : > { %6911 = vmatprep.subr.bf16.mxu0 %v23268_v1  ;;  %v23287_v1 = vld [vmem:[%s26117_s16 + $0x940] ss:$72 sps:$4 sm:$0xff]  }
 0x3c9   : > { %6953 = vmatpush1.bf16.msra.mxu1 %v23263_v29  ;;  %v27144_v29 = vpop.f32.mrf.mxu0 }
 0x3ca   : > { %6954 = vmatprep.subr.bf16.mxu1 %v23271_v30  ;;  %v27146_v30 = vpop.f32.mrf.mxu1 }
 0x3cb   : > { %6912 = vmatpush1.bf16.msra.mxu0 %v23266_v31  ;;  %v23295_v31 = vld [vmem:[%s26117_s16 + $0x11b4] ss:$72 sps:$4 sm:$0xff]  }
 0x3cc   : > { %6913 = vmatprep.subr.bf16.mxu0 %v23274_v41  ;;  %v23290_v41 = vld [vmem:[%s26117_s16 + $0x8b0] ss:$72 sps:$4 sm:$0xff]  }
 0x3cd   : > { %6955 = vmatpush1.bf16.msra.mxu1 %v23269_v52  ;;  %v23298_v52 = vld [vmem:[%s26117_s16 + $0x824] ss:$72 sps:$4 sm:$0xff]  }
 0x3ce   : > { %6956 = vmatprep.subr.bf16.mxu1 %v23277_v54  ;;  %v23293_v54 = vld [vmem:[%s26117_s16 + $0x11b0] ss:$72 sps:$4 sm:$0xff]  }
 0x3cf   : > { %6914 = vmatpush1.bf16.msra.mxu0 %v23272_v57  ;;  %v27152_v57 = vpop.f32.mrf.mxu0 }
 0x3d0   : > { %6915 = vmatprep.subr.bf16.mxu0 %v23280_v2  ;;  %29879 = vst [vmem:[#allocation29_spill] sm:$0xff] %v27152_v57  ;;  %v27154_v2 = vpop.f32.mrf.mxu1  ;;  %v23338_v57 = vld [vmem:[%s26117_s16 + $0x1630] ss:$72 sps:$4 sm:$0xff]  }
 0x3d1   : > { %6957 = vmatpush1.bf16.msra.mxu1 %v23275_v6  ;;  %29880 = vst [vmem:[#allocation30_spill] sm:$0xff] %v27154_v2  ;;  %v23301_v6 = vld [vmem:[%s26117_s16 + $0x1124] ss:$72 sps:$4 sm:$0xff]  }
 0x3d2   : > { %6958 = vmatprep.subr.bf16.mxu1 %v23283_v7  ;;  %v23296_v7 = vld [vmem:[%s26117_s16 + $0x820] ss:$72 sps:$4 sm:$0xff]   ;;  %v23322_v2 = vld [vmem:[%s26117_s16 + $0x5e4] ss:$72 sps:$4 sm:$0xff]  }
 0x3d3   : > { %6916 = vmatpush1.bf16.msra.mxu0 %v23278_v61  ;;  %v23304_v61 = vld [vmem:[%s26117_s16 + $0x794] ss:$72 sps:$4 sm:$0xff]  }
 0x3d4   : > { %6917 = vmatprep.subr.bf16.mxu0 %v23286_v15  ;;  %v23299_v15 = vld [vmem:[%s26117_s16 + $0x1120] ss:$72 sps:$4 sm:$0xff]  }
 0x3d5   : > { %6959 = vmatpush1.bf16.msra.mxu1 %v23281_v16  ;;  %v27160_v16 = vpop.f32.mrf.mxu0 }
 0x3d6   : > { %6960 = vmatprep.subr.bf16.mxu1 %v23289_v59  ;;  %29881 = vst [vmem:[#allocation31_spill] sm:$0xff] %v27160_v16  ;;  %v27162_v59 = vpop.f32.mrf.mxu1  ;;  %v1436_v16 = vrot.slane %v506_v60, %v26451_v35 }
 0x3d7   : > { %6918 = vmatpush1.bf16.msra.mxu0 %v23284_v24  ;;  %29882 = vst [vmem:[#allocation32_spill] sm:$0xff] %v27162_v59  ;;  %v23307_v24 = vld [vmem:[%s26117_s16 + $0x1094] ss:$72 sps:$4 sm:$0xff]   ;;  %v27166_v26 = vpop.f32.mrf.mxu0  ;;  %v23335_v59 = vld [vmem:[%s26117_s16 + $0xdc0] ss:$72 sps:$4 sm:$0xff]  }
 0x3d8   : > { %6919 = vmatprep.subr.bf16.mxu0 %v23292_v25  ;;  %v23302_v25 = vld [vmem:[%s26117_s16 + $0x790] ss:$72 sps:$4 sm:$0xff]  }
 0x3d9   : > { %6961 = vmatpush1.bf16.msra.mxu1 %v23287_v1  ;;  %v27168_v1 = vpop.f32.mrf.mxu1  ;;  %v27174_v10 = vpop.f32.mrf.mxu0 }
 0x3da   : > { %6962 = vmatprep.subr.bf16.mxu1 %v23295_v31  ;;  %v23310_v31 = vld [vmem:[%s26117_s16 + $0x704] ss:$72 sps:$4 sm:$0xff]  }
 0x3db   : > { %6920 = vmatpush2.bf16.msra.mxu0 %v23290_v41  ;;  %v23305_v41 = vld [vmem:[%s26117_s16 + $0x1090] ss:$72 sps:$4 sm:$0xff]  }
 0x3dc   : > { %6921 = vmatprep.subr.bf16.mxu0 %v23298_v52  ;;  %v23308_v52 = vld [vmem:[%s26117_s16 + $0x700] ss:$72 sps:$4 sm:$0xff]  }
 0x3dd   : > { %6963 = vmatpush2.bf16.msra.mxu1 %v23293_v54  ;;  %v27176_v54 = vpop.f32.mrf.mxu1 }
 0x3de   : > { %6964 = vmatprep.subr.bf16.mxu1 %v23301_v6  ;;  %v23311_v6 = vld [vmem:[%s26117_s16 + $0x1000] ss:$72 sps:$4 sm:$0xff]  }
 0x3df   : > { %6922 = vmatpush2.bf16.msra.mxu0 %v23296_v7  ;;  %v23314_v7 = vld [vmem:[%s26117_s16 + $0x670] ss:$72 sps:$4 sm:$0xff]  }
 0x3e0   : > { %6923 = vmatprep.subr.bf16.mxu0 %v23304_v61  ;;  %v27182_v61 = vpop.f32.mrf.mxu0 }
 0x3e1   : > { %6965 = vmatpush2.bf16.msra.mxu1 %v23299_v15  ;;  %29883 = vst [vmem:[#allocation33_spill] sm:$0xff] %v27182_v61  ;;  %v27184_v15 = vpop.f32.mrf.mxu1  ;;  %v23328_v61 = vld [vmem:[%s26117_s16 + $0x554] ss:$72 sps:$4 sm:$0xff]  }
 0x3e2   : > { %6966 = vmatprep.subr.bf16.mxu1 %v23307_v24  ;;  %29884 = vst [vmem:[#allocation34_spill] sm:$0xff] %v27184_v15  ;;  %v23317_v24 = vld [vmem:[%s26117_s16 + $0xf70] ss:$72 sps:$4 sm:$0xff]  }
 0x3e3   : > { %6924 = vmatpush2.bf16.msra.mxu0 %v23302_v25  ;;  %v23320_v25 = vld [vmem:[%s26117_s16 + $0x5e0] ss:$72 sps:$4 sm:$0xff]  }
 0x3e4   : > { %6925 = vmatprep.subr.bf16.mxu0 %v23310_v31  ;;  %v27190_v31 = vpop.f32.mrf.mxu0 }
 0x3e5   : > { %6967 = vmatpush2.bf16.msra.mxu1 %v23305_v41  ;;  %29885 = vst [vmem:[#allocation35_spill] sm:$0xff] %v27190_v31  ;;  %v27192_v41 = vpop.f32.mrf.mxu1  ;;  %v23334_v31 = vld [vmem:[%s26117_s16 + $0x4c4] ss:$72 sps:$4 sm:$0xff]  }
 0x3e6   : > { %6968 = vmatprep.subr.bf16.mxu1 %v23313_v58  ;;  %29886 = vst [vmem:[#allocation36_spill] sm:$0xff] %v27192_v41  ;;  %v23323_v58 = vld [vmem:[%s26117_s16 + $0xee0] ss:$72 sps:$4 sm:$0xff]   ;;  %v27196_v15 = vpop.f32.mrf.mxu0  ;;  %v23355_v41 = vld [vmem:[%s26117_s16 + $0x1364] ss:$72 sps:$4 sm:$0xff]  }
 0x3e7   : > { %6926 = vmatpush2.bf16.msra.mxu0 %v23308_v52  ;;  %v23326_v52 = vld [vmem:[%s26117_s16 + $0x550] ss:$72 sps:$4 sm:$0xff]  }
 0x3e8   : > { %6927 = vmatprep.subr.bf16.mxu0 %v23316_v49  ;;  %v23331_v49 = vld [vmem:[%s26117_s16 + $0xe54] ss:$72 sps:$4 sm:$0xff]   ;;  %v27204_v0 = vpop.f32.mrf.mxu0 }
 0x3e9   : > { %6969 = vmatpush2.bf16.msra.mxu1 %v23311_v6  ;;  %v27200_v6 = vpop.f32.mrf.mxu1 }
 0x3ea   : > { %6970 = vmatprep.subr.bf16.mxu1 %v23319_v27  ;;  %29887 = vst [vmem:[#allocation37_spill] sm:$0xff] %v27200_v6  ;;  %v23329_v27 = vld [vmem:[%s26117_s16 + $0xe50] ss:$72 sps:$4 sm:$0xff]   ;;  %v23382_v6 = vld [vmem:[%s26117_s16 + $0x1754] ss:$72 sps:$4 sm:$0xff]  }
 0x3eb   : > { %6928 = vmatpush2.bf16.msra.mxu0 %v23314_v7  ;;  %v23337_v7 = vld [vmem:[%s26117_s16 + $0xdc4] ss:$72 sps:$4 sm:$0xff]   ;;  %v27208_v37 = vpop.f32.mrf.mxu1 }
 0x3ec   : > { %6929 = vmatprep.subr.bf16.mxu0 %v23322_v2  ;;  %v23332_v2 = vld [vmem:[%s26117_s16 + $0x4c0] ss:$72 sps:$4 sm:$0xff]  }
 0x3ed   : > { %6971 = vmatpush2.bf16.msra.mxu1 %v23317_v24  ;;  %v23340_v24 = vld [vmem:[%s26117_s16 + $0x1634] ss:$72 sps:$4 sm:$0xff]  }
 0x3ee   : > { %6972 = vmatprep.subr.bf16.mxu1 %v23325_v48  ;;  %v27212_v48 = vpop.f32.mrf.mxu0 }
 0x3ef   : > { %6930 = vmatpush2.bf16.msra.mxu0 %v23320_v25  ;;  %29888 = vst [vmem:[#allocation38_spill] sm:$0xff] %v27212_v48  ;;  %v27215_v25 = vld [vmem:[%s26446_s3 + $0x30] sm:$0xff] }
 0x3f0   : > { %6931 = vmatprep.subr.bf16.mxu0 %v23328_v61  ;;  %v27218_v61 = vpop.f32.mrf.mxu1  ;;  %v27221_v5 = vpop.f32.mrf.mxu0 }
 0x3f1   : > { %6973 = vmatpush2.bf16.msra.mxu1 %v23323_v58  ;;  %29889 = vst [vmem:[#allocation39_spill] sm:$0xff] %v27218_v61  ;;  %v23343_v58 = vld [vmem:[%s26117_s16 + $0x15a4] ss:$72 sps:$4 sm:$0xff]   ;;  %29890 = vst [vmem:[#allocation40_spill] sm:$0xff] %v27221_v5  ;;  %v23350_v5 = vld [vmem:[%s26117_s16 + $0x13f0] ss:$72 sps:$4 sm:$0xff]  }
 0x3f2   : > { %6974 = vmatprep.subr.bf16.mxu1 %v23331_v49  ;;  %v1440_v49 = vrot.slane %v27215_v25, %v26444_v32 }
 0x3f3   : > { %6932 = vmatpush2.bf16.msra.mxu0 %v23326_v52  ;;  %v27226_v52 = vpop.f32.mrf.mxu1 }
 0x3f4   : > { %6933 = vmatprep.subr.bf16.mxu0 %v23334_v31  ;;  %v23341_v31 = vld [vmem:[%s26117_s16 + $0x15a0] ss:$72 sps:$4 sm:$0xff]   ;;  %29891 = vst [vmem:[#allocation41_spill] sm:$0xff] %v27226_v52 }
 0x3f5   : > { %6975 = vmatpush2.bf16.msra.mxu1 %v23329_v27  ;;  %v23346_v27 = vld [vmem:[%s26117_s16 + $0x1514] ss:$72 sps:$4 sm:$0xff]  }
 0x3f6   : > { %6976 = vmatprep.subr.bf16.mxu1 %v23337_v7 }
 0x3f7   : > { %6934 = vmatpush2.bf16.msra.mxu0 %v23332_v2  ;;  %v27239_v2 = vrot.slane %v1440_v49, %v26444_v32  ;;  %v23352_v49 = vld [vmem:[%s26117_s16 + $0x13f4] ss:$72 sps:$4 sm:$0xff]  }
 0x3f8   : > { %6989 = vmatprep.subr.bf16.mxu0 %v23340_v24  ;;  %v23344_v24 = vld [vmem:[%s26117_s16 + $0x1510] ss:$72 sps:$4 sm:$0xff]  }
 0x3f9   : > { %6977 = vmatpush2.bf16.msra.mxu1 %v23335_v59 }
 0x3fa   : > { %v27228_v48 = vpop.f32.mrf.mxu0  ;;  %6936 = vmatmul.mubr.bf16.vlgmr.msra.gmra.mxu0 %v26229_v11 }
 0x3fb   : > { %6990 = vmatpush1.bf16.msra.mxu0 %v23338_v57  ;;  %7021 = vmatprep.mubr.bf16.mxu0 %v26266_v43  ;;  %v23349_v43 = vld [vmem:[%s26117_s16 + $0x1484] ss:$72 sps:$4 sm:$0xff]  }
 0x3fc   : > { %v27233_v7 = vpop.f32.mrf.mxu0  ;;  %v27235_v59 = vpop.f32.mrf.mxu1  ;;  %6979 = vmatmul.mubr.bf16.vlgmr.msra.gmra.mxu1 %v26233_v14  ;;  %6991 = vmatprep.subr.bf16.mxu0 %v23343_v58  ;;  %v23347_v58 = vld [vmem:[%s26117_s16 + $0x1480] ss:$72 sps:$4 sm:$0xff]  }
 0x3fe   : > { %v6683_v11 = vpop.f32.mrf.mxu0  ;;  %v27242_v57 = vpop.f32.mrf.mxu1 }
 0x3ff   : > { %v6684_v61 = vadd.f32 %v6683_v11, %v27239_v2  ;;  %6992 = vmatpush1.bf16.msra.mxu0 %v23341_v31  ;;  %v23353_v11 = vld [vmem:[%s26117_s16 + $0x1360] ss:$72 sps:$4 sm:$0xff]   ;;  %v23358_v31 = vld [vmem:[%s26117_s16 + $0x12d4] ss:$72 sps:$4 sm:$0xff]  }
 0x400   : > { %v6726_v52 = vpop.f32.mrf.mxu1  ;;  %6993 = vmatprep.subr.bf16.mxu0 %v23346_v27  ;;  %v23359_v27 = vld [vmem:[%s26117_s16 + $0x1240] ss:$72 sps:$4 sm:$0xff]  }
 0x401   : > { %v27246_v14 = vadd.f32 %v6726_v52, %v6684_v61  ;;  %v23356_v61 = vld [vmem:[%s26117_s16 + $0x12d0] ss:$72 sps:$4 sm:$0xff]   ;;  %v23361_v52 = vld [vmem:[%s26117_s16 + $0x1244] ss:$72 sps:$4 sm:$0xff]  }
 0x403   : > { %6994 = vmatpush1.bf16.msra.mxu0 %v23344_v24  ;;  %v23364_v24 = vld [vmem:[%s26117_s16 + $0x1ab4] ss:$72 sps:$4 sm:$0xff]  }
 0x404   : > { %6995 = vmatprep.subr.bf16.mxu0 %v23349_v43  ;;  %v23362_v43 = vld [vmem:[%s26117_s16 + $0x1ab0] ss:$72 sps:$4 sm:$0xff]  }
 0x407   : > { %6996 = vmatpush1.bf16.msra.mxu0 %v23347_v58  ;;  %v23367_v58 = vld [vmem:[%s26117_s16 + $0x1a24] ss:$72 sps:$4 sm:$0xff]  }
 0x408   : > { %6997 = vmatprep.subr.bf16.mxu0 %v23352_v49  ;;  %v23368_v49 = vld [vmem:[%s26117_s16 + $0x1990] ss:$72 sps:$4 sm:$0xff]  }
 0x40b   : > { %6998 = vmatpush1.bf16.msra.mxu0 %v23350_v5  ;;  %v23365_v5 = vld [vmem:[%s26117_s16 + $0x1a20] ss:$72 sps:$4 sm:$0xff]  }
 0x40c   : > { %6999 = vmatprep.subr.bf16.mxu0 %v23355_v41  ;;  %v23370_v41 = vld [vmem:[%s26117_s16 + $0x1994] ss:$72 sps:$4 sm:$0xff]  }
 0x40f   : > { %7000 = vmatpush1.bf16.msra.mxu0 %v23353_v11  ;;  %v23373_v11 = vld [vmem:[%s26117_s16 + $0x1904] ss:$72 sps:$4 sm:$0xff]  }
 0x410   : > { %7001 = vmatprep.subr.bf16.mxu0 %v23358_v31  ;;  %v504_v31 = vld [vmem:[%s26446_s3 + $0x18] sm:$0xff] }
 0x413   : > { %7002 = vmatpush1.bf16.msra.mxu0 %v23356_v61  ;;  %v23371_v61 = vld [vmem:[%s26117_s16 + $0x1900] ss:$72 sps:$4 sm:$0xff]  }
 0x414   : > { %7003 = vmatprep.subr.bf16.mxu0 %v23361_v52  ;;  %v23376_v52 = vld [vmem:[%s26117_s16 + $0x1874] ss:$72 sps:$4 sm:$0xff]  }
 0x417   : > { %7004 = vmatpush1.bf16.msra.mxu0 %v23359_v27  ;;  %v23374_v27 = vld [vmem:[%s26117_s16 + $0x1870] ss:$72 sps:$4 sm:$0xff]  }
 0x418   : > { %7005 = vmatprep.subr.bf16.mxu0 %v23364_v24  ;;  %v1420_v24 = vrot.slane %v504_v31, %v26451_v35 }
 0x41b   : > { %7006 = vmatpush2.bf16.msra.mxu0 %v23362_v43  ;;  %v505_v43 = vld [vmem:[%s26446_s3 + $0x20] sm:$0xff] }
 0x41c   : > { %7007 = vmatprep.subr.bf16.mxu0 %v23367_v58  ;;  %v1416_v58 = vrot.slane %v504_v31, %v26444_v32  ;;  %v1444_v31 = vrot.slane %v27215_v25, %v26451_v35  ;;  %v1424_v63 = vrot.slane %v505_v43, %v26444_v32 }
 0x41e   : > { %v27297_v25 = vrot.slane %v1444_v31, %v26444_v32 }
 0x41f   : > { %7008 = vmatpush2.bf16.msra.mxu0 %v23365_v5  ;;  %v23377_v5 = vld [vmem:[%s26117_s16 + $0x17e0] ss:$72 sps:$4 sm:$0xff]  }
 0x420   : > { %7009 = vmatprep.subr.bf16.mxu0 %v23370_v41  ;;  %v1510_v41 = vrot.slane %v1420_v24, %v26444_v32 }
 0x423   : > { %7010 = vmatpush2.bf16.msra.mxu0 %v23368_v49  ;;  %v1428_v49 = vrot.slane %v505_v43, %v26451_v35  ;;  %v27309_v43 = vrot.slane %v1424_v63, %v26444_v32 }
 0x424   : > { %7011 = vmatprep.subr.bf16.mxu0 %v23373_v11  ;;  %v27277_v11 = vrot.slane %v1416_v58, %v26444_v32 }
 0x425   : > { %v27286_v24 = vrot.slane %v1428_v49, %v26444_v32  ;;  %v1526_v49 = vrot.slane %v1436_v16, %v26444_v32 }
 0x427   : > { %7012 = vmatpush2.bf16.msra.mxu0 %v23371_v61  ;;  %v6295_v61 = vadd.f32 %v27082_v4, %v1510_v41  ;;  %v1412_v4 = vrot.slane %v25610_v40, %v26451_v35 }
 0x428   : > { %7013 = vmatprep.subr.bf16.mxu0 %v23376_v52  ;;  %v23385_v52 = vld [vmem:[%s26117_s16 + $0x16c4] ss:$72 sps:$4 sm:$0xff]  }
 0x429   : > { %v6338_v58 = vadd.f32 %v27114_v34, %v6295_v61  ;;  %v27306_v40 = vrot.slane %v1412_v4, %v26444_v32  ;;  %v29897_v4 = vld [vmem:[#allocation37_spill] sm:$0xff] }
 0x42b   : > { %7014 = vmatpush2.bf16.msra.mxu0 %v23374_v27  ;;  %v6293_v27 = vadd.f32 %v27076_v56, %v27277_v11  ;;  %v6381_v34 = vadd.f32 %v27116_v36, %v6338_v58  ;;  %v7033_v36 = vmul.f32 0.03608439, %v26555_v23  ;;  %v29896_v58 = vld [vmem:[#allocation26_spill] sm:$0xff] }
 0x42c   : > { %7015 = vmatprep.subr.bf16.mxu0 %v23379_v13  ;;  %v23383_v13 = vld [vmem:[%s26117_s16 + $0x16c0] ss:$72 sps:$4 sm:$0xff]  }
 0x42d   : > { %v6336_v56 = vadd.f32 %v27106_v28, %v6293_v27  ;;  %v6680_v28 = vadd.f32 %v27228_v48, %v27239_v2  ;;  %v6422_v48 = vadd.f32 %v27136_v19, %v27309_v43  ;;  %v6164_v19 = vadd.f32 %v26717_v38, %v26730_v50 }
 0x42f   : > { %7016 = vmatpush2.bf16.msra.mxu0 %v23377_v5  ;;  %v1432_v5 = vrot.slane %v506_v60, %v26444_v32  ;;  %v27316_v60 = vpop.f32.mrf.mxu0  ;;  %v6379_v16 = vadd.f32 %v27108_v55, %v6336_v56  ;;  %v6123_v55 = vadd.f32 %v26647_v3, %v26641_v62  ;;  %v7032_v3 = vmul.f32 0.03608439, %v26548_v18 }
 0x430   : > { %7017 = vmatprep.subr.bf16.mxu0 %v23382_v6  ;;  %v6424_v6 = vadd.f32 %v27144_v29, %v27286_v24 }
 0x431   : > { %v27321_v61 = vrot.slane %v1432_v5, %v26444_v32  ;;  %v7035_v38 = vmul.f32 0.03608439, %v6123_v55  ;;  %v29899_v5 = vld [vmem:[#allocation36_spill] sm:$0xff]  ;;  %v29906_v55 = vld [vmem:[#allocation35_spill] sm:$0xff] }
 0x432   : > { %v6467_v29 = vadd.f32 %v27146_v30, %v6424_v6  ;;  %v6166_v30 = vadd.f32 %v26723_v42, %v27306_v40  ;;  %v29898_v6 = vld [vmem:[#allocation28_spill] sm:$0xff] }
 0x433   : > { %7018 = vmatpush2.bf16.msra.mxu0 %v23380_v33  ;;  %v6682_v33 = vadd.f32 %v27233_v7, %v27297_v25  ;;  %v6553_v7 = vadd.f32 %v27176_v54, %v1526_v49  ;;  %v6551_v42 = vadd.f32 %v27168_v1, %v27321_v61 }
 0x434   : > { %7019 = vmatprep.subr.bf16.mxu0 %v23385_v52  ;;  %v6510_v63 = vadd.f32 %v27174_v10, %v6467_v29  ;;  %v6723_v10 = vadd.f32 %v27235_v59, %v6680_v28  ;;  %v6209_v59 = vadd.f32 %v26734_v53, %v6166_v30  ;;  %v29901_v29 = vld [vmem:[#allocation29_spill] sm:$0xff]  ;;  %v29904_v30 = vld [vmem:[#allocation27_spill] sm:$0xff] }
 0x435   : > { %v6725_v23 = vadd.f32 %v27242_v57, %v6682_v33  ;;  %v6299_v57 = vadd.f32 %v27098_v20, %v1510_v41  ;;  %v6596_v31 = vadd.f32 %v27204_v0, %v6553_v7  ;;  %v6297_v20 = vadd.f32 %v27088_v9, %v27277_v11  ;;  %v29893_v9 = vld [vmem:[#allocation22_spill] sm:$0xff]  ;;  %v29903_v7 = vld [vmem:[#allocation20_spill] sm:$0xff] }
 0x436   : > { %v6252_v50 = vadd.f32 %v26807_v51, %v6209_v59  ;;  %v6594_v53 = vadd.f32 %v27196_v15, %v6551_v42  ;;  %v6426_v28 = vadd.f32 %v29901_v29, %v27309_v43  ;;  %v29908_v43 = vld [vmem:[#allocation24_spill] sm:$0xff]  ;;  %v29909_v42 = vld [vmem:[#allocation30_spill] sm:$0xff] }
 0x437   : > { %7020 = vmatpush2.bf16.msra.mxu0 %v23383_v13  ;;  %v6465_v13 = vadd.f32 %v27138_v21, %v6422_v48  ;;  %v6207_v21 = vadd.f32 %v26725_v44, %v6164_v19  ;;  %v6342_v1 = vadd.f32 %v27130_v8, %v6299_v57  ;;  %v6340_v8 = vadd.f32 %v29896_v58, %v6297_v20  ;;  %v29910_v19 = vld [vmem:[#allocation16_spill] sm:$0xff] }
 0x438   : > { %7109 = vmatprep.subr.mxu0 %v6381_v34  ;;  %v7037_v44 = vmul.f32 0.03608439, %v6252_v50  ;;  %v6557_v34 = vadd.f32 %v29899_v5, %v1526_v49  ;;  %v29905_v49 = vld [vmem:[#allocation34_spill] sm:$0xff]  ;;  %v7038_v57 = vmul.f32 0.03608439, %v29910_v19 }
 0x439   : > { %v6508_v18 = vadd.f32 %v27166_v26, %v6465_v13  ;;  %v6250_v41 = vadd.f32 %v29893_v9, %v6207_v21  ;;  %v29894_v26 = vld [vmem:[#allocation31_spill] sm:$0xff]  ;;  %v6385_v56 = vadd.f32 %v29898_v6, %v6342_v1  ;;  %v6383_v48 = vadd.f32 %v29904_v30, %v6340_v8  ;;  %v29915_v50 = vld [vmem:[#allocation18_spill] sm:$0xff] }
 0x43a   : > { %v6765_v52 = vpop.f32.mrf.mxu0  ;;  %7022 = vmatmul.mubr.bf16.vlgmr.msra.gmra.mxu0 %v26307_v22  ;;  %v5912_v22 = vadd.f32 %v26541_v12, %v26464_v47  ;;  %v6041_v12 = vadd.f32 %v26630_v46, %v26623_v39  ;;  %v29892_v46 = vld [vmem:[#allocation17_spill] sm:$0xff]  ;;  %v6428_v15 = vadd.f32 %v29894_v26, %v27286_v24  ;;  %v7040_v20 = vmul.f32 0.03608439, %v29915_v50  ;;  %v29917_v21 = vld [vmem:[#allocation23_spill] sm:$0xff] }
 0x43b   : > { %7110 = vmatpush1.xpose.msra.mxu0 %v6379_v16  ;;  %7143 = vmatprep.mubr.f32.mxu0 %v7033_v36  ;;  %v6766_v27 = vadd.f32 %v6765_v52, %v6723_v10  ;;  %v7034_v51 = vmul.f32 0.03608439, %v29892_v46  ;;  %v7036_v24 = vmul.f32 0.03608439, %v6250_v41  ;;  %v29902_v36 = vld [vmem:[#allocation32_spill] sm:$0xff] }
 0x43c   : > { %v6767_v2 = vpop.f32.mrf.mxu0  ;;  %7179 = vmatprep.subr.mxu0 %v6510_v63  ;;  %v5955_v0 = vadd.f32 %v26606_v17, %v5912_v22  ;;  %v29895_v17 = vld [vmem:[#allocation19_spill] sm:$0xff]  ;;  %v6471_v16 = vadd.f32 %v29902_v36, %v6428_v15  ;;  %v7042_v1 = vmul.f32 0.03608439, %v29917_v21 }
 0x43d   : > { %v6768_v54 = vadd.f32 %v6767_v2, %v6725_v23  ;;  %v6084_v11 = vadd.f32 %v29895_v17, %v6041_v12  ;;  %v6555_v23 = vadd.f32 %v29905_v49, %v27321_v61  ;;  %v29913_v61 = vld [vmem:[#allocation38_spill] sm:$0xff]  ;;  %v29914_v12 = vld [vmem:[#allocation41_spill] sm:$0xff] }
 0x43e   : > { %v6769_v62 = vpop.f32.mrf.mxu0  ;;  %v5998_v39 = vadd.f32 %v26628_v45, %v5955_v0  ;;  %v29900_v45 = vld [vmem:[#allocation21_spill] sm:$0xff]  ;;  %v6514_v10 = vadd.f32 %v29906_v55, %v6471_v16  ;;  %v25843_v55 = vmov 1966171168  }
 0x43f   : > { %v27346_v47 = vadd.f32 %v6769_v62, %v27246_v14  ;;  %7555 = vmatprep.subr.mxu1 %v6768_v54  ;;  %v6639_v14 = vadd.f32 %v27208_v37, %v6596_v31  ;;  %v6637_v37 = vadd.f32 %v29897_v4, %v6594_v53  ;;  %v6170_v33 = vadd.f32 %v29900_v45, %v27306_v40  ;;  %v29907_v40 = vld [vmem:[#allocation40_spill] sm:$0xff]  ;;  %v29916_v53 = vld [vmem:[#allocation39_spill] sm:$0xff] }
 0x440   : > { %7556 = vmatpush1.msra.mxu1 %v6766_v27  ;;  %v7039_v63 = vmul.f32 0.03608439, %v5998_v39  ;;  %v6127_v52 = vadd.f32 %v29903_v7, %v6084_v11  ;;  %v6600_v2 = vadd.f32 %v29907_v40, %v6557_v34  ;;  %v6469_v54 = vadd.f32 %v29909_v42, %v6426_v28  ;;  %v29911_v27 = vld [vmem:[#allocation25_spill] sm:$0xff] }
 0x441   : > { %v6213_v22 = vadd.f32 %v29908_v43, %v6170_v33  ;;  %v6598_v13 = vadd.f32 %v29913_v61, %v6555_v23  ;;  %v508_v39 = vld [vmem:[%s26446_s3 + $0x38] sm:$0xff] }
 0x442   : > { %7144 = vmatmul.mubr.f32.vlgmr.msra.gmra.mxu0 %v7032_v3  ;;  %v7041_v31 = vmul.f32 0.03608439, %v6127_v52  ;;  %v29912_v3 = vld [vmem:[#allocation33_spill] sm:$0xff]  ;;  %v1452_v41 = vrot.slane %v508_v39, %v26451_v35 }
 0x443   : > { %7180 = vmatpush1.xpose.msra.mxu0 %v6508_v18  ;;  %7213 = vmatprep.mubr.f32.mxu0 %v7035_v38  ;;  %v6256_v62 = vadd.f32 %v29911_v27, %v6213_v22  ;;  %v6512_v59 = vadd.f32 %v29912_v3, %v6469_v54  ;;  %v6643_v38 = vadd.f32 %v29914_v12, %v6600_v2  ;;  %v509_v52 = vld [vmem:[%s26446_s3 + $0x40] sm:$0xff] }
 0x444   : > { %7249 = vmatprep.subr.mxu0 %v6639_v14  ;;  %v6641_v0 = vadd.f32 %v29916_v53, %v6598_v13  ;;  %v27390_v14 = vpop.f32.mrf.mxu1  ;;  %v1542_v17 = vrot.slane %v1452_v41, %v26444_v32  ;;  %v1460_v23 = vrot.slane %v509_v52, %v26451_v35  ;;  %v500_v43 = vld [vmem:[%s482_s11] sm:$0x3] }
 0x445   : > { %v7043_v18 = vmul.f32 0.03608439, %v6256_v62  ;;  %v20557_v54 = vadd.f32 -1.0, %v500_v43 }
 0x446   : > { %7214 = vmatmul.mubr.f32.vlgmr.msra.gmra.mxu0 %v7034_v51  ;;  %v6808_v46 = vpop.f32.mrf.mxu1  ;;  %v1448_v51 = vrot.slane %v508_v39, %v26444_v32  ;;  %v1550_v42 = vrot.slane %v1460_v23, %v26444_v32 }
 0x447   : > { %7250 = vmatpush1.xpose.msra.mxu0 %v6637_v37  ;;  %7283 = vmatprep.mubr.f32.mxu0 %v7037_v44  ;;  %v27397_v44 = vpop.f32.mrf.mxu0  ;;  %v7045_v3 = vmul.f32 1e+09, %v20557_v54 }
 0x448   : > { %7319 = vmatprep.subr.mxu0 %v6385_v56  ;;  %v6810_v9 = vpop.f32.mrf.mxu1  ;;  %v1538_v26 = vrot.slane %v1448_v51, %v26444_v32 }
 0x449   : > { %v6811_v8 = vadd.f32 %v6810_v9, %v1542_v17 }
 0x44a   : > { %7284 = vmatmul.mubr.f32.vlgmr.msra.gmra.mxu0 %v7036_v24  ;;  %v6812_v15 = vpop.f32.mrf.mxu1  ;;  %v6809_v11 = vadd.f32 %v6808_v46, %v1538_v26 }
 0x44b   : > { %7320 = vmatpush1.xpose.msra.mxu0 %v6383_v48  ;;  %7353 = vmatprep.mubr.f32.mxu0 %v7039_v63  ;;  %v6813_v37 = vadd.f32 %v6812_v15, %v1538_v26  ;;  %v1456_v48 = vrot.slane %v509_v52, %v26444_v32 }
 0x44c   : > { %7389 = vmatprep.subr.mxu0 %v6514_v10  ;;  %v6814_v58 = vpop.f32.mrf.mxu1  ;;  %v7048_v10 = vunpack.c.l.s4 %v25843_v55 }
 0x44d   : > { %v6815_v34 = vadd.f32 %v6814_v58, %v1542_v17  ;;  %v1546_v22 = vrot.slane %v1456_v48, %v26444_v32 }
 0x44e   : > { %7354 = vmatmul.mubr.f32.vlgmr.msra.gmra.mxu0 %v7038_v57  ;;  %v7049_v19 = vunpack.c.0.s8 %v7048_v10 }
 0x44f   : > { %7390 = vmatpush1.xpose.msra.mxu0 %v6512_v59  ;;  %7423 = vmatprep.mubr.f32.mxu0 %v7041_v31  ;;  %v29918_v59 = vld [vmem:[#allocation15_spill] sm:$0xff] }
 0x450   : > { %7459 = vmatprep.subr.mxu0 %v6643_v38  ;;  %v7052_v61 = vsub.s32 %v7049_v19, %v29918_v59 }
 0x452   : > { %7424 = vmatmul.mubr.f32.vlgmr.msra.gmra.mxu0 %v7040_v20 }
 0x453   : > { %7460 = vmatpush1.xpose.msra.mxu0 %v6641_v0  ;;  %7493 = vmatprep.mubr.f32.mxu0 %v7043_v18  ;;  %v7053_v0 = vrot.slane %v7045_v3, %v7052_v61 }
 0x455   : > { %v7061_v26 = vrot.slane %v7053_v0, %v7052_v61 }
 0x456   : > { %7494 = vmatmul.mubr.f32.vlgmr.msra.gmra.mxu0 %v7042_v1 }
 0x457   : > { %v7072_v58 = vrot.slane %v7061_v26, %v26444_v32  ;;  %v23428_v26 = vld [vmem:[%s26125_s2 + $0x330] ss:$24 sps:$4 sm:$0xff]  }
 0x47a   : > { %v6851_v4 = vpop.f32.mrf.mxu0 }
 0x47b   : > { %v6852_v6 = vadd.f32 %v6851_v4, %v6809_v11 }
 0x47c   : > { %v6853_v56 = vpop.f32.mrf.mxu0  ;;  %v6894_v5 = vpop.f32.mrf.mxu1 }
 0x47d   : > { %v6854_v45 = vadd.f32 %v6853_v56, %v6811_v8  ;;  %v27399_v33 = vadd.f32 %v6894_v5, %v6852_v6  ;;  %v7054_v6 = vcombine.high %v7053_v0, %v7053_v0  ;;  %v23410_v0 = vld [vmem:[%s26125_s2 + $0x3c0] ss:$24 sps:$4 sm:$0xff]  }
 0x47e   : > { %v6855_v29 = vpop.f32.mrf.mxu0  ;;  %v6896_v28 = vpop.f32.mrf.mxu1 }
 0x47f   : > { %v27401_v24 = vadd.f32 %v6855_v29, %v6813_v37  ;;  %v6897_v36 = vadd.f32 %v6896_v28, %v6854_v45  ;;  %v7068_v29 = vrot.slane %v7054_v6, %v7052_v61  ;;  %v23448_v6 = vld [vmem:[%s26125_s2 + $0x5a4] ss:$24 sps:$4 sm:$0xff]  }
 0x480   : > { %v6857_v16 = vpop.f32.mrf.mxu0  ;;  %v27405_v7 = vpop.f32.mrf.mxu1 }
 0x481   : > { %v27403_v63 = vadd.f32 %v6857_v16, %v6815_v34  ;;  %7626 = vmatprep.subr.mxu1 %v6897_v36  ;;  %v7076_v52 = vrot.slane %v7068_v29, %v26444_v32 }
 0x482   : > { %v27413_v49 = vpop.f32.mrf.mxu1 }
 0x4ba   : > { %v6937_v30 = vpop.f32.mrf.mxu0 }
 0x4bb   : > { %v6938_v27 = vadd.f32 %v6937_v30, %v1546_v22 }
 0x4bc   : > { %v6939_v40 = vpop.f32.mrf.mxu0  ;;  %v6980_v2 = vpop.f32.mrf.mxu1 }
 0x4bd   : > { %v6940_v62 = vadd.f32 %v6939_v40, %v1550_v42  ;;  %v6981_v12 = vadd.f32 %v6980_v2, %v6938_v27 }
 0x4be   : > { %v6941_v57 = vpop.f32.mrf.mxu0  ;;  %v6982_v31 = vpop.f32.mrf.mxu1 }
 0x4bf   : > { %v6942_v38 = vadd.f32 %v6941_v57, %v1546_v22  ;;  %v6983_v20 = vadd.f32 %v6982_v31, %v6940_v62 }
 0x4c0   : > { %v6943_v13 = vpop.f32.mrf.mxu0  ;;  %v6984_v35 = vpop.f32.mrf.mxu1 }
 0x4c1   : > { %v6944_v18 = vadd.f32 %v6943_v13, %v1550_v42  ;;  %v6985_v39 = vadd.f32 %v6984_v35, %v6942_v38  ;;  %v25844_v13 = vmov 0.0   ;;  %v23392_v35 = vld [vmem:[%s26125_s2 + $0x450] ss:$24 sps:$4 sm:$0xff]   ;;  %v23398_v38 = vld [vmem:[%s26125_s2 + $0x420] ss:$24 sps:$4 sm:$0xff]  }
 0x4c2   : > { %v6986_v21 = vpop.f32.mrf.mxu1  ;;  %7589 = vmatprep.mubr.f32.mxu1 %v25844_v13 }
 0x4c3   : > { %v6987_v9 = vadd.f32 %v6986_v21, %v6944_v18  ;;  %v23406_v18 = vld [vmem:[%s26125_s2 + $0x3f4] ss:$24 sps:$4 sm:$0xff]   ;;  %v23412_v21 = vld [vmem:[%s26125_s2 + $0x3c4] ss:$24 sps:$4 sm:$0xff]  }
 0x4fa   : > { %v7023_v50 = vpop.f32.mrf.mxu0 }
 0x4fb   : > { %v27419_v53 = vadd.f32 %v7023_v50, %v6981_v12  ;;  %v23394_v12 = vld [vmem:[%s26125_s2 + $0x454] ss:$24 sps:$4 sm:$0xff]   ;;  %v23400_v50 = vld [vmem:[%s26125_s2 + $0x424] ss:$24 sps:$4 sm:$0xff]  }
 0x4fc   : > { %v7025_v1 = vpop.f32.mrf.mxu0  ;;  %9785 = vmatprep.subr.bf16.mxu0 %v23394_v12  ;;  %v23466_v12 = vld [vmem:[%s26125_s2 + $0x514] ss:$24 sps:$4 sm:$0xff]  }
 0x4fd   : > { %v27421_v46 = vadd.f32 %v7025_v1, %v6983_v20  ;;  %9786 = vmatpush1.bf16.msra.mxu0 %v23392_v35  ;;  %v23404_v20 = vld [vmem:[%s26125_s2 + $0x3f0] ss:$24 sps:$4 sm:$0xff]   ;;  %v23461_v35 = vld [vmem:[%s26125_s2 + $0x1e0] ss:$24 sps:$4 sm:$0xff]  }
 0x4fe   : > { %v7027_v51 = vpop.f32.mrf.mxu0  ;;  %9787 = vmatprep.subr.bf16.mxu0 %v23400_v50  ;;  %v23416_v1 = vld [vmem:[%s26125_s2 + $0x390] ss:$24 sps:$4 sm:$0xff]   ;;  %v23470_v50 = vld [vmem:[%s26125_s2 + $0x4e0] ss:$24 sps:$4 sm:$0xff]  }
 0x4ff   : > { %v27423_v41 = vadd.f32 %v7027_v51, %v6985_v39  ;;  %v23418_v39 = vld [vmem:[%s26125_s2 + $0x394] ss:$24 sps:$4 sm:$0xff]   ;;  %v23422_v51 = vld [vmem:[%s26125_s2 + $0x360] ss:$24 sps:$4 sm:$0xff]  }
 0x500   : > { %v7029_v15 = vpop.f32.mrf.mxu0 }
 0x501   : > { %v27425_v17 = vadd.f32 %v7029_v15, %v6987_v9  ;;  %9788 = vmatpush1.bf16.msra.mxu0 %v23398_v38  ;;  %v23424_v9 = vld [vmem:[%s26125_s2 + $0x364] ss:$24 sps:$4 sm:$0xff]   ;;  %v23430_v15 = vld [vmem:[%s26125_s2 + $0x334] ss:$24 sps:$4 sm:$0xff]  }
 0x502   : > { %v7145_v11 = vpop.f32.mrf.mxu0  ;;  %9789 = vmatprep.subr.bf16.mxu0 %v23406_v18  ;;  %v23469_v38 = vld [vmem:[%s26125_s2 + $0x1b4] ss:$24 sps:$4 sm:$0xff]   ;;  %v23472_v18 = vld [vmem:[%s26125_s2 + $0x4e4] ss:$24 sps:$4 sm:$0xff]  }
 0x503   : > { %v7146_v37 = vadd.f32 %v7145_v11, %v7072_v58  ;;  %v23434_v11 = vld [vmem:[%s26125_s2 + $0x300] ss:$24 sps:$4 sm:$0xff]   ;;  %v23436_v58 = vld [vmem:[%s26125_s2 + $0x304] ss:$24 sps:$4 sm:$0xff]  }
 0x504   : > { %v7147_v8 = vpop.f32.mrf.mxu0 }
 0x505   : > { %9790 = vmatpush1.bf16.msra.mxu0 %v23404_v20  ;;  %v23440_v8 = vld [vmem:[%s26125_s2 + $0x5d0] ss:$24 sps:$4 sm:$0xff]  }
 0x506   : > { %v7215_v4 = vpop.f32.mrf.mxu0  ;;  %9791 = vmatprep.subr.bf16.mxu0 %v23412_v21  ;;  %v23467_v20 = vld [vmem:[%s26125_s2 + $0x1b0] ss:$24 sps:$4 sm:$0xff]   ;;  %v23478_v21 = vld [vmem:[%s26125_s2 + $0x4b4] ss:$24 sps:$4 sm:$0xff]  }
 0x507   : > { %v7216_v5 = vadd.f32 %v7215_v4, %v7146_v37  ;;  %v23442_v4 = vld [vmem:[%s26125_s2 + $0x5d4] ss:$24 sps:$4 sm:$0xff]   ;;  %v23446_v37 = vld [vmem:[%s26125_s2 + $0x5a0] ss:$24 sps:$4 sm:$0xff]  }
 0x508   : > { %v7217_v56 = vpop.f32.mrf.mxu0 }
 0x509   : > { %9792 = vmatpush1.bf16.msra.mxu0 %v23410_v0  ;;  %v23452_v56 = vld [vmem:[%s26125_s2 + $0x570] ss:$24 sps:$4 sm:$0xff]   ;;  %v23475_v0 = vld [vmem:[%s26125_s2 + $0x184] ss:$24 sps:$4 sm:$0xff]  }
 0x50a   : > { %v7285_v34 = vpop.f32.mrf.mxu0  ;;  %9793 = vmatprep.subr.bf16.mxu0 %v23418_v39  ;;  %v23476_v39 = vld [vmem:[%s26125_s2 + $0x4b0] ss:$24 sps:$4 sm:$0xff]  }
 0x50b   : > { %v7286_v45 = vadd.f32 %v7285_v34, %v7216_v5  ;;  %v23454_v5 = vld [vmem:[%s26125_s2 + $0x574] ss:$24 sps:$4 sm:$0xff]  }
 0x50c   : > { %v7287_v28 = vpop.f32.mrf.mxu0 }
 0x50d   : > { %v7500_v36 = vsel %vm7499_vm0, %v7286_v45, -inf  ;;  %9794 = vmatpush1.bf16.msra.mxu0 %v23416_v1  ;;  %v6686_v28 = vadd.f32 %v27316_v60, %v27297_v25  ;;  %v6901_v25 = vadd.f32 %v27413_v49, %v27403_v63  ;;  %v23389_v63 = vld [vmem:[%s26125_s2 + $0x120] ss:$24 sps:$4 sm:$0xff]   ;;  %v23395_v49 = vld [vmem:[%s26125_s2 + $0xf0] ss:$24 sps:$4 sm:$0xff]  }
 0x50e   : > { %v7355_v16 = vpop.f32.mrf.mxu0  ;;  %7501 = vmax.xlane.f32.xlu0 %v7500_v36  ;;  %9795 = vmatprep.subr.bf16.mxu0 %v23424_v9  ;;  %v23473_v1 = vld [vmem:[%s26125_s2 + $0x180] ss:$24 sps:$4 sm:$0xff]   ;;  %v23484_v9 = vld [vmem:[%s26125_s2 + $0x754] ss:$24 sps:$4 sm:$0xff]  }
 0x50f   : > { %v7356_v23 = vadd.f32 %v7355_v16, %v7076_v52  ;;  %v6729_v16 = vadd.f32 %v27390_v14, %v6686_v28 }
 0x510   : > { %v7357_v30 = vpop.f32.mrf.mxu0 }
 0x511   : > { %9796 = vmatpush1.bf16.msra.mxu0 %v23422_v51  ;;  %v6772_v52 = vadd.f32 %v27397_v44, %v6729_v16  ;;  %v6899_v44 = vadd.f32 %v27405_v7, %v27401_v24  ;;  %v23391_v24 = vld [vmem:[%s26125_s2 + $0x124] ss:$24 sps:$4 sm:$0xff]   ;;  %v23397_v7 = vld [vmem:[%s26125_s2 + $0xf4] ss:$24 sps:$4 sm:$0xff]  }
 0x512   : > { %v7425_v48 = vpop.f32.mrf.mxu0  ;;  %9797 = vmatprep.subr.bf16.mxu0 %v23430_v15  ;;  %v23415_v30 = vld [vmem:[%s26125_s2 + $0x64] ss:$24 sps:$4 sm:$0xff]  }
 0x513   : > { %v7426_v10 = vadd.f32 %v7425_v48, %v7356_v23  ;;  %v23413_v48 = vld [vmem:[%s26125_s2 + $0x60] ss:$24 sps:$4 sm:$0xff]   ;;  %v23421_v23 = vld [vmem:[%s26125_s2 + $0x34] ss:$24 sps:$4 sm:$0xff]   ;;  %v23481_v51 = vld [vmem:[%s26125_s2 + $0x484] ss:$24 sps:$4 sm:$0xff]  }
 0x514   : > { %v7427_v55 = vpop.f32.mrf.mxu0  ;;  %v23490_v15 = vld [vmem:[%s26125_s2 + $0x15c] ss:$24 sps:$4 sm:$0xff]  }
 0x515   : > { %9798 = vmatpush1.bf16.msra.mxu0 %v23428_v26  ;;  %v23419_v55 = vld [vmem:[%s26125_s2 + $0x30] ss:$24 sps:$4 sm:$0xff]   ;;  %v23479_v26 = vld [vmem:[%s26125_s2 + $0x480] ss:$24 sps:$4 sm:$0xff]  }
 0x516   : > { %v7495_v40 = vpop.f32.mrf.mxu0  ;;  %9799 = vmatprep.subr.bf16.mxu0 %v23436_v58 }
 0x517   : > { %v7496_v2 = vadd.f32 %v7495_v40, %v7426_v10  ;;  %v23427_v10 = vld [vmem:[%s26125_s2 + $0x4] ss:$24 sps:$4 sm:$0xff]   ;;  %v23425_v40 = vld [vmem:[%s26125_s2] ss:$24 sps:$4 sm:$0xff]  }
 0x518   : > { %v7497_v43 = vpop.f32.mrf.mxu0 }
 0x519   : > { %v7503_v22 = vsel %vm7499_vm0, %v7496_v2, -inf  ;;  %9800 = vmatpush1.bf16.msra.mxu0 %v23434_v11  ;;  %v23431_v43 = vld [vmem:[%s26125_s2 + $0x2d0] ss:$24 sps:$4 sm:$0xff]  }
 0x51a   : > { %7504 = vmax.xlane.f32.xlu0 %v7503_v22  ;;  %9801 = vmatprep.subr.bf16.mxu0 %v23442_v4  ;;  %v23439_v22 = vld [vmem:[%s26125_s2 + $0x2a4] ss:$24 sps:$4 sm:$0xff]  }
 0x51d   : > { %9802 = vmatpush2.bf16.msra.mxu0 %v23440_v8 }
 0x51e   : > { %9803 = vmatprep.subr.bf16.mxu0 %v23448_v6 }
 0x521   : > { %9804 = vmatpush2.bf16.msra.mxu0 %v23446_v37 }
 0x522   : > { %9805 = vmatprep.subr.bf16.mxu0 %v23454_v5 }
 0x525   : > { %9806 = vmatpush2.bf16.msra.mxu0 %v23452_v56 }
 0x597   : > { %v7502_v42 = vpop.xlane.xlu0 %7501 }
 0x598   : > { %v7506_v54 = vsub.f32 %v7286_v45, %v7502_v42  ;;  %v23437_v42 = vld [vmem:[%s26125_s2 + $0x2a0] ss:$24 sps:$4 sm:$0xff]  }
 0x59a   : > { %v7508_v19 = vmul.f32 1.442695, %v7506_v54  ;;  %v23445_v54 = vld [vmem:[%s26125_s2 + $0x274] ss:$24 sps:$4 sm:$0xff]  }
 0x59c   : > { %25546 = vpow2.f32 %v7508_v19  ;;  %v23443_v19 = vld [vmem:[%s26125_s2 + $0x270] ss:$24 sps:$4 sm:$0xff]  }
 0x5a3   : > { %v7505_v57 = vpop.xlane.xlu0 %7504 }
 0x5a4   : > { %v7507_v32 = vsub.f32 %v7496_v2, %v7505_v57  ;;  %v23433_v2 = vld [vmem:[%s26125_s2 + $0x2d4] ss:$24 sps:$4 sm:$0xff]   ;;  %v23451_v57 = vld [vmem:[%s26125_s2 + $0x244] ss:$24 sps:$4 sm:$0xff]  }
 0x5a6   : > { %v7510_v31 = vmul.f32 1.442695, %v7507_v32  ;;  %v23449_v32 = vld [vmem:[%s26125_s2 + $0x240] ss:$24 sps:$4 sm:$0xff]  }
 0x5a8   : > { %25548 = vpow2.f32 %v7510_v31  ;;  %v23457_v31 = vld [vmem:[%s26125_s2 + $0x214] ss:$24 sps:$4 sm:$0xff]  }
 0x5a9   : > { %v25547_v27 = vpop.eup %25546 }
 0x5aa   : > { %v7512_v62 = vsel %vm7499_vm0, %v25547_v27, 0.0 }
 0x5ab   : > { %7513 = vadd.xlane.f32.xlu1 %v7512_v62  ;;  %v23455_v62 = vld [vmem:[%s26125_s2 + $0x210] ss:$24 sps:$4 sm:$0xff]  }
 0x5b5   : > { %v27432_v3 = vpop.eup %25548 }
 0x5b6   : > { %v7515_v61 = vsel %vm7499_vm0, %v27432_v3, 0.0 }
 0x5b7   : > { %7516 = vadd.xlane.f32.xlu1 %v7515_v61  ;;  %v23463_v61 = vld [vmem:[%s26125_s2 + $0x1e4] ss:$24 sps:$4 sm:$0xff]  }
 0x634   : > { %v7514_v34 = vpop.xlane.xlu1 %7513 }
 0x635   : > { %25550 = vrcp.f32 %v7514_v34 }
 0x640   : > { %v7517_v45 = vpop.xlane.xlu1 %7516 }
 0x641   : > { %25552 = vrcp.f32 %v7517_v45  ;;  %v23482_v45 = vld [vmem:[%s26125_s2 + $0x750] ss:$24 sps:$4 sm:$0xff]  }
 0x642   : > { %v25551_v29 = vpop.eup %25550 }
 0x643   : > { %v7519_v36 = vmul.f32 %v25551_v29, %v25547_v27  ;;  %v23458_v27 = vld [vmem:[%s26125_s2 + $0x540] ss:$24 sps:$4 sm:$0xff]  }
 0x645   : > { %20558 = vmatmul.mubr.msk.f32.vlgmr.msra.gmra.mxu1 %vm7499_vm0, %v7519_v36 }
 0x646   : > { %7627 = vmatpush1.msra.mxu1 %v27399_v33  ;;  %7660 = vmatprep.mubr.f32.mxu1 %v25844_v13  ;;  %v23386_v33 = vld [vmem:[%s26125_s2 + $0x150] ss:$24 sps:$4 sm:$0xff]  }
 0x647   : > { %7697 = vmatprep.subr.mxu1 %v27421_v46  ;;  %v23401_v46 = vld [vmem:[%s26125_s2 + $0xc0] ss:$24 sps:$4 sm:$0xff]  }
 0x649   : > { %20559 = vmatmul.mubr.msk.f32.vlgmr.msra.gmra.mxu1 %vm7499_vm0, %v7519_v36 }
 0x64a   : > { %7698 = vmatpush1.msra.mxu1 %v27419_v53  ;;  %7731 = vmatprep.mubr.f32.mxu1 %v25844_v13  ;;  %v23403_v53 = vld [vmem:[%s26125_s2 + $0xc4] ss:$24 sps:$4 sm:$0xff]  }
 0x64b   : > { %7771 = vmatprep.subr.mxu1 %v6772_v52 }
 0x64d   : > { %20560 = vmatmul.mubr.msk.f32.vlgmr.msra.gmra.mxu1 %vm7499_vm0, %v7519_v36  ;;  %v23487_v36 = vld [vmem:[%s26125_s2 + $0x724] ss:$24 sps:$4 sm:$0xff]  }
 0x64e   : > { %v25553_v60 = vpop.eup %25552  ;;  %7772 = vmatpush1.msra.mxu1 %v27346_v47  ;;  %7805 = vmatprep.mubr.f32.mxu1 %v25844_v13  ;;  %v23388_v47 = vld [vmem:[%s26125_s2 + $0x154] ss:$24 sps:$4 sm:$0xff]  }
 0x64f   : > { %7842 = vmatprep.subr.mxu1 %v6901_v25  ;;  %v7521_v14 = vmul.f32 %v25553_v60, %v27432_v3  ;;  %v23460_v3 = vld [vmem:[%s26125_s2 + $0x544] ss:$24 sps:$4 sm:$0xff]   ;;  %v23485_v25 = vld [vmem:[%s26125_s2 + $0x720] ss:$24 sps:$4 sm:$0xff]  }
 0x650   : > { %9807 = vmatprep.subr.bf16.mxu0 %v23460_v3  ;;  %v23488_v60 = vld [vmem:[%s26125_s2 + $0x158] ss:$24 sps:$4 sm:$0xff]   ;;  %v23532_v3 = vld [vmem:[%s26125_s2 + $0xc] ss:$24 sps:$4 sm:$0xff]  }
 0x651   : > { %20561 = vmatmul.mubr.msk.f32.vlgmr.msra.gmra.mxu1 %vm7499_vm0, %v7521_v14  ;;  %9808 = vmatpush2.bf16.msra.mxu0 %v23458_v27  ;;  %v23524_v27 = vld [vmem:[%s26125_s2 + $0x38] ss:$24 sps:$4 sm:$0xff]  }
 0x652   : > { %7843 = vmatpush1.msra.mxu1 %v6899_v44  ;;  %7876 = vmatprep.mubr.f32.mxu1 %v25844_v13 }
 0x653   : > { %7913 = vmatprep.subr.mxu1 %v27425_v17  ;;  %v23407_v17 = vld [vmem:[%s26125_s2 + $0x90] ss:$24 sps:$4 sm:$0xff]   ;;  %9809 = vmatprep.subr.bf16.mxu0 %v23466_v12  ;;  %v23538_v12 = vld [vmem:[%s26125_s2 + $0x2dc] ss:$24 sps:$4 sm:$0xff]  }
 0x655   : > { %20562 = vmatmul.mubr.msk.f32.vlgmr.msra.gmra.mxu1 %vm7499_vm0, %v7521_v14 }
 0x656   : > { %7914 = vmatpush1.msra.mxu1 %v27423_v41  ;;  %7947 = vmatprep.mubr.f32.mxu1 %v25844_v13  ;;  %v23409_v41 = vld [vmem:[%s26125_s2 + $0x94] ss:$24 sps:$4 sm:$0xff]   ;;  %v23464_v13 = vld [vmem:[%s26125_s2 + $0x510] ss:$24 sps:$4 sm:$0xff]  }
 0x657   : > { %9742 = vmatprep.subr.bf16.mxu1 %v23388_v47  ;;  %9810 = vmatpush2.bf16.msra.mxu0 %v23464_v13  ;;  %v23493_v47 = vld [vmem:[%s26125_s2 + $0x6f4] ss:$24 sps:$4 sm:$0xff]   ;;  %v23530_v13 = vld [vmem:[%s26125_s2 + $0x8] ss:$24 sps:$4 sm:$0xff]  }
 0x658   : > { %9811 = vmatprep.subr.bf16.mxu0 %v23472_v18  ;;  %v23544_v18 = vld [vmem:[%s26125_s2 + $0x2ac] ss:$24 sps:$4 sm:$0xff]  }
 0x659   : > { %20563 = vmatmul.mubr.msk.f32.vlgmr.msra.gmra.mxu1 %vm7499_vm0, %v7521_v14 }
 0x65a   : > { %9743 = vmatpush1.bf16.msra.mxu1 %v23386_v33  ;;  %v23496_v33 = vld [vmem:[%s26125_s2 + $0x12c] ss:$24 sps:$4 sm:$0xff]  }
 0x65b   : > { %9744 = vmatprep.subr.bf16.mxu1 %v23391_v24  ;;  %9812 = vmatpush2.bf16.msra.mxu0 %v23470_v50  ;;  %v23536_v50 = vld [vmem:[%s26125_s2 + $0x2d8] ss:$24 sps:$4 sm:$0xff]  }
 0x65c   : > { %9813 = vmatprep.subr.bf16.mxu0 %v23478_v21  ;;  %v23542_v21 = vld [vmem:[%s26125_s2 + $0x2a8] ss:$24 sps:$4 sm:$0xff]  }
 0x65e   : > { %9745 = vmatpush1.bf16.msra.mxu1 %v23389_v63 }
 0x65f   : > { %9746 = vmatprep.subr.bf16.mxu1 %v23397_v7  ;;  %9814 = vmatpush2.bf16.msra.mxu0 %v23476_v39  ;;  %v23491_v7 = vld [vmem:[%s26125_s2 + $0x6f0] ss:$24 sps:$4 sm:$0xff]   ;;  %v23550_v39 = vld [vmem:[%s26125_s2 + $0x27c] ss:$24 sps:$4 sm:$0xff]  }
 0x660   : > { %9815 = vmatprep.subr.bf16.mxu0 %v23481_v51  ;;  %v23545_v51 = vld [vmem:[%s26125_s2 + $0x840] ss:$24 sps:$4 sm:$0xff]  }
 0x662   : > { %9747 = vmatpush1.bf16.msra.mxu1 %v23395_v49  ;;  %v23494_v49 = vld [vmem:[%s26125_s2 + $0x128] ss:$24 sps:$4 sm:$0xff]  }
 0x663   : > { %9748 = vmatprep.subr.bf16.mxu1 %v23403_v53  ;;  %9816 = vmatpush2.bf16.msra.mxu0 %v23479_v26  ;;  %v23499_v53 = vld [vmem:[%s26125_s2 + $0x6c4] ss:$24 sps:$4 sm:$0xff]   ;;  %v23553_v26 = vld [vmem:[%s26125_s2 + $0x814] ss:$24 sps:$4 sm:$0xff]  }
 0x664   : > { %9871 = vmatprep.subr.bf16.mxu0 %v23490_v15  ;;  %v23556_v15 = vld [vmem:[%s26125_s2 + $0x24c] ss:$24 sps:$4 sm:$0xff]  }
 0x666   : > { %9749 = vmatpush1.bf16.msra.mxu1 %v23401_v46  ;;  %v23502_v46 = vld [vmem:[%s26125_s2 + $0xfc] ss:$24 sps:$4 sm:$0xff]  }
 0x667   : > { %9750 = vmatprep.subr.bf16.mxu1 %v23409_v41  ;;  %v23497_v41 = vld [vmem:[%s26125_s2 + $0x6c0] ss:$24 sps:$4 sm:$0xff]  }
 0x66a   : > { %9751 = vmatpush1.bf16.msra.mxu1 %v23407_v17  ;;  %v23500_v17 = vld [vmem:[%s26125_s2 + $0xf8] ss:$24 sps:$4 sm:$0xff]  }
 0x66b   : > { %9752 = vmatprep.subr.bf16.mxu1 %v23415_v30  ;;  %v23505_v30 = vld [vmem:[%s26125_s2 + $0x694] ss:$24 sps:$4 sm:$0xff]  }
 0x66e   : > { %9753 = vmatpush1.bf16.msra.mxu1 %v23413_v48  ;;  %v23508_v48 = vld [vmem:[%s26125_s2 + $0xcc] ss:$24 sps:$4 sm:$0xff]  }
 0x66f   : > { %9754 = vmatprep.subr.bf16.mxu1 %v23421_v23  ;;  %v23503_v23 = vld [vmem:[%s26125_s2 + $0x690] ss:$24 sps:$4 sm:$0xff]  }
 0x672   : > { %9755 = vmatpush1.bf16.msra.mxu1 %v23419_v55  ;;  %v23506_v55 = vld [vmem:[%s26125_s2 + $0xc8] ss:$24 sps:$4 sm:$0xff]  }
 0x673   : > { %9756 = vmatprep.subr.bf16.mxu1 %v23427_v10  ;;  %v23511_v10 = vld [vmem:[%s26125_s2 + $0x664] ss:$24 sps:$4 sm:$0xff]  }
 0x676   : > { %9757 = vmatpush1.bf16.msra.mxu1 %v23425_v40  ;;  %v23514_v40 = vld [vmem:[%s26125_s2 + $0x9c] ss:$24 sps:$4 sm:$0xff]  }
 0x677   : > { %9758 = vmatprep.subr.bf16.mxu1 %v23433_v2  ;;  %v23509_v2 = vld [vmem:[%s26125_s2 + $0x660] ss:$24 sps:$4 sm:$0xff]  }
 0x67a   : > { %9759 = vmatpush2.bf16.msra.mxu1 %v23431_v43  ;;  %v23512_v43 = vld [vmem:[%s26125_s2 + $0x98] ss:$24 sps:$4 sm:$0xff]  }
 0x67b   : > { %9760 = vmatprep.subr.bf16.mxu1 %v23439_v22  ;;  %v23517_v22 = vld [vmem:[%s26125_s2 + $0x634] ss:$24 sps:$4 sm:$0xff]  }
 0x67e   : > { %9761 = vmatpush2.bf16.msra.mxu1 %v23437_v42  ;;  %v23520_v42 = vld [vmem:[%s26125_s2 + $0x6c] ss:$24 sps:$4 sm:$0xff]  }
 0x67f   : > { %9762 = vmatprep.subr.bf16.mxu1 %v23445_v54  ;;  %v23515_v54 = vld [vmem:[%s26125_s2 + $0x630] ss:$24 sps:$4 sm:$0xff]  }
 0x682   : > { %9763 = vmatpush2.bf16.msra.mxu1 %v23443_v19  ;;  %v23518_v19 = vld [vmem:[%s26125_s2 + $0x68] ss:$24 sps:$4 sm:$0xff]  }
 0x683   : > { %9764 = vmatprep.subr.bf16.mxu1 %v23451_v57  ;;  %v23523_v57 = vld [vmem:[%s26125_s2 + $0x604] ss:$24 sps:$4 sm:$0xff]  }
 0x686   : > { %9765 = vmatpush2.bf16.msra.mxu1 %v23449_v32  ;;  %v23526_v32 = vld [vmem:[%s26125_s2 + $0x3c] ss:$24 sps:$4 sm:$0xff]  }
 0x687   : > { %9766 = vmatprep.subr.bf16.mxu1 %v23457_v31  ;;  %v23521_v31 = vld [vmem:[%s26125_s2 + $0x600] ss:$24 sps:$4 sm:$0xff]  }
 0x68a   : > { %9767 = vmatpush2.bf16.msra.mxu1 %v23455_v62  ;;  %v23529_v62 = vld [vmem:[%s26125_s2 + $0x8d4] ss:$24 sps:$4 sm:$0xff]  }
 0x68b   : > { %9768 = vmatprep.subr.bf16.mxu1 %v23463_v61  ;;  %v23527_v61 = vld [vmem:[%s26125_s2 + $0x8d0] ss:$24 sps:$4 sm:$0xff]  }
 0x68e   : > { %9769 = vmatpush2.bf16.msra.mxu1 %v23461_v35  ;;  %v23535_v35 = vld [vmem:[%s26125_s2 + $0x8a4] ss:$24 sps:$4 sm:$0xff]  }
 0x68f   : > { %9770 = vmatprep.subr.bf16.mxu1 %v23469_v38  ;;  %v23533_v38 = vld [vmem:[%s26125_s2 + $0x8a0] ss:$24 sps:$4 sm:$0xff]  }
 0x692   : > { %9771 = vmatpush2.bf16.msra.mxu1 %v23467_v20  ;;  %v23541_v20 = vld [vmem:[%s26125_s2 + $0x874] ss:$24 sps:$4 sm:$0xff]  }
 0x693   : > { %9772 = vmatprep.subr.bf16.mxu1 %v23475_v0  ;;  %v23539_v0 = vld [vmem:[%s26125_s2 + $0x870] ss:$24 sps:$4 sm:$0xff]  }
 0x696   : > { %9773 = vmatpush2.bf16.msra.mxu1 %v23473_v1  ;;  %v23547_v1 = vld [vmem:[%s26125_s2 + $0x844] ss:$24 sps:$4 sm:$0xff]  }
 0x697   : > { %9828 = vmatprep.subr.bf16.mxu1 %v23484_v9  ;;  %v23548_v9 = vld [vmem:[%s26125_s2 + $0x278] ss:$24 sps:$4 sm:$0xff]  }
 0x705   : > { %v7591_v11 = vpop.f32.mrf.mxu1 }
 0x707   : > { %v7593_v58 = vpop.f32.mrf.mxu1 }
 0x709   : > { %v7662_v8 = vpop.f32.mrf.mxu1 }
 0x70b   : > { %v7664_v4 = vpop.f32.mrf.mxu1 }
 0x70d   : > { %v27529_v37 = vpop.f32.mrf.mxu1 }
 0x70f   : > { %v7735_v6 = vpop.f32.mrf.mxu1 }
 0x711   : > { %v7807_v56 = vpop.f32.mrf.mxu1 }
 0x712   : > { %v27534_v29 = vpack.c.bf16 %v7807_v56, %v7591_v11  ;;  %v23551_v11 = vld [vmem:[%s26125_s2 + $0x810] ss:$24 sps:$4 sm:$0xff]  }
 0x713   : > { %v7809_v5 = vpop.f32.mrf.mxu1  ;;  %v23560_v56 = vld [vmem:[%s26125_s2 + $0x218] ss:$24 sps:$4 sm:$0xff]  }
 0x714   : > { %v27531_v34 = vpack.c.bf16 %v7809_v5, %v7593_v58  ;;  %v23554_v58 = vld [vmem:[%s26125_s2 + $0x248] ss:$24 sps:$4 sm:$0xff]   ;;  %v23565_v5 = vld [vmem:[%s26125_s2 + $0x7b4] ss:$24 sps:$4 sm:$0xff]  }
 0x715   : > { %v7878_v28 = vpop.f32.mrf.mxu1 }
 0x716   : > { %9774 = vmatprep.mubr.bf16.mxu1 %v27531_v34  ;;  %v27543_v14 = vpack.c.bf16 %v7878_v28, %v7662_v8  ;;  %v23559_v8 = vld [vmem:[%s26125_s2 + $0x7e4] ss:$24 sps:$4 sm:$0xff]   ;;  %v23563_v28 = vld [vmem:[%s26125_s2 + $0x7b0] ss:$24 sps:$4 sm:$0xff]  }
 0x717   : > { %v7880_v16 = vpop.f32.mrf.mxu1  ;;  %9775 = vmatmul.mubr.bf16.vlgmr.msra.gmra.mxu1 %v27534_v29 }
 0x718   : > { %v27539_v52 = vpack.c.bf16 %v7880_v16, %v7664_v4  ;;  %9829 = vmatpush1.bf16.msra.mxu1 %v23482_v45  ;;  %v23562_v4 = vld [vmem:[%s26125_s2 + $0x21c] ss:$24 sps:$4 sm:$0xff]   ;;  %v23568_v45 = vld [vmem:[%s26125_s2 + $0x1ec] ss:$24 sps:$4 sm:$0xff]  }
 0x719   : > { %v27545_v44 = vpop.f32.mrf.mxu1  ;;  %9830 = vmatprep.subr.bf16.mxu1 %v23487_v36  ;;  %v23566_v36 = vld [vmem:[%s26125_s2 + $0x1e8] ss:$24 sps:$4 sm:$0xff]   ;;  %v23571_v16 = vld [vmem:[%s26125_s2 + $0x784] ss:$24 sps:$4 sm:$0xff]  }
 0x71a   : > { %9817 = vmatprep.mubr.bf16.mxu0 %v27539_v52 }
 0x71b   : > { %v7951_v24 = vpop.f32.mrf.mxu1  ;;  %9818 = vmatmul.mubr.bf16.vlgmr.msra.gmra.mxu0 %v27543_v14 }
 0x71c   : > { %v27551_v63 = vpack.c.bf16 %v7951_v24, %v7735_v6  ;;  %9831 = vmatpush1.bf16.msra.mxu1 %v23485_v25  ;;  %9872 = vmatpush1.bf16.msra.mxu0 %v23488_v60  ;;  %v23557_v6 = vld [vmem:[%s26125_s2 + $0x7e0] ss:$24 sps:$4 sm:$0xff]   ;;  %v23574_v25 = vld [vmem:[%s26125_s2 + $0x1bc] ss:$24 sps:$4 sm:$0xff]  }
 0x71d   : > { %9903 = vmatprep.mubr.bf16.mxu0 %v27531_v34  ;;  %9832 = vmatprep.subr.bf16.mxu1 %v23493_v47  ;;  %v23569_v60 = vld [vmem:[%s26125_s2 + $0x780] ss:$24 sps:$4 sm:$0xff]   ;;  %v23580_v24 = vld [vmem:[%s26125_s2 + $0x45c] ss:$24 sps:$4 sm:$0xff]  }
 0x71e   : > { %9860 = vmatprep.mubr.bf16.mxu1 %v27551_v63  ;;  %9873 = vmatprep.subr.bf16.mxu0 %v23496_v33  ;;  %v23572_v47 = vld [vmem:[%s26125_s2 + $0x1b8] ss:$24 sps:$4 sm:$0xff]   ;;  %v23577_v33 = vld [vmem:[%s26125_s2 + $0x18c] ss:$24 sps:$4 sm:$0xff]  }
 0x720   : > { %9833 = vmatpush1.bf16.msra.mxu1 %v23491_v7  ;;  %9874 = vmatpush1.bf16.msra.mxu0 %v23494_v49  ;;  %v23575_v7 = vld [vmem:[%s26125_s2 + $0x188] ss:$24 sps:$4 sm:$0xff]   ;;  %v23578_v49 = vld [vmem:[%s26125_s2 + $0x458] ss:$24 sps:$4 sm:$0xff]  }
 0x721   : > { %9834 = vmatprep.subr.bf16.mxu1 %v23499_v53  ;;  %9875 = vmatprep.subr.bf16.mxu0 %v23502_v46  ;;  %v27615_v53 = vpack.c.bf16 %v27545_v44, %v27529_v37  ;;  %v23583_v46 = vld [vmem:[%s26125_s2 + $0x42c] ss:$24 sps:$4 sm:$0xff]   ;;  %v23589_v37 = vld [vmem:[%s26125_s2 + $0x3fc] ss:$24 sps:$4 sm:$0xff]  }
 0x722   : > { %v23592_v44 = vld [vmem:[%s26125_s2 + $0x72c] ss:$24 sps:$4 sm:$0xff]  }
 0x724   : > { %9835 = vmatpush1.bf16.msra.mxu1 %v23497_v41  ;;  %9876 = vmatpush1.bf16.msra.mxu0 %v23500_v17  ;;  %v23586_v41 = vld [vmem:[%s26125_s2 + $0x75c] ss:$24 sps:$4 sm:$0xff]   ;;  %v23581_v17 = vld [vmem:[%s26125_s2 + $0x428] ss:$24 sps:$4 sm:$0xff]  }
 0x725   : > { %9836 = vmatprep.subr.bf16.mxu1 %v23505_v30  ;;  %9877 = vmatprep.subr.bf16.mxu0 %v23508_v48  ;;  %v23584_v30 = vld [vmem:[%s26125_s2 + $0x758] ss:$24 sps:$4 sm:$0xff]  }
 0x726   : > { %v23587_v48 = vld [vmem:[%s26125_s2 + $0x3f8] ss:$24 sps:$4 sm:$0xff]  }
 0x728   : > { %9837 = vmatpush1.bf16.msra.mxu1 %v23503_v23  ;;  %9878 = vmatpush1.bf16.msra.mxu0 %v23506_v55  ;;  %v23590_v23 = vld [vmem:[%s26125_s2 + $0x728] ss:$24 sps:$4 sm:$0xff]   ;;  %v23595_v55 = vld [vmem:[%s26125_s2 + $0x3cc] ss:$24 sps:$4 sm:$0xff]  }
 0x729   : > { %9838 = vmatprep.subr.bf16.mxu1 %v23511_v10  ;;  %9879 = vmatprep.subr.bf16.mxu0 %v23514_v40  ;;  %v23598_v10 = vld [vmem:[%s26125_s2 + $0x6fc] ss:$24 sps:$4 sm:$0xff]   ;;  %v23593_v40 = vld [vmem:[%s26125_s2 + $0x3c8] ss:$24 sps:$4 sm:$0xff]  }
 0x72c   : > { %9839 = vmatpush1.bf16.msra.mxu1 %v23509_v2  ;;  %9880 = vmatpush1.bf16.msra.mxu0 %v23512_v43  ;;  %v23596_v2 = vld [vmem:[%s26125_s2 + $0x6f8] ss:$24 sps:$4 sm:$0xff]   ;;  %v23601_v43 = vld [vmem:[%s26125_s2 + $0x39c] ss:$24 sps:$4 sm:$0xff]  }
 0x72d   : > { %9840 = vmatprep.subr.bf16.mxu1 %v23517_v22  ;;  %9881 = vmatprep.subr.bf16.mxu0 %v23520_v42  ;;  %v23604_v22 = vld [vmem:[%s26125_s2 + $0x6cc] ss:$24 sps:$4 sm:$0xff]   ;;  %v23599_v42 = vld [vmem:[%s26125_s2 + $0x398] ss:$24 sps:$4 sm:$0xff]  }
 0x730   : > { %9841 = vmatpush1.bf16.msra.mxu1 %v23515_v54  ;;  %9882 = vmatpush1.bf16.msra.mxu0 %v23518_v19  ;;  %v23602_v54 = vld [vmem:[%s26125_s2 + $0x6c8] ss:$24 sps:$4 sm:$0xff]   ;;  %v23607_v19 = vld [vmem:[%s26125_s2 + $0x36c] ss:$24 sps:$4 sm:$0xff]  }
 0x731   : > { %9842 = vmatprep.subr.bf16.mxu1 %v23523_v57  ;;  %9883 = vmatprep.subr.bf16.mxu0 %v23526_v32  ;;  %v23610_v57 = vld [vmem:[%s26125_s2 + $0x69c] ss:$24 sps:$4 sm:$0xff]   ;;  %v23605_v32 = vld [vmem:[%s26125_s2 + $0x368] ss:$24 sps:$4 sm:$0xff]  }
 0x734   : > { %9843 = vmatpush1.bf16.msra.mxu1 %v23521_v31  ;;  %9884 = vmatpush1.bf16.msra.mxu0 %v23524_v27  ;;  %v23608_v31 = vld [vmem:[%s26125_s2 + $0x698] ss:$24 sps:$4 sm:$0xff]   ;;  %v23613_v27 = vld [vmem:[%s26125_s2 + $0x33c] ss:$24 sps:$4 sm:$0xff]  }
 0x735   : > { %9844 = vmatprep.subr.bf16.mxu1 %v23529_v62  ;;  %9885 = vmatprep.subr.bf16.mxu0 %v23532_v3  ;;  %v23616_v62 = vld [vmem:[%s26125_s2 + $0x66c] ss:$24 sps:$4 sm:$0xff]   ;;  %v23611_v3 = vld [vmem:[%s26125_s2 + $0x338] ss:$24 sps:$4 sm:$0xff]  }
 0x738   : > { %9845 = vmatpush2.bf16.msra.mxu1 %v23527_v61  ;;  %9886 = vmatpush1.bf16.msra.mxu0 %v23530_v13  ;;  %v23614_v61 = vld [vmem:[%s26125_s2 + $0x668] ss:$24 sps:$4 sm:$0xff]   ;;  %v23619_v13 = vld [vmem:[%s26125_s2 + $0x30c] ss:$24 sps:$4 sm:$0xff]  }
 0x739   : > { %9846 = vmatprep.subr.bf16.mxu1 %v23535_v35  ;;  %9887 = vmatprep.subr.bf16.mxu0 %v23538_v12  ;;  %v23622_v35 = vld [vmem:[%s26125_s2 + $0x63c] ss:$24 sps:$4 sm:$0xff]   ;;  %v23617_v12 = vld [vmem:[%s26125_s2 + $0x308] ss:$24 sps:$4 sm:$0xff]  }
 0x73c   : > { %9847 = vmatpush2.bf16.msra.mxu1 %v23533_v38  ;;  %9888 = vmatpush2.bf16.msra.mxu0 %v23536_v50  ;;  %v23620_v38 = vld [vmem:[%s26125_s2 + $0x638] ss:$24 sps:$4 sm:$0xff]   ;;  %v23625_v50 = vld [vmem:[%s26125_s2 + $0x5dc] ss:$24 sps:$4 sm:$0xff]  }
 0x73d   : > { %9848 = vmatprep.subr.bf16.mxu1 %v23541_v20  ;;  %9889 = vmatprep.subr.bf16.mxu0 %v23544_v18  ;;  %v23628_v20 = vld [vmem:[%s26125_s2 + $0x60c] ss:$24 sps:$4 sm:$0xff]   ;;  %v23623_v18 = vld [vmem:[%s26125_s2 + $0x5d8] ss:$24 sps:$4 sm:$0xff]  }
 0x740   : > { %9849 = vmatpush2.bf16.msra.mxu1 %v23539_v0  ;;  %9890 = vmatpush2.bf16.msra.mxu0 %v23542_v21  ;;  %v23626_v0 = vld [vmem:[%s26125_s2 + $0x608] ss:$24 sps:$4 sm:$0xff]   ;;  %v23631_v21 = vld [vmem:[%s26125_s2 + $0x5ac] ss:$24 sps:$4 sm:$0xff]  }
 0x741   : > { %9850 = vmatprep.subr.bf16.mxu1 %v23547_v1  ;;  %9891 = vmatprep.subr.bf16.mxu0 %v23550_v39  ;;  %v23634_v1 = vld [vmem:[%s26125_s2 + $0x8dc] ss:$24 sps:$4 sm:$0xff]   ;;  %v23629_v39 = vld [vmem:[%s26125_s2 + $0x5a8] ss:$24 sps:$4 sm:$0xff]  }
 0x744   : > { %9851 = vmatpush2.bf16.msra.mxu1 %v23545_v51  ;;  %9892 = vmatpush2.bf16.msra.mxu0 %v23548_v9  ;;  %v23632_v51 = vld [vmem:[%s26125_s2 + $0x8d8] ss:$24 sps:$4 sm:$0xff]   ;;  %v23637_v9 = vld [vmem:[%s26125_s2 + $0x57c] ss:$24 sps:$4 sm:$0xff]  }
 0x745   : > { %9852 = vmatprep.subr.bf16.mxu1 %v23553_v26  ;;  %9893 = vmatprep.subr.bf16.mxu0 %v23556_v15  ;;  %v23640_v26 = vld [vmem:[%s26125_s2 + $0x8ac] ss:$24 sps:$4 sm:$0xff]   ;;  %v23635_v15 = vld [vmem:[%s26125_s2 + $0x578] ss:$24 sps:$4 sm:$0xff]  }
 0x748   : > { %9853 = vmatpush2.bf16.msra.mxu1 %v23551_v11  ;;  %9894 = vmatpush2.bf16.msra.mxu0 %v23554_v58  ;;  %v23638_v11 = vld [vmem:[%s26125_s2 + $0x8a8] ss:$24 sps:$4 sm:$0xff]   ;;  %v23643_v58 = vld [vmem:[%s26125_s2 + $0x54c] ss:$24 sps:$4 sm:$0xff]  }
 0x749   : > { %9854 = vmatprep.subr.bf16.mxu1 %v23559_v8  ;;  %9895 = vmatprep.subr.bf16.mxu0 %v23562_v4  ;;  %v23646_v8 = vld [vmem:[%s26125_s2 + $0x87c] ss:$24 sps:$4 sm:$0xff]   ;;  %v23641_v4 = vld [vmem:[%s26125_s2 + $0x548] ss:$24 sps:$4 sm:$0xff]  }
 0x74c   : > { %9855 = vmatpush2.bf16.msra.mxu1 %v23557_v6  ;;  %9896 = vmatpush2.bf16.msra.mxu0 %v23560_v56  ;;  %v23644_v6 = vld [vmem:[%s26125_s2 + $0x878] ss:$24 sps:$4 sm:$0xff]   ;;  %v23649_v56 = vld [vmem:[%s26125_s2 + $0x51c] ss:$24 sps:$4 sm:$0xff]  }
 0x74d   : > { %9856 = vmatprep.subr.bf16.mxu1 %v23565_v5  ;;  %9897 = vmatprep.subr.bf16.mxu0 %v23568_v45  ;;  %v23652_v5 = vld [vmem:[%s26125_s2 + $0x84c] ss:$24 sps:$4 sm:$0xff]   ;;  %v23647_v45 = vld [vmem:[%s26125_s2 + $0x518] ss:$24 sps:$4 sm:$0xff]  }
 0x750   : > { %9857 = vmatpush2.bf16.msra.mxu1 %v23563_v28  ;;  %9898 = vmatpush2.bf16.msra.mxu0 %v23566_v36  ;;  %v23650_v28 = vld [vmem:[%s26125_s2 + $0x848] ss:$24 sps:$4 sm:$0xff]   ;;  %v23655_v36 = vld [vmem:[%s26125_s2 + $0x4ec] ss:$24 sps:$4 sm:$0xff]  }
 0x751   : > { %9858 = vmatprep.subr.bf16.mxu1 %v23571_v16  ;;  %9899 = vmatprep.subr.bf16.mxu0 %v23574_v25  ;;  %v23658_v16 = vld [vmem:[%s26125_s2 + $0x81c] ss:$24 sps:$4 sm:$0xff]   ;;  %v23653_v25 = vld [vmem:[%s26125_s2 + $0x4e8] ss:$24 sps:$4 sm:$0xff]  }
 0x754   : > { %9859 = vmatpush2.bf16.msra.mxu1 %v23569_v60  ;;  %9900 = vmatpush2.bf16.msra.mxu0 %v23572_v47  ;;  %v23656_v60 = vld [vmem:[%s26125_s2 + $0x818] ss:$24 sps:$4 sm:$0xff]   ;;  %v23661_v47 = vld [vmem:[%s26125_s2 + $0x4bc] ss:$24 sps:$4 sm:$0xff]  }
 0x755   : > { %9901 = vmatprep.subr.bf16.mxu0 %v23577_v33  ;;  %9914 = vmatprep.subr.bf16.mxu1 %v23580_v24  ;;  %v23664_v33 = vld [vmem:[%s26125_s2 + $0x7ec] ss:$24 sps:$4 sm:$0xff]   ;;  %v23659_v24 = vld [vmem:[%s26125_s2 + $0x4b8] ss:$24 sps:$4 sm:$0xff]  }
 0x757   : > { %9861 = vmatmul.mubr.bf16.vlgmr.msra.gmra.mxu1 %v27615_v53 }
 0x758   : > { %9902 = vmatpush2.bf16.msra.mxu0 %v23575_v7  ;;  %9915 = vmatpush1.bf16.msra.mxu1 %v23578_v49  ;;  %v23662_v7 = vld [vmem:[%s26125_s2 + $0x7e8] ss:$24 sps:$4 sm:$0xff]   ;;  %v23667_v49 = vld [vmem:[%s26125_s2 + $0x48c] ss:$24 sps:$4 sm:$0xff]  }
 0x759   : > { %9946 = vmatprep.mubr.bf16.mxu1 %v27539_v52  ;;  %9916 = vmatprep.subr.bf16.mxu1 %v23583_v46  ;;  %v23670_v46 = vld [vmem:[%s26125_s2 + $0x7bc] ss:$24 sps:$4 sm:$0xff]  }
 0x75a   : > { %9957 = vmatprep.subr.bf16.mxu0 %v23586_v41  ;;  %v23665_v41 = vld [vmem:[%s26125_s2 + $0x488] ss:$24 sps:$4 sm:$0xff]  }
 0x75b   : > { %9904 = vmatmul.mubr.bf16.vlgmr.msra.gmra.mxu0 %v27534_v29 }
 0x75c   : > { %9917 = vmatpush1.bf16.msra.mxu1 %v23581_v17  ;;  %9958 = vmatpush1.bf16.msra.mxu0 %v23584_v30  ;;  %v23668_v17 = vld [vmem:[%s26125_s2 + $0x7b8] ss:$24 sps:$4 sm:$0xff]   ;;  %v23673_v30 = vld [vmem:[%s26125_s2 + $0x78c] ss:$24 sps:$4 sm:$0xff]  }
 0x75d   : > { %9989 = vmatprep.mubr.bf16.mxu0 %v27551_v63  ;;  %9918 = vmatprep.subr.bf16.mxu1 %v23589_v37  ;;  %v23676_v37 = vld [vmem:[%s26125_s2 + $0x164] ss:$24 sps:$4 sm:$0xff]  }
 0x75e   : > { %9959 = vmatprep.subr.bf16.mxu0 %v23592_v44  ;;  %v23671_v44 = vld [vmem:[%s26125_s2 + $0x788] ss:$24 sps:$4 sm:$0xff]  }
 0x760   : > { %9919 = vmatpush1.bf16.msra.mxu1 %v23587_v48  ;;  %9960 = vmatpush1.bf16.msra.mxu0 %v23590_v23  ;;  %v23674_v48 = vld [vmem:[%s26125_s2 + $0x160] ss:$24 sps:$4 sm:$0xff]   ;;  %v23679_v23 = vld [vmem:[%s26125_s2 + $0x134] ss:$24 sps:$4 sm:$0xff]  }
 0x761   : > { %9920 = vmatprep.subr.bf16.mxu1 %v23595_v55  ;;  %9961 = vmatprep.subr.bf16.mxu0 %v23598_v10  ;;  %v23682_v55 = vld [vmem:[%s26125_s2 + $0x464] ss:$24 sps:$4 sm:$0xff]   ;;  %v23677_v10 = vld [vmem:[%s26125_s2 + $0x130] ss:$24 sps:$4 sm:$0xff]  }
 0x764   : > { %9921 = vmatpush1.bf16.msra.mxu1 %v23593_v40  ;;  %9962 = vmatpush1.bf16.msra.mxu0 %v23596_v2  ;;  %v23680_v40 = vld [vmem:[%s26125_s2 + $0x460] ss:$24 sps:$4 sm:$0xff]   ;;  %v23685_v2 = vld [vmem:[%s26125_s2 + $0x104] ss:$24 sps:$4 sm:$0xff]  }
 0x765   : > { %9922 = vmatprep.subr.bf16.mxu1 %v23601_v43  ;;  %9963 = vmatprep.subr.bf16.mxu0 %v23604_v22  ;;  %v23688_v43 = vld [vmem:[%s26125_s2 + $0x434] ss:$24 sps:$4 sm:$0xff]   ;;  %v23683_v22 = vld [vmem:[%s26125_s2 + $0x100] ss:$24 sps:$4 sm:$0xff]  }
 0x768   : > { %9923 = vmatpush1.bf16.msra.mxu1 %v23599_v42  ;;  %9964 = vmatpush1.bf16.msra.mxu0 %v23602_v54  ;;  %v23686_v42 = vld [vmem:[%s26125_s2 + $0x430] ss:$24 sps:$4 sm:$0xff]   ;;  %v23694_v54 = vld [vmem:[%s26125_s2 + $0x404] ss:$24 sps:$4 sm:$0xff]  }
 0x769   : > { %9924 = vmatprep.subr.bf16.mxu1 %v23607_v19  ;;  %9965 = vmatprep.subr.bf16.mxu0 %v23610_v57  ;;  %v23689_v19 = vld [vmem:[%s26125_s2 + $0xd0] ss:$24 sps:$4 sm:$0xff]   ;;  %v23692_v57 = vld [vmem:[%s26125_s2 + $0x400] ss:$24 sps:$4 sm:$0xff]  }
 0x76c   : > { %9925 = vmatpush1.bf16.msra.mxu1 %v23605_v32  ;;  %9966 = vmatpush1.bf16.msra.mxu0 %v23608_v31  ;;  %v23697_v32 = vld [vmem:[%s26125_s2 + $0xa4] ss:$24 sps:$4 sm:$0xff]   ;;  %v23700_v31 = vld [vmem:[%s26125_s2 + $0x3d4] ss:$24 sps:$4 sm:$0xff]  }
 0x76d   : > { %9926 = vmatprep.subr.bf16.mxu1 %v23613_v27  ;;  %9967 = vmatprep.subr.bf16.mxu0 %v23616_v62  ;;  %v23698_v27 = vld [vmem:[%s26125_s2 + $0x3d0] ss:$24 sps:$4 sm:$0xff]   ;;  %v23703_v62 = vld [vmem:[%s26125_s2 + $0x74] ss:$24 sps:$4 sm:$0xff]  }
 0x770   : > { %9927 = vmatpush1.bf16.msra.mxu1 %v23611_v3  ;;  %9968 = vmatpush1.bf16.msra.mxu0 %v23614_v61  ;;  %v23706_v3 = vld [vmem:[%s26125_s2 + $0x3a4] ss:$24 sps:$4 sm:$0xff]   ;;  %v23701_v61 = vld [vmem:[%s26125_s2 + $0x70] ss:$24 sps:$4 sm:$0xff]  }
 0x771   : > { %9928 = vmatprep.subr.bf16.mxu1 %v23619_v13  ;;  %9969 = vmatprep.subr.bf16.mxu0 %v23622_v35  ;;  %v23704_v13 = vld [vmem:[%s26125_s2 + $0x3a0] ss:$24 sps:$4 sm:$0xff]   ;;  %v23709_v35 = vld [vmem:[%s26125_s2 + $0x44] ss:$24 sps:$4 sm:$0xff]  }
 0x774   : > { %9929 = vmatpush1.bf16.msra.mxu1 %v23617_v12  ;;  %9970 = vmatpush1.bf16.msra.mxu0 %v23620_v38  ;;  %v23712_v12 = vld [vmem:[%s26125_s2 + $0x374] ss:$24 sps:$4 sm:$0xff]   ;;  %v23707_v38 = vld [vmem:[%s26125_s2 + $0x40] ss:$24 sps:$4 sm:$0xff]  }
 0x775   : > { %9930 = vmatprep.subr.bf16.mxu1 %v23625_v50  ;;  %9971 = vmatprep.subr.bf16.mxu0 %v23628_v20  ;;  %v23710_v50 = vld [vmem:[%s26125_s2 + $0x370] ss:$24 sps:$4 sm:$0xff]   ;;  %v23715_v20 = vld [vmem:[%s26125_s2 + $0x14] ss:$24 sps:$4 sm:$0xff]  }
 0x778   : > { %9931 = vmatpush2.bf16.msra.mxu1 %v23623_v18  ;;  %9972 = vmatpush1.bf16.msra.mxu0 %v23626_v0  ;;  %v23718_v18 = vld [vmem:[%s26125_s2 + $0x344] ss:$24 sps:$4 sm:$0xff]   ;;  %v23713_v0 = vld [vmem:[%s26125_s2 + $0x10] ss:$24 sps:$4 sm:$0xff]  }
 0x779   : > { %9932 = vmatprep.subr.bf16.mxu1 %v23631_v21  ;;  %9973 = vmatprep.subr.bf16.mxu0 %v23634_v1  ;;  %v23716_v21 = vld [vmem:[%s26125_s2 + $0x340] ss:$24 sps:$4 sm:$0xff]   ;;  %v23721_v1 = vld [vmem:[%s26125_s2 + $0x2e4] ss:$24 sps:$4 sm:$0xff]  }
 0x77c   : > { %9933 = vmatpush2.bf16.msra.mxu1 %v23629_v39  ;;  %9974 = vmatpush2.bf16.msra.mxu0 %v23632_v51  ;;  %v23724_v39 = vld [vmem:[%s26125_s2 + $0x314] ss:$24 sps:$4 sm:$0xff]   ;;  %v23719_v51 = vld [vmem:[%s26125_s2 + $0x2e0] ss:$24 sps:$4 sm:$0xff]  }
 0x77d   : > { %9934 = vmatprep.subr.bf16.mxu1 %v23637_v9  ;;  %9975 = vmatprep.subr.bf16.mxu0 %v23640_v26  ;;  %v23722_v9 = vld [vmem:[%s26125_s2 + $0x310] ss:$24 sps:$4 sm:$0xff]   ;;  %v23727_v26 = vld [vmem:[%s26125_s2 + $0x2b4] ss:$24 sps:$4 sm:$0xff]  }
 0x780   : > { %9935 = vmatpush2.bf16.msra.mxu1 %v23635_v15  ;;  %9976 = vmatpush2.bf16.msra.mxu0 %v23638_v11  ;;  %v23730_v15 = vld [vmem:[%s26125_s2 + $0x5e4] ss:$24 sps:$4 sm:$0xff]   ;;  %v23725_v11 = vld [vmem:[%s26125_s2 + $0x2b0] ss:$24 sps:$4 sm:$0xff]  }
 0x781   : > { %9936 = vmatprep.subr.bf16.mxu1 %v23643_v58  ;;  %9977 = vmatprep.subr.bf16.mxu0 %v23646_v8  ;;  %v23728_v58 = vld [vmem:[%s26125_s2 + $0x5e0] ss:$24 sps:$4 sm:$0xff]   ;;  %v23733_v8 = vld [vmem:[%s26125_s2 + $0x284] ss:$24 sps:$4 sm:$0xff]  }
 0x784   : > { %9937 = vmatpush2.bf16.msra.mxu1 %v23641_v4  ;;  %9978 = vmatpush2.bf16.msra.mxu0 %v23644_v6  ;;  %v23736_v4 = vld [vmem:[%s26125_s2 + $0x5b4] ss:$24 sps:$4 sm:$0xff]   ;;  %v23731_v6 = vld [vmem:[%s26125_s2 + $0x280] ss:$24 sps:$4 sm:$0xff]  }
 0x785   : > { %9938 = vmatprep.subr.bf16.mxu1 %v23649_v56  ;;  %9979 = vmatprep.subr.bf16.mxu0 %v23652_v5  ;;  %v23734_v56 = vld [vmem:[%s26125_s2 + $0x5b0] ss:$24 sps:$4 sm:$0xff]   ;;  %v23739_v5 = vld [vmem:[%s26125_s2 + $0x254] ss:$24 sps:$4 sm:$0xff]  }
 0x788   : > { %9939 = vmatpush2.bf16.msra.mxu1 %v23647_v45  ;;  %9980 = vmatpush2.bf16.msra.mxu0 %v23650_v28  ;;  %v23742_v45 = vld [vmem:[%s26125_s2 + $0x584] ss:$24 sps:$4 sm:$0xff]   ;;  %v23737_v28 = vld [vmem:[%s26125_s2 + $0x250] ss:$24 sps:$4 sm:$0xff]  }
 0x789   : > { %9940 = vmatprep.subr.bf16.mxu1 %v23655_v36  ;;  %9981 = vmatprep.subr.bf16.mxu0 %v23658_v16  ;;  %v23740_v36 = vld [vmem:[%s26125_s2 + $0x580] ss:$24 sps:$4 sm:$0xff]   ;;  %v23745_v16 = vld [vmem:[%s26125_s2 + $0x224] ss:$24 sps:$4 sm:$0xff]  }
 0x78c   : > { %9941 = vmatpush2.bf16.msra.mxu1 %v23653_v25  ;;  %9982 = vmatpush2.bf16.msra.mxu0 %v23656_v60  ;;  %v23748_v25 = vld [vmem:[%s26125_s2 + $0x554] ss:$24 sps:$4 sm:$0xff]   ;;  %v23743_v60 = vld [vmem:[%s26125_s2 + $0x220] ss:$24 sps:$4 sm:$0xff]  }
 0x78d   : > { %9942 = vmatprep.subr.bf16.mxu1 %v23661_v47  ;;  %9983 = vmatprep.subr.bf16.mxu0 %v23664_v33  ;;  %v23746_v47 = vld [vmem:[%s26125_s2 + $0x550] ss:$24 sps:$4 sm:$0xff]   ;;  %v23751_v33 = vld [vmem:[%s26125_s2 + $0x1f4] ss:$24 sps:$4 sm:$0xff]  }
 0x790   : > { %9943 = vmatpush2.bf16.msra.mxu1 %v23659_v24  ;;  %9984 = vmatpush2.bf16.msra.mxu0 %v23662_v7  ;;  %v23754_v24 = vld [vmem:[%s26125_s2 + $0x524] ss:$24 sps:$4 sm:$0xff]   ;;  %v23749_v7 = vld [vmem:[%s26125_s2 + $0x1f0] ss:$24 sps:$4 sm:$0xff]  }
 0x791   : > { %9944 = vmatprep.subr.bf16.mxu1 %v23667_v49  ;;  %9985 = vmatprep.subr.bf16.mxu0 %v23670_v46  ;;  %v23752_v49 = vld [vmem:[%s26125_s2 + $0x520] ss:$24 sps:$4 sm:$0xff]   ;;  %v23757_v46 = vld [vmem:[%s26125_s2 + $0x1c4] ss:$24 sps:$4 sm:$0xff]  }
 0x794   : > { %9945 = vmatpush2.bf16.msra.mxu1 %v23665_v41  ;;  %9986 = vmatpush2.bf16.msra.mxu0 %v23668_v17  ;;  %v23760_v41 = vld [vmem:[%s26125_s2 + $0x4f4] ss:$24 sps:$4 sm:$0xff]   ;;  %v23755_v17 = vld [vmem:[%s26125_s2 + $0x1c0] ss:$24 sps:$4 sm:$0xff]  }
 0x795   : > { %9987 = vmatprep.subr.bf16.mxu0 %v23673_v30  ;;  %10000 = vmatprep.subr.bf16.mxu1 %v23676_v37  ;;  %v23758_v30 = vld [vmem:[%s26125_s2 + $0x4f0] ss:$24 sps:$4 sm:$0xff]   ;;  %v23763_v37 = vld [vmem:[%s26125_s2 + $0x194] ss:$24 sps:$4 sm:$0xff]  }
 0x797   : > { %9947 = vmatmul.mubr.bf16.vlgmr.msra.gmra.mxu1 %v27543_v14 }
 0x798   : > { %9988 = vmatpush2.bf16.msra.mxu0 %v23671_v44  ;;  %10001 = vmatpush1.bf16.msra.mxu1 %v23674_v48  ;;  %v23766_v44 = vld [vmem:[%s26125_s2 + $0x4c4] ss:$24 sps:$4 sm:$0xff]   ;;  %v23761_v48 = vld [vmem:[%s26125_s2 + $0x190] ss:$24 sps:$4 sm:$0xff]  }
 0x799   : > { %10032 = vmatprep.mubr.bf16.mxu1 %v27531_v34  ;;  %10002 = vmatprep.subr.bf16.mxu1 %v23679_v23  ;;  %v23691_v34 = vld [vmem:[%s26125_s2 + $0xd4] ss:$24 sps:$4 sm:$0xff]   ;;  %v23764_v23 = vld [vmem:[%s26125_s2 + $0x4c0] ss:$24 sps:$4 sm:$0xff]  }
 0x79a   : > { %10043 = vmatprep.subr.bf16.mxu0 %v23682_v55  ;;  %v23769_v55 = vld [vmem:[%s26125_s2 + $0x494] ss:$24 sps:$4 sm:$0xff]  }
 0x79b   : > { %9990 = vmatmul.mubr.bf16.vlgmr.msra.gmra.mxu0 %v27615_v53 }
 0x79c   : > { %10003 = vmatpush1.bf16.msra.mxu1 %v23677_v10  ;;  %10044 = vmatpush1.bf16.msra.mxu0 %v23680_v40  ;;  %v23772_v10 = vld [vmem:[%s26125_s2 + $0x764] ss:$24 sps:$4 sm:$0xff]   ;;  %v23767_v40 = vld [vmem:[%s26125_s2 + $0x490] ss:$24 sps:$4 sm:$0xff]  }
 0x79d   : > { %10075 = vmatprep.mubr.bf16.mxu0 %v27539_v52  ;;  %10004 = vmatprep.subr.bf16.mxu1 %v23685_v2  ;;  %v23695_v52 = vld [vmem:[%s26125_s2 + $0xa0] ss:$24 sps:$4 sm:$0xff]  }
 0x79e   : > { %10045 = vmatprep.subr.bf16.mxu0 %v23688_v43  ;;  %v23770_v2 = vld [vmem:[%s26125_s2 + $0x760] ss:$24 sps:$4 sm:$0xff]   ;;  %v23775_v43 = vld [vmem:[%s26125_s2 + $0x734] ss:$24 sps:$4 sm:$0xff]  }
 0x7a0   : > { %10005 = vmatpush1.bf16.msra.mxu1 %v23683_v22  ;;  %10046 = vmatpush1.bf16.msra.mxu0 %v23686_v42  ;;  %v23773_v22 = vld [vmem:[%s26125_s2 + $0x730] ss:$24 sps:$4 sm:$0xff]   ;;  %v23778_v42 = vld [vmem:[%s26125_s2 + $0x704] ss:$24 sps:$4 sm:$0xff]  }
 0x7a1   : > { %10006 = vmatprep.subr.bf16.mxu1 %v23691_v34  ;;  %10047 = vmatprep.subr.bf16.mxu0 %v23694_v54  ;;  %v23776_v34 = vld [vmem:[%s26125_s2 + $0x700] ss:$24 sps:$4 sm:$0xff]   ;;  %v23781_v54 = vld [vmem:[%s26125_s2 + $0x6d4] ss:$24 sps:$4 sm:$0xff]  }
 0x7a4   : > { %10007 = vmatpush1.bf16.msra.mxu1 %v23689_v19  ;;  %10048 = vmatpush1.bf16.msra.mxu0 %v23692_v57  ;;  %v23784_v19 = vld [vmem:[%s26125_s2 + $0x6a4] ss:$24 sps:$4 sm:$0xff]   ;;  %v23787_v57 = vld [vmem:[%s26125_s2 + $0x674] ss:$24 sps:$4 sm:$0xff]  }
 0x7a5   : > { %10008 = vmatprep.subr.bf16.mxu1 %v23697_v32  ;;  %10049 = vmatprep.subr.bf16.mxu0 %v23700_v31  ;;  %v23790_v32 = vld [vmem:[%s26125_s2 + $0x644] ss:$24 sps:$4 sm:$0xff]   ;;  %v23788_v31 = vld [vmem:[%s26125_s2 + $0x640] ss:$24 sps:$4 sm:$0xff]  }
 0x7a8   : > { %10009 = vmatpush1.bf16.msra.mxu1 %v23695_v52  ;;  %10050 = vmatpush1.bf16.msra.mxu0 %v23698_v27  ;;  %v23793_v52 = vld [vmem:[%s26125_s2 + $0x614] ss:$24 sps:$4 sm:$0xff]   ;;  %v23791_v27 = vld [vmem:[%s26125_s2 + $0x610] ss:$24 sps:$4 sm:$0xff]  }
 0x7a9   : > { %10010 = vmatprep.subr.bf16.mxu1 %v23703_v62  ;;  %10051 = vmatprep.subr.bf16.mxu0 %v23706_v3  ;;  %v23796_v62 = vld [vmem:[%s26125_s2 + $0x8e4] ss:$24 sps:$4 sm:$0xff]   ;;  %v23794_v3 = vld [vmem:[%s26125_s2 + $0x8e0] ss:$24 sps:$4 sm:$0xff]  }
 0x7ac   : > { %10011 = vmatpush1.bf16.msra.mxu1 %v23701_v61  ;;  %10052 = vmatpush1.bf16.msra.mxu0 %v23704_v13  ;;  %v23799_v61 = vld [vmem:[%s26125_s2 + $0x8b4] ss:$24 sps:$4 sm:$0xff]   ;;  %v23797_v13 = vld [vmem:[%s26125_s2 + $0x8b0] ss:$24 sps:$4 sm:$0xff]  }
 0x7ad   : > { %10012 = vmatprep.subr.bf16.mxu1 %v23709_v35  ;;  %10053 = vmatprep.subr.bf16.mxu0 %v23712_v12  ;;  %v23802_v35 = vld [vmem:[%s26125_s2 + $0x884] ss:$24 sps:$4 sm:$0xff]   ;;  %v23800_v12 = vld [vmem:[%s26125_s2 + $0x880] ss:$24 sps:$4 sm:$0xff]  }
 0x7b0   : > { %10013 = vmatpush1.bf16.msra.mxu1 %v23707_v38  ;;  %10054 = vmatpush1.bf16.msra.mxu0 %v23710_v50  ;;  %v23805_v38 = vld [vmem:[%s26125_s2 + $0x854] ss:$24 sps:$4 sm:$0xff]   ;;  %v23803_v50 = vld [vmem:[%s26125_s2 + $0x850] ss:$24 sps:$4 sm:$0xff]  }
 0x7b1   : > { %10014 = vmatprep.subr.bf16.mxu1 %v23715_v20  ;;  %10055 = vmatprep.subr.bf16.mxu0 %v23718_v18  ;;  %v23808_v20 = vld [vmem:[%s26125_s2 + $0x824] ss:$24 sps:$4 sm:$0xff]   ;;  %v23806_v18 = vld [vmem:[%s26125_s2 + $0x820] ss:$24 sps:$4 sm:$0xff]  }
 0x7b4   : > { %10015 = vmatpush1.bf16.msra.mxu1 %v23713_v0  ;;  %10056 = vmatpush1.bf16.msra.mxu0 %v23716_v21  ;;  %v23811_v0 = vld [vmem:[%s26125_s2 + $0x7f4] ss:$24 sps:$4 sm:$0xff]   ;;  %v23809_v21 = vld [vmem:[%s26125_s2 + $0x7f0] ss:$24 sps:$4 sm:$0xff]  }
 0x7b5   : > { %10016 = vmatprep.subr.bf16.mxu1 %v23721_v1  ;;  %10057 = vmatprep.subr.bf16.mxu0 %v23724_v39  ;;  %v23814_v1 = vld [vmem:[%s26125_s2 + $0x7c4] ss:$24 sps:$4 sm:$0xff]   ;;  %v23812_v39 = vld [vmem:[%s26125_s2 + $0x7c0] ss:$24 sps:$4 sm:$0xff]  }
 0x7b8   : > { %10017 = vmatpush2.bf16.msra.mxu1 %v23719_v51  ;;  %10058 = vmatpush1.bf16.msra.mxu0 %v23722_v9  ;;  %v23817_v51 = vld [vmem:[%s26125_s2 + $0x794] ss:$24 sps:$4 sm:$0xff]   ;;  %v23815_v9 = vld [vmem:[%s26125_s2 + $0x790] ss:$24 sps:$4 sm:$0xff]  }
 0x7b9   : > { %10018 = vmatprep.subr.bf16.mxu1 %v23727_v26  ;;  %10059 = vmatprep.subr.bf16.mxu0 %v23730_v15 }
 0x7bc   : > { %10019 = vmatpush2.bf16.msra.mxu1 %v23725_v11  ;;  %10060 = vmatpush2.bf16.msra.mxu0 %v23728_v58 }
 0x7bd   : > { %10020 = vmatprep.subr.bf16.mxu1 %v23733_v8  ;;  %10061 = vmatprep.subr.bf16.mxu0 %v23736_v4 }
 0x7c0   : > { %10021 = vmatpush2.bf16.msra.mxu1 %v23731_v6  ;;  %10062 = vmatpush2.bf16.msra.mxu0 %v23734_v56 }
 0x7c1   : > { %10022 = vmatprep.subr.bf16.mxu1 %v23739_v5  ;;  %10063 = vmatprep.subr.bf16.mxu0 %v23742_v45 }
 0x7c4   : > { %10023 = vmatpush2.bf16.msra.mxu1 %v23737_v28  ;;  %10064 = vmatpush2.bf16.msra.mxu0 %v23740_v36 }
 0x7c5   : > { %10024 = vmatprep.subr.bf16.mxu1 %v23745_v16  ;;  %10065 = vmatprep.subr.bf16.mxu0 %v23748_v25 }
 0x7c8   : > { %10025 = vmatpush2.bf16.msra.mxu1 %v23743_v60  ;;  %10066 = vmatpush2.bf16.msra.mxu0 %v23746_v47  ;;  %v27788_v47 = vsub.s32 5, %v29918_v59 }
 0x7c9   : > { %10026 = vmatprep.subr.bf16.mxu1 %v23751_v33  ;;  %10067 = vmatprep.subr.bf16.mxu0 %v23754_v24  ;;  %v27791_v33 = vsub.s32 1, %v29918_v59 }
 0x7cc   : > { %10027 = vmatpush2.bf16.msra.mxu1 %v23749_v7  ;;  %10068 = vmatpush2.bf16.msra.mxu0 %v23752_v49  ;;  %v25611_v7 = vld [vmem:[%s26446_s3] sm:$0xff] }
 0x7cd   : > { %10028 = vmatprep.subr.bf16.mxu1 %v23757_v46  ;;  %10069 = vmatprep.subr.bf16.mxu0 %v23760_v41  ;;  %v8255_v49 = vrot.slane %v25611_v7, %v27788_v47 }
 0x7d0   : > { %10029 = vmatpush2.bf16.msra.mxu1 %v23755_v17  ;;  %10070 = vmatpush2.bf16.msra.mxu0 %v23758_v30  ;;  %v8251_v17 = vrot.slane %v25611_v7, %v27791_v33  ;;  %v25612_v30 = vld [vmem:[%s26446_s3 + $0x8] sm:$0xff] }
 0x7d1   : > { %10030 = vmatprep.subr.bf16.mxu1 %v23763_v37  ;;  %10071 = vmatprep.subr.bf16.mxu0 %v23766_v44  ;;  %v8259_v37 = vrot.slane %v25612_v30, %v27791_v33  ;;  %v8285_v44 = vrot.slane %v8255_v49, %v27791_v33 }
 0x7d4   : > { %10031 = vmatpush2.bf16.msra.mxu1 %v23761_v48  ;;  %10072 = vmatpush2.bf16.msra.mxu0 %v23764_v23 }
 0x7d5   : > { %10073 = vmatprep.subr.bf16.mxu0 %v23769_v55  ;;  %10086 = vmatprep.subr.bf16.mxu1 %v23772_v10  ;;  %v8281_v55 = vrot.slane %v8251_v17, %v27791_v33  ;;  %v8289_v10 = vrot.slane %v8259_v37, %v27791_v33  ;;  %v25620_v17 = vld [vmem:[%s26191_s18 + $0x40] sm:$0xff] }
 0x7d7   : > { %10033 = vmatmul.mubr.bf16.vlgmr.msra.gmra.mxu1 %v27534_v29  ;;  %v23779_v29 = vld [vmem:[%s26125_s2 + $0x6d0] ss:$24 sps:$4 sm:$0xff]   ;;  %v9776_v26 = vpop.f32.mrf.mxu1 }
 0x7d8   : > { %10074 = vmatpush2.bf16.msra.mxu0 %v23767_v40  ;;  %10087 = vmatpush1.bf16.msra.mxu1 %v23770_v2  ;;  %v8263_v40 = vrot.slane %v25612_v30, %v27788_v47 }
 0x7d9   : > { %10118 = vmatprep.mubr.bf16.mxu1 %v27551_v63  ;;  %10088 = vmatprep.subr.bf16.mxu1 %v23775_v43  ;;  %v23782_v63 = vld [vmem:[%s26125_s2 + $0x6a0] ss:$24 sps:$4 sm:$0xff]   ;;  %v9778_v15 = vpop.f32.mrf.mxu1 }
 0x7da   : > { %v9779_v2 = vadd.f32 %v9778_v15, %v8285_v44 }
 0x7db   : > { %10076 = vmatmul.mubr.bf16.vlgmr.msra.gmra.mxu0 %v27543_v14  ;;  %v23785_v14 = vld [vmem:[%s26125_s2 + $0x670] ss:$24 sps:$4 sm:$0xff]   ;;  %v9819_v11 = vpop.f32.mrf.mxu0  ;;  %v9780_v58 = vpop.f32.mrf.mxu1 }
 0x7dc   : > { %10089 = vmatpush1.bf16.msra.mxu1 %v23773_v22 }
 0x7dd   : > { %10090 = vmatprep.subr.bf16.mxu1 %v23778_v42  ;;  %v9821_v8 = vpop.f32.mrf.mxu0  ;;  %v9782_v4 = vpop.f32.mrf.mxu1  ;;  %v9777_v42 = vadd.f32 %v9776_v26, %v8281_v55 }
 0x7df   : > { %v9823_v6 = vpop.f32.mrf.mxu0 }
 0x7e0   : > { %10091 = vmatpush1.bf16.msra.mxu1 %v23776_v34  ;;  %v9822_v34 = vadd.f32 %v9821_v8, %v9779_v2  ;;  %v25616_v8 = vld [vmem:[%s26191_s18 + $0x10] sm:$0xff] }
 0x7e1   : > { %10092 = vmatprep.subr.bf16.mxu1 %v23781_v54  ;;  %v9825_v5 = vpop.f32.mrf.mxu0 }
 0x7e4   : > { %10093 = vmatpush1.bf16.msra.mxu1 %v23779_v29  ;;  %v8293_v29 = vrot.slane %v8263_v40, %v27791_v33 }
 0x7e5   : > { %10094 = vmatprep.subr.bf16.mxu1 %v23784_v19 }
 0x7e8   : > { %10095 = vmatpush1.bf16.msra.mxu1 %v23782_v63  ;;  %v9820_v63 = vadd.f32 %v9819_v11, %v9777_v42 }
 0x7e9   : > { %10096 = vmatprep.subr.bf16.mxu1 %v23787_v57  ;;  %v9783_v57 = vadd.f32 %v9782_v4, %v8285_v44 }
 0x7ec   : > { %10097 = vmatpush1.bf16.msra.mxu1 %v23785_v14 }
 0x7ed   : > { %10098 = vmatprep.subr.bf16.mxu1 %v23790_v32 }
 0x7f0   : > { %10099 = vmatpush1.bf16.msra.mxu1 %v23788_v31 }
 0x7f1   : > { %10100 = vmatprep.subr.bf16.mxu1 %v23793_v52  ;;  %v9781_v52 = vadd.f32 %v9780_v58, %v8281_v55 }
 0x7f4   : > { %10101 = vmatpush1.bf16.msra.mxu1 %v23791_v27 }
 0x7f5   : > { %10102 = vmatprep.subr.bf16.mxu1 %v23796_v62  ;;  %v25613_v62 = vld [vmem:[%s26446_s3 + $0x10] sm:$0xff] }
 0x7f8   : > { %10103 = vmatpush2.bf16.msra.mxu1 %v23794_v3  ;;  %v8267_v3 = vrot.slane %v25613_v62, %v27791_v33 }
 0x7f9   : > { %10104 = vmatprep.subr.bf16.mxu1 %v23799_v61  ;;  %v9826_v61 = vadd.f32 %v9825_v5, %v9783_v57 }
 0x7fa   : > { %v8297_v11 = vrot.slane %v8267_v3, %v27791_v33  ;;  %v25623_v3 = vld [vmem:[%s26191_s18 + $0x28] sm:$0xff] }
 0x7fc   : > { %10105 = vmatpush2.bf16.msra.mxu1 %v23797_v13 }
 0x7fd   : > { %10106 = vmatprep.subr.bf16.mxu1 %v23802_v35 }
 0x800   : > { %10107 = vmatpush2.bf16.msra.mxu1 %v23800_v12 }
 0x801   : > { %10108 = vmatprep.subr.bf16.mxu1 %v23805_v38 }
 0x804   : > { %10109 = vmatpush2.bf16.msra.mxu1 %v23803_v50 }
 0x805   : > { %10110 = vmatprep.subr.bf16.mxu1 %v23808_v20  ;;  %v9824_v20 = vadd.f32 %v9823_v6, %v9781_v52 }
 0x808   : > { %10111 = vmatpush2.bf16.msra.mxu1 %v23806_v18  ;;  %v8271_v18 = vrot.slane %v25613_v62, %v27788_v47 }
 0x809   : > { %10112 = vmatprep.subr.bf16.mxu1 %v23811_v0  ;;  %v25614_v0 = vld [vmem:[%s26191_s18 + $0x8] sm:$0xff] }
 0x80c   : > { %10113 = vmatpush2.bf16.msra.mxu1 %v23809_v21 }
 0x80d   : > { %10114 = vmatprep.subr.bf16.mxu1 %v23814_v1 }
 0x810   : > { %10115 = vmatpush2.bf16.msra.mxu1 %v23812_v39 }
 0x811   : > { %10116 = vmatprep.subr.bf16.mxu1 %v23817_v51 }
 0x814   : > { %10117 = vmatpush2.bf16.msra.mxu1 %v23815_v9  ;;  %v25615_v9 = vld [vmem:[%s26191_s18] sm:$0xff] }
 0x817   : > { %10119 = vmatmul.mubr.bf16.vlgmr.msra.gmra.mxu1 %v27615_v53  ;;  %v9862_v56 = vpop.f32.mrf.mxu1 }
 0x818   : > { %v9863_v27 = vadd.f32 %v9862_v56, %v9820_v63 }
 0x819   : > { %v9864_v45 = vpop.f32.mrf.mxu1 }
 0x81a   : > { %v9865_v14 = vadd.f32 %v9864_v45, %v9822_v34  ;;  %v27810_v26 = vadd.f32 %v25615_v9, %v9863_v27 }
 0x81b   : > { %v9905_v28 = vpop.f32.mrf.mxu0  ;;  %v9866_v36 = vpop.f32.mrf.mxu1 }
 0x81c   : > { %v9906_v54 = vadd.f32 %v9905_v28, %v8289_v10  ;;  %v27807_v21 = vadd.f32 %v25614_v0, %v9865_v14  ;;  %v9867_v15 = vadd.f32 %v9866_v36, %v9824_v20  ;;  %v8301_v28 = vrot.slane %v8271_v18, %v27791_v33 }
 0x81d   : > { %v9907_v16 = vpop.f32.mrf.mxu0  ;;  %v9868_v25 = vpop.f32.mrf.mxu1 }
 0x81e   : > { %v9908_v13 = vadd.f32 %v9907_v16, %v8293_v29  ;;  %v9869_v1 = vadd.f32 %v9868_v25, %v9826_v61  ;;  %v10141_v16 = vadd.f32 %v27807_v21, %v27810_v26  ;;  %v25617_v25 = vld [vmem:[%s26191_s18 + $0x38] sm:$0xff] }
 0x81f   : > { %v9909_v60 = vpop.f32.mrf.mxu0 }
 0x820   : > { %v9910_v35 = vadd.f32 %v9909_v60, %v8289_v10  ;;  %v27820_v60 = vadd.f32 %v25617_v25, %v9869_v1  ;;  %v25625_v1 = vld [vmem:[%s26191_s18 + $0x58] sm:$0xff]  ;;  %v23830_v25 = vld [vmem:[%s26132_s8 + $0x1e0] ss:$48 sps:$4 sm:$0xff]  }
 0x821   : > { %v9911_v24 = vpop.f32.mrf.mxu0 }
 0x822   : > { %v9912_v58 = vadd.f32 %v9911_v24, %v8293_v29 }
 0x857   : > { %v9948_v53 = vpop.f32.mrf.mxu1 }
 0x858   : > { %v9949_v32 = vadd.f32 %v9948_v53, %v9906_v54  ;;  %v25618_v53 = vld [vmem:[%s26191_s18 + $0x30] sm:$0xff]  ;;  %v25621_v54 = vld [vmem:[%s26191_s18 + $0x48] sm:$0xff] }
 0x859   : > { %v9950_v46 = vpop.f32.mrf.mxu1  ;;  %v27823_v24 = vadd.f32 %v25618_v53, %v9867_v15  ;;  %v23818_v15 = vld [vmem:[%s26132_s8 + $0x2a0] ss:$48 sps:$4 sm:$0xff]   ;;  %v23838_v53 = vld [vmem:[%s26132_s8 + $0x184] ss:$48 sps:$4 sm:$0xff]  }
 0x85a   : > { %v9951_v39 = vadd.f32 %v9950_v46, %v9908_v13  ;;  %v25619_v46 = vld [vmem:[%s26191_s18 + $0x18] sm:$0xff] }
 0x85b   : > { %v9991_v41 = vpop.f32.mrf.mxu0  ;;  %v9952_v48 = vpop.f32.mrf.mxu1  ;;  %v10148_v10 = vadd.f32 %v27820_v60, %v27823_v24 }
 0x85c   : > { %v9992_v12 = vadd.f32 %v9991_v41, %v9949_v32  ;;  %v9953_v51 = vadd.f32 %v9952_v48, %v9910_v35  ;;  %v25622_v32 = vld [vmem:[%s26191_s18 + $0x20] sm:$0xff] }
 0x85d   : > { %v9993_v23 = vpop.f32.mrf.mxu0  ;;  %v9954_v43 = vpop.f32.mrf.mxu1 }
 0x85e   : > { %v27814_v4 = vadd.f32 %v25616_v8, %v9992_v12  ;;  %v9994_v6 = vadd.f32 %v9993_v23, %v9951_v39  ;;  %v9955_v36 = vadd.f32 %v9954_v43, %v9912_v58  ;;  %v23821_v58 = vld [vmem:[%s26132_s8 + $0x8a0] ss:$48 sps:$4 sm:$0xff]   ;;  %v23823_v8 = vld [vmem:[%s26132_s8 + $0x8a4] ss:$48 sps:$4 sm:$0xff]  }
 0x85f   : > { %v9995_v22 = vpop.f32.mrf.mxu0  ;;  %13959 = vmatprep.subr.bf16.mxu1 %v23823_v8 }
 0x860   : > { %v9996_v56 = vadd.f32 %v9995_v22, %v9953_v51  ;;  %v10142_v49 = vadd.f32 %v10141_v16, %v27814_v4  ;;  %v27827_v41 = vadd.f32 %v25619_v46, %v9994_v6  ;;  %v23826_v6 = vld [vmem:[%s26132_s8 + $0x244] ss:$48 sps:$4 sm:$0xff]   ;;  %13960 = vmatpush1.bf16.msra.mxu1 %v23821_v58  ;;  %v23839_v46 = vld [vmem:[%s26132_s8 + $0x780] ss:$48 sps:$4 sm:$0xff]  }
 0x861   : > { %v9997_v31 = vpop.f32.mrf.mxu0  ;;  %v23835_v16 = vld [vmem:[%s26132_s8 + $0x7e4] ss:$48 sps:$4 sm:$0xff]  }
 0x862   : > { %v27830_v30 = vadd.f32 %v25620_v17, %v9996_v56  ;;  %v9998_v37 = vadd.f32 %v9997_v31, %v9955_v36  ;;  %v10143_v42 = vadd.f32 %v10142_v49, %v27827_v41  ;;  %v23829_v56 = vld [vmem:[%s26132_s8 + $0x844] ss:$48 sps:$4 sm:$0xff]   ;;  %v23833_v36 = vld [vmem:[%s26132_s8 + $0x7e0] ss:$48 sps:$4 sm:$0xff]  }
 0x863   : > { %13961 = vmatprep.subr.bf16.mxu1 %v23829_v56  ;;  %v23836_v49 = vld [vmem:[%s26132_s8 + $0x180] ss:$48 sps:$4 sm:$0xff]   ;;  %v23844_v17 = vld [vmem:[%s26132_s8 + $0x124] ss:$48 sps:$4 sm:$0xff]  }
 0x864   : > { %v10149_v34 = vadd.f32 %v10148_v10, %v27830_v30  ;;  %v27837_v29 = vadd.f32 %v25621_v54, %v9998_v37  ;;  %v23847_v37 = vld [vmem:[%s26132_s8 + $0x724] ss:$48 sps:$4 sm:$0xff]   ;;  %v23848_v10 = vld [vmem:[%s26132_s8 + $0xc0] ss:$48 sps:$4 sm:$0xff]  }
 0x865   : > { %v23865_v54 = vld [vmem:[%s26132_s8 + $0x604] ss:$48 sps:$4 sm:$0xff]  }
 0x897   : > { %v10034_v19 = vpop.f32.mrf.mxu1 }
 0x898   : > { %v10035_v7 = vadd.f32 %v10034_v19, %v8297_v11 }
 0x899   : > { %v10036_v38 = vpop.f32.mrf.mxu1 }
 0x89a   : > { %v10037_v23 = vadd.f32 %v10036_v38, %v8301_v28  ;;  %v10150_v38 = vadd.f32 %v10149_v34, %v27837_v29  ;;  %v23862_v34 = vld [vmem:[%s26132_s8 + $0x4] ss:$48 sps:$4 sm:$0xff]  }
 0x89b   : > { %v10077_v50 = vpop.f32.mrf.mxu0  ;;  %v10038_v5 = vpop.f32.mrf.mxu1 }
 0x89c   : > { %v10078_v55 = vadd.f32 %v10077_v50, %v10035_v7  ;;  %v10039_v2 = vadd.f32 %v10038_v5, %v8297_v11  ;;  %v25624_v50 = vld [vmem:[%s26191_s18 + $0x50] sm:$0xff] }
 0x89d   : > { %v10079_v45 = vpop.f32.mrf.mxu0  ;;  %v10040_v44 = vpop.f32.mrf.mxu1  ;;  %v23820_v11 = vld [vmem:[%s26132_s8 + $0x2a4] ss:$48 sps:$4 sm:$0xff]   ;;  %v23824_v5 = vld [vmem:[%s26132_s8 + $0x240] ss:$48 sps:$4 sm:$0xff]  }
 0x89e   : > { %v10080_v43 = vadd.f32 %v10079_v45, %v10037_v23  ;;  %v10041_v57 = vadd.f32 %v10040_v44, %v8301_v28  ;;  %13916 = vmatprep.subr.bf16.mxu0 %v23820_v11  ;;  %v23827_v45 = vld [vmem:[%s26132_s8 + $0x840] ss:$48 sps:$4 sm:$0xff]   ;;  %v23832_v28 = vld [vmem:[%s26132_s8 + $0x1e4] ss:$48 sps:$4 sm:$0xff]  }
 0x89f   : > { %v10081_v48 = vpop.f32.mrf.mxu0  ;;  %13917 = vmatpush1.bf16.msra.mxu0 %v23818_v15  ;;  %13962 = vmatpush1.bf16.msra.mxu1 %v23827_v45  ;;  %v23841_v7 = vld [vmem:[%s26132_s8 + $0x784] ss:$48 sps:$4 sm:$0xff]   ;;  %v23842_v44 = vld [vmem:[%s26132_s8 + $0x120] ss:$48 sps:$4 sm:$0xff]  }
 0x8a0   : > { %v10082_v14 = vadd.f32 %v10081_v48, %v10039_v2  ;;  %13918 = vmatprep.subr.bf16.mxu0 %v23826_v6  ;;  %13963 = vmatprep.subr.bf16.mxu1 %v23835_v16  ;;  %v23845_v48 = vld [vmem:[%s26132_s8 + $0x720] ss:$48 sps:$4 sm:$0xff]   ;;  %v23850_v23 = vld [vmem:[%s26132_s8 + $0xc4] ss:$48 sps:$4 sm:$0xff]  }
 0x8a1   : > { %v10083_v19 = vpop.f32.mrf.mxu0  ;;  %v23856_v2 = vld [vmem:[%s26132_s8 + $0x64] ss:$48 sps:$4 sm:$0xff]  }
 0x8a2   : > { %v10084_v62 = vadd.f32 %v10083_v19, %v10041_v57  ;;  %v23860_v19 = vld [vmem:[%s26132_s8] ss:$48 sps:$4 sm:$0xff]   ;;  %v23868_v57 = vld [vmem:[%s26132_s8 + $0x5a4] ss:$48 sps:$4 sm:$0xff]  }
 0x8a3   : > { %13919 = vmatpush1.bf16.msra.mxu0 %v23824_v5  ;;  %13964 = vmatpush1.bf16.msra.mxu1 %v23833_v36 }
 0x8a4   : > { %13920 = vmatprep.subr.bf16.mxu0 %v23832_v28  ;;  %13965 = vmatprep.subr.bf16.mxu1 %v23841_v7  ;;  %v23874_v7 = vld [vmem:[%s26132_s8 + $0x544] ss:$48 sps:$4 sm:$0xff]  }
 0x8a7   : > { %13921 = vmatpush1.bf16.msra.mxu0 %v23830_v25  ;;  %13966 = vmatpush1.bf16.msra.mxu1 %v23839_v46  ;;  %v23872_v46 = vld [vmem:[%s26132_s8 + $0x540] ss:$48 sps:$4 sm:$0xff]  }
 0x8a8   : > { %13922 = vmatprep.subr.bf16.mxu0 %v23838_v53  ;;  %13967 = vmatprep.subr.bf16.mxu1 %v23847_v37  ;;  %v23880_v37 = vld [vmem:[%s26132_s8 + $0x4e4] ss:$48 sps:$4 sm:$0xff]  }
 0x8ab   : > { %13923 = vmatpush1.bf16.msra.mxu0 %v23836_v49  ;;  %13968 = vmatpush1.bf16.msra.mxu1 %v23845_v48  ;;  %v23877_v49 = vld [vmem:[%s26132_s8 + $0xb44] ss:$48 sps:$4 sm:$0xff]   ;;  %v23878_v48 = vld [vmem:[%s26132_s8 + $0x4e0] ss:$48 sps:$4 sm:$0xff]  }
 0x8ac   : > { %13924 = vmatprep.subr.bf16.mxu0 %v23844_v17  ;;  %v23875_v17 = vld [vmem:[%s26132_s8 + $0xb40] ss:$48 sps:$4 sm:$0xff]  }
 0x8af   : > { %13925 = vmatpush1.bf16.msra.mxu0 %v23842_v44  ;;  %v23883_v44 = vld [vmem:[%s26132_s8 + $0xae4] ss:$48 sps:$4 sm:$0xff]  }
 0x8b0   : > { %13926 = vmatprep.subr.bf16.mxu0 %v23850_v23  ;;  %v23881_v23 = vld [vmem:[%s26132_s8 + $0xae0] ss:$48 sps:$4 sm:$0xff]  }
 0x8b3   : > { %13927 = vmatpush1.bf16.msra.mxu0 %v23848_v10  ;;  %v23886_v10 = vld [vmem:[%s26132_s8 + $0x484] ss:$48 sps:$4 sm:$0xff]  }
 0x8b4   : > { %13928 = vmatprep.subr.bf16.mxu0 %v23856_v2  ;;  %v23889_v2 = vld [vmem:[%s26132_s8 + $0xa84] ss:$48 sps:$4 sm:$0xff]  }
 0x8d7   : > { %v10120_v40 = vpop.f32.mrf.mxu1 }
 0x8d8   : > { %v10121_v22 = vadd.f32 %v10120_v40, %v10078_v55  ;;  %v23853_v55 = vld [vmem:[%s26132_s8 + $0x6c4] ss:$48 sps:$4 sm:$0xff]   ;;  %v23851_v40 = vld [vmem:[%s26132_s8 + $0x6c0] ss:$48 sps:$4 sm:$0xff]  }
 0x8d9   : > { %v10122_v63 = vpop.f32.mrf.mxu1  ;;  %13969 = vmatprep.subr.bf16.mxu1 %v23853_v55  ;;  %v23884_v55 = vld [vmem:[%s26132_s8 + $0x480] ss:$48 sps:$4 sm:$0xff]  }
 0x8da   : > { %v27840_v31 = vadd.f32 %v25622_v32, %v10121_v22  ;;  %v10123_v52 = vadd.f32 %v10122_v63, %v10080_v43  ;;  %v23859_v43 = vld [vmem:[%s26132_s8 + $0x664] ss:$48 sps:$4 sm:$0xff]   ;;  %v23854_v22 = vld [vmem:[%s26132_s8 + $0x60] ss:$48 sps:$4 sm:$0xff]   ;;  %13970 = vmatpush1.bf16.msra.mxu1 %v23851_v40 }
 0x8db   : > { %v10124_v27 = vpop.f32.mrf.mxu1  ;;  %13971 = vmatprep.subr.bf16.mxu1 %v23859_v43  ;;  %13929 = vmatpush1.bf16.msra.mxu0 %v23854_v22  ;;  %v23863_v63 = vld [vmem:[%s26132_s8 + $0x600] ss:$48 sps:$4 sm:$0xff]   ;;  %v23892_v43 = vld [vmem:[%s26132_s8 + $0x424] ss:$48 sps:$4 sm:$0xff]  }
 0x8dc   : > { %v27843_v61 = vadd.f32 %v25623_v3, %v10123_v52  ;;  %v10125_v13 = vadd.f32 %v10124_v27, %v10082_v14  ;;  %v10144_v35 = vadd.f32 %v10143_v42, %v27840_v31  ;;  %v23857_v42 = vld [vmem:[%s26132_s8 + $0x660] ss:$48 sps:$4 sm:$0xff]   ;;  %13930 = vmatprep.subr.bf16.mxu0 %v23862_v34  ;;  %v23871_v14 = vld [vmem:[%s26132_s8 + $0xba4] ss:$48 sps:$4 sm:$0xff]  }
 0x8dd   : > { %v10126_v12 = vpop.f32.mrf.mxu1  ;;  %v23866_v32 = vld [vmem:[%s26132_s8 + $0x5a0] ss:$48 sps:$4 sm:$0xff]   ;;  %v23895_v22 = vld [vmem:[%s26132_s8 + $0xa24] ss:$48 sps:$4 sm:$0xff]  }
 0x8de   : > { %v27848_v20 = vadd.f32 %v25624_v50, %v10125_v13  ;;  %v10127_v18 = vadd.f32 %v10126_v12, %v10084_v62  ;;  %v10145_v0 = vadd.f32 %v10144_v35, %v27843_v61  ;;  %13972 = vmatpush1.bf16.msra.mxu1 %v23857_v42  ;;  %v23869_v52 = vld [vmem:[%s26132_s8 + $0xba0] ss:$48 sps:$4 sm:$0xff]  }
 0x8df   : > { %13973 = vmatprep.subr.bf16.mxu1 %v23865_v54  ;;  %13931 = vmatpush1.bf16.msra.mxu0 %v23860_v19  ;;  %v23887_v40 = vld [vmem:[%s26132_s8 + $0xa80] ss:$48 sps:$4 sm:$0xff]   ;;  %v23898_v54 = vld [vmem:[%s26132_s8 + $0x3c4] ss:$48 sps:$4 sm:$0xff]  }
 0x8e0   : > { %v27852_v39 = vadd.f32 %v25625_v1, %v10127_v18  ;;  %10146 = vadd.xlane.f32.xlu0 %v10145_v0  ;;  %v10151_v51 = vadd.f32 %v10150_v38, %v27848_v20  ;;  %13932 = vmatprep.subr.bf16.mxu0 %v23868_v57  ;;  %v23890_v42 = vld [vmem:[%s26132_s8 + $0x420] ss:$48 sps:$4 sm:$0xff]   ;;  %v23901_v19 = vld [vmem:[%s26132_s8 + $0x9c4] ss:$48 sps:$4 sm:$0xff]  }
 0x8e1   : > { %v23893_v34 = vld [vmem:[%s26132_s8 + $0xa20] ss:$48 sps:$4 sm:$0xff]  }
 0x8e2   : > { %v10152_v9 = vadd.f32 %v10151_v51, %v27852_v39  ;;  %13974 = vmatpush1.bf16.msra.mxu1 %v23863_v63  ;;  %v23896_v63 = vld [vmem:[%s26132_s8 + $0x3c0] ss:$48 sps:$4 sm:$0xff]  }
 0x8e3   : > { %13975 = vmatprep.subr.bf16.mxu1 %v23871_v14  ;;  %13933 = vmatpush2.bf16.msra.mxu0 %v23866_v32  ;;  %v23899_v57 = vld [vmem:[%s26132_s8 + $0x9c0] ss:$48 sps:$4 sm:$0xff]   ;;  %v23904_v14 = vld [vmem:[%s26132_s8 + $0x364] ss:$48 sps:$4 sm:$0xff]  }
 0x8e4   : > { %10153 = vadd.xlane.f32.xlu1 %v10152_v9  ;;  %13934 = vmatprep.subr.bf16.mxu0 %v23874_v7  ;;  %v23907_v32 = vld [vmem:[%s26132_s8 + $0x964] ss:$48 sps:$4 sm:$0xff]  }
 0x8e5   : > { %v27997_v7 = vld [vmem:[%s26446_s3 + $0x28] sm:$0xff] }
 0x8e6   : > { %13976 = vmatpush2.bf16.msra.mxu1 %v23869_v52  ;;  %v23902_v52 = vld [vmem:[%s26132_s8 + $0x360] ss:$48 sps:$4 sm:$0xff]  }
 0x8e7   : > { %13977 = vmatprep.subr.bf16.mxu1 %v23877_v49  ;;  %13935 = vmatpush2.bf16.msra.mxu0 %v23872_v46  ;;  %v10237_v49 = vrot.slane %v27997_v7, %v27788_v47 }
 0x8e8   : > { %13936 = vmatprep.subr.bf16.mxu0 %v23880_v37 }
 0x8ea   : > { %13978 = vmatpush2.bf16.msra.mxu1 %v23875_v17 }
 0x8eb   : > { %13979 = vmatprep.subr.bf16.mxu1 %v23883_v44  ;;  %13937 = vmatpush2.bf16.msra.mxu0 %v23878_v48 }
 0x8ec   : > { %13938 = vmatprep.subr.bf16.mxu0 %v23886_v10 }
 0x8ee   : > { %13980 = vmatpush2.bf16.msra.mxu1 %v23881_v23 }
 0x8ef   : > { %13981 = vmatprep.subr.bf16.mxu1 %v23889_v2  ;;  %13939 = vmatpush2.bf16.msra.mxu0 %v23884_v55  ;;  %v28016_v2 = vld [vmem:[%s26446_s3 + $0x40] sm:$0xff] }
 0x8f0   : > { %13940 = vmatprep.subr.bf16.mxu0 %v23892_v43 }
 0x8f2   : > { %13982 = vmatpush2.bf16.msra.mxu1 %v23887_v40 }
 0x8f3   : > { %13983 = vmatprep.subr.bf16.mxu1 %v23895_v22  ;;  %13941 = vmatpush2.bf16.msra.mxu0 %v23890_v42 }
 0x8f4   : > { %13942 = vmatprep.subr.bf16.mxu0 %v23898_v54 }
 0x8f6   : > { %13984 = vmatpush2.bf16.msra.mxu1 %v23893_v34 }
 0x8f7   : > { %13985 = vmatprep.subr.bf16.mxu1 %v23901_v19  ;;  %13943 = vmatpush2.bf16.msra.mxu0 %v23896_v63 }
 0x8f8   : > { %13944 = vmatprep.subr.bf16.mxu0 %v23904_v14 }
 0x8fa   : > { %13986 = vmatpush2.bf16.msra.mxu1 %v23899_v57 }
 0x8fb   : > { %13987 = vmatprep.subr.bf16.mxu1 %v23907_v32  ;;  %13945 = vmatpush2.bf16.msra.mxu0 %v23902_v52 }
 0x969   : > { %v10147_v27 = vpop.xlane.xlu0 %10146 }
 0x96a   : > { %v10156_v62 = vmul.f32 0.0013020834, %v10147_v27  ;;  %v23905_v27 = vld [vmem:[%s26132_s8 + $0x960] ss:$48 sps:$4 sm:$0xff]  }
 0x96b   : > { %13988 = vmatpush2.bf16.msra.mxu1 %v23905_v27 }
 0x96c   : > { %v27893_v3 = vsub.f32 %v27810_v26, %v10156_v62  ;;  %v27896_v13 = vsub.f32 %v27807_v21, %v10156_v62  ;;  %v27899_v35 = vsub.f32 %v27814_v4, %v10156_v62  ;;  %v27902_v38 = vsub.f32 %v27827_v41, %v10156_v62 }
 0x96d   : > { %v10154_v12 = vpop.xlane.xlu1 %10153  ;;  %v27909_v26 = vsub.f32 %v27840_v31, %v10156_v62  ;;  %v27923_v9 = vsub.f32 %v27843_v61, %v10156_v62  ;;  %v23910_v62 = vld [vmem:[%s26132_s8 + $0x304] ss:$48 sps:$4 sm:$0xff]  }
 0x96e   : > { %v10157_v50 = vmul.f32 0.0013020834, %v10154_v12  ;;  %v10170_v18 = vmul.f32 %v27893_v3, %v27893_v3  ;;  %v10171_v0 = vmul.f32 %v27896_v13, %v27896_v13  ;;  %v10172_v21 = vmul.f32 %v27899_v35, %v27899_v35  ;;  %v23913_v12 = vld [vmem:[%s26132_s8 + $0x904] ss:$48 sps:$4 sm:$0xff]   ;;  %13946 = vmatprep.subr.bf16.mxu0 %v23910_v62 }
 0x96f   : > { %v10173_v31 = vmul.f32 %v27902_v38, %v27902_v38  ;;  %v10175_v6 = vmul.f32 %v27923_v9, %v27923_v9  ;;  %13989 = vmatprep.subr.bf16.mxu1 %v23913_v12 }
 0x970   : > { %v10182_v1 = vadd.f32 %v10171_v0, %v10170_v18  ;;  %v27914_v4 = vsub.f32 %v27823_v24, %v10157_v50  ;;  %v27917_v41 = vsub.f32 %v27820_v60, %v10157_v50  ;;  %v27920_v51 = vsub.f32 %v27830_v30, %v10157_v50  ;;  %v23911_v18 = vld [vmem:[%s26132_s8 + $0x900] ss:$48 sps:$4 sm:$0xff]   ;;  %v23916_v0 = vld [vmem:[%s26132_s8 + $0xea4] ss:$48 sps:$4 sm:$0xff]  }
 0x971   : > { %v27928_v11 = vsub.f32 %v27837_v29, %v10157_v50  ;;  %v10174_v30 = vmul.f32 %v27909_v26, %v27909_v26  ;;  %v27937_v61 = vsub.f32 %v27848_v20, %v10157_v50  ;;  %v27944_v5 = vsub.f32 %v27852_v39, %v10157_v50  ;;  %v23908_v50 = vld [vmem:[%s26132_s8 + $0x300] ss:$48 sps:$4 sm:$0xff]   ;;  %13990 = vmatpush2.bf16.msra.mxu1 %v23911_v18 }
 0x972   : > { %v10183_v15 = vadd.f32 %v10182_v1, %v10172_v21  ;;  %v10176_v24 = vmul.f32 %v27914_v4, %v27914_v4  ;;  %v10177_v60 = vmul.f32 %v27917_v41, %v27917_v41  ;;  %v10178_v8 = vmul.f32 %v27920_v51, %v27920_v51  ;;  %13947 = vmatpush2.bf16.msra.mxu0 %v23908_v50  ;;  %v23919_v21 = vld [vmem:[%s26132_s8 + $0x2ac] ss:$48 sps:$4 sm:$0xff]  }
 0x973   : > { %v10179_v45 = vmul.f32 %v27928_v11, %v27928_v11  ;;  %v10180_v16 = vmul.f32 %v27937_v61, %v27937_v61  ;;  %v10181_v36 = vmul.f32 %v27944_v5, %v27944_v5  ;;  %14002 = vmatprep.subr.bf16.mxu0 %v23916_v0  ;;  %14045 = vmatprep.subr.bf16.mxu1 %v23919_v21 }
 0x974   : > { %v10184_v58 = vadd.f32 %v10183_v15, %v10173_v31  ;;  %v10189_v29 = vadd.f32 %v10177_v60, %v10176_v24 }
 0x976   : > { %v10185_v56 = vadd.f32 %v10184_v58, %v10174_v30  ;;  %v10190_v20 = vadd.f32 %v10189_v29, %v10178_v8  ;;  %v25626_v58 = vld [vmem:[%s26446_s3 + $0x18] sm:$0xff]  ;;  %v25627_v29 = vld [vmem:[%s26446_s3 + $0x20] sm:$0xff] }
 0x977   : > { %v10221_v8 = vrot.slane %v25626_v58, %v27788_v47 }
 0x978   : > { %v10186_v28 = vadd.f32 %v10185_v56, %v10175_v6  ;;  %v10191_v25 = vadd.f32 %v10190_v20, %v10179_v45  ;;  %v10229_v6 = vrot.slane %v25627_v29, %v27788_v47  ;;  %v10217_v56 = vrot.slane %v25626_v58, %v27791_v33  ;;  %v25628_v20 = vld [vmem:[%s26446_s3 + $0x30] sm:$0xff] }
 0x979   : > { %v10225_v45 = vrot.slane %v25627_v29, %v27791_v33 }
 0x97a   : > { %10187 = vadd.xlane.f32.xlu0 %v10186_v28  ;;  %v10192_v53 = vadd.f32 %v10191_v25, %v10180_v16  ;;  %v10287_v28 = vrot.slane %v25628_v20, %v27788_v47  ;;  %v25629_v16 = vld [vmem:[%s26446_s3 + $0x38] sm:$0xff]  ;;  %v10259_v37 = vrot.slane %v10229_v6, %v27791_v33  ;;  %v10247_v23 = vrot.slane %v10217_v56, %v27791_v33 }
 0x97b   : > { %v10295_v25 = vrot.slane %v25629_v16, %v27788_v47  ;;  %v10291_v44 = vrot.slane %v25629_v16, %v27791_v33  ;;  %v10255_v10 = vrot.slane %v10225_v45, %v27791_v33  ;;  %v23922_v56 = vld [vmem:[%s26132_s8 + $0xe44] ss:$48 sps:$4 sm:$0xff]   ;;  %v23925_v45 = vld [vmem:[%s26132_s8 + $0x24c] ss:$48 sps:$4 sm:$0xff]   ;;  %v23923_v16 = vld [vmem:[%s26132_s8 + $0x248] ss:$48 sps:$4 sm:$0xff]  }
 0x97c   : > { %v10193_v39 = vadd.f32 %v10192_v53, %v10181_v36  ;;  %v10251_v53 = vrot.slane %v10221_v8, %v27791_v33  ;;  %v10317_v40 = vrot.slane %v10287_v28, %v27791_v33  ;;  %v23920_v28 = vld [vmem:[%s26132_s8 + $0xe40] ss:$48 sps:$4 sm:$0xff]  }
 0x97d   : > { %v10321_v63 = vrot.slane %v10291_v44, %v27791_v33  ;;  %v23935_v44 = vld [vmem:[%s26132_s8 + $0x188] ss:$48 sps:$4 sm:$0xff]  }
 0x97e   : > { %10194 = vadd.xlane.f32.xlu1 %v10193_v39  ;;  %v10283_v39 = vrot.slane %v25628_v20, %v27791_v33 }
 0xa03   : > { %v10188_v1 = vpop.xlane.xlu0 %10187 }
 0xa04   : > { %v10196_v31 = vmul.f32 0.0013020834, %v10188_v1 }
 0xa06   : > { %v10198_v15 = vadd.f32 1e-12, %v10196_v31 }
 0xa07   : > { %v10195_v24 = vpop.xlane.xlu1 %10194 }
 0xa08   : > { %25554 = vrsqrt.f32 %v10198_v15  ;;  %v10197_v60 = vmul.f32 0.0013020834, %v10195_v24 }
 0xa0a   : > { %v10199_v30 = vadd.f32 1e-12, %v10197_v60  ;;  %v23914_v60 = vld [vmem:[%s26132_s8 + $0xea0] ss:$48 sps:$4 sm:$0xff]  }
 0xa0c   : > { %25556 = vrsqrt.f32 %v10199_v30  ;;  %v23917_v30 = vld [vmem:[%s26132_s8 + $0x2a8] ss:$48 sps:$4 sm:$0xff]  }
 0xa15   : > { %v27992_v36 = vpop.eup %25554 }
 0xa16   : > { %v10203_v46 = vmul.f32 %v27992_v36, %v27896_v13  ;;  %v10205_v17 = vmul.f32 %v27992_v36, %v27902_v38  ;;  %v10202_v48 = vmul.f32 %v27992_v36, %v27893_v3  ;;  %v10204_v55 = vmul.f32 %v27992_v36, %v27899_v35 }
 0xa17   : > { %v10325_v13 = vrot.slane %v10295_v25, %v27791_v33  ;;  %v10303_v38 = vrot.slane %v28016_v2, %v27788_v47  ;;  %v10313_v3 = vrot.slane %v10283_v39, %v27791_v33  ;;  %v10207_v42 = vmul.f32 %v27992_v36, %v27923_v9  ;;  %v23928_v25 = vld [vmem:[%s26132_s8 + $0xde4] ss:$48 sps:$4 sm:$0xff]   ;;  %v23926_v39 = vld [vmem:[%s26132_s8 + $0xde0] ss:$48 sps:$4 sm:$0xff]  }
 0xa18   : > { %v10269_v22 = vmul.f32 %v10251_v53, %v10203_v46  ;;  %v10267_v35 = vrot.slane %v10237_v49, %v27791_v33  ;;  %v10271_v19 = vmul.f32 %v10259_v37, %v10205_v17  ;;  %v10268_v57 = vmul.f32 %v10247_v23, %v10202_v48  ;;  %v23929_v49 = vld [vmem:[%s26132_s8 + $0x1e8] ss:$48 sps:$4 sm:$0xff]   ;;  %v23934_v46 = vld [vmem:[%s26132_s8 + $0xd84] ss:$48 sps:$4 sm:$0xff]   ;;  %v23937_v17 = vld [vmem:[%s26132_s8 + $0x18c] ss:$48 sps:$4 sm:$0xff]  }
 0xa19   : > { %v28020_v43 = vpop.eup %25556  ;;  %v10270_v32 = vmul.f32 %v10255_v10, %v10204_v55  ;;  %v23940_v48 = vld [vmem:[%s26132_s8 + $0xd24] ss:$48 sps:$4 sm:$0xff]   ;;  %v23938_v55 = vld [vmem:[%s26132_s8 + $0xd20] ss:$48 sps:$4 sm:$0xff]  }
 0xa1a   : > { %v10209_v34 = vmul.f32 %v28020_v43, %v27917_v41  ;;  %v10211_v54 = vmul.f32 %v28020_v43, %v27928_v11  ;;  %v10208_v47 = vmul.f32 %v28020_v43, %v27914_v4  ;;  %v10210_v14 = vmul.f32 %v28020_v43, %v27920_v51 }
 0xa1b   : > { %v10213_v27 = vmul.f32 %v28020_v43, %v27944_v5  ;;  %v10333_v41 = vrot.slane %v10303_v38, %v27791_v33  ;;  %v28038_v11 = vadd.f32 %v10317_v40, %v10269_v22  ;;  %v10273_v50 = vmul.f32 %v10267_v35, %v10207_v42  ;;  %v23944_v38 = vld [vmem:[%s26132_s8 + $0xcc0] ss:$48 sps:$4 sm:$0xff]   ;;  %v23947_v22 = vld [vmem:[%s26132_s8 + $0xc8] ss:$48 sps:$4 sm:$0xff]   ;;  %v23955_v42 = vld [vmem:[%s26132_s8 + $0x6c] ss:$48 sps:$4 sm:$0xff]  }
 0xa1c   : > { %v10275_v9 = vmul.f32 %v10251_v53, %v10209_v34  ;;  %v10277_v52 = vmul.f32 %v10259_v37, %v10211_v54  ;;  %v10274_v62 = vmul.f32 %v10247_v23, %v10208_v47  ;;  %v10276_v12 = vmul.f32 %v10255_v10, %v10210_v14  ;;  %v23931_v53 = vld [vmem:[%s26132_s8 + $0x1ec] ss:$48 sps:$4 sm:$0xff]   ;;  %v23932_v37 = vld [vmem:[%s26132_s8 + $0xd80] ss:$48 sps:$4 sm:$0xff]   ;;  %v23941_v10 = vld [vmem:[%s26132_s8 + $0x128] ss:$48 sps:$4 sm:$0xff]  }
 0xa1d   : > { %v28042_v18 = vadd.f32 %v10325_v13, %v10271_v19  ;;  %v10279_v0 = vmul.f32 %v10267_v35, %v10213_v27  ;;  %v28046_v21 = vadd.f32 %v10313_v3, %v10268_v57  ;;  %v28050_v1 = vadd.f32 %v10321_v63, %v10270_v32  ;;  %v23943_v23 = vld [vmem:[%s26132_s8 + $0x12c] ss:$48 sps:$4 sm:$0xff]   ;;  %v23950_v35 = vld [vmem:[%s26132_s8 + $0xc60] ss:$48 sps:$4 sm:$0xff]   ;;  %v23953_v34 = vld [vmem:[%s26132_s8 + $0x68] ss:$48 sps:$4 sm:$0xff]  }
 0xa1e   : > { %v28040_v4 = vadd.f32 %v10317_v40, %v10275_v9  ;;  %v28044_v51 = vadd.f32 %v10325_v13, %v10277_v52  ;;  %v28048_v5 = vadd.f32 %v10313_v3, %v10274_v62  ;;  %v28052_v31 = vadd.f32 %v10321_v63, %v10276_v12  ;;  %v23946_v40 = vld [vmem:[%s26132_s8 + $0xcc4] ss:$48 sps:$4 sm:$0xff]   ;;  %v23949_v13 = vld [vmem:[%s26132_s8 + $0xcc] ss:$48 sps:$4 sm:$0xff]   ;;  %v23956_v63 = vld [vmem:[%s26132_s8 + $0xc00] ss:$48 sps:$4 sm:$0xff]  }
 0xa1f   : > { %29920 = vst [vmem:[#allocation22_spill] sm:$0xff] %v28042_v18  ;;  %29923 = vst [vmem:[#allocation26_spill] sm:$0xff] %v28050_v1  ;;  %v28064_v58 = vadd.f32 %v10333_v41, %v10279_v0  ;;  %v28074_v6 = vadd.f32 %v10333_v41, %v10273_v50  ;;  %v23952_v3 = vld [vmem:[%s26132_s8 + $0xc64] ss:$48 sps:$4 sm:$0xff]   ;;  %v23961_v19 = vld [vmem:[%s26132_s8 + $0xc] ss:$48 sps:$4 sm:$0xff]  }
 0xa20   : > { %29919 = vst [vmem:[#allocation17_spill] sm:$0xff] %v28040_v4  ;;  %29921 = vst [vmem:[#allocation31_spill] sm:$0xff] %v28044_v51  ;;  %v28056_v15 = vpack.c.bf16 %v28040_v4, %v28038_v11  ;;  %v28060_v24 = vpack.c.bf16 %v28044_v51, %v28042_v18  ;;  %v28068_v8 = vpack.c.bf16 %v28048_v5, %v28046_v21  ;;  %v23958_v54 = vld [vmem:[%s26132_s8 + $0xc04] ss:$48 sps:$4 sm:$0xff]   ;;  %v23959_v47 = vld [vmem:[%s26132_s8 + $0x8] ss:$48 sps:$4 sm:$0xff]  }
 0xa21   : > { %29922 = vst [vmem:[#allocation19_spill] sm:$0xff] %v28048_v5  ;;  %29924 = vst [vmem:[#allocation37_spill] sm:$0xff] %v28052_v31  ;;  %v28072_v29 = vpack.c.bf16 %v28052_v31, %v28050_v1  ;;  %v28084_v20 = vpack.c.bf16 %v28064_v58, %v28074_v6  ;;  %v23964_v57 = vld [vmem:[%s26132_s8 + $0x11a4] ss:$48 sps:$4 sm:$0xff]   ;;  %v23967_v14 = vld [vmem:[%s26132_s8 + $0x5ac] ss:$48 sps:$4 sm:$0xff]  }
 0xa22   : > { %29925 = vst [vmem:[#allocation28_spill] sm:$0xff] %v28064_v58  ;;  %29926 = vst [vmem:[#allocation36_spill] sm:$0xff] %v28074_v6  ;;  %13948 = vmatprep.mubr.bf16.mxu0 %v28056_v15  ;;  %13991 = vmatprep.mubr.bf16.mxu1 %v28060_v24  ;;  %v23962_v32 = vld [vmem:[%s26132_s8 + $0x11a0] ss:$48 sps:$4 sm:$0xff]   ;;  %v23965_v9 = vld [vmem:[%s26132_s8 + $0x5a8] ss:$48 sps:$4 sm:$0xff]  }
 0xa23   : > { %13949 = vmatmul.mubr.bf16.vlgmr.msra.gmra.mxu0 %v28068_v8  ;;  %13992 = vmatmul.mubr.bf16.vlgmr.msra.gmra.mxu1 %v28072_v29  ;;  %v23970_v52 = vld [vmem:[%s26132_s8 + $0x1144] ss:$48 sps:$4 sm:$0xff]   ;;  %v23973_v27 = vld [vmem:[%s26132_s8 + $0x54c] ss:$48 sps:$4 sm:$0xff]   ;;  %v23968_v41 = vld [vmem:[%s26132_s8 + $0x1140] ss:$48 sps:$4 sm:$0xff]  }
 0xa24   : > { %14003 = vmatpush1.bf16.msra.mxu0 %v23914_v60  ;;  %14046 = vmatpush1.bf16.msra.mxu1 %v23917_v30  ;;  %v23971_v62 = vld [vmem:[%s26132_s8 + $0x548] ss:$48 sps:$4 sm:$0xff]   ;;  %v23976_v12 = vld [vmem:[%s26132_s8 + $0x10e4] ss:$48 sps:$4 sm:$0xff]   ;;  %v23979_v50 = vld [vmem:[%s26132_s8 + $0x4ec] ss:$48 sps:$4 sm:$0xff]  }
 0xa25   : > { %14034 = vmatprep.mubr.bf16.mxu0 %v28084_v20  ;;  %14077 = vmatprep.mubr.bf16.mxu1 %v28056_v15  ;;  %v23974_v0 = vld [vmem:[%s26132_s8 + $0x10e0] ss:$48 sps:$4 sm:$0xff]   ;;  %v23977_v60 = vld [vmem:[%s26132_s8 + $0x4e8] ss:$48 sps:$4 sm:$0xff]   ;;  %v23982_v30 = vld [vmem:[%s26132_s8 + $0x1084] ss:$48 sps:$4 sm:$0xff]  }
 0xa26   : > { %14004 = vmatprep.subr.bf16.mxu0 %v23922_v56  ;;  %14047 = vmatprep.subr.bf16.mxu1 %v23925_v45  ;;  %v23985_v56 = vld [vmem:[%s26132_s8 + $0x48c] ss:$48 sps:$4 sm:$0xff]   ;;  %v23980_v45 = vld [vmem:[%s26132_s8 + $0x1080] ss:$48 sps:$4 sm:$0xff]  }
 0xa27   : > { %v25640_v18 = vld [vmem:[%s26446_s3 + $0x38] sm:$0xff] }
 0xa28   : > { %14005 = vmatpush1.bf16.msra.mxu0 %v23920_v28  ;;  %14048 = vmatpush1.bf16.msra.mxu1 %v23923_v16  ;;  %v23983_v28 = vld [vmem:[%s26132_s8 + $0x488] ss:$48 sps:$4 sm:$0xff]   ;;  %v23988_v16 = vld [vmem:[%s26132_s8 + $0x1024] ss:$48 sps:$4 sm:$0xff]  }
 0xa29   : > { %14006 = vmatprep.subr.bf16.mxu0 %v23928_v25  ;;  %14049 = vmatprep.subr.bf16.mxu1 %v23931_v53  ;;  %v23991_v25 = vld [vmem:[%s26132_s8 + $0x42c] ss:$48 sps:$4 sm:$0xff]   ;;  %v23986_v53 = vld [vmem:[%s26132_s8 + $0x1020] ss:$48 sps:$4 sm:$0xff]  }
 0xa2c   : > { %14007 = vmatpush1.bf16.msra.mxu0 %v23926_v39  ;;  %14050 = vmatpush1.bf16.msra.mxu1 %v23929_v49  ;;  %v23989_v39 = vld [vmem:[%s26132_s8 + $0x428] ss:$48 sps:$4 sm:$0xff]   ;;  %v23994_v49 = vld [vmem:[%s26132_s8 + $0xfc4] ss:$48 sps:$4 sm:$0xff]  }
 0xa2d   : > { %14008 = vmatprep.subr.bf16.mxu0 %v23934_v46  ;;  %14051 = vmatprep.subr.bf16.mxu1 %v23937_v17  ;;  %v23997_v46 = vld [vmem:[%s26132_s8 + $0x3cc] ss:$48 sps:$4 sm:$0xff]   ;;  %v10233_v17 = vrot.slane %v27997_v7, %v27791_v33 }
 0xa2f   : > { %v10263_v7 = vrot.slane %v10233_v17, %v27791_v33  ;;  %v24049_v17 = vld [vmem:[%s26132_s8 + $0xc68] ss:$48 sps:$4 sm:$0xff]  }
 0xa30   : > { %14009 = vmatpush1.bf16.msra.mxu0 %v23932_v37  ;;  %14052 = vmatpush1.bf16.msra.mxu1 %v23935_v44  ;;  %v23992_v37 = vld [vmem:[%s26132_s8 + $0xfc0] ss:$48 sps:$4 sm:$0xff]   ;;  %v23995_v44 = vld [vmem:[%s26132_s8 + $0x3c8] ss:$48 sps:$4 sm:$0xff]  }
 0xa31   : > { %14010 = vmatprep.subr.bf16.mxu0 %v23940_v48  ;;  %14053 = vmatprep.subr.bf16.mxu1 %v23943_v23  ;;  %v24000_v48 = vld [vmem:[%s26132_s8 + $0xf64] ss:$48 sps:$4 sm:$0xff]   ;;  %v24003_v23 = vld [vmem:[%s26132_s8 + $0x36c] ss:$48 sps:$4 sm:$0xff]  }
 0xa34   : > { %14011 = vmatpush1.bf16.msra.mxu0 %v23938_v55  ;;  %14054 = vmatpush1.bf16.msra.mxu1 %v23941_v10  ;;  %v10212_v55 = vmul.f32 %v28020_v43, %v27937_v61  ;;  %v10206_v10 = vmul.f32 %v27992_v36, %v27909_v26  ;;  %v24009_v61 = vld [vmem:[%s26132_s8 + $0x30c] ss:$48 sps:$4 sm:$0xff]  }
 0xa35   : > { %14012 = vmatprep.subr.bf16.mxu0 %v23946_v40  ;;  %14055 = vmatprep.subr.bf16.mxu1 %v23949_v13  ;;  %v10299_v40 = vrot.slane %v28016_v2, %v27791_v33  ;;  %v23998_v13 = vld [vmem:[%s26132_s8 + $0xf60] ss:$48 sps:$4 sm:$0xff]  }
 0xa36   : > { %v10278_v43 = vmul.f32 %v10263_v7, %v10212_v55  ;;  %v10272_v26 = vmul.f32 %v10263_v7, %v10206_v10  ;;  %v24004_v2 = vld [vmem:[%s26132_s8 + $0xf00] ss:$48 sps:$4 sm:$0xff]   ;;  %v24060_v55 = vld [vmem:[%s26132_s8 + $0xbac] ss:$48 sps:$4 sm:$0xff]   ;;  %v24058_v7 = vld [vmem:[%s26132_s8 + $0xba8] ss:$48 sps:$4 sm:$0xff]  }
 0xa37   : > { %v10329_v36 = vrot.slane %v10299_v40, %v27791_v33  ;;  %v24010_v33 = vld [vmem:[%s26132_s8 + $0x8a8] ss:$48 sps:$4 sm:$0xff]   ;;  %v24063_v10 = vld [vmem:[%s26132_s8 + $0x11ac] ss:$48 sps:$4 sm:$0xff]  }
 0xa38   : > { %14013 = vmatpush1.bf16.msra.mxu0 %v23944_v38  ;;  %14056 = vmatpush1.bf16.msra.mxu1 %v23947_v22  ;;  %v24001_v38 = vld [vmem:[%s26132_s8 + $0x368] ss:$48 sps:$4 sm:$0xff]   ;;  %v24006_v22 = vld [vmem:[%s26132_s8 + $0xf04] ss:$48 sps:$4 sm:$0xff]  }
 0xa39   : > { %14014 = vmatprep.subr.bf16.mxu0 %v23952_v3  ;;  %14057 = vmatprep.subr.bf16.mxu1 %v23955_v42  ;;  %v24007_v3 = vld [vmem:[%s26132_s8 + $0x308] ss:$48 sps:$4 sm:$0xff]   ;;  %v28156_v42 = vadd.f32 %v10329_v36, %v10278_v43  ;;  %v24072_v43 = vld [vmem:[%s26132_s8 + $0xaec] ss:$48 sps:$4 sm:$0xff]  }
 0xa3a   : > { %v24061_v40 = vld [vmem:[%s26132_s8 + $0x11a8] ss:$48 sps:$4 sm:$0xff]  }
 0xa3b   : > { %29927 = vst [vmem:[#allocation21_spill] sm:$0xff] %v28156_v42 }
 0xa3c   : > { %14015 = vmatpush1.bf16.msra.mxu0 %v23950_v35  ;;  %14058 = vmatpush1.bf16.msra.mxu1 %v23953_v34  ;;  %v24012_v35 = vld [vmem:[%s26132_s8 + $0x8ac] ss:$48 sps:$4 sm:$0xff]  }
 0xa3d   : > { %14016 = vmatprep.subr.bf16.mxu0 %v23958_v54  ;;  %14059 = vmatprep.subr.bf16.mxu1 %v23961_v19  ;;  %v24015_v34 = vld [vmem:[%s26132_s8 + $0xeac] ss:$48 sps:$4 sm:$0xff]   ;;  %v28160_v54 = vadd.f32 %v10329_v36, %v10272_v26  ;;  %v24070_v36 = vld [vmem:[%s26132_s8 + $0xae8] ss:$48 sps:$4 sm:$0xff]  }
 0xa3e   : > { %v24075_v26 = vld [vmem:[%s26132_s8 + $0x10ec] ss:$48 sps:$4 sm:$0xff]  }
 0xa3f   : > { %29928 = vst [vmem:[#allocation29_spill] sm:$0xff] %v28160_v54  ;;  %v28165_v19 = vpack.c.bf16 %v28156_v42, %v28160_v54 }
 0xa40   : > { %14017 = vmatpush1.bf16.msra.mxu0 %v23956_v63  ;;  %14060 = vmatpush1.bf16.msra.mxu1 %v23959_v47  ;;  %v24013_v63 = vld [vmem:[%s26132_s8 + $0xea8] ss:$48 sps:$4 sm:$0xff]   ;;  %v24018_v47 = vld [vmem:[%s26132_s8 + $0x84c] ss:$48 sps:$4 sm:$0xff]  }
 0xa41   : > { %14018 = vmatprep.subr.bf16.mxu0 %v23964_v57  ;;  %14061 = vmatprep.subr.bf16.mxu1 %v23967_v14  ;;  %v24021_v57 = vld [vmem:[%s26132_s8 + $0xe4c] ss:$48 sps:$4 sm:$0xff]   ;;  %v24016_v14 = vld [vmem:[%s26132_s8 + $0x848] ss:$48 sps:$4 sm:$0xff]  }
 0xa44   : > { %14019 = vmatpush2.bf16.msra.mxu0 %v23962_v32  ;;  %14062 = vmatpush2.bf16.msra.mxu1 %v23965_v9  ;;  %v24019_v32 = vld [vmem:[%s26132_s8 + $0xe48] ss:$48 sps:$4 sm:$0xff]   ;;  %v24024_v9 = vld [vmem:[%s26132_s8 + $0x7ec] ss:$48 sps:$4 sm:$0xff]  }
 0xa45   : > { %14020 = vmatprep.subr.bf16.mxu0 %v23970_v52  ;;  %14063 = vmatprep.subr.bf16.mxu1 %v23973_v27  ;;  %v24027_v52 = vld [vmem:[%s26132_s8 + $0xdec] ss:$48 sps:$4 sm:$0xff]   ;;  %v24022_v27 = vld [vmem:[%s26132_s8 + $0x7e8] ss:$48 sps:$4 sm:$0xff]  }
 0xa48   : > { %14021 = vmatpush2.bf16.msra.mxu0 %v23968_v41  ;;  %14064 = vmatpush2.bf16.msra.mxu1 %v23971_v62  ;;  %v24025_v41 = vld [vmem:[%s26132_s8 + $0xde8] ss:$48 sps:$4 sm:$0xff]   ;;  %v24030_v62 = vld [vmem:[%s26132_s8 + $0x78c] ss:$48 sps:$4 sm:$0xff]  }
 0xa49   : > { %14022 = vmatprep.subr.bf16.mxu0 %v23976_v12  ;;  %14065 = vmatprep.subr.bf16.mxu1 %v23979_v50  ;;  %v24033_v12 = vld [vmem:[%s26132_s8 + $0xd8c] ss:$48 sps:$4 sm:$0xff]   ;;  %v24028_v50 = vld [vmem:[%s26132_s8 + $0x788] ss:$48 sps:$4 sm:$0xff]  }
 0xa4c   : > { %14023 = vmatpush2.bf16.msra.mxu0 %v23974_v0  ;;  %14066 = vmatpush2.bf16.msra.mxu1 %v23977_v60  ;;  %v24031_v0 = vld [vmem:[%s26132_s8 + $0xd88] ss:$48 sps:$4 sm:$0xff]   ;;  %v24036_v60 = vld [vmem:[%s26132_s8 + $0x72c] ss:$48 sps:$4 sm:$0xff]  }
 0xa4d   : > { %14024 = vmatprep.subr.bf16.mxu0 %v23982_v30  ;;  %14067 = vmatprep.subr.bf16.mxu1 %v23985_v56  ;;  %v24039_v30 = vld [vmem:[%s26132_s8 + $0xd2c] ss:$48 sps:$4 sm:$0xff]   ;;  %v24034_v56 = vld [vmem:[%s26132_s8 + $0x728] ss:$48 sps:$4 sm:$0xff]  }
 0xa50   : > { %14025 = vmatpush2.bf16.msra.mxu0 %v23980_v45  ;;  %14068 = vmatpush2.bf16.msra.mxu1 %v23983_v28  ;;  %v24037_v45 = vld [vmem:[%s26132_s8 + $0xd28] ss:$48 sps:$4 sm:$0xff]   ;;  %v24042_v28 = vld [vmem:[%s26132_s8 + $0x6cc] ss:$48 sps:$4 sm:$0xff]  }
 0xa51   : > { %14026 = vmatprep.subr.bf16.mxu0 %v23988_v16  ;;  %14069 = vmatprep.subr.bf16.mxu1 %v23991_v25  ;;  %v24045_v16 = vld [vmem:[%s26132_s8 + $0xccc] ss:$48 sps:$4 sm:$0xff]   ;;  %v24040_v25 = vld [vmem:[%s26132_s8 + $0x6c8] ss:$48 sps:$4 sm:$0xff]  }
 0xa54   : > { %14027 = vmatpush2.bf16.msra.mxu0 %v23986_v53  ;;  %14070 = vmatpush2.bf16.msra.mxu1 %v23989_v39  ;;  %v24043_v53 = vld [vmem:[%s26132_s8 + $0xcc8] ss:$48 sps:$4 sm:$0xff]   ;;  %v24048_v39 = vld [vmem:[%s26132_s8 + $0x66c] ss:$48 sps:$4 sm:$0xff]  }
 0xa55   : > { %14028 = vmatprep.subr.bf16.mxu0 %v23994_v49  ;;  %14071 = vmatprep.subr.bf16.mxu1 %v23997_v46  ;;  %v24051_v49 = vld [vmem:[%s26132_s8 + $0xc6c] ss:$48 sps:$4 sm:$0xff]   ;;  %v24046_v46 = vld [vmem:[%s26132_s8 + $0x668] ss:$48 sps:$4 sm:$0xff]  }
 0xa58   : > { %14029 = vmatpush2.bf16.msra.mxu0 %v23992_v37  ;;  %14072 = vmatpush2.bf16.msra.mxu1 %v23995_v44  ;;  %v24054_v37 = vld [vmem:[%s26132_s8 + $0x60c] ss:$48 sps:$4 sm:$0xff]  }
 0xa59   : > { %14030 = vmatprep.subr.bf16.mxu0 %v24000_v48  ;;  %14073 = vmatprep.subr.bf16.mxu1 %v24003_v23  ;;  %v24057_v44 = vld [vmem:[%s26132_s8 + $0xc0c] ss:$48 sps:$4 sm:$0xff]   ;;  %v24052_v48 = vld [vmem:[%s26132_s8 + $0x608] ss:$48 sps:$4 sm:$0xff]  }
 0xa5a   : > { %v24055_v23 = vld [vmem:[%s26132_s8 + $0xc08] ss:$48 sps:$4 sm:$0xff]  }
 0xa5c   : > { %14031 = vmatpush2.bf16.msra.mxu0 %v23998_v13  ;;  %14074 = vmatpush2.bf16.msra.mxu1 %v24001_v38  ;;  %v24066_v13 = vld [vmem:[%s26132_s8 + $0xb4c] ss:$48 sps:$4 sm:$0xff]  }
 0xa5d   : > { %14032 = vmatprep.subr.bf16.mxu0 %v24006_v22  ;;  %14075 = vmatprep.subr.bf16.mxu1 %v24009_v61  ;;  %v24069_v38 = vld [vmem:[%s26132_s8 + $0x114c] ss:$48 sps:$4 sm:$0xff]   ;;  %v24064_v22 = vld [vmem:[%s26132_s8 + $0xb48] ss:$48 sps:$4 sm:$0xff]  }
 0xa5e   : > { %v24067_v61 = vld [vmem:[%s26132_s8 + $0x1148] ss:$48 sps:$4 sm:$0xff]  }
 0xa60   : > { %14033 = vmatpush2.bf16.msra.mxu0 %v24004_v2  ;;  %14076 = vmatpush2.bf16.msra.mxu1 %v24007_v3  ;;  %v24073_v2 = vld [vmem:[%s26132_s8 + $0x10e8] ss:$48 sps:$4 sm:$0xff]   ;;  %v24078_v3 = vld [vmem:[%s26132_s8 + $0xa8c] ss:$48 sps:$4 sm:$0xff]  }
 0xa61   : > { %14088 = vmatprep.subr.bf16.mxu0 %v24012_v35  ;;  %14131 = vmatprep.subr.bf16.mxu1 %v24015_v34  ;;  %v24081_v35 = vld [vmem:[%s26132_s8 + $0x108c] ss:$48 sps:$4 sm:$0xff]   ;;  %v24076_v34 = vld [vmem:[%s26132_s8 + $0xa88] ss:$48 sps:$4 sm:$0xff]  }
 0xa63   : > { %14035 = vmatmul.mubr.bf16.vlgmr.msra.gmra.mxu0 %v28165_v19  ;;  %14078 = vmatmul.mubr.bf16.vlgmr.msra.gmra.mxu1 %v28068_v8 }
 0xa64   : > { %14089 = vmatpush1.bf16.msra.mxu0 %v24010_v33  ;;  %14120 = vmatprep.mubr.bf16.mxu0 %v28060_v24  ;;  %v24079_v33 = vld [vmem:[%s26132_s8 + $0x1088] ss:$48 sps:$4 sm:$0xff]  }
 0xa65   : > { %14132 = vmatpush1.bf16.msra.mxu1 %v24013_v63  ;;  %14163 = vmatprep.mubr.bf16.mxu1 %v28084_v20  ;;  %v24084_v63 = vld [vmem:[%s26132_s8 + $0xa2c] ss:$48 sps:$4 sm:$0xff]  }
 0xa66   : > { %14090 = vmatprep.subr.bf16.mxu0 %v24018_v47  ;;  %14133 = vmatprep.subr.bf16.mxu1 %v24021_v57  ;;  %v24087_v47 = vld [vmem:[%s26132_s8 + $0x102c] ss:$48 sps:$4 sm:$0xff]   ;;  %v24082_v57 = vld [vmem:[%s26132_s8 + $0xa28] ss:$48 sps:$4 sm:$0xff]  }
 0xa68   : > { %14091 = vmatpush1.bf16.msra.mxu0 %v24016_v14  ;;  %v24085_v14 = vld [vmem:[%s26132_s8 + $0x1028] ss:$48 sps:$4 sm:$0xff]  }
 0xa69   : > { %14134 = vmatpush1.bf16.msra.mxu1 %v24019_v32  ;;  %14092 = vmatprep.subr.bf16.mxu0 %v24024_v9  ;;  %v24090_v32 = vld [vmem:[%s26132_s8 + $0x9cc] ss:$48 sps:$4 sm:$0xff]  }
 0xa6a   : > { %14135 = vmatprep.subr.bf16.mxu1 %v24027_v52  ;;  %v24093_v9 = vld [vmem:[%s26132_s8 + $0xfcc] ss:$48 sps:$4 sm:$0xff]   ;;  %v24088_v52 = vld [vmem:[%s26132_s8 + $0x9c8] ss:$48 sps:$4 sm:$0xff]  }
 0xa6c   : > { %14093 = vmatpush1.bf16.msra.mxu0 %v24022_v27  ;;  %v24091_v27 = vld [vmem:[%s26132_s8 + $0xfc8] ss:$48 sps:$4 sm:$0xff]  }
 0xa6d   : > { %14136 = vmatpush1.bf16.msra.mxu1 %v24025_v41  ;;  %14094 = vmatprep.subr.bf16.mxu0 %v24030_v62  ;;  %v24096_v41 = vld [vmem:[%s26132_s8 + $0x96c] ss:$48 sps:$4 sm:$0xff]  }
 0xa6e   : > { %14137 = vmatprep.subr.bf16.mxu1 %v24033_v12  ;;  %v24099_v62 = vld [vmem:[%s26132_s8 + $0xf6c] ss:$48 sps:$4 sm:$0xff]   ;;  %v24094_v12 = vld [vmem:[%s26132_s8 + $0x968] ss:$48 sps:$4 sm:$0xff]  }
 0xa70   : > { %14095 = vmatpush1.bf16.msra.mxu0 %v24028_v50  ;;  %v24097_v50 = vld [vmem:[%s26132_s8 + $0xf68] ss:$48 sps:$4 sm:$0xff]  }
 0xa71   : > { %14138 = vmatpush1.bf16.msra.mxu1 %v24031_v0  ;;  %14096 = vmatprep.subr.bf16.mxu0 %v24036_v60  ;;  %v24102_v0 = vld [vmem:[%s26132_s8 + $0x90c] ss:$48 sps:$4 sm:$0xff]  }
 0xa72   : > { %14139 = vmatprep.subr.bf16.mxu1 %v24039_v30  ;;  %v24105_v60 = vld [vmem:[%s26132_s8 + $0xf0c] ss:$48 sps:$4 sm:$0xff]   ;;  %v24100_v30 = vld [vmem:[%s26132_s8 + $0x908] ss:$48 sps:$4 sm:$0xff]  }
 0xa74   : > { %14097 = vmatpush1.bf16.msra.mxu0 %v24034_v56  ;;  %v24103_v56 = vld [vmem:[%s26132_s8 + $0xf08] ss:$48 sps:$4 sm:$0xff]  }
 0xa75   : > { %14140 = vmatpush1.bf16.msra.mxu1 %v24037_v45  ;;  %14098 = vmatprep.subr.bf16.mxu0 %v24042_v28  ;;  %v24108_v45 = vld [vmem:[%s26132_s8 + $0x2b4] ss:$48 sps:$4 sm:$0xff]  }
 0xa76   : > { %14141 = vmatprep.subr.bf16.mxu1 %v24045_v16  ;;  %v24111_v28 = vld [vmem:[%s26132_s8 + $0x8b4] ss:$48 sps:$4 sm:$0xff]   ;;  %v24106_v16 = vld [vmem:[%s26132_s8 + $0x2b0] ss:$48 sps:$4 sm:$0xff]  }
 0xa78   : > { %14099 = vmatpush1.bf16.msra.mxu0 %v24040_v25  ;;  %v24109_v25 = vld [vmem:[%s26132_s8 + $0x8b0] ss:$48 sps:$4 sm:$0xff]  }
 0xa79   : > { %14142 = vmatpush1.bf16.msra.mxu1 %v24043_v53  ;;  %14100 = vmatprep.subr.bf16.mxu0 %v24048_v39  ;;  %v24114_v53 = vld [vmem:[%s26132_s8 + $0x254] ss:$48 sps:$4 sm:$0xff]  }
 0xa7a   : > { %14143 = vmatprep.subr.bf16.mxu1 %v24051_v49  ;;  %v24117_v39 = vld [vmem:[%s26132_s8 + $0x854] ss:$48 sps:$4 sm:$0xff]   ;;  %v24112_v49 = vld [vmem:[%s26132_s8 + $0x250] ss:$48 sps:$4 sm:$0xff]  }
 0xa7c   : > { %14101 = vmatpush1.bf16.msra.mxu0 %v24046_v46  ;;  %v24115_v46 = vld [vmem:[%s26132_s8 + $0x850] ss:$48 sps:$4 sm:$0xff]  }
 0xa7d   : > { %14144 = vmatpush1.bf16.msra.mxu1 %v24049_v17  ;;  %14102 = vmatprep.subr.bf16.mxu0 %v24054_v37  ;;  %v24120_v17 = vld [vmem:[%s26132_s8 + $0x1f4] ss:$48 sps:$4 sm:$0xff]  }
 0xa7e   : > { %14145 = vmatprep.subr.bf16.mxu1 %v24057_v44  ;;  %v24123_v37 = vld [vmem:[%s26132_s8 + $0x7f4] ss:$48 sps:$4 sm:$0xff]   ;;  %v24118_v44 = vld [vmem:[%s26132_s8 + $0x1f0] ss:$48 sps:$4 sm:$0xff]  }
 0xa80   : > { %14103 = vmatpush1.bf16.msra.mxu0 %v24052_v48  ;;  %v24121_v48 = vld [vmem:[%s26132_s8 + $0x7f0] ss:$48 sps:$4 sm:$0xff]  }
 0xa81   : > { %14146 = vmatpush1.bf16.msra.mxu1 %v24055_v23  ;;  %14104 = vmatprep.subr.bf16.mxu0 %v24060_v55  ;;  %v24126_v23 = vld [vmem:[%s26132_s8 + $0x194] ss:$48 sps:$4 sm:$0xff]  }
 0xa82   : > { %14147 = vmatprep.subr.bf16.mxu1 %v24063_v10  ;;  %v24129_v55 = vld [vmem:[%s26132_s8 + $0x794] ss:$48 sps:$4 sm:$0xff]   ;;  %v24124_v10 = vld [vmem:[%s26132_s8 + $0x190] ss:$48 sps:$4 sm:$0xff]  }
 0xa84   : > { %14105 = vmatpush2.bf16.msra.mxu0 %v24058_v7  ;;  %v24127_v7 = vld [vmem:[%s26132_s8 + $0x790] ss:$48 sps:$4 sm:$0xff]  }
 0xa85   : > { %14148 = vmatpush2.bf16.msra.mxu1 %v24061_v40  ;;  %14106 = vmatprep.subr.bf16.mxu0 %v24066_v13  ;;  %v24132_v40 = vld [vmem:[%s26132_s8 + $0x134] ss:$48 sps:$4 sm:$0xff]  }
 0xa86   : > { %14149 = vmatprep.subr.bf16.mxu1 %v24069_v38  ;;  %v24135_v13 = vld [vmem:[%s26132_s8 + $0x734] ss:$48 sps:$4 sm:$0xff]   ;;  %v24130_v38 = vld [vmem:[%s26132_s8 + $0x130] ss:$48 sps:$4 sm:$0xff]  }
 0xa88   : > { %14107 = vmatpush2.bf16.msra.mxu0 %v24064_v22  ;;  %v24133_v22 = vld [vmem:[%s26132_s8 + $0x730] ss:$48 sps:$4 sm:$0xff]  }
 0xa89   : > { %14150 = vmatpush2.bf16.msra.mxu1 %v24067_v61  ;;  %14108 = vmatprep.subr.bf16.mxu0 %v24072_v43  ;;  %v24138_v61 = vld [vmem:[%s26132_s8 + $0xd4] ss:$48 sps:$4 sm:$0xff]  }
 0xa8a   : > { %14151 = vmatprep.subr.bf16.mxu1 %v24075_v26  ;;  %v24141_v43 = vld [vmem:[%s26132_s8 + $0x6d4] ss:$48 sps:$4 sm:$0xff]   ;;  %v24136_v26 = vld [vmem:[%s26132_s8 + $0xd0] ss:$48 sps:$4 sm:$0xff]  }
 0xa8c   : > { %14109 = vmatpush2.bf16.msra.mxu0 %v24070_v36  ;;  %v24139_v36 = vld [vmem:[%s26132_s8 + $0x6d0] ss:$48 sps:$4 sm:$0xff]  }
 0xa8d   : > { %14152 = vmatpush2.bf16.msra.mxu1 %v24073_v2  ;;  %14110 = vmatprep.subr.bf16.mxu0 %v24078_v3  ;;  %v24144_v2 = vld [vmem:[%s26132_s8 + $0x74] ss:$48 sps:$4 sm:$0xff]  }
 0xa8e   : > { %14153 = vmatprep.subr.bf16.mxu1 %v24081_v35  ;;  %v24147_v3 = vld [vmem:[%s26132_s8 + $0x674] ss:$48 sps:$4 sm:$0xff]   ;;  %v24142_v35 = vld [vmem:[%s26132_s8 + $0x70] ss:$48 sps:$4 sm:$0xff]  }
 0xa90   : > { %14111 = vmatpush2.bf16.msra.mxu0 %v24076_v34  ;;  %v24145_v34 = vld [vmem:[%s26132_s8 + $0x670] ss:$48 sps:$4 sm:$0xff]  }
 0xa91   : > { %14154 = vmatpush2.bf16.msra.mxu1 %v24079_v33  ;;  %14112 = vmatprep.subr.bf16.mxu0 %v24084_v63  ;;  %v24150_v33 = vld [vmem:[%s26132_s8 + $0x14] ss:$48 sps:$4 sm:$0xff]  }
 0xa92   : > { %14155 = vmatprep.subr.bf16.mxu1 %v24087_v47  ;;  %v24153_v63 = vld [vmem:[%s26132_s8 + $0x614] ss:$48 sps:$4 sm:$0xff]   ;;  %v24148_v47 = vld [vmem:[%s26132_s8 + $0x10] ss:$48 sps:$4 sm:$0xff]  }
 0xa94   : > { %14113 = vmatpush2.bf16.msra.mxu0 %v24082_v57  ;;  %v24151_v57 = vld [vmem:[%s26132_s8 + $0x610] ss:$48 sps:$4 sm:$0xff]  }
 0xa95   : > { %14156 = vmatpush2.bf16.msra.mxu1 %v24085_v14  ;;  %14114 = vmatprep.subr.bf16.mxu0 %v24090_v32  ;;  %v24156_v14 = vld [vmem:[%s26132_s8 + $0x5b4] ss:$48 sps:$4 sm:$0xff]  }
 0xa96   : > { %14157 = vmatprep.subr.bf16.mxu1 %v24093_v9  ;;  %v24159_v32 = vld [vmem:[%s26132_s8 + $0xbb4] ss:$48 sps:$4 sm:$0xff]   ;;  %v24154_v9 = vld [vmem:[%s26132_s8 + $0x5b0] ss:$48 sps:$4 sm:$0xff]  }
 0xa98   : > { %14115 = vmatpush2.bf16.msra.mxu0 %v24088_v52  ;;  %v24157_v52 = vld [vmem:[%s26132_s8 + $0xbb0] ss:$48 sps:$4 sm:$0xff]  }
 0xa99   : > { %14158 = vmatpush2.bf16.msra.mxu1 %v24091_v27  ;;  %14116 = vmatprep.subr.bf16.mxu0 %v24096_v41  ;;  %v24162_v27 = vld [vmem:[%s26132_s8 + $0x554] ss:$48 sps:$4 sm:$0xff]  }
 0xa9a   : > { %14159 = vmatprep.subr.bf16.mxu1 %v24099_v62  ;;  %v24165_v41 = vld [vmem:[%s26132_s8 + $0xb54] ss:$48 sps:$4 sm:$0xff]   ;;  %v24160_v62 = vld [vmem:[%s26132_s8 + $0x550] ss:$48 sps:$4 sm:$0xff]  }
 0xa9c   : > { %14117 = vmatpush2.bf16.msra.mxu0 %v24094_v12  ;;  %v24163_v12 = vld [vmem:[%s26132_s8 + $0xb50] ss:$48 sps:$4 sm:$0xff]  }
 0xa9d   : > { %14160 = vmatpush2.bf16.msra.mxu1 %v24097_v50  ;;  %14118 = vmatprep.subr.bf16.mxu0 %v24102_v0  ;;  %v24168_v50 = vld [vmem:[%s26132_s8 + $0x4f4] ss:$48 sps:$4 sm:$0xff]  }
 0xa9e   : > { %14161 = vmatprep.subr.bf16.mxu1 %v24105_v60  ;;  %v24171_v0 = vld [vmem:[%s26132_s8 + $0xaf4] ss:$48 sps:$4 sm:$0xff]   ;;  %v24166_v60 = vld [vmem:[%s26132_s8 + $0x4f0] ss:$48 sps:$4 sm:$0xff]  }
 0xaa0   : > { %14119 = vmatpush2.bf16.msra.mxu0 %v24100_v30  ;;  %v24169_v30 = vld [vmem:[%s26132_s8 + $0xaf0] ss:$48 sps:$4 sm:$0xff]  }
 0xaa1   : > { %14162 = vmatpush2.bf16.msra.mxu1 %v24103_v56  ;;  %14174 = vmatprep.subr.bf16.mxu0 %v24108_v45  ;;  %v24174_v56 = vld [vmem:[%s26132_s8 + $0x494] ss:$48 sps:$4 sm:$0xff]  }
 0xaa2   : > { %14217 = vmatprep.subr.bf16.mxu1 %v24111_v28  ;;  %v24177_v45 = vld [vmem:[%s26132_s8 + $0xa94] ss:$48 sps:$4 sm:$0xff]   ;;  %v24172_v28 = vld [vmem:[%s26132_s8 + $0x490] ss:$48 sps:$4 sm:$0xff]  }
 0xaa3   : > { %14121 = vmatmul.mubr.bf16.vlgmr.msra.gmra.mxu0 %v28072_v29 }
 0xaa4   : > { %14164 = vmatmul.mubr.bf16.vlgmr.msra.gmra.mxu1 %v28165_v19  ;;  %14175 = vmatpush1.bf16.msra.mxu0 %v24106_v16  ;;  %v24175_v16 = vld [vmem:[%s26132_s8 + $0xa90] ss:$48 sps:$4 sm:$0xff]  }
 0xaa5   : > { %14206 = vmatprep.mubr.bf16.mxu0 %v28056_v15  ;;  %14218 = vmatpush1.bf16.msra.mxu1 %v24109_v25  ;;  %v24180_v25 = vld [vmem:[%s26132_s8 + $0x434] ss:$48 sps:$4 sm:$0xff]  }
 0xaa6   : > { %14249 = vmatprep.mubr.bf16.mxu1 %v28060_v24  ;;  %14176 = vmatprep.subr.bf16.mxu0 %v24114_v53  ;;  %v24183_v53 = vld [vmem:[%s26132_s8 + $0xa34] ss:$48 sps:$4 sm:$0xff]  }
 0xaa7   : > { %14219 = vmatprep.subr.bf16.mxu1 %v24117_v39  ;;  %v24178_v39 = vld [vmem:[%s26132_s8 + $0x430] ss:$48 sps:$4 sm:$0xff]  }
 0xaa8   : > { %14177 = vmatpush1.bf16.msra.mxu0 %v24112_v49  ;;  %v24181_v49 = vld [vmem:[%s26132_s8 + $0xa30] ss:$48 sps:$4 sm:$0xff]  }
 0xaa9   : > { %14220 = vmatpush1.bf16.msra.mxu1 %v24115_v46  ;;  %14178 = vmatprep.subr.bf16.mxu0 %v24120_v17  ;;  %v24186_v46 = vld [vmem:[%s26132_s8 + $0x3d4] ss:$48 sps:$4 sm:$0xff]  }
 0xaaa   : > { %14221 = vmatprep.subr.bf16.mxu1 %v24123_v37  ;;  %v24189_v17 = vld [vmem:[%s26132_s8 + $0x9d4] ss:$48 sps:$4 sm:$0xff]   ;;  %v24184_v37 = vld [vmem:[%s26132_s8 + $0x3d0] ss:$48 sps:$4 sm:$0xff]  }
 0xaac   : > { %14179 = vmatpush1.bf16.msra.mxu0 %v24118_v44  ;;  %v24187_v44 = vld [vmem:[%s26132_s8 + $0x9d0] ss:$48 sps:$4 sm:$0xff]  }
 0xaad   : > { %14222 = vmatpush1.bf16.msra.mxu1 %v24121_v48  ;;  %14180 = vmatprep.subr.bf16.mxu0 %v24126_v23  ;;  %v24192_v48 = vld [vmem:[%s26132_s8 + $0x374] ss:$48 sps:$4 sm:$0xff]  }
 0xaae   : > { %14223 = vmatprep.subr.bf16.mxu1 %v24129_v55  ;;  %v24195_v23 = vld [vmem:[%s26132_s8 + $0x974] ss:$48 sps:$4 sm:$0xff]   ;;  %v24190_v55 = vld [vmem:[%s26132_s8 + $0x370] ss:$48 sps:$4 sm:$0xff]  }
 0xab0   : > { %14181 = vmatpush1.bf16.msra.mxu0 %v24124_v10  ;;  %v28296_v10 = vsub.s32 2, %v29918_v59 }
 0xab1   : > { %14224 = vmatpush1.bf16.msra.mxu1 %v24127_v7  ;;  %14182 = vmatprep.subr.bf16.mxu0 %v24132_v40  ;;  %v24193_v7 = vld [vmem:[%s26132_s8 + $0x970] ss:$48 sps:$4 sm:$0xff]   ;;  %v24198_v40 = vld [vmem:[%s26132_s8 + $0x314] ss:$48 sps:$4 sm:$0xff]  }
 0xab2   : > { %14225 = vmatprep.subr.bf16.mxu1 %v24135_v13  ;;  %v24201_v13 = vld [vmem:[%s26132_s8 + $0x914] ss:$48 sps:$4 sm:$0xff]  }
 0xab4   : > { %14183 = vmatpush1.bf16.msra.mxu0 %v24130_v38  ;;  %v24196_v38 = vld [vmem:[%s26132_s8 + $0x310] ss:$48 sps:$4 sm:$0xff]  }
 0xab5   : > { %14226 = vmatpush1.bf16.msra.mxu1 %v24133_v22  ;;  %14184 = vmatprep.subr.bf16.mxu0 %v24138_v61  ;;  %v25632_v22 = vld [vmem:[%s26446_s3] sm:$0xff] }
 0xab6   : > { %14227 = vmatprep.subr.bf16.mxu1 %v24141_v43  ;;  %v10931_v61 = vrot.slane %v25632_v22, %v28296_v10  ;;  %v24199_v43 = vld [vmem:[%s26132_s8 + $0x910] ss:$48 sps:$4 sm:$0xff]  }
 0xab7   : > { %v24244_v22 = vld [vmem:[%s26132_s8 + $0xc10] ss:$48 sps:$4 sm:$0xff]  }
 0xab8   : > { %14185 = vmatpush1.bf16.msra.mxu0 %v24136_v26  ;;  %v24204_v26 = vld [vmem:[%s26132_s8 + $0xeb4] ss:$48 sps:$4 sm:$0xff]  }
 0xab9   : > { %14228 = vmatpush1.bf16.msra.mxu1 %v24139_v36  ;;  %14186 = vmatprep.subr.bf16.mxu0 %v24144_v2  ;;  %v24207_v36 = vld [vmem:[%s26132_s8 + $0x2bc] ss:$48 sps:$4 sm:$0xff]   ;;  %v24202_v2 = vld [vmem:[%s26132_s8 + $0xeb0] ss:$48 sps:$4 sm:$0xff]  }
 0xaba   : > { %14229 = vmatprep.subr.bf16.mxu1 %v24147_v3  ;;  %v10991_v3 = vrot.slane %v10931_v61, %v28296_v10  ;;  %v24247_v61 = vld [vmem:[%s26132_s8 + $0x18] ss:$48 sps:$4 sm:$0xff]  }
 0xabc   : > { %14187 = vmatpush1.bf16.msra.mxu0 %v24142_v35  ;;  %v24205_v35 = vld [vmem:[%s26132_s8 + $0x2b8] ss:$48 sps:$4 sm:$0xff]  }
 0xabd   : > { %14230 = vmatpush1.bf16.msra.mxu1 %v24145_v34  ;;  %14188 = vmatprep.subr.bf16.mxu0 %v24150_v33  ;;  %v24210_v34 = vld [vmem:[%s26132_s8 + $0xe54] ss:$48 sps:$4 sm:$0xff]  }
 0xabe   : > { %14231 = vmatprep.subr.bf16.mxu1 %v24153_v63 }
 0xac0   : > { %14189 = vmatpush1.bf16.msra.mxu0 %v24148_v47  ;;  %v24213_v47 = vld [vmem:[%s26132_s8 + $0x25c] ss:$48 sps:$4 sm:$0xff]  }
 0xac1   : > { %14232 = vmatpush1.bf16.msra.mxu1 %v24151_v57  ;;  %14190 = vmatprep.subr.bf16.mxu0 %v24156_v14  ;;  %v24208_v14 = vld [vmem:[%s26132_s8 + $0xe50] ss:$48 sps:$4 sm:$0xff]  }
 0xac2   : > { %14233 = vmatprep.subr.bf16.mxu1 %v24159_v32 }
 0xac4   : > { %14191 = vmatpush2.bf16.msra.mxu0 %v24154_v9 }
 0xac5   : > { %14234 = vmatpush2.bf16.msra.mxu1 %v24157_v52  ;;  %14192 = vmatprep.subr.bf16.mxu0 %v24162_v27  ;;  %v24211_v52 = vld [vmem:[%s26132_s8 + $0x258] ss:$48 sps:$4 sm:$0xff]   ;;  %v24216_v27 = vld [vmem:[%s26132_s8 + $0xdf4] ss:$48 sps:$4 sm:$0xff]  }
 0xac6   : > { %14235 = vmatprep.subr.bf16.mxu1 %v24165_v41 }
 0xac8   : > { %14193 = vmatpush2.bf16.msra.mxu0 %v24160_v62  ;;  %v24219_v62 = vld [vmem:[%s26132_s8 + $0x1fc] ss:$48 sps:$4 sm:$0xff]  }
 0xac9   : > { %14236 = vmatpush2.bf16.msra.mxu1 %v24163_v12  ;;  %14194 = vmatprep.subr.bf16.mxu0 %v24168_v50 }
 0xaca   : > { %14237 = vmatprep.subr.bf16.mxu1 %v24171_v0  ;;  %v24214_v0 = vld [vmem:[%s26132_s8 + $0xdf0] ss:$48 sps:$4 sm:$0xff]  }
 0xacc   : > { %14195 = vmatpush2.bf16.msra.mxu0 %v24166_v60 }
 0xacd   : > { %14238 = vmatpush2.bf16.msra.mxu1 %v24169_v30  ;;  %14196 = vmatprep.subr.bf16.mxu0 %v24174_v56  ;;  %v24217_v30 = vld [vmem:[%s26132_s8 + $0x1f8] ss:$48 sps:$4 sm:$0xff]   ;;  %v24222_v56 = vld [vmem:[%s26132_s8 + $0xd94] ss:$48 sps:$4 sm:$0xff]  }
 0xace   : > { %14239 = vmatprep.subr.bf16.mxu1 %v24177_v45 }
 0xad0   : > { %14197 = vmatpush2.bf16.msra.mxu0 %v24172_v28  ;;  %v24225_v28 = vld [vmem:[%s26132_s8 + $0x19c] ss:$48 sps:$4 sm:$0xff]  }
 0xad1   : > { %14240 = vmatpush2.bf16.msra.mxu1 %v24175_v16  ;;  %14198 = vmatprep.subr.bf16.mxu0 %v24180_v25  ;;  %v24220_v16 = vld [vmem:[%s26132_s8 + $0xd90] ss:$48 sps:$4 sm:$0xff]   ;;  %v24223_v25 = vld [vmem:[%s26132_s8 + $0x198] ss:$48 sps:$4 sm:$0xff]  }
 0xad2   : > { %14241 = vmatprep.subr.bf16.mxu1 %v24183_v53  ;;  %v24228_v53 = vld [vmem:[%s26132_s8 + $0xd34] ss:$48 sps:$4 sm:$0xff]  }
 0xad4   : > { %14199 = vmatpush2.bf16.msra.mxu0 %v24178_v39  ;;  %v24231_v39 = vld [vmem:[%s26132_s8 + $0x13c] ss:$48 sps:$4 sm:$0xff]  }
 0xad5   : > { %14242 = vmatpush2.bf16.msra.mxu1 %v24181_v49  ;;  %14200 = vmatprep.subr.bf16.mxu0 %v24186_v46  ;;  %v24226_v49 = vld [vmem:[%s26132_s8 + $0xd30] ss:$48 sps:$4 sm:$0xff]   ;;  %v24229_v46 = vld [vmem:[%s26132_s8 + $0x138] ss:$48 sps:$4 sm:$0xff]  }
 0xad6   : > { %14243 = vmatprep.subr.bf16.mxu1 %v24189_v17  ;;  %v24234_v17 = vld [vmem:[%s26132_s8 + $0xcd4] ss:$48 sps:$4 sm:$0xff]  }
 0xad8   : > { %14201 = vmatpush2.bf16.msra.mxu0 %v24184_v37  ;;  %v24237_v37 = vld [vmem:[%s26132_s8 + $0xdc] ss:$48 sps:$4 sm:$0xff]  }
 0xad9   : > { %14244 = vmatpush2.bf16.msra.mxu1 %v24187_v44  ;;  %14202 = vmatprep.subr.bf16.mxu0 %v24192_v48  ;;  %v24232_v44 = vld [vmem:[%s26132_s8 + $0xcd0] ss:$48 sps:$4 sm:$0xff]   ;;  %v24235_v48 = vld [vmem:[%s26132_s8 + $0xd8] ss:$48 sps:$4 sm:$0xff]  }
 0xada   : > { %14245 = vmatprep.subr.bf16.mxu1 %v24195_v23  ;;  %v24240_v23 = vld [vmem:[%s26132_s8 + $0xc74] ss:$48 sps:$4 sm:$0xff]  }
 0xadc   : > { %14203 = vmatpush2.bf16.msra.mxu0 %v24190_v55  ;;  %v24243_v55 = vld [vmem:[%s26132_s8 + $0x7c] ss:$48 sps:$4 sm:$0xff]  }
 0xadd   : > { %14246 = vmatpush2.bf16.msra.mxu1 %v24193_v7  ;;  %14204 = vmatprep.subr.bf16.mxu0 %v24198_v40  ;;  %v24238_v7 = vld [vmem:[%s26132_s8 + $0xc70] ss:$48 sps:$4 sm:$0xff]   ;;  %v24241_v40 = vld [vmem:[%s26132_s8 + $0x78] ss:$48 sps:$4 sm:$0xff]  }
 0xade   : > { %14247 = vmatprep.subr.bf16.mxu1 %v24201_v13  ;;  %v24246_v13 = vld [vmem:[%s26132_s8 + $0xc14] ss:$48 sps:$4 sm:$0xff]  }
 0xae0   : > { %14205 = vmatpush2.bf16.msra.mxu0 %v24196_v38  ;;  %v24249_v38 = vld [vmem:[%s26132_s8 + $0x1c] ss:$48 sps:$4 sm:$0xff]  }
 0xae1   : > { %14248 = vmatpush2.bf16.msra.mxu1 %v24199_v43  ;;  %14260 = vmatprep.subr.bf16.mxu0 %v24204_v26  ;;  %v24252_v43 = vld [vmem:[%s26132_s8 + $0x11b4] ss:$48 sps:$4 sm:$0xff]   ;;  %v24255_v26 = vld [vmem:[%s26132_s8 + $0x5bc] ss:$48 sps:$4 sm:$0xff]  }
 0xae2   : > { %14303 = vmatprep.subr.bf16.mxu1 %v24207_v36  ;;  %v24250_v36 = vld [vmem:[%s26132_s8 + $0x11b0] ss:$48 sps:$4 sm:$0xff]  }
 0xae3   : > { %14207 = vmatmul.mubr.bf16.vlgmr.msra.gmra.mxu0 %v28068_v8  ;;  %v13950_v33 = vpop.f32.mrf.mxu0  ;;  %v13993_v63 = vpop.f32.mrf.mxu1 }
 0xae4   : > { %14250 = vmatmul.mubr.bf16.vlgmr.msra.gmra.mxu1 %v28072_v29  ;;  %v13951_v57 = vadd.f32 %v13950_v33, %v10991_v3  ;;  %14261 = vmatpush1.bf16.msra.mxu0 %v24202_v2  ;;  %v24253_v2 = vld [vmem:[%s26132_s8 + $0x5b8] ss:$48 sps:$4 sm:$0xff]  }
 0xae5   : > { %14292 = vmatprep.mubr.bf16.mxu0 %v28084_v20  ;;  %14304 = vmatpush1.bf16.msra.mxu1 %v24205_v35  ;;  %v28316_v32 = vpop.f32.mrf.mxu0  ;;  %v28318_v9 = vpop.f32.mrf.mxu1  ;;  %v24261_v35 = vld [vmem:[%s26132_s8 + $0x55c] ss:$48 sps:$4 sm:$0xff]   ;;  %v24259_v33 = vld [vmem:[%s26132_s8 + $0x558] ss:$48 sps:$4 sm:$0xff]  }
 0xae6   : > { %v28322_v41 = vadd.f32 %v13993_v63, %v13951_v57  ;;  %14335 = vmatprep.mubr.bf16.mxu1 %v28056_v15  ;;  %14262 = vmatprep.subr.bf16.mxu0 %v24210_v34  ;;  %v24256_v34 = vld [vmem:[%s26132_s8 + $0x1150] ss:$48 sps:$4 sm:$0xff]   ;;  %v24264_v63 = vld [vmem:[%s26132_s8 + $0x10f4] ss:$48 sps:$4 sm:$0xff]  }
 0xae7   : > { %14305 = vmatprep.subr.bf16.mxu1 %v24213_v47  ;;  %v13954_v12 = vpop.f32.mrf.mxu0  ;;  %v13997_v60 = vpop.f32.mrf.mxu1  ;;  %v24267_v47 = vld [vmem:[%s26132_s8 + $0x4fc] ss:$48 sps:$4 sm:$0xff]   ;;  %v24262_v57 = vld [vmem:[%s26132_s8 + $0x10f0] ss:$48 sps:$4 sm:$0xff]  }
 0xae8   : > { %v13955_v50 = vadd.f32 %v13954_v12, %v10991_v3  ;;  %14263 = vmatpush1.bf16.msra.mxu0 %v24208_v14  ;;  %v24258_v3 = vld [vmem:[%s26132_s8 + $0x1154] ss:$48 sps:$4 sm:$0xff]   ;;  %v24265_v14 = vld [vmem:[%s26132_s8 + $0x4f8] ss:$48 sps:$4 sm:$0xff]  }
 0xae9   : > { %14306 = vmatpush1.bf16.msra.mxu1 %v24211_v52  ;;  %14264 = vmatprep.subr.bf16.mxu0 %v24216_v27  ;;  %v24270_v52 = vld [vmem:[%s26132_s8 + $0x1094] ss:$48 sps:$4 sm:$0xff]   ;;  %v24273_v27 = vld [vmem:[%s26132_s8 + $0x49c] ss:$48 sps:$4 sm:$0xff]   ;;  %v24271_v12 = vld [vmem:[%s26132_s8 + $0x498] ss:$48 sps:$4 sm:$0xff]  }
 0xaea   : > { %v28329_v45 = vadd.f32 %v13997_v60, %v13955_v50  ;;  %14307 = vmatprep.subr.bf16.mxu1 %v24219_v62  ;;  %v24268_v62 = vld [vmem:[%s26132_s8 + $0x1090] ss:$48 sps:$4 sm:$0xff]   ;;  %v24276_v50 = vld [vmem:[%s26132_s8 + $0x1034] ss:$48 sps:$4 sm:$0xff]  }
 0xaeb   : > { %v24274_v60 = vld [vmem:[%s26132_s8 + $0x1030] ss:$48 sps:$4 sm:$0xff]  }
 0xaec   : > { %14265 = vmatpush1.bf16.msra.mxu0 %v24214_v0  ;;  %v24279_v0 = vld [vmem:[%s26132_s8 + $0x43c] ss:$48 sps:$4 sm:$0xff]  }
 0xaed   : > { %14308 = vmatpush1.bf16.msra.mxu1 %v24217_v30  ;;  %14266 = vmatprep.subr.bf16.mxu0 %v24222_v56  ;;  %v24277_v30 = vld [vmem:[%s26132_s8 + $0x438] ss:$48 sps:$4 sm:$0xff]   ;;  %v24282_v56 = vld [vmem:[%s26132_s8 + $0xfd4] ss:$48 sps:$4 sm:$0xff]  }
 0xaee   : > { %14309 = vmatprep.subr.bf16.mxu1 %v24225_v28  ;;  %v24285_v28 = vld [vmem:[%s26132_s8 + $0x3dc] ss:$48 sps:$4 sm:$0xff]  }
 0xaf0   : > { %14267 = vmatpush1.bf16.msra.mxu0 %v24220_v16  ;;  %v24280_v16 = vld [vmem:[%s26132_s8 + $0xfd0] ss:$48 sps:$4 sm:$0xff]  }
 0xaf1   : > { %14310 = vmatpush1.bf16.msra.mxu1 %v24223_v25  ;;  %14268 = vmatprep.subr.bf16.mxu0 %v24228_v53  ;;  %v24283_v25 = vld [vmem:[%s26132_s8 + $0x3d8] ss:$48 sps:$4 sm:$0xff]   ;;  %v24288_v53 = vld [vmem:[%s26132_s8 + $0xf74] ss:$48 sps:$4 sm:$0xff]  }
 0xaf2   : > { %14311 = vmatprep.subr.bf16.mxu1 %v24231_v39  ;;  %v24291_v39 = vld [vmem:[%s26132_s8 + $0x37c] ss:$48 sps:$4 sm:$0xff]  }
 0xaf4   : > { %14269 = vmatpush1.bf16.msra.mxu0 %v24226_v49  ;;  %v24286_v49 = vld [vmem:[%s26132_s8 + $0xf70] ss:$48 sps:$4 sm:$0xff]  }
 0xaf5   : > { %14312 = vmatpush1.bf16.msra.mxu1 %v24229_v46  ;;  %14270 = vmatprep.subr.bf16.mxu0 %v24234_v17  ;;  %v24289_v46 = vld [vmem:[%s26132_s8 + $0x378] ss:$48 sps:$4 sm:$0xff]   ;;  %v24294_v17 = vld [vmem:[%s26132_s8 + $0xf14] ss:$48 sps:$4 sm:$0xff]  }
 0xaf6   : > { %14313 = vmatprep.subr.bf16.mxu1 %v24237_v37  ;;  %v24297_v37 = vld [vmem:[%s26132_s8 + $0x31c] ss:$48 sps:$4 sm:$0xff]  }
 0xaf8   : > { %14271 = vmatpush1.bf16.msra.mxu0 %v24232_v44  ;;  %v24292_v44 = vld [vmem:[%s26132_s8 + $0xf10] ss:$48 sps:$4 sm:$0xff]  }
 0xaf9   : > { %14314 = vmatpush1.bf16.msra.mxu1 %v24235_v48  ;;  %14272 = vmatprep.subr.bf16.mxu0 %v24240_v23  ;;  %v24295_v48 = vld [vmem:[%s26132_s8 + $0x318] ss:$48 sps:$4 sm:$0xff]   ;;  %v24300_v23 = vld [vmem:[%s26132_s8 + $0x8bc] ss:$48 sps:$4 sm:$0xff]  }
 0xafa   : > { %14315 = vmatprep.subr.bf16.mxu1 %v24243_v55  ;;  %v24303_v55 = vld [vmem:[%s26132_s8 + $0xebc] ss:$48 sps:$4 sm:$0xff]  }
 0xafc   : > { %14273 = vmatpush1.bf16.msra.mxu0 %v24238_v7  ;;  %v24298_v7 = vld [vmem:[%s26132_s8 + $0x8b8] ss:$48 sps:$4 sm:$0xff]  }
 0xafd   : > { %14316 = vmatpush1.bf16.msra.mxu1 %v24241_v40  ;;  %14274 = vmatprep.subr.bf16.mxu0 %v24246_v13  ;;  %v28385_v40 = vpop.f32.mrf.mxu0  ;;  %v24301_v13 = vld [vmem:[%s26132_s8 + $0xeb8] ss:$48 sps:$4 sm:$0xff]  }
 0xafe   : > { %14317 = vmatprep.subr.bf16.mxu1 %v24249_v38  ;;  %v24306_v38 = vld [vmem:[%s26132_s8 + $0x85c] ss:$48 sps:$4 sm:$0xff]  }
 0xb00   : > { %14275 = vmatpush1.bf16.msra.mxu0 %v24244_v22 }
 0xb01   : > { %14318 = vmatpush1.bf16.msra.mxu1 %v24247_v61  ;;  %14276 = vmatprep.subr.bf16.mxu0 %v24252_v43  ;;  %v24309_v61 = vld [vmem:[%s26132_s8 + $0xe5c] ss:$48 sps:$4 sm:$0xff]  }
 0xb02   : > { %14319 = vmatprep.subr.bf16.mxu1 %v24255_v26  ;;  %v24304_v26 = vld [vmem:[%s26132_s8 + $0x858] ss:$48 sps:$4 sm:$0xff]  }
 0xb04   : > { %14277 = vmatpush2.bf16.msra.mxu0 %v24250_v36 }
 0xb05   : > { %14320 = vmatpush2.bf16.msra.mxu1 %v24253_v2  ;;  %14278 = vmatprep.subr.bf16.mxu0 %v24258_v3  ;;  %v24307_v2 = vld [vmem:[%s26132_s8 + $0xe58] ss:$48 sps:$4 sm:$0xff]   ;;  %v24312_v3 = vld [vmem:[%s26132_s8 + $0x7fc] ss:$48 sps:$4 sm:$0xff]  }
 0xb06   : > { %14321 = vmatprep.subr.bf16.mxu1 %v24261_v35 }
 0xb08   : > { %14279 = vmatpush2.bf16.msra.mxu0 %v24256_v34 }
 0xb09   : > { %14322 = vmatpush2.bf16.msra.mxu1 %v24259_v33  ;;  %14280 = vmatprep.subr.bf16.mxu0 %v24264_v63 }
 0xb0a   : > { %14323 = vmatprep.subr.bf16.mxu1 %v24267_v47  ;;  %v24310_v47 = vld [vmem:[%s26132_s8 + $0x7f8] ss:$48 sps:$4 sm:$0xff]  }
 0xb0c   : > { %14281 = vmatpush2.bf16.msra.mxu0 %v24262_v57  ;;  %v24313_v57 = vld [vmem:[%s26132_s8 + $0xdf8] ss:$48 sps:$4 sm:$0xff]  }
 0xb0d   : > { %14324 = vmatpush2.bf16.msra.mxu1 %v24265_v14  ;;  %14282 = vmatprep.subr.bf16.mxu0 %v24270_v52  ;;  %v24318_v14 = vld [vmem:[%s26132_s8 + $0x79c] ss:$48 sps:$4 sm:$0xff]  }
 0xb0e   : > { %14325 = vmatprep.subr.bf16.mxu1 %v24273_v27 }
 0xb10   : > { %14283 = vmatpush2.bf16.msra.mxu0 %v24268_v62  ;;  %v24321_v62 = vld [vmem:[%s26132_s8 + $0xd9c] ss:$48 sps:$4 sm:$0xff]  }
 0xb11   : > { %14326 = vmatpush2.bf16.msra.mxu1 %v24271_v12  ;;  %14284 = vmatprep.subr.bf16.mxu0 %v24276_v50  ;;  %v24316_v50 = vld [vmem:[%s26132_s8 + $0x798] ss:$48 sps:$4 sm:$0xff]  }
 0xb12   : > { %14327 = vmatprep.subr.bf16.mxu1 %v24279_v0  ;;  %v24319_v0 = vld [vmem:[%s26132_s8 + $0xd98] ss:$48 sps:$4 sm:$0xff]  }
 0xb14   : > { %14285 = vmatpush2.bf16.msra.mxu0 %v24274_v60  ;;  %v24324_v60 = vld [vmem:[%s26132_s8 + $0x73c] ss:$48 sps:$4 sm:$0xff]  }
 0xb15   : > { %14328 = vmatpush2.bf16.msra.mxu1 %v24277_v30  ;;  %14286 = vmatprep.subr.bf16.mxu0 %v24282_v56 }
 0xb16   : > { %14329 = vmatprep.subr.bf16.mxu1 %v24285_v28  ;;  %v24327_v28 = vld [vmem:[%s26132_s8 + $0xd3c] ss:$48 sps:$4 sm:$0xff]  }
 0xb18   : > { %14287 = vmatpush2.bf16.msra.mxu0 %v24280_v16 }
 0xb19   : > { %14330 = vmatpush2.bf16.msra.mxu1 %v24283_v25  ;;  %14288 = vmatprep.subr.bf16.mxu0 %v24288_v53  ;;  %v24322_v25 = vld [vmem:[%s26132_s8 + $0x738] ss:$48 sps:$4 sm:$0xff]  }
 0xb1a   : > { %14331 = vmatprep.subr.bf16.mxu1 %v24291_v39  ;;  %v24325_v53 = vld [vmem:[%s26132_s8 + $0xd38] ss:$48 sps:$4 sm:$0xff]   ;;  %v24330_v39 = vld [vmem:[%s26132_s8 + $0x6dc] ss:$48 sps:$4 sm:$0xff]  }
 0xb1c   : > { %14289 = vmatpush2.bf16.msra.mxu0 %v24286_v49 }
 0xb1d   : > { %14332 = vmatpush2.bf16.msra.mxu1 %v24289_v46  ;;  %14290 = vmatprep.subr.bf16.mxu0 %v24294_v17  ;;  %v24333_v46 = vld [vmem:[%s26132_s8 + $0xcdc] ss:$48 sps:$4 sm:$0xff]   ;;  %v24328_v17 = vld [vmem:[%s26132_s8 + $0x6d8] ss:$48 sps:$4 sm:$0xff]  }
 0xb1e   : > { %14333 = vmatprep.subr.bf16.mxu1 %v24297_v37  ;;  %v24331_v37 = vld [vmem:[%s26132_s8 + $0xcd8] ss:$48 sps:$4 sm:$0xff]  }
 0xb20   : > { %14291 = vmatpush2.bf16.msra.mxu0 %v24292_v44  ;;  %v24336_v44 = vld [vmem:[%s26132_s8 + $0x67c] ss:$48 sps:$4 sm:$0xff]  }
 0xb21   : > { %14334 = vmatpush2.bf16.msra.mxu1 %v24295_v48  ;;  %14346 = vmatprep.subr.bf16.mxu0 %v24300_v23  ;;  %v24339_v48 = vld [vmem:[%s26132_s8 + $0xc7c] ss:$48 sps:$4 sm:$0xff]   ;;  %v24334_v23 = vld [vmem:[%s26132_s8 + $0x678] ss:$48 sps:$4 sm:$0xff]  }
 0xb22   : > { %14389 = vmatprep.subr.bf16.mxu1 %v24303_v55  ;;  %v24337_v55 = vld [vmem:[%s26132_s8 + $0xc78] ss:$48 sps:$4 sm:$0xff]  }
 0xb23   : > { %v14036_v22 = vpop.f32.mrf.mxu0  ;;  %14293 = vmatmul.mubr.bf16.vlgmr.msra.gmra.mxu0 %v28165_v19 }
 0xb24   : > { %v28392_v43 = vadd.f32 %v14036_v22, %v28322_v41  ;;  %14336 = vmatmul.mubr.bf16.vlgmr.msra.gmra.mxu1 %v28068_v8  ;;  %14347 = vmatpush1.bf16.msra.mxu0 %v24298_v7  ;;  %v24315_v41 = vld [vmem:[%s26132_s8 + $0xdfc] ss:$48 sps:$4 sm:$0xff]  }
 0xb25   : > { %14378 = vmatprep.mubr.bf16.mxu0 %v28060_v24  ;;  %14390 = vmatpush1.bf16.msra.mxu1 %v24301_v13  ;;  %v28397_v36 = vpop.f32.mrf.mxu0  ;;  %v24342_v7 = vld [vmem:[%s26132_s8 + $0x61c] ss:$48 sps:$4 sm:$0xff]  }
 0xb26   : > { %v14690_v35 = vmul.f32 %v28392_v43, %v28392_v43  ;;  %14421 = vmatprep.mubr.bf16.mxu1 %v28084_v20  ;;  %14348 = vmatprep.subr.bf16.mxu0 %v24306_v38  ;;  %v24345_v13 = vld [vmem:[%s26132_s8 + $0xc1c] ss:$48 sps:$4 sm:$0xff]   ;;  %v24340_v38 = vld [vmem:[%s26132_s8 + $0x618] ss:$48 sps:$4 sm:$0xff]  }
 0xb27   : > { %v14040_v34 = vpop.f32.mrf.mxu0  ;;  %14391 = vmatprep.subr.bf16.mxu1 %v24309_v61  ;;  %v24343_v61 = vld [vmem:[%s26132_s8 + $0xc18] ss:$48 sps:$4 sm:$0xff]  }
 0xb28   : > { %v14714_v33 = vmul.f32 %v14690_v35, %v28392_v43  ;;  %v28407_v63 = vadd.f32 %v14040_v34, %v28329_v45  ;;  %14349 = vmatpush1.bf16.msra.mxu0 %v24304_v26  ;;  %v24348_v26 = vld [vmem:[%s26132_s8 + $0xbbc] ss:$48 sps:$4 sm:$0xff]   ;;  %v24346_v35 = vld [vmem:[%s26132_s8 + $0xbb8] ss:$48 sps:$4 sm:$0xff]  }
 0xb29   : > { %14392 = vmatpush1.bf16.msra.mxu1 %v24307_v2  ;;  %14350 = vmatprep.subr.bf16.mxu0 %v24312_v3  ;;  %v24351_v3 = vld [vmem:[%s26132_s8 + $0x11bc] ss:$48 sps:$4 sm:$0xff]   ;;  %v24349_v34 = vld [vmem:[%s26132_s8 + $0x11b8] ss:$48 sps:$4 sm:$0xff]  }
 0xb2a   : > { %v14738_v52 = vmul.f32 0.044715, %v14714_v33  ;;  %v14702_v27 = vmul.f32 %v28407_v63, %v28407_v63  ;;  %14393 = vmatprep.subr.bf16.mxu1 %v24315_v41  ;;  %v24354_v33 = vld [vmem:[%s26132_s8 + $0xb5c] ss:$48 sps:$4 sm:$0xff]  }
 0xb2c   : > { %v14762_v12 = vadd.f32 %v14738_v52, %v28392_v43  ;;  %v14726_v45 = vmul.f32 %v14702_v27, %v28407_v63  ;;  %14351 = vmatpush1.bf16.msra.mxu0 %v24310_v47  ;;  %v24352_v27 = vld [vmem:[%s26132_s8 + $0xb58] ss:$48 sps:$4 sm:$0xff]  }
 0xb2d   : > { %14394 = vmatpush1.bf16.msra.mxu1 %v24313_v57  ;;  %14352 = vmatprep.subr.bf16.mxu0 %v24318_v14  ;;  %v24357_v14 = vld [vmem:[%s26132_s8 + $0x115c] ss:$48 sps:$4 sm:$0xff]  }
 0xb2e   : > { %v14786_v30 = vmul.f32 0.7978846, %v14762_v12  ;;  %v14750_v56 = vmul.f32 0.044715, %v14726_v45  ;;  %14395 = vmatprep.subr.bf16.mxu1 %v24321_v62  ;;  %v24355_v62 = vld [vmem:[%s26132_s8 + $0x1158] ss:$48 sps:$4 sm:$0xff]  }
 0xb2f   : > { %v24360_v12 = vld [vmem:[%s26132_s8 + $0xafc] ss:$48 sps:$4 sm:$0xff]  }
 0xb30   : > { %25558 = vtanh.f32 %v14786_v30  ;;  %v14774_v16 = vadd.f32 %v14750_v56, %v28407_v63  ;;  %14353 = vmatpush1.bf16.msra.mxu0 %v24316_v50  ;;  %v24358_v30 = vld [vmem:[%s26132_s8 + $0xaf8] ss:$48 sps:$4 sm:$0xff]  }
 0xb31   : > { %14396 = vmatpush1.bf16.msra.mxu1 %v24319_v0  ;;  %14354 = vmatprep.subr.bf16.mxu0 %v24324_v60  ;;  %v24363_v0 = vld [vmem:[%s26132_s8 + $0x10fc] ss:$48 sps:$4 sm:$0xff]   ;;  %v24361_v56 = vld [vmem:[%s26132_s8 + $0x10f8] ss:$48 sps:$4 sm:$0xff]  }
 0xb32   : > { %v14798_v49 = vmul.f32 0.7978846, %v14774_v16  ;;  %14397 = vmatprep.subr.bf16.mxu1 %v24327_v28  ;;  %v24366_v28 = vld [vmem:[%s26132_s8 + $0xa9c] ss:$48 sps:$4 sm:$0xff]   ;;  %v24367_v16 = vld [vmem:[%s26132_s8 + $0x1098] ss:$48 sps:$4 sm:$0xff]  }
 0xb34   : > { %25560 = vtanh.f32 %v14798_v49  ;;  %14355 = vmatpush1.bf16.msra.mxu0 %v24322_v25  ;;  %v24372_v25 = vld [vmem:[%s26132_s8 + $0xa3c] ss:$48 sps:$4 sm:$0xff]   ;;  %v24373_v49 = vld [vmem:[%s26132_s8 + $0x1038] ss:$48 sps:$4 sm:$0xff]  }
 0xb35   : > { %14398 = vmatpush1.bf16.msra.mxu1 %v24325_v53  ;;  %14356 = vmatprep.subr.bf16.mxu0 %v24330_v39  ;;  %v24375_v53 = vld [vmem:[%s26132_s8 + $0x103c] ss:$48 sps:$4 sm:$0xff]   ;;  %v24370_v39 = vld [vmem:[%s26132_s8 + $0xa38] ss:$48 sps:$4 sm:$0xff]  }
 0xb36   : > { %14399 = vmatprep.subr.bf16.mxu1 %v24333_v46  ;;  %v24378_v46 = vld [vmem:[%s26132_s8 + $0x9dc] ss:$48 sps:$4 sm:$0xff]  }
 0xb38   : > { %14357 = vmatpush1.bf16.msra.mxu0 %v24328_v17  ;;  %v24381_v17 = vld [vmem:[%s26132_s8 + $0xfdc] ss:$48 sps:$4 sm:$0xff]  }
 0xb39   : > { %14400 = vmatpush1.bf16.msra.mxu1 %v24331_v37  ;;  %14358 = vmatprep.subr.bf16.mxu0 %v24336_v44  ;;  %v28462_v37 = vpop.f32.mrf.mxu1  ;;  %v24376_v44 = vld [vmem:[%s26132_s8 + $0x9d8] ss:$48 sps:$4 sm:$0xff]  }
 0xb3a   : > { %14401 = vmatprep.subr.bf16.mxu1 %v24339_v48  ;;  %v24379_v48 = vld [vmem:[%s26132_s8 + $0xfd8] ss:$48 sps:$4 sm:$0xff]  }
 0xb3c   : > { %14359 = vmatpush1.bf16.msra.mxu0 %v24334_v23  ;;  %v24384_v23 = vld [vmem:[%s26132_s8 + $0x97c] ss:$48 sps:$4 sm:$0xff]  }
 0xb3d   : > { %v25559_v22 = vpop.eup %25558  ;;  %14402 = vmatpush1.bf16.msra.mxu1 %v24337_v55  ;;  %14360 = vmatprep.subr.bf16.mxu0 %v24342_v7  ;;  %v14079_v55 = vpop.f32.mrf.mxu1  ;;  %v24387_v7 = vld [vmem:[%s26132_s8 + $0xf7c] ss:$48 sps:$4 sm:$0xff]  }
 0xb3e   : > { %v14834_v2 = vadd.f32 1.0, %v25559_v22  ;;  %14403 = vmatprep.subr.bf16.mxu1 %v24345_v13  ;;  %v24382_v13 = vld [vmem:[%s26132_s8 + $0x978] ss:$48 sps:$4 sm:$0xff]   ;;  %v24390_v22 = vld [vmem:[%s26132_s8 + $0x91c] ss:$48 sps:$4 sm:$0xff]  }
 0xb40   : > { %14361 = vmatpush1.bf16.msra.mxu0 %v24340_v38  ;;  %v14858_v47 = vmul.f32 0.5, %v14834_v2  ;;  %v24385_v38 = vld [vmem:[%s26132_s8 + $0xf78] ss:$48 sps:$4 sm:$0xff]   ;;  %v28476_v2 = vpop.f32.mrf.mxu1 }
 0xb41   : > { %v25561_v41 = vpop.eup %25560  ;;  %14404 = vmatpush1.bf16.msra.mxu1 %v24343_v61  ;;  %14362 = vmatprep.subr.bf16.mxu0 %v24348_v26  ;;  %v28472_v61 = vld [vmem:[%s26446_s3 + $0x8] sm:$0xff] }
 0xb42   : > { %v14846_v57 = vadd.f32 1.0, %v25561_v41  ;;  %14405 = vmatprep.subr.bf16.mxu1 %v24351_v3  ;;  %v14882_v45 = vmul.f32 %v14858_v47, %v28392_v43  ;;  %v24369_v43 = vld [vmem:[%s26132_s8 + $0x109c] ss:$48 sps:$4 sm:$0xff]   ;;  %v10939_v26 = vrot.slane %v28472_v61, %v28296_v10  ;;  %v24391_v41 = vld [vmem:[%s26132_s8 + $0xf18] ss:$48 sps:$4 sm:$0xff]   ;;  %v14083_v47 = vpop.f32.mrf.mxu1 }
 0xb43   : > { %v24393_v3 = vld [vmem:[%s26132_s8 + $0xf1c] ss:$48 sps:$4 sm:$0xff]  }
 0xb44   : > { %v14870_v52 = vmul.f32 0.5, %v14846_v57  ;;  %14363 = vmatpush2.bf16.msra.mxu0 %v24346_v35  ;;  %v24388_v35 = vld [vmem:[%s26132_s8 + $0x918] ss:$48 sps:$4 sm:$0xff]   ;;  %v24399_v57 = vld [vmem:[%s26132_s8 + $0x8c4] ss:$48 sps:$4 sm:$0xff]  }
 0xb45   : > { %14406 = vmatpush2.bf16.msra.mxu1 %v24349_v34  ;;  %14364 = vmatprep.subr.bf16.mxu0 %v24354_v33  ;;  %v24396_v34 = vld [vmem:[%s26132_s8 + $0x2c4] ss:$48 sps:$4 sm:$0xff]   ;;  %v10999_v33 = vrot.slane %v10939_v26, %v28296_v10 }
 0xb46   : > { %v14894_v50 = vmul.f32 %v14870_v52, %v28407_v63  ;;  %14407 = vmatprep.subr.bf16.mxu1 %v24357_v14  ;;  %v24364_v63 = vld [vmem:[%s26132_s8 + $0xa98] ss:$48 sps:$4 sm:$0xff]   ;;  %v24394_v14 = vld [vmem:[%s26132_s8 + $0x2c0] ss:$48 sps:$4 sm:$0xff]   ;;  %v28485_v52 = vpop.f32.mrf.mxu0 }
 0xb48   : > { %v28448_v60 = vpack.c.bf16 %v14894_v50, %v14882_v45  ;;  %14365 = vmatpush2.bf16.msra.mxu0 %v24352_v27  ;;  %v24397_v27 = vld [vmem:[%s26132_s8 + $0x8c0] ss:$48 sps:$4 sm:$0xff]   ;;  %v24402_v45 = vld [vmem:[%s26132_s8 + $0x264] ss:$48 sps:$4 sm:$0xff]  }
 0xb49   : > { %14408 = vmatpush2.bf16.msra.mxu1 %v24355_v62  ;;  %14366 = vmatprep.subr.bf16.mxu0 %v24360_v12  ;;  %v14080_v62 = vadd.f32 %v14079_v55, %v10999_v33  ;;  %v28488_v12 = vpop.f32.mrf.mxu1  ;;  %v24409_v55 = vld [vmem:[%s26132_s8 + $0x800] ss:$48 sps:$4 sm:$0xff]  }
 0xb4a   : > { %14409 = vmatprep.subr.bf16.mxu1 %v24363_v0  ;;  %v24405_v0 = vld [vmem:[%s26132_s8 + $0x864] ss:$48 sps:$4 sm:$0xff]  }
 0xb4c   : > { %14367 = vmatpush2.bf16.msra.mxu0 %v24358_v30 }
 0xb4d   : > { %14410 = vmatpush2.bf16.msra.mxu1 %v24361_v56  ;;  %14368 = vmatprep.subr.bf16.mxu0 %v24366_v28  ;;  %v24400_v28 = vld [vmem:[%s26132_s8 + $0x260] ss:$48 sps:$4 sm:$0xff]  }
 0xb4e   : > { %14411 = vmatprep.subr.bf16.mxu1 %v24369_v43 }
 0xb50   : > { %14369 = vmatpush2.bf16.msra.mxu0 %v24364_v63  ;;  %v24403_v63 = vld [vmem:[%s26132_s8 + $0x860] ss:$48 sps:$4 sm:$0xff]  }
 0xb51   : > { %14412 = vmatpush2.bf16.msra.mxu1 %v24367_v16  ;;  %14370 = vmatprep.subr.bf16.mxu0 %v24372_v25  ;;  %v24408_v16 = vld [vmem:[%s26132_s8 + $0x204] ss:$48 sps:$4 sm:$0xff]   ;;  %v14084_v25 = vadd.f32 %v14083_v47, %v10999_v33 }
 0xb52   : > { %14413 = vmatprep.subr.bf16.mxu1 %v24375_v53 }
 0xb54   : > { %14371 = vmatpush2.bf16.msra.mxu0 %v24370_v39 }
 0xb55   : > { %14414 = vmatpush2.bf16.msra.mxu1 %v24373_v49  ;;  %14372 = vmatprep.subr.bf16.mxu0 %v24378_v46  ;;  %v24411_v49 = vld [vmem:[%s26132_s8 + $0x804] ss:$48 sps:$4 sm:$0xff]  }
 0xb56   : > { %14415 = vmatprep.subr.bf16.mxu1 %v24381_v17 }
 0xb58   : > { %14373 = vmatpush2.bf16.msra.mxu0 %v24376_v44 }
 0xb59   : > { %14416 = vmatpush2.bf16.msra.mxu1 %v24379_v48  ;;  %14374 = vmatprep.subr.bf16.mxu0 %v24384_v23  ;;  %v24406_v48 = vld [vmem:[%s26132_s8 + $0x200] ss:$48 sps:$4 sm:$0xff]  }
 0xb5a   : > { %14417 = vmatprep.subr.bf16.mxu1 %v24387_v7  ;;  %v24414_v7 = vld [vmem:[%s26132_s8 + $0x1a4] ss:$48 sps:$4 sm:$0xff]  }
 0xb5c   : > { %14375 = vmatpush2.bf16.msra.mxu0 %v24382_v13 }
 0xb5d   : > { %14418 = vmatpush2.bf16.msra.mxu1 %v24385_v38  ;;  %14376 = vmatprep.subr.bf16.mxu0 %v24390_v22  ;;  %v24417_v22 = vld [vmem:[%s26132_s8 + $0x7a4] ss:$48 sps:$4 sm:$0xff]  }
 0xb5e   : > { %14419 = vmatprep.subr.bf16.mxu1 %v24393_v3 }
 0xb60   : > { %14377 = vmatpush2.bf16.msra.mxu0 %v24388_v35  ;;  %v24412_v35 = vld [vmem:[%s26132_s8 + $0x1a0] ss:$48 sps:$4 sm:$0xff]  }
 0xb61   : > { %14420 = vmatpush2.bf16.msra.mxu1 %v24391_v41  ;;  %14432 = vmatprep.subr.bf16.mxu0 %v24396_v34  ;;  %v24415_v41 = vld [vmem:[%s26132_s8 + $0x7a0] ss:$48 sps:$4 sm:$0xff]   ;;  %v24420_v34 = vld [vmem:[%s26132_s8 + $0x144] ss:$48 sps:$4 sm:$0xff]  }
 0xb62   : > { %14475 = vmatprep.subr.bf16.mxu1 %v24399_v57  ;;  %v24423_v57 = vld [vmem:[%s26132_s8 + $0x744] ss:$48 sps:$4 sm:$0xff]  }
 0xb63   : > { %v14122_v50 = vpop.f32.mrf.mxu0  ;;  %14379 = vmatmul.mubr.bf16.vlgmr.msra.gmra.mxu0 %v28072_v29 }
 0xb64   : > { %v14123_v30 = vadd.f32 %v14122_v50, %v14080_v62  ;;  %v14165_v56 = vpop.f32.mrf.mxu1  ;;  %14422 = vmatmul.mubr.bf16.vlgmr.msra.gmra.mxu1 %v28165_v19  ;;  %14433 = vmatpush1.bf16.msra.mxu0 %v24394_v14  ;;  %v24418_v62 = vld [vmem:[%s26132_s8 + $0x140] ss:$48 sps:$4 sm:$0xff]   ;;  %v24426_v50 = vld [vmem:[%s26132_s8 + $0xe4] ss:$48 sps:$4 sm:$0xff]  }
 0xb65   : > { %14464 = vmatprep.mubr.bf16.mxu0 %v28056_v15  ;;  %14476 = vmatpush1.bf16.msra.mxu1 %v24397_v27  ;;  %v28496_v43 = vpop.f32.mrf.mxu0 }
 0xb66   : > { %v28500_v53 = vadd.f32 %v14165_v56, %v14123_v30  ;;  %14507 = vmatprep.mubr.bf16.mxu1 %v28060_v24  ;;  %v28503_v39 = vpop.f32.mrf.mxu1  ;;  %14434 = vmatprep.subr.bf16.mxu0 %v24402_v45  ;;  %v24421_v45 = vld [vmem:[%s26132_s8 + $0x740] ss:$48 sps:$4 sm:$0xff]   ;;  %v24429_v30 = vld [vmem:[%s26132_s8 + $0x6e4] ss:$48 sps:$4 sm:$0xff]  }
 0xb67   : > { %v14126_v46 = vpop.f32.mrf.mxu0  ;;  %14477 = vmatprep.subr.bf16.mxu1 %v24405_v0 }
 0xb68   : > { %v14692_v17 = vmul.f32 %v28500_v53, %v28500_v53  ;;  %v14127_v44 = vadd.f32 %v14126_v46, %v14084_v25  ;;  %14435 = vmatpush1.bf16.msra.mxu0 %v24400_v28  ;;  %v14169_v23 = vpop.f32.mrf.mxu1  ;;  %v24424_v28 = vld [vmem:[%s26132_s8 + $0xe0] ss:$48 sps:$4 sm:$0xff]   ;;  %v24435_v25 = vld [vmem:[%s26132_s8 + $0x684] ss:$48 sps:$4 sm:$0xff]  }
 0xb69   : > { %14478 = vmatpush1.bf16.msra.mxu1 %v24403_v63  ;;  %14436 = vmatprep.subr.bf16.mxu0 %v24408_v16  ;;  %v24427_v63 = vld [vmem:[%s26132_s8 + $0x6e0] ss:$48 sps:$4 sm:$0xff]   ;;  %v24432_v16 = vld [vmem:[%s26132_s8 + $0x84] ss:$48 sps:$4 sm:$0xff]  }
 0xb6a   : > { %v14716_v13 = vmul.f32 %v14692_v17, %v28500_v53  ;;  %v28512_v38 = vadd.f32 %v14169_v23, %v14127_v44  ;;  %14479 = vmatprep.subr.bf16.mxu1 %v24411_v49  ;;  %v24430_v49 = vld [vmem:[%s26132_s8 + $0x80] ss:$48 sps:$4 sm:$0xff]   ;;  %v24438_v17 = vld [vmem:[%s26132_s8 + $0x24] ss:$48 sps:$4 sm:$0xff]  }
 0xb6b   : > { %v24433_v46 = vld [vmem:[%s26132_s8 + $0x680] ss:$48 sps:$4 sm:$0xff]   ;;  %v24441_v44 = vld [vmem:[%s26132_s8 + $0x624] ss:$48 sps:$4 sm:$0xff]  }
 0xb6c   : > { %v14740_v26 = vmul.f32 0.044715, %v14716_v13  ;;  %v14704_v3 = vmul.f32 %v28512_v38, %v28512_v38  ;;  %14437 = vmatpush1.bf16.msra.mxu0 %v24406_v48  ;;  %v24436_v48 = vld [vmem:[%s26132_s8 + $0x20] ss:$48 sps:$4 sm:$0xff]  }
 0xb6d   : > { %14480 = vmatpush1.bf16.msra.mxu1 %v24409_v55  ;;  %14438 = vmatprep.subr.bf16.mxu0 %v24414_v7  ;;  %v24439_v23 = vld [vmem:[%s26132_s8 + $0x620] ss:$48 sps:$4 sm:$0xff]   ;;  %v24444_v55 = vld [vmem:[%s26132_s8 + $0x5c4] ss:$48 sps:$4 sm:$0xff]  }
 0xb6e   : > { %v14764_v33 = vadd.f32 %v14740_v26, %v28500_v53  ;;  %v14728_v47 = vmul.f32 %v14704_v3, %v28512_v38  ;;  %14481 = vmatprep.subr.bf16.mxu1 %v24417_v22  ;;  %v24447_v7 = vld [vmem:[%s26132_s8 + $0xbc4] ss:$48 sps:$4 sm:$0xff]   ;;  %v24442_v26 = vld [vmem:[%s26132_s8 + $0x5c0] ss:$48 sps:$4 sm:$0xff]  }
 0xb6f   : > { %v24445_v3 = vld [vmem:[%s26132_s8 + $0xbc0] ss:$48 sps:$4 sm:$0xff]  }
 0xb70   : > { %v14788_v14 = vmul.f32 0.7978846, %v14764_v33  ;;  %v14752_v27 = vmul.f32 0.044715, %v14728_v47  ;;  %14439 = vmatpush1.bf16.msra.mxu0 %v24412_v35  ;;  %v24450_v35 = vld [vmem:[%s26132_s8 + $0x564] ss:$48 sps:$4 sm:$0xff]  }
 0xb71   : > { %14482 = vmatpush1.bf16.msra.mxu1 %v24415_v41  ;;  %14440 = vmatprep.subr.bf16.mxu0 %v24420_v34  ;;  %v24453_v41 = vld [vmem:[%s26132_s8 + $0xb64] ss:$48 sps:$4 sm:$0xff]  }
 0xb72   : > { %25562 = vtanh.f32 %v14788_v14  ;;  %v14776_v0 = vadd.f32 %v14752_v27, %v28512_v38  ;;  %14483 = vmatprep.subr.bf16.mxu1 %v24423_v57  ;;  %v24448_v57 = vld [vmem:[%s26132_s8 + $0x560] ss:$48 sps:$4 sm:$0xff]   ;;  %v24456_v27 = vld [vmem:[%s26132_s8 + $0x504] ss:$48 sps:$4 sm:$0xff]  }
 0xb73   : > { %v24451_v14 = vld [vmem:[%s26132_s8 + $0xb60] ss:$48 sps:$4 sm:$0xff]  }
 0xb74   : > { %v14800_v56 = vmul.f32 0.7978846, %v14776_v0  ;;  %14441 = vmatpush1.bf16.msra.mxu0 %v24418_v62 }
 0xb75   : > { %14484 = vmatpush1.bf16.msra.mxu1 %v24421_v45  ;;  %14442 = vmatprep.subr.bf16.mxu0 %v24426_v50  ;;  %v24459_v45 = vld [vmem:[%s26132_s8 + $0xb04] ss:$48 sps:$4 sm:$0xff]  }
 0xb76   : > { %25564 = vtanh.f32 %v14800_v56  ;;  %14485 = vmatprep.subr.bf16.mxu1 %v24429_v30  ;;  %v24454_v30 = vld [vmem:[%s26132_s8 + $0x500] ss:$48 sps:$4 sm:$0xff]  }
 0xb77   : > { %v24457_v56 = vld [vmem:[%s26132_s8 + $0xb00] ss:$48 sps:$4 sm:$0xff]  }
 0xb78   : > { %14443 = vmatpush1.bf16.msra.mxu0 %v24424_v28  ;;  %v24462_v28 = vld [vmem:[%s26132_s8 + $0x4a4] ss:$48 sps:$4 sm:$0xff]  }
 0xb79   : > { %14486 = vmatpush1.bf16.msra.mxu1 %v24427_v63  ;;  %14444 = vmatprep.subr.bf16.mxu0 %v24432_v16  ;;  %v24465_v16 = vld [vmem:[%s26132_s8 + $0xaa4] ss:$48 sps:$4 sm:$0xff]  }
 0xb7a   : > { %14487 = vmatprep.subr.bf16.mxu1 %v24435_v25  ;;  %v24468_v25 = vld [vmem:[%s26132_s8 + $0x444] ss:$48 sps:$4 sm:$0xff]  }
 0xb7c   : > { %14445 = vmatpush1.bf16.msra.mxu0 %v24430_v49  ;;  %v24471_v49 = vld [vmem:[%s26132_s8 + $0xa44] ss:$48 sps:$4 sm:$0xff]  }
 0xb7d   : > { %14488 = vmatpush1.bf16.msra.mxu1 %v24433_v46  ;;  %14446 = vmatprep.subr.bf16.mxu0 %v24438_v17  ;;  %v24466_v46 = vld [vmem:[%s26132_s8 + $0x440] ss:$48 sps:$4 sm:$0xff]  }
 0xb7e   : > { %14489 = vmatprep.subr.bf16.mxu1 %v24441_v44  ;;  %v24469_v17 = vld [vmem:[%s26132_s8 + $0xa40] ss:$48 sps:$4 sm:$0xff]   ;;  %v24474_v44 = vld [vmem:[%s26132_s8 + $0x3e4] ss:$48 sps:$4 sm:$0xff]  }
 0xb7f   : > { %v25563_v13 = vpop.eup %25562 }
 0xb80   : > { %v14836_v22 = vadd.f32 1.0, %v25563_v13  ;;  %14447 = vmatpush1.bf16.msra.mxu0 %v24436_v48  ;;  %v24477_v48 = vld [vmem:[%s26132_s8 + $0x9e4] ss:$48 sps:$4 sm:$0xff]  }
 0xb81   : > { %14490 = vmatpush1.bf16.msra.mxu1 %v24439_v23  ;;  %14448 = vmatprep.subr.bf16.mxu0 %v24444_v55  ;;  %v24472_v23 = vld [vmem:[%s26132_s8 + $0x3e0] ss:$48 sps:$4 sm:$0xff]   ;;  %v24483_v13 = vld [vmem:[%s26132_s8 + $0x984] ss:$48 sps:$4 sm:$0xff]  }
 0xb82   : > { %14491 = vmatprep.subr.bf16.mxu1 %v24447_v7  ;;  %v14860_v33 = vmul.f32 0.5, %v14836_v22  ;;  %v24475_v55 = vld [vmem:[%s26132_s8 + $0x9e0] ss:$48 sps:$4 sm:$0xff]   ;;  %v24480_v7 = vld [vmem:[%s26132_s8 + $0x384] ss:$48 sps:$4 sm:$0xff]  }
 0xb83   : > { %v25565_v34 = vpop.eup %25564  ;;  %v24478_v22 = vld [vmem:[%s26132_s8 + $0x380] ss:$48 sps:$4 sm:$0xff]  }
 0xb84   : > { %v14848_v47 = vadd.f32 1.0, %v25565_v34  ;;  %14449 = vmatpush2.bf16.msra.mxu0 %v24442_v26  ;;  %v14884_v50 = vmul.f32 %v14860_v33, %v28500_v53  ;;  %v24460_v53 = vld [vmem:[%s26132_s8 + $0x4a0] ss:$48 sps:$4 sm:$0xff]  }
 0xb85   : > { %14492 = vmatpush2.bf16.msra.mxu1 %v24445_v3  ;;  %14450 = vmatprep.subr.bf16.mxu0 %v24450_v35  ;;  %v24481_v26 = vld [vmem:[%s26132_s8 + $0x980] ss:$48 sps:$4 sm:$0xff]   ;;  %v24486_v3 = vld [vmem:[%s26132_s8 + $0x324] ss:$48 sps:$4 sm:$0xff]  }
 0xb86   : > { %v14872_v62 = vmul.f32 0.5, %v14848_v47  ;;  %14493 = vmatprep.subr.bf16.mxu1 %v24453_v41  ;;  %v24489_v35 = vld [vmem:[%s26132_s8 + $0x924] ss:$48 sps:$4 sm:$0xff]   ;;  %v24484_v41 = vld [vmem:[%s26132_s8 + $0x320] ss:$48 sps:$4 sm:$0xff]  }
 0xb87   : > { %v28574_v34 = vld [vmem:[%s26446_s3 + $0x10] sm:$0xff] }
 0xb88   : > { %v14896_v0 = vmul.f32 %v14872_v62, %v28512_v38  ;;  %14451 = vmatpush2.bf16.msra.mxu0 %v24448_v57  ;;  %v24463_v38 = vld [vmem:[%s26132_s8 + $0xaa0] ss:$48 sps:$4 sm:$0xff]   ;;  %v10947_v33 = vrot.slane %v28574_v34, %v28296_v10  ;;  %v24492_v57 = vld [vmem:[%s26132_s8 + $0xec4] ss:$48 sps:$4 sm:$0xff]  }
 0xb89   : > { %14494 = vmatpush2.bf16.msra.mxu1 %v24451_v14  ;;  %14452 = vmatprep.subr.bf16.mxu0 %v24456_v27  ;;  %v24487_v47 = vld [vmem:[%s26132_s8 + $0x920] ss:$48 sps:$4 sm:$0xff]   ;;  %v24495_v14 = vld [vmem:[%s26132_s8 + $0x2cc] ss:$48 sps:$4 sm:$0xff]  }
 0xb8a   : > { %v28553_v63 = vpack.c.bf16 %v14896_v0, %v14884_v50  ;;  %14495 = vmatprep.subr.bf16.mxu1 %v24459_v45  ;;  %v11007_v27 = vrot.slane %v10947_v33, %v28296_v10  ;;  %v24490_v62 = vld [vmem:[%s26132_s8 + $0xec0] ss:$48 sps:$4 sm:$0xff]   ;;  %v28583_v45 = vpop.f32.mrf.mxu0  ;;  %v24493_v50 = vld [vmem:[%s26132_s8 + $0x2c8] ss:$48 sps:$4 sm:$0xff]   ;;  %v28586_v0 = vpop.f32.mrf.mxu1  ;;  %v24516_v33 = vld [vmem:[%s26132_s8 + $0xd44] ss:$48 sps:$4 sm:$0xff]  }
 0xb8c   : > { %14453 = vmatpush2.bf16.msra.mxu0 %v24454_v30  ;;  %v24498_v30 = vld [vmem:[%s26132_s8 + $0xe64] ss:$48 sps:$4 sm:$0xff]  }
 0xb8d   : > { %14496 = vmatpush2.bf16.msra.mxu1 %v24457_v56  ;;  %14454 = vmatprep.subr.bf16.mxu0 %v24462_v28  ;;  %v24501_v28 = vld [vmem:[%s26132_s8 + $0x26c] ss:$48 sps:$4 sm:$0xff]  }
 0xb8e   : > { %14497 = vmatprep.subr.bf16.mxu1 %v24465_v16 }
 0xb90   : > { %14455 = vmatpush2.bf16.msra.mxu0 %v24460_v53 }
 0xb91   : > { %14498 = vmatpush2.bf16.msra.mxu1 %v24463_v38  ;;  %14456 = vmatprep.subr.bf16.mxu0 %v24468_v25  ;;  %v24496_v38 = vld [vmem:[%s26132_s8 + $0xe60] ss:$48 sps:$4 sm:$0xff]  }
 0xb92   : > { %14499 = vmatprep.subr.bf16.mxu1 %v24471_v49  ;;  %v24499_v49 = vld [vmem:[%s26132_s8 + $0x268] ss:$48 sps:$4 sm:$0xff]  }
 0xb94   : > { %14457 = vmatpush2.bf16.msra.mxu0 %v24466_v46  ;;  %v24504_v46 = vld [vmem:[%s26132_s8 + $0xe04] ss:$48 sps:$4 sm:$0xff]  }
 0xb95   : > { %14500 = vmatpush2.bf16.msra.mxu1 %v24469_v17  ;;  %14458 = vmatprep.subr.bf16.mxu0 %v24474_v44 }
 0xb96   : > { %14501 = vmatprep.subr.bf16.mxu1 %v24477_v48  ;;  %v24507_v48 = vld [vmem:[%s26132_s8 + $0x20c] ss:$48 sps:$4 sm:$0xff]  }
 0xb98   : > { %14459 = vmatpush2.bf16.msra.mxu0 %v24472_v23 }
 0xb99   : > { %14502 = vmatpush2.bf16.msra.mxu1 %v24475_v55  ;;  %14460 = vmatprep.subr.bf16.mxu0 %v24480_v7  ;;  %v24502_v7 = vld [vmem:[%s26132_s8 + $0xe00] ss:$48 sps:$4 sm:$0xff]  }
 0xb9a   : > { %14503 = vmatprep.subr.bf16.mxu1 %v24483_v13 }
 0xb9c   : > { %14461 = vmatpush2.bf16.msra.mxu0 %v24478_v22  ;;  %v24505_v22 = vld [vmem:[%s26132_s8 + $0x208] ss:$48 sps:$4 sm:$0xff]  }
 0xb9d   : > { %14504 = vmatpush2.bf16.msra.mxu1 %v24481_v26  ;;  %14462 = vmatprep.subr.bf16.mxu0 %v24486_v3  ;;  %v24513_v3 = vld [vmem:[%s26132_s8 + $0x1ac] ss:$48 sps:$4 sm:$0xff]  }
 0xb9e   : > { %14505 = vmatprep.subr.bf16.mxu1 %v24489_v35  ;;  %v24508_v35 = vld [vmem:[%s26132_s8 + $0xda0] ss:$48 sps:$4 sm:$0xff]  }
 0xba0   : > { %14463 = vmatpush2.bf16.msra.mxu0 %v24484_v41  ;;  %v24511_v41 = vld [vmem:[%s26132_s8 + $0x1a8] ss:$48 sps:$4 sm:$0xff]  }
 0xba1   : > { %14506 = vmatpush2.bf16.msra.mxu1 %v24487_v47  ;;  %14518 = vmatprep.subr.bf16.mxu0 %v24492_v57  ;;  %v24519_v47 = vld [vmem:[%s26132_s8 + $0x14c] ss:$48 sps:$4 sm:$0xff]   ;;  %v24514_v57 = vld [vmem:[%s26132_s8 + $0xd40] ss:$48 sps:$4 sm:$0xff]  }
 0xba2   : > { %14561 = vmatprep.subr.bf16.mxu1 %v24495_v14  ;;  %v24517_v14 = vld [vmem:[%s26132_s8 + $0x148] ss:$48 sps:$4 sm:$0xff]  }
 0xba3   : > { %v14208_v56 = vpop.f32.mrf.mxu0  ;;  %14465 = vmatmul.mubr.bf16.vlgmr.msra.gmra.mxu0 %v28068_v8 }
 0xba4   : > { %v14209_v16 = vadd.f32 %v14208_v56, %v11007_v27  ;;  %v14251_v53 = vpop.f32.mrf.mxu1  ;;  %14508 = vmatmul.mubr.bf16.vlgmr.msra.gmra.mxu1 %v28072_v29  ;;  %14519 = vmatpush1.bf16.msra.mxu0 %v24490_v62  ;;  %v24525_v62 = vld [vmem:[%s26132_s8 + $0xec] ss:$48 sps:$4 sm:$0xff]   ;;  %v24528_v56 = vld [vmem:[%s26132_s8 + $0xc84] ss:$48 sps:$4 sm:$0xff]  }
 0xba5   : > { %14550 = vmatprep.mubr.bf16.mxu0 %v28084_v20  ;;  %14562 = vmatpush1.bf16.msra.mxu1 %v24493_v50  ;;  %v28594_v25 = vpop.f32.mrf.mxu0  ;;  %v24520_v50 = vld [vmem:[%s26132_s8 + $0xce0] ss:$48 sps:$4 sm:$0xff]  }
 0xba6   : > { %v28598_v17 = vadd.f32 %v14251_v53, %v14209_v16  ;;  %14593 = vmatprep.mubr.bf16.mxu1 %v28056_v15  ;;  %v28601_v44 = vpop.f32.mrf.mxu1  ;;  %14520 = vmatprep.subr.bf16.mxu0 %v24498_v30  ;;  %v24510_v15 = vld [vmem:[%s26132_s8 + $0xda4] ss:$48 sps:$4 sm:$0xff]   ;;  %v24523_v30 = vld [vmem:[%s26132_s8 + $0xe8] ss:$48 sps:$4 sm:$0xff]   ;;  %v24526_v16 = vld [vmem:[%s26132_s8 + $0xc80] ss:$48 sps:$4 sm:$0xff]  }
 0xba7   : > { %v14212_v23 = vpop.f32.mrf.mxu0  ;;  %14563 = vmatprep.subr.bf16.mxu1 %v24501_v28  ;;  %v24531_v28 = vld [vmem:[%s26132_s8 + $0x8c] ss:$48 sps:$4 sm:$0xff]   ;;  %v24529_v53 = vld [vmem:[%s26132_s8 + $0x88] ss:$48 sps:$4 sm:$0xff]  }
 0xba8   : > { %v14213_v55 = vadd.f32 %v14212_v23, %v11007_v27  ;;  %14521 = vmatpush1.bf16.msra.mxu0 %v24496_v38  ;;  %v14255_v13 = vpop.f32.mrf.mxu1  ;;  %v24522_v27 = vld [vmem:[%s26132_s8 + $0xce4] ss:$48 sps:$4 sm:$0xff]  }
 0xba9   : > { %14564 = vmatpush1.bf16.msra.mxu1 %v24499_v49  ;;  %14522 = vmatprep.subr.bf16.mxu0 %v24504_v46  ;;  %v24534_v38 = vld [vmem:[%s26132_s8 + $0xc24] ss:$48 sps:$4 sm:$0xff]   ;;  %v24537_v49 = vld [vmem:[%s26132_s8 + $0x2c] ss:$48 sps:$4 sm:$0xff]   ;;  %v24532_v46 = vld [vmem:[%s26132_s8 + $0xc20] ss:$48 sps:$4 sm:$0xff]  }
 0xbaa   : > { %v28607_v26 = vadd.f32 %v14255_v13, %v14213_v55  ;;  %14565 = vmatprep.subr.bf16.mxu1 %v24507_v48  ;;  %v24535_v48 = vld [vmem:[%s26132_s8 + $0x28] ss:$48 sps:$4 sm:$0xff]   ;;  %v24540_v23 = vld [vmem:[%s26132_s8 + $0x11c4] ss:$48 sps:$4 sm:$0xff]   ;;  %v24543_v55 = vld [vmem:[%s26132_s8 + $0x5cc] ss:$48 sps:$4 sm:$0xff]  }
 0xbab   : > { %v24541_v13 = vld [vmem:[%s26132_s8 + $0x5c8] ss:$48 sps:$4 sm:$0xff]  }
 0xbac   : > { %14523 = vmatpush1.bf16.msra.mxu0 %v24502_v7  ;;  %v24538_v7 = vld [vmem:[%s26132_s8 + $0x11c0] ss:$48 sps:$4 sm:$0xff]  }
 0xbad   : > { %14566 = vmatpush1.bf16.msra.mxu1 %v24505_v22  ;;  %14524 = vmatprep.subr.bf16.mxu0 %v24510_v15  ;;  %v24546_v22 = vld [vmem:[%s26132_s8 + $0x1164] ss:$48 sps:$4 sm:$0xff]   ;;  %v24549_v15 = vld [vmem:[%s26132_s8 + $0x56c] ss:$48 sps:$4 sm:$0xff]  }
 0xbae   : > { %14567 = vmatprep.subr.bf16.mxu1 %v24513_v3  ;;  %v24544_v3 = vld [vmem:[%s26132_s8 + $0x1160] ss:$48 sps:$4 sm:$0xff]  }
 0xbb0   : > { %14525 = vmatpush1.bf16.msra.mxu0 %v24508_v35  ;;  %v24547_v35 = vld [vmem:[%s26132_s8 + $0x568] ss:$48 sps:$4 sm:$0xff]  }
 0xbb1   : > { %14568 = vmatpush1.bf16.msra.mxu1 %v24511_v41  ;;  %14526 = vmatprep.subr.bf16.mxu0 %v24516_v33  ;;  %v24552_v41 = vld [vmem:[%s26132_s8 + $0x1104] ss:$48 sps:$4 sm:$0xff]   ;;  %v24555_v33 = vld [vmem:[%s26132_s8 + $0x50c] ss:$48 sps:$4 sm:$0xff]  }
 0xbb2   : > { %14569 = vmatprep.subr.bf16.mxu1 %v24519_v47  ;;  %v24550_v47 = vld [vmem:[%s26132_s8 + $0x1100] ss:$48 sps:$4 sm:$0xff]  }
 0xbb4   : > { %14527 = vmatpush1.bf16.msra.mxu0 %v24514_v57  ;;  %v24553_v57 = vld [vmem:[%s26132_s8 + $0x508] ss:$48 sps:$4 sm:$0xff]  }
 0xbb5   : > { %14570 = vmatpush1.bf16.msra.mxu1 %v24517_v14  ;;  %14528 = vmatprep.subr.bf16.mxu0 %v24522_v27  ;;  %v24558_v14 = vld [vmem:[%s26132_s8 + $0x10a4] ss:$48 sps:$4 sm:$0xff]   ;;  %v24561_v27 = vld [vmem:[%s26132_s8 + $0x4ac] ss:$48 sps:$4 sm:$0xff]  }
 0xbb6   : > { %14571 = vmatprep.subr.bf16.mxu1 %v24525_v62  ;;  %v24556_v62 = vld [vmem:[%s26132_s8 + $0x10a0] ss:$48 sps:$4 sm:$0xff]  }
 0xbb8   : > { %14529 = vmatpush1.bf16.msra.mxu0 %v24520_v50  ;;  %v24559_v50 = vld [vmem:[%s26132_s8 + $0x4a8] ss:$48 sps:$4 sm:$0xff]  }
 0xbb9   : > { %14572 = vmatpush1.bf16.msra.mxu1 %v24523_v30  ;;  %14530 = vmatprep.subr.bf16.mxu0 %v24528_v56  ;;  %v24564_v30 = vld [vmem:[%s26132_s8 + $0x1044] ss:$48 sps:$4 sm:$0xff]   ;;  %v24567_v56 = vld [vmem:[%s26132_s8 + $0x44c] ss:$48 sps:$4 sm:$0xff]  }
 0xbba   : > { %14573 = vmatprep.subr.bf16.mxu1 %v24531_v28  ;;  %v24562_v28 = vld [vmem:[%s26132_s8 + $0x1040] ss:$48 sps:$4 sm:$0xff]  }
 0xbbc   : > { %14531 = vmatpush1.bf16.msra.mxu0 %v24526_v16  ;;  %v24565_v16 = vld [vmem:[%s26132_s8 + $0x448] ss:$48 sps:$4 sm:$0xff]  }
 0xbbd   : > { %14574 = vmatpush1.bf16.msra.mxu1 %v24529_v53  ;;  %14532 = vmatprep.subr.bf16.mxu0 %v24534_v38  ;;  %v24570_v53 = vld [vmem:[%s26132_s8 + $0xfe4] ss:$48 sps:$4 sm:$0xff]   ;;  %v24573_v38 = vld [vmem:[%s26132_s8 + $0x3ec] ss:$48 sps:$4 sm:$0xff]  }
 0xbbe   : > { %14575 = vmatprep.subr.bf16.mxu1 %v24537_v49  ;;  %v24568_v49 = vld [vmem:[%s26132_s8 + $0xfe0] ss:$48 sps:$4 sm:$0xff]  }
 0xbc0   : > { %14533 = vmatpush1.bf16.msra.mxu0 %v24532_v46  ;;  %v24571_v46 = vld [vmem:[%s26132_s8 + $0x3e8] ss:$48 sps:$4 sm:$0xff]  }
 0xbc1   : > { %14576 = vmatpush1.bf16.msra.mxu1 %v24535_v48  ;;  %14534 = vmatprep.subr.bf16.mxu0 %v24540_v23  ;;  %v24576_v48 = vld [vmem:[%s26132_s8 + $0xf84] ss:$48 sps:$4 sm:$0xff]   ;;  %v24579_v23 = vld [vmem:[%s26132_s8 + $0x38c] ss:$48 sps:$4 sm:$0xff]  }
 0xbc2   : > { %14577 = vmatprep.subr.bf16.mxu1 %v24543_v55  ;;  %v24574_v55 = vld [vmem:[%s26132_s8 + $0xf80] ss:$48 sps:$4 sm:$0xff]  }
 0xbc4   : > { %14535 = vmatpush2.bf16.msra.mxu0 %v24538_v7  ;;  %v24577_v7 = vld [vmem:[%s26132_s8 + $0x388] ss:$48 sps:$4 sm:$0xff]  }
 0xbc5   : > { %14578 = vmatpush2.bf16.msra.mxu1 %v24541_v13  ;;  %14536 = vmatprep.subr.bf16.mxu0 %v24546_v22  ;;  %v24582_v13 = vld [vmem:[%s26132_s8 + $0xf24] ss:$48 sps:$4 sm:$0xff]   ;;  %v24585_v22 = vld [vmem:[%s26132_s8 + $0x32c] ss:$48 sps:$4 sm:$0xff]  }
 0xbc6   : > { %14579 = vmatprep.subr.bf16.mxu1 %v24549_v15  ;;  %v24580_v15 = vld [vmem:[%s26132_s8 + $0xf20] ss:$48 sps:$4 sm:$0xff]  }
 0xbc8   : > { %14537 = vmatpush2.bf16.msra.mxu0 %v24544_v3  ;;  %v24583_v3 = vld [vmem:[%s26132_s8 + $0x328] ss:$48 sps:$4 sm:$0xff]  }
 0xbc9   : > { %14580 = vmatpush2.bf16.msra.mxu1 %v24547_v35  ;;  %14538 = vmatprep.subr.bf16.mxu0 %v24552_v41  ;;  %v24588_v35 = vld [vmem:[%s26132_s8 + $0x8cc] ss:$48 sps:$4 sm:$0xff]  }
 0xbca   : > { %14581 = vmatprep.subr.bf16.mxu1 %v24555_v33  ;;  %v24591_v41 = vld [vmem:[%s26132_s8 + $0xecc] ss:$48 sps:$4 sm:$0xff]   ;;  %v28663_v33 = vsub.s32 6, %v29918_v59 }
 0xbcc   : > { %14539 = vmatpush2.bf16.msra.mxu0 %v24550_v47  ;;  %v24586_v47 = vld [vmem:[%s26132_s8 + $0x8c8] ss:$48 sps:$4 sm:$0xff]  }
 0xbcd   : > { %14582 = vmatpush2.bf16.msra.mxu1 %v24553_v57  ;;  %14540 = vmatprep.subr.bf16.mxu0 %v24558_v14  ;;  %v28666_v57 = vpop.f32.mrf.mxu0  ;;  %v24589_v14 = vld [vmem:[%s26132_s8 + $0xec8] ss:$48 sps:$4 sm:$0xff]  }
 0xbce   : > { %14583 = vmatprep.subr.bf16.mxu1 %v24561_v27  ;;  %v24594_v27 = vld [vmem:[%s26132_s8 + $0x86c] ss:$48 sps:$4 sm:$0xff]  }
 0xbd0   : > { %14541 = vmatpush2.bf16.msra.mxu0 %v24556_v62  ;;  %v25635_v62 = vld [vmem:[%s26446_s3] sm:$0xff] }
 0xbd1   : > { %14584 = vmatpush2.bf16.msra.mxu1 %v24559_v50  ;;  %14542 = vmatprep.subr.bf16.mxu0 %v24564_v30  ;;  %v10935_v50 = vrot.slane %v25635_v62, %v28663_v33 }
 0xbd2   : > { %14585 = vmatprep.subr.bf16.mxu1 %v24567_v56  ;;  %v24597_v56 = vld [vmem:[%s26132_s8 + $0xe6c] ss:$48 sps:$4 sm:$0xff]  }
 0xbd4   : > { %14543 = vmatpush2.bf16.msra.mxu0 %v24562_v28  ;;  %v10943_v28 = vrot.slane %v28472_v61, %v28663_v33  ;;  %v24603_v61 = vld [vmem:[%s26132_s8 + $0xe0c] ss:$48 sps:$4 sm:$0xff]  }
 0xbd5   : > { %14586 = vmatpush2.bf16.msra.mxu1 %v24565_v16  ;;  %14544 = vmatprep.subr.bf16.mxu0 %v24570_v53  ;;  %v24592_v53 = vld [vmem:[%s26132_s8 + $0x868] ss:$48 sps:$4 sm:$0xff]  }
 0xbd6   : > { %14587 = vmatprep.subr.bf16.mxu1 %v24573_v38 }
 0xbd8   : > { %14545 = vmatpush2.bf16.msra.mxu0 %v24568_v49  ;;  %v24595_v49 = vld [vmem:[%s26132_s8 + $0xe68] ss:$48 sps:$4 sm:$0xff]  }
 0xbd9   : > { %14588 = vmatpush2.bf16.msra.mxu1 %v24571_v46  ;;  %14546 = vmatprep.subr.bf16.mxu0 %v24576_v48  ;;  %v24600_v46 = vld [vmem:[%s26132_s8 + $0x80c] ss:$48 sps:$4 sm:$0xff]  }
 0xbda   : > { %14589 = vmatprep.subr.bf16.mxu1 %v24579_v23 }
 0xbdc   : > { %14547 = vmatpush2.bf16.msra.mxu0 %v24574_v55 }
 0xbdd   : > { %14590 = vmatpush2.bf16.msra.mxu1 %v24577_v7  ;;  %14548 = vmatprep.subr.bf16.mxu0 %v24582_v13  ;;  %v24598_v7 = vld [vmem:[%s26132_s8 + $0x808] ss:$48 sps:$4 sm:$0xff]  }
 0xbde   : > { %14591 = vmatprep.subr.bf16.mxu1 %v24585_v22  ;;  %v24606_v22 = vld [vmem:[%s26132_s8 + $0x7ac] ss:$48 sps:$4 sm:$0xff]  }
 0xbe0   : > { %14549 = vmatpush2.bf16.msra.mxu0 %v24580_v15 }
 0xbe1   : > { %14592 = vmatpush2.bf16.msra.mxu1 %v24583_v3  ;;  %14604 = vmatprep.subr.bf16.mxu0 %v24588_v35 }
 0xbe2   : > { %14647 = vmatprep.subr.bf16.mxu1 %v24591_v41 }
 0xbe3   : > { %v14294_v30 = vpop.f32.mrf.mxu0  ;;  %14551 = vmatmul.mubr.bf16.vlgmr.msra.gmra.mxu0 %v28165_v19 }
 0xbe4   : > { %v28677_v16 = vadd.f32 %v14294_v30, %v28598_v17  ;;  %14594 = vmatmul.mubr.bf16.vlgmr.msra.gmra.mxu1 %v28068_v8  ;;  %14605 = vmatpush1.bf16.msra.mxu0 %v24586_v47  ;;  %v10995_v8 = vrot.slane %v10935_v50, %v28296_v10  ;;  %v24607_v50 = vld [vmem:[%s26132_s8 + $0xda8] ss:$48 sps:$4 sm:$0xff]   ;;  %v24612_v30 = vld [vmem:[%s26132_s8 + $0x74c] ss:$48 sps:$4 sm:$0xff]  }
 0xbe5   : > { %14636 = vmatprep.mubr.bf16.mxu0 %v28060_v24  ;;  %14648 = vmatpush1.bf16.msra.mxu1 %v24589_v14  ;;  %v28682_v38 = vpop.f32.mrf.mxu0  ;;  %v11003_v24 = vrot.slane %v10943_v28, %v28296_v10 }
 0xbe6   : > { %v14694_v48 = vmul.f32 %v28677_v16, %v28677_v16  ;;  %14679 = vmatprep.mubr.bf16.mxu1 %v28084_v20  ;;  %14606 = vmatprep.subr.bf16.mxu0 %v24594_v27  ;;  %v13957_v13 = vadd.f32 %v28385_v40, %v10995_v8  ;;  %v24601_v20 = vld [vmem:[%s26132_s8 + $0xe08] ss:$48 sps:$4 sm:$0xff]   ;;  %v13953_v41 = vadd.f32 %v28316_v32, %v10995_v8 }
 0xbe7   : > { %v14298_v17 = vpop.f32.mrf.mxu0  ;;  %14649 = vmatprep.subr.bf16.mxu1 %v24597_v56  ;;  %v14086_v15 = vadd.f32 %v28488_v12, %v11003_v24  ;;  %v14082_v40 = vadd.f32 %v28476_v2, %v11003_v24  ;;  %v24604_v12 = vld [vmem:[%s26132_s8 + $0x7a8] ss:$48 sps:$4 sm:$0xff]  }
 0xbe8   : > { %v14718_v23 = vmul.f32 %v14694_v48, %v28677_v16  ;;  %v28694_v55 = vadd.f32 %v14298_v17, %v28607_v26  ;;  %14607 = vmatpush1.bf16.msra.mxu0 %v24592_v53  ;;  %v24609_v26 = vld [vmem:[%s26132_s8 + $0xdac] ss:$48 sps:$4 sm:$0xff]   ;;  %v14000_v62 = vadd.f32 %v28462_v37, %v13957_v13  ;;  %v13996_v28 = vadd.f32 %v28318_v9, %v13953_v41  ;;  %v24613_v9 = vld [vmem:[%s26132_s8 + $0xd48] ss:$48 sps:$4 sm:$0xff]  }
 0xbe9   : > { %14650 = vmatpush1.bf16.msra.mxu1 %v24595_v49  ;;  %14608 = vmatprep.subr.bf16.mxu0 %v24600_v46  ;;  %v14129_v47 = vadd.f32 %v28583_v45, %v14086_v15  ;;  %v14125_v32 = vadd.f32 %v28496_v43, %v14082_v40  ;;  %v24615_v45 = vld [vmem:[%s26132_s8 + $0xd4c] ss:$48 sps:$4 sm:$0xff]   ;;  %v24610_v43 = vld [vmem:[%s26132_s8 + $0x748] ss:$48 sps:$4 sm:$0xff]  }
 0xbea   : > { %v14742_v3 = vmul.f32 0.044715, %v14718_v23  ;;  %v14706_v35 = vmul.f32 %v28694_v55, %v28694_v55  ;;  %14651 = vmatprep.subr.bf16.mxu1 %v24603_v61  ;;  %v28717_v53 = vadd.f32 %v28485_v52, %v14000_v62  ;;  %v28725_v46 = vadd.f32 %v28397_v36, %v13996_v28  ;;  %v24618_v48 = vld [vmem:[%s26132_s8 + $0x6ec] ss:$48 sps:$4 sm:$0xff]   ;;  %v24616_v17 = vld [vmem:[%s26132_s8 + $0x6e8] ss:$48 sps:$4 sm:$0xff]  }
 0xbeb   : > { %v28720_v37 = vadd.f32 %v28586_v0, %v14129_v47  ;;  %v28730_v52 = vadd.f32 %v28503_v39, %v14125_v32  ;;  %v24621_v61 = vld [vmem:[%s26132_s8 + $0xcec] ss:$48 sps:$4 sm:$0xff]   ;;  %v24619_v39 = vld [vmem:[%s26132_s8 + $0xce8] ss:$48 sps:$4 sm:$0xff]  }
 0xbec   : > { %v14766_v14 = vadd.f32 %v14742_v3, %v28677_v16  ;;  %v14730_v27 = vmul.f32 %v14706_v35, %v28694_v55  ;;  %14609 = vmatpush1.bf16.msra.mxu0 %v24598_v7  ;;  %v14703_v8 = vmul.f32 %v28717_v53, %v28717_v53  ;;  %v14691_v24 = vmul.f32 %v28725_v46, %v28725_v46  ;;  %v24624_v23 = vld [vmem:[%s26132_s8 + $0x68c] ss:$48 sps:$4 sm:$0xff]   ;;  %v24622_v15 = vld [vmem:[%s26132_s8 + $0x688] ss:$48 sps:$4 sm:$0xff]  }
 0xbed   : > { %14652 = vmatpush1.bf16.msra.mxu1 %v24601_v20  ;;  %14610 = vmatprep.subr.bf16.mxu0 %v24606_v22  ;;  %v14705_v36 = vmul.f32 %v28720_v37, %v28720_v37  ;;  %v14693_v7 = vmul.f32 %v28730_v52, %v28730_v52  ;;  %v24627_v13 = vld [vmem:[%s26132_s8 + $0xc8c] ss:$48 sps:$4 sm:$0xff]   ;;  %v24625_v35 = vld [vmem:[%s26132_s8 + $0xc88] ss:$48 sps:$4 sm:$0xff]  }
 0xbee   : > { %v14790_v2 = vmul.f32 0.7978846, %v14766_v14  ;;  %v14754_v56 = vmul.f32 0.044715, %v14730_v27  ;;  %14653 = vmatprep.subr.bf16.mxu1 %v24609_v26  ;;  %v14727_v20 = vmul.f32 %v14703_v8, %v28717_v53  ;;  %v14715_v3 = vmul.f32 %v14691_v24, %v28725_v46  ;;  %v24630_v26 = vld [vmem:[%s26132_s8 + $0x62c] ss:$48 sps:$4 sm:$0xff]  }
 0xbef   : > { %v14729_v22 = vmul.f32 %v14705_v36, %v28720_v37  ;;  %v14717_v41 = vmul.f32 %v14693_v7, %v28730_v52  ;;  %v24633_v40 = vld [vmem:[%s26132_s8 + $0xc2c] ss:$48 sps:$4 sm:$0xff]   ;;  %v24628_v27 = vld [vmem:[%s26132_s8 + $0x628] ss:$48 sps:$4 sm:$0xff]  }
 0xbf0   : > { %25566 = vtanh.f32 %v14790_v2  ;;  %v14778_v49 = vadd.f32 %v14754_v56, %v28694_v55  ;;  %14611 = vmatpush1.bf16.msra.mxu0 %v24604_v12  ;;  %v14751_v47 = vmul.f32 0.044715, %v14727_v20  ;;  %v14739_v62 = vmul.f32 0.044715, %v14715_v3  ;;  %v24639_v56 = vld [vmem:[%s26132_s8 + $0x11cc] ss:$48 sps:$4 sm:$0xff]  }
 0xbf1   : > { %14654 = vmatpush1.bf16.msra.mxu1 %v24607_v50  ;;  %14612 = vmatprep.subr.bf16.mxu0 %v24612_v30  ;;  %v14753_v14 = vmul.f32 0.044715, %v14729_v22  ;;  %v24631_v50 = vld [vmem:[%s26132_s8 + $0xc28] ss:$48 sps:$4 sm:$0xff]   ;;  %v24636_v30 = vld [vmem:[%s26132_s8 + $0xbcc] ss:$48 sps:$4 sm:$0xff]  }
 0xbf2   : > { %v14802_v0 = vmul.f32 0.7978846, %v14778_v49  ;;  %14655 = vmatprep.subr.bf16.mxu1 %v24615_v45  ;;  %v14741_v32 = vmul.f32 0.044715, %v14717_v41  ;;  %v14775_v45 = vadd.f32 %v14751_v47, %v28717_v53  ;;  %v24634_v49 = vld [vmem:[%s26132_s8 + $0xbc8] ss:$48 sps:$4 sm:$0xff]  }
 0xbf3   : > { %v14777_v28 = vadd.f32 %v14753_v14, %v28720_v37  ;;  %v24640_v7 = vld [vmem:[%s26132_s8 + $0xb68] ss:$48 sps:$4 sm:$0xff]   ;;  %v24648_v22 = vld [vmem:[%s26132_s8 + $0xb0c] ss:$48 sps:$4 sm:$0xff]  }
 0xbf4   : > { %25568 = vtanh.f32 %v14802_v0  ;;  %14613 = vmatpush1.bf16.msra.mxu0 %v24610_v43  ;;  %v24642_v0 = vld [vmem:[%s26132_s8 + $0xb6c] ss:$48 sps:$4 sm:$0xff]   ;;  %v14799_v24 = vmul.f32 0.7978846, %v14775_v45  ;;  %v24643_v20 = vld [vmem:[%s26132_s8 + $0x1168] ss:$48 sps:$4 sm:$0xff]   ;;  %v28785_v45 = vpop.f32.mrf.mxu1 }
 0xbf5   : > { %14656 = vmatpush1.bf16.msra.mxu1 %v24613_v9  ;;  %14614 = vmatprep.subr.bf16.mxu0 %v24618_v48  ;;  %v14763_v9 = vadd.f32 %v14739_v62, %v28725_v46  ;;  %v24637_v48 = vld [vmem:[%s26132_s8 + $0x11c8] ss:$48 sps:$4 sm:$0xff]   ;;  %v24654_v47 = vld [vmem:[%s26132_s8 + $0xaac] ss:$48 sps:$4 sm:$0xff]  }
 0xbf6   : > { %14657 = vmatprep.subr.bf16.mxu1 %v24621_v61  ;;  %v14765_v61 = vadd.f32 %v14741_v32, %v28730_v52  ;;  %25570 = vtanh.f32 %v14799_v24  ;;  %v24652_v14 = vld [vmem:[%s26132_s8 + $0xaa8] ss:$48 sps:$4 sm:$0xff]   ;;  %v24663_v62 = vld [vmem:[%s26132_s8 + $0x104c] ss:$48 sps:$4 sm:$0xff]  }
 0xbf7   : > { %v24666_v32 = vld [vmem:[%s26132_s8 + $0x9ec] ss:$48 sps:$4 sm:$0xff]  }
 0xbf8   : > { %14615 = vmatpush1.bf16.msra.mxu0 %v24616_v17  ;;  %v24645_v17 = vld [vmem:[%s26132_s8 + $0x116c] ss:$48 sps:$4 sm:$0xff]  }
 0xbf9   : > { %14658 = vmatpush1.bf16.msra.mxu1 %v24619_v39  ;;  %14616 = vmatprep.subr.bf16.mxu0 %v24624_v23  ;;  %v14801_v39 = vmul.f32 0.7978846, %v14777_v28  ;;  %v24664_v28 = vld [vmem:[%s26132_s8 + $0x9e8] ss:$48 sps:$4 sm:$0xff]  }
 0xbfa   : > { %14659 = vmatprep.subr.bf16.mxu1 %v24627_v13  ;;  %v14787_v13 = vmul.f32 0.7978846, %v14763_v9  ;;  %v24672_v9 = vld [vmem:[%s26132_s8 + $0x98c] ss:$48 sps:$4 sm:$0xff]  }
 0xbfb   : > { %25572 = vtanh.f32 %v14801_v39  ;;  %v24673_v39 = vld [vmem:[%s26132_s8 + $0xf88] ss:$48 sps:$4 sm:$0xff]  }
 0xbfc   : > { %14617 = vmatpush1.bf16.msra.mxu0 %v24622_v15  ;;  %v14789_v15 = vmul.f32 0.7978846, %v14765_v61  ;;  %25574 = vtanh.f32 %v14787_v13  ;;  %v24675_v61 = vld [vmem:[%s26132_s8 + $0xf8c] ss:$48 sps:$4 sm:$0xff]  }
 0xbfd   : > { %v25567_v12 = vpop.eup %25566  ;;  %14660 = vmatpush1.bf16.msra.mxu1 %v24625_v35  ;;  %14618 = vmatprep.subr.bf16.mxu0 %v24630_v26  ;;  %v24651_v26 = vld [vmem:[%s26132_s8 + $0x110c] ss:$48 sps:$4 sm:$0xff]  }
 0xbfe   : > { %v14838_v2 = vadd.f32 1.0, %v25567_v12  ;;  %14661 = vmatprep.subr.bf16.mxu1 %v24633_v40  ;;  %v24646_v40 = vld [vmem:[%s26132_s8 + $0xb08] ss:$48 sps:$4 sm:$0xff]   ;;  %25576 = vtanh.f32 %v14789_v15  ;;  %v24660_v12 = vld [vmem:[%s26132_s8 + $0xa4c] ss:$48 sps:$4 sm:$0xff]  }
 0xbff   : > { %v25636_v13 = vld [vmem:[%s26446_s3 + $0x18] sm:$0xff] }
 0xc00   : > { %14619 = vmatpush1.bf16.msra.mxu0 %v24628_v27  ;;  %v14862_v8 = vmul.f32 0.5, %v14838_v2  ;;  %v24655_v27 = vld [vmem:[%s26132_s8 + $0x10a8] ss:$48 sps:$4 sm:$0xff]   ;;  %v24669_v2 = vld [vmem:[%s26132_s8 + $0xfec] ss:$48 sps:$4 sm:$0xff]  }
 0xc01   : > { %v25569_v43 = vpop.eup %25568  ;;  %14662 = vmatpush1.bf16.msra.mxu1 %v24631_v50  ;;  %14620 = vmatprep.subr.bf16.mxu0 %v24636_v30  ;;  %v24658_v50 = vld [vmem:[%s26132_s8 + $0xa48] ss:$48 sps:$4 sm:$0xff]   ;;  %v24681_v15 = vld [vmem:[%s26132_s8 + $0xf2c] ss:$48 sps:$4 sm:$0xff]  }
 0xc02   : > { %v14850_v36 = vadd.f32 1.0, %v25569_v43  ;;  %14663 = vmatprep.subr.bf16.mxu1 %v24639_v56  ;;  %v14886_v3 = vmul.f32 %v14862_v8, %v28677_v16  ;;  %v24649_v16 = vld [vmem:[%s26132_s8 + $0x1108] ss:$48 sps:$4 sm:$0xff]  }
 0xc03   : > { %v24661_v30 = vld [vmem:[%s26132_s8 + $0x1048] ss:$48 sps:$4 sm:$0xff]   ;;  %v25571_v56 = vpop.eup %25570 }
 0xc04   : > { %v14874_v23 = vmul.f32 0.5, %v14850_v36  ;;  %14621 = vmatpush2.bf16.msra.mxu0 %v24634_v49  ;;  %v24667_v43 = vld [vmem:[%s26132_s8 + $0xfe8] ss:$48 sps:$4 sm:$0xff]   ;;  %v14847_v36 = vadd.f32 1.0, %v25571_v56 }
 0xc05   : > { %14664 = vmatpush2.bf16.msra.mxu1 %v24637_v48  ;;  %14622 = vmatprep.subr.bf16.mxu0 %v24642_v0  ;;  %v14337_v0 = vpop.f32.mrf.mxu1  ;;  %v24685_v56 = vld [vmem:[%s26134_s17 + $0x450] ss:$24 sps:$4 sm:$0xff]  }
 0xc06   : > { %v14898_v35 = vmul.f32 %v14874_v23, %v28694_v55  ;;  %14665 = vmatprep.subr.bf16.mxu1 %v24645_v17  ;;  %v24657_v55 = vld [vmem:[%s26132_s8 + $0x10ac] ss:$48 sps:$4 sm:$0xff]   ;;  %v24670_v17 = vld [vmem:[%s26132_s8 + $0x988] ss:$48 sps:$4 sm:$0xff]  }
 0xc07   : > { %v24678_v23 = vld [vmem:[%s26132_s8 + $0x92c] ss:$48 sps:$4 sm:$0xff]  }
 0xc08   : > { %v28771_v41 = vpack.c.bf16 %v14898_v35, %v14886_v3  ;;  %14623 = vmatpush2.bf16.msra.mxu0 %v24640_v7  ;;  %v25573_v49 = vpop.eup %25572  ;;  %v14871_v35 = vmul.f32 0.5, %v14847_v36 }
 0xc09   : > { %14666 = vmatpush2.bf16.msra.mxu1 %v24643_v20  ;;  %14624 = vmatprep.subr.bf16.mxu0 %v24648_v22  ;;  %v25575_v48 = vpop.eup %25574  ;;  %v14849_v24 = vadd.f32 1.0, %v25573_v49  ;;  %v10955_v20 = vrot.slane %v25636_v13, %v28296_v10  ;;  %v28796_v22 = vpop.f32.mrf.mxu1 }
 0xc0a   : > { %14667 = vmatprep.subr.bf16.mxu1 %v24651_v26  ;;  %v14835_v7 = vadd.f32 1.0, %v25575_v48  ;;  %v24676_v26 = vld [vmem:[%s26132_s8 + $0x928] ss:$48 sps:$4 sm:$0xff]   ;;  %v24690_v48 = vld [vmem:[%s26134_s17 + $0x124] ss:$24 sps:$4 sm:$0xff]  }
 0xc0b   : > { %v25577_v8 = vpop.eup %25576 }
 0xc0c   : > { %14625 = vmatpush2.bf16.msra.mxu0 %v24646_v40  ;;  %v14837_v3 = vadd.f32 1.0, %v25577_v8  ;;  %v14873_v40 = vmul.f32 0.5, %v14849_v24  ;;  %v24693_v8 = vld [vmem:[%s26134_s17 + $0x424] ss:$24 sps:$4 sm:$0xff]   ;;  %v24696_v24 = vld [vmem:[%s26134_s17 + $0xf4] ss:$24 sps:$4 sm:$0xff]  }
 0xc0d   : > { %14668 = vmatpush2.bf16.msra.mxu1 %v24649_v16  ;;  %14626 = vmatprep.subr.bf16.mxu0 %v24654_v47  ;;  %v24679_v16 = vld [vmem:[%s26132_s8 + $0xf28] ss:$48 sps:$4 sm:$0xff]   ;;  %v24684_v47 = vld [vmem:[%s26134_s17 + $0x154] ss:$24 sps:$4 sm:$0xff]  }
 0xc0e   : > { %14669 = vmatprep.subr.bf16.mxu1 %v24657_v55  ;;  %v14859_v55 = vmul.f32 0.5, %v14835_v7 }
 0xc10   : > { %14627 = vmatpush2.bf16.msra.mxu0 %v24652_v14  ;;  %v11015_v14 = vrot.slane %v10955_v20, %v28296_v10 }
 0xc11   : > { %14670 = vmatpush2.bf16.msra.mxu1 %v24655_v27  ;;  %14628 = vmatprep.subr.bf16.mxu0 %v24660_v12  ;;  %v14341_v27 = vpop.f32.mrf.mxu1  ;;  %v24687_v12 = vld [vmem:[%s26134_s17 + $0x454] ss:$24 sps:$4 sm:$0xff]  }
 0xc12   : > { %14671 = vmatprep.subr.bf16.mxu1 %v24663_v62  ;;  %v14861_v62 = vmul.f32 0.5, %v14837_v3  ;;  %v14338_v49 = vadd.f32 %v14337_v0, %v11015_v14 }
 0xc14   : > { %14629 = vmatpush2.bf16.msra.mxu0 %v24658_v50  ;;  %v14895_v50 = vmul.f32 %v14871_v35, %v28717_v53  ;;  %v10951_v53 = vrot.slane %v28574_v34, %v28663_v33 }
 0xc15   : > { %14672 = vmatpush2.bf16.msra.mxu1 %v24661_v30  ;;  %14630 = vmatprep.subr.bf16.mxu0 %v24666_v32  ;;  %v24682_v30 = vld [vmem:[%s26134_s17 + $0x150] ss:$24 sps:$4 sm:$0xff]   ;;  %v14897_v32 = vmul.f32 %v14873_v40, %v28720_v37 }
 0xc16   : > { %14673 = vmatprep.subr.bf16.mxu1 %v24669_v2  ;;  %v28807_v2 = vpop.f32.mrf.mxu0 }
 0xc18   : > { %14631 = vmatpush2.bf16.msra.mxu0 %v24664_v28  ;;  %v14883_v28 = vmul.f32 %v14859_v55, %v28725_v46  ;;  %v10959_v46 = vrot.slane %v25636_v13, %v28663_v33  ;;  %v11011_v13 = vrot.slane %v10951_v53, %v28296_v10  ;;  %v24697_v55 = vld [vmem:[%s26134_s17 + $0x3f0] ss:$24 sps:$4 sm:$0xff]  }
 0xc19   : > { %14674 = vmatpush2.bf16.msra.mxu1 %v24667_v43  ;;  %14632 = vmatprep.subr.bf16.mxu0 %v24672_v9  ;;  %v14343_v43 = vpop.f32.mrf.mxu1  ;;  %v14885_v9 = vmul.f32 %v14861_v62, %v28730_v52 }
 0xc1a   : > { %14675 = vmatprep.subr.bf16.mxu1 %v24675_v61  ;;  %v28816_v61 = vpack.c.bf16 %v14895_v50, %v14883_v28  ;;  %v14215_v40 = vadd.f32 %v28666_v57, %v11011_v13  ;;  %v24705_v50 = vld [vmem:[%s26134_s17 + $0x3c4] ss:$24 sps:$4 sm:$0xff]  }
 0xc1b   : > { %v28821_v52 = vpack.c.bf16 %v14897_v32, %v14885_v9  ;;  %v24703_v9 = vld [vmem:[%s26134_s17 + $0x3c0] ss:$24 sps:$4 sm:$0xff]  }
 0xc1c   : > { %14633 = vmatpush2.bf16.msra.mxu0 %v24670_v17  ;;  %v24688_v17 = vld [vmem:[%s26134_s17 + $0x120] ss:$24 sps:$4 sm:$0xff]  }
 0xc1d   : > { %14676 = vmatpush2.bf16.msra.mxu1 %v24673_v39  ;;  %14634 = vmatprep.subr.bf16.mxu0 %v24678_v23  ;;  %v14342_v39 = vadd.f32 %v14341_v27, %v11015_v14  ;;  %v24702_v14 = vld [vmem:[%s26134_s17 + $0xc4] ss:$24 sps:$4 sm:$0xff]  }
 0xc1e   : > { %14677 = vmatprep.subr.bf16.mxu1 %v24681_v15  ;;  %v11019_v15 = vrot.slane %v10959_v46, %v28296_v10 }
 0xc20   : > { %14635 = vmatpush2.bf16.msra.mxu0 %v24676_v26  ;;  %v24694_v26 = vld [vmem:[%s26134_s17 + $0xf0] ss:$24 sps:$4 sm:$0xff]   ;;  %v14344_v27 = vadd.f32 %v14343_v43, %v11019_v15  ;;  %v14340_v57 = vadd.f32 %v28796_v22, %v11019_v15  ;;  %v14258_v43 = vadd.f32 %v28785_v45, %v14215_v40  ;;  %v24712_v15 = vld [vmem:[%s26134_s17 + $0x60] ss:$24 sps:$4 sm:$0xff]   ;;  %v24723_v40 = vld [vmem:[%s26134_s17 + $0x334] ss:$24 sps:$4 sm:$0xff]  }
 0xc21   : > { %14678 = vmatpush2.bf16.msra.mxu1 %v24679_v16  ;;  %18428 = vmatprep.subr.bf16.mxu0 %v24684_v47 }
 0xc22   : > { %18471 = vmatprep.subr.bf16.mxu1 %v24687_v12  ;;  %v28856_v46 = vadd.f32 %v28807_v2, %v14258_v43  ;;  %v24732_v43 = vld [vmem:[%s26134_s17 + $0x2d4] ss:$24 sps:$4 sm:$0xff]  }
 0xc23   : > { %v14380_v37 = vpop.f32.mrf.mxu0  ;;  %14637 = vmatmul.mubr.bf16.vlgmr.msra.gmra.mxu0 %v28072_v29  ;;  %v24691_v29 = vld [vmem:[%s26134_s17 + $0x420] ss:$24 sps:$4 sm:$0xff]  }
 0xc24   : > { %v14381_v0 = vadd.f32 %v14380_v37, %v14338_v49  ;;  %v14423_v36 = vpop.f32.mrf.mxu1  ;;  %14680 = vmatmul.mubr.bf16.vlgmr.msra.gmra.mxu1 %v28165_v19  ;;  %18429 = vmatpush1.bf16.msra.mxu0 %v24682_v30  ;;  %v24699_v19 = vld [vmem:[%s26134_s17 + $0x3f4] ss:$24 sps:$4 sm:$0xff]   ;;  %v14211_v30 = vadd.f32 %v28594_v25, %v11011_v13  ;;  %v24700_v49 = vld [vmem:[%s26134_s17 + $0xc0] ss:$24 sps:$4 sm:$0xff]   ;;  %v14707_v13 = vmul.f32 %v28856_v46, %v28856_v46 }
 0xc25   : > { %18460 = vmatprep.mubr.bf16.mxu0 %v28816_v61  ;;  %18472 = vmatpush1.bf16.msra.mxu1 %v24685_v56  ;;  %v14382_v34 = vpop.f32.mrf.mxu0  ;;  %v24711_v37 = vld [vmem:[%s26134_s17 + $0x394] ss:$24 sps:$4 sm:$0xff]  }
 0xc26   : > { %v28827_v23 = vadd.f32 %v14423_v36, %v14381_v0  ;;  %18503 = vmatprep.mubr.bf16.mxu1 %v28821_v52  ;;  %v14425_v7 = vpop.f32.mrf.mxu1  ;;  %18430 = vmatprep.subr.bf16.mxu0 %v24690_v48  ;;  %v24708_v48 = vld [vmem:[%s26134_s17 + $0x94] ss:$24 sps:$4 sm:$0xff]   ;;  %v14383_v25 = vadd.f32 %v14382_v34, %v14340_v57 }
 0xc27   : > { %v14384_v20 = vpop.f32.mrf.mxu0  ;;  %18473 = vmatprep.subr.bf16.mxu1 %v24693_v8  ;;  %v14254_v8 = vadd.f32 %v28601_v44, %v14211_v30  ;;  %v24714_v44 = vld [vmem:[%s26134_s17 + $0x64] ss:$24 sps:$4 sm:$0xff]  }
 0xc28   : > { %v14696_v3 = vmul.f32 %v28827_v23, %v28827_v23  ;;  %v14385_v35 = vadd.f32 %v14384_v20, %v14342_v39  ;;  %18431 = vmatpush1.bf16.msra.mxu0 %v24688_v17  ;;  %v14427_v16 = vpop.f32.mrf.mxu1  ;;  %v28866_v2 = vadd.f32 %v14425_v7, %v14383_v25  ;;  %v24715_v7 = vld [vmem:[%s26134_s17 + $0x360] ss:$24 sps:$4 sm:$0xff]   ;;  %v24729_v30 = vld [vmem:[%s26134_s17 + $0x304] ss:$24 sps:$4 sm:$0xff]  }
 0xc29   : > { %18474 = vmatpush1.bf16.msra.mxu1 %v24691_v29  ;;  %v14386_v47 = vpop.f32.mrf.mxu0  ;;  %18432 = vmatprep.subr.bf16.mxu0 %v24696_v24  ;;  %v24706_v29 = vld [vmem:[%s26134_s17 + $0x90] ss:$24 sps:$4 sm:$0xff]   ;;  %v28862_v34 = vadd.f32 %v28682_v38, %v14254_v8 }
 0xc2a   : > { %v14720_v12 = vmul.f32 %v14696_v3, %v28827_v23  ;;  %v28840_v62 = vadd.f32 %v14427_v16, %v14385_v35  ;;  %18475 = vmatprep.subr.bf16.mxu1 %v24699_v19  ;;  %v14387_v28 = vadd.f32 %v14386_v47, %v14344_v27  ;;  %v14429_v45 = vpop.f32.mrf.mxu1  ;;  %v24709_v24 = vld [vmem:[%s26134_s17 + $0x390] ss:$24 sps:$4 sm:$0xff]   ;;  %v24717_v19 = vld [vmem:[%s26134_s17 + $0x364] ss:$24 sps:$4 sm:$0xff]   ;;  %v24720_v35 = vld [vmem:[%s26134_s17 + $0x34] ss:$24 sps:$4 sm:$0xff]   ;;  %v14731_v16 = vmul.f32 %v14707_v13, %v28856_v46 }
 0xc2b   : > { %v14695_v3 = vmul.f32 %v28862_v34, %v28862_v34  ;;  %v24721_v27 = vld [vmem:[%s26134_s17 + $0x330] ss:$24 sps:$4 sm:$0xff]  }
 0xc2c   : > { %v14744_v32 = vmul.f32 0.044715, %v14720_v12  ;;  %v14708_v56 = vmul.f32 %v28840_v62, %v28840_v62  ;;  %18433 = vmatpush1.bf16.msra.mxu0 %v24694_v26  ;;  %v28858_v17 = vadd.f32 %v14429_v45, %v14387_v28  ;;  %v14697_v26 = vmul.f32 %v28866_v2, %v28866_v2  ;;  %v24726_v12 = vld [vmem:[%s26134_s17 + $0x4] ss:$24 sps:$4 sm:$0xff]   ;;  %v24730_v8 = vld [vmem:[%s26134_s17 + $0x2d0] ss:$24 sps:$4 sm:$0xff]  }
 0xc2d   : > { %18476 = vmatpush1.bf16.msra.mxu1 %v24697_v55  ;;  %18434 = vmatprep.subr.bf16.mxu0 %v24702_v14  ;;  %v24718_v55 = vld [vmem:[%s26134_s17 + $0x30] ss:$24 sps:$4 sm:$0xff]   ;;  %v14719_v14 = vmul.f32 %v14695_v3, %v28862_v34  ;;  %v14755_v57 = vmul.f32 0.044715, %v14731_v16  ;;  %v24739_v3 = vld [vmem:[%s26134_s17 + $0x5a0] ss:$24 sps:$4 sm:$0xff]  }
 0xc2e   : > { %v14768_v53 = vadd.f32 %v14744_v32, %v28827_v23  ;;  %v14732_v22 = vmul.f32 %v14708_v56, %v28840_v62  ;;  %18477 = vmatprep.subr.bf16.mxu1 %v24705_v50  ;;  %v14709_v38 = vmul.f32 %v28858_v17, %v28858_v17  ;;  %v14721_v50 = vmul.f32 %v14697_v26, %v28866_v2  ;;  %v24724_v56 = vld [vmem:[%s26134_s17] ss:$24 sps:$4 sm:$0xff]  }
 0xc2f   : > { %v14743_v28 = vmul.f32 0.044715, %v14719_v14  ;;  %v14779_v25 = vadd.f32 %v14755_v57, %v28856_v46  ;;  %v24745_v14 = vld [vmem:[%s26134_s17 + $0x570] ss:$24 sps:$4 sm:$0xff]   ;;  %v24759_v57 = vld [vmem:[%s26134_s17 + $0x514] ss:$24 sps:$4 sm:$0xff]  }
 0xc30   : > { %v14792_v0 = vmul.f32 0.7978846, %v14768_v53  ;;  %v14756_v36 = vmul.f32 0.044715, %v14732_v22  ;;  %18435 = vmatpush1.bf16.msra.mxu0 %v24700_v49  ;;  %v14733_v47 = vmul.f32 %v14709_v38, %v28858_v17  ;;  %v24727_v49 = vld [vmem:[%s26134_s17 + $0x300] ss:$24 sps:$4 sm:$0xff]  }
 0xc31   : > { %18478 = vmatpush1.bf16.msra.mxu1 %v24703_v9  ;;  %18436 = vmatprep.subr.bf16.mxu0 %v24708_v48  ;;  %v14745_v9 = vmul.f32 0.044715, %v14721_v50  ;;  %v24735_v48 = vld [vmem:[%s26134_s17 + $0x5d4] ss:$24 sps:$4 sm:$0xff]   ;;  %v14767_v45 = vadd.f32 %v14743_v28, %v28862_v34  ;;  %v24736_v38 = vld [vmem:[%s26134_s17 + $0x2a0] ss:$24 sps:$4 sm:$0xff]  }
 0xc32   : > { %25578 = vtanh.f32 %v14792_v0  ;;  %v14780_v39 = vadd.f32 %v14756_v36, %v28840_v62  ;;  %18479 = vmatprep.subr.bf16.mxu1 %v24711_v37  ;;  %v14757_v32 = vmul.f32 0.044715, %v14733_v47  ;;  %v24733_v0 = vld [vmem:[%s26134_s17 + $0x5d0] ss:$24 sps:$4 sm:$0xff]   ;;  %v24738_v36 = vld [vmem:[%s26134_s17 + $0x2a4] ss:$24 sps:$4 sm:$0xff]  }
 0xc33   : > { %v24751_v50 = vld [vmem:[%s26134_s17 + $0x540] ss:$24 sps:$4 sm:$0xff]   ;;  %v24762_v28 = vld [vmem:[%s26134_s17 + $0x1e4] ss:$24 sps:$4 sm:$0xff]  }
 0xc34   : > { %v14804_v20 = vmul.f32 0.7978846, %v14780_v39  ;;  %18437 = vmatpush1.bf16.msra.mxu0 %v24706_v29  ;;  %v14781_v37 = vadd.f32 %v14757_v32, %v28858_v17  ;;  %v14769_v29 = vadd.f32 %v14745_v9, %v28866_v2  ;;  %v14803_v39 = vmul.f32 0.7978846, %v14779_v25  ;;  %v24754_v32 = vld [vmem:[%s26134_s17 + $0x210] ss:$24 sps:$4 sm:$0xff]  }
 0xc35   : > { %18480 = vmatpush1.bf16.msra.mxu1 %v24709_v24  ;;  %18438 = vmatprep.subr.bf16.mxu0 %v24714_v44  ;;  %v24741_v24 = vld [vmem:[%s26134_s17 + $0x5a4] ss:$24 sps:$4 sm:$0xff]   ;;  %v24760_v9 = vld [vmem:[%s26134_s17 + $0x1e0] ss:$24 sps:$4 sm:$0xff]   ;;  %v24768_v25 = vld [vmem:[%s26134_s17 + $0x1b4] ss:$24 sps:$4 sm:$0xff]  }
 0xc36   : > { %25580 = vtanh.f32 %v14804_v20  ;;  %18481 = vmatprep.subr.bf16.mxu1 %v24717_v19  ;;  %v14805_v20 = vmul.f32 0.7978846, %v14781_v37  ;;  %v24771_v37 = vld [vmem:[%s26134_s17 + $0x4b4] ss:$24 sps:$4 sm:$0xff]  }
 0xc37   : > { %25582 = vtanh.f32 %v14803_v39  ;;  %v24777_v39 = vld [vmem:[%s26134_s17 + $0x484] ss:$24 sps:$4 sm:$0xff]  }
 0xc38   : > { %18439 = vmatpush1.bf16.msra.mxu0 %v24712_v15  ;;  %v14791_v15 = vmul.f32 0.7978846, %v14767_v45  ;;  %25584 = vtanh.f32 %v14805_v20  ;;  %v24772_v20 = vld [vmem:[%s26134_s17 + $0x180] ss:$24 sps:$4 sm:$0xff]  }
 0xc39   : > { %18482 = vmatpush1.bf16.msra.mxu1 %v24715_v7  ;;  %18440 = vmatprep.subr.bf16.mxu0 %v24720_v35  ;;  %v24744_v7 = vld [vmem:[%s26134_s17 + $0x274] ss:$24 sps:$4 sm:$0xff]   ;;  %v14793_v35 = vmul.f32 0.7978846, %v14769_v29  ;;  %v24769_v29 = vld [vmem:[%s26134_s17 + $0x4b0] ss:$24 sps:$4 sm:$0xff]  }
 0xc3a   : > { %18483 = vmatprep.subr.bf16.mxu1 %v24723_v40  ;;  %v24747_v40 = vld [vmem:[%s26134_s17 + $0x574] ss:$24 sps:$4 sm:$0xff]   ;;  %25586 = vtanh.f32 %v14791_v15  ;;  %v24775_v15 = vld [vmem:[%s26134_s17 + $0x480] ss:$24 sps:$4 sm:$0xff]  }
 0xc3b   : > { %25588 = vtanh.f32 %v14793_v35  ;;  %v24783_v35 = vld [vmem:[%s26134_s17 + $0xa54] ss:$24 sps:$4 sm:$0xff]  }
 0xc3c   : > { %18441 = vmatpush1.bf16.msra.mxu0 %v24718_v55  ;;  %v24742_v55 = vld [vmem:[%s26134_s17 + $0x270] ss:$24 sps:$4 sm:$0xff]  }
 0xc3d   : > { %18484 = vmatpush1.bf16.msra.mxu1 %v24721_v27  ;;  %18442 = vmatprep.subr.bf16.mxu0 %v24726_v12  ;;  %v24750_v27 = vld [vmem:[%s26134_s17 + $0x244] ss:$24 sps:$4 sm:$0xff]  }
 0xc3e   : > { %18485 = vmatprep.subr.bf16.mxu1 %v24729_v30  ;;  %v24756_v30 = vld [vmem:[%s26134_s17 + $0x214] ss:$24 sps:$4 sm:$0xff]  }
 0xc3f   : > { %v25579_v53 = vpop.eup %25578 }
 0xc40   : > { %v14840_v22 = vadd.f32 1.0, %v25579_v53  ;;  %18443 = vmatpush1.bf16.msra.mxu0 %v24724_v56  ;;  %v24757_v56 = vld [vmem:[%s26134_s17 + $0x510] ss:$24 sps:$4 sm:$0xff]   ;;  %v24763_v53 = vld [vmem:[%s26134_s17 + $0x4e0] ss:$24 sps:$4 sm:$0xff]  }
 0xc41   : > { %18486 = vmatpush1.bf16.msra.mxu1 %v24727_v49  ;;  %18444 = vmatprep.subr.bf16.mxu0 %v24732_v43  ;;  %v24765_v49 = vld [vmem:[%s26134_s17 + $0x4e4] ss:$24 sps:$4 sm:$0xff]  }
 0xc42   : > { %18487 = vmatprep.subr.bf16.mxu1 %v24735_v48  ;;  %v14864_v19 = vmul.f32 0.5, %v14840_v22 }
 0xc43   : > { %v25581_v44 = vpop.eup %25580 }
 0xc44   : > { %v14852_v13 = vadd.f32 1.0, %v25581_v44  ;;  %18445 = vmatpush2.bf16.msra.mxu0 %v24730_v8  ;;  %v14888_v16 = vmul.f32 %v14864_v19, %v28827_v23  ;;  %v24753_v23 = vld [vmem:[%s26134_s17 + $0x544] ss:$24 sps:$4 sm:$0xff]   ;;  %v25583_v43 = vpop.eup %25582 }
 0xc45   : > { %18488 = vmatpush2.bf16.msra.mxu1 %v24733_v0  ;;  %18446 = vmatprep.subr.bf16.mxu0 %v24738_v36  ;;  %v25585_v48 = vpop.eup %25584  ;;  %v14851_v45 = vadd.f32 1.0, %v25583_v43  ;;  %v24766_v0 = vld [vmem:[%s26134_s17 + $0x1b0] ss:$24 sps:$4 sm:$0xff]   ;;  %v24799_v43 = vld [vmem:[%s26134_s17 + $0x9c0] ss:$24 sps:$4 sm:$0xff]  }
 0xc46   : > { %v14876_v26 = vmul.f32 0.5, %v14852_v13  ;;  %18489 = vmatprep.subr.bf16.mxu1 %v24741_v24  ;;  %v14853_v36 = vadd.f32 1.0, %v25585_v48  ;;  %v24774_v24 = vld [vmem:[%s26134_s17 + $0x184] ss:$24 sps:$4 sm:$0xff]   ;;  %v24807_v48 = vld [vmem:[%s26134_s17 + $0x994] ss:$24 sps:$4 sm:$0xff]  }
 0xc47   : > { %v25587_v22 = vpop.eup %25586  ;;  %v14875_v13 = vmul.f32 0.5, %v14851_v45  ;;  %v24811_v45 = vld [vmem:[%s26134_s17 + $0x960] ss:$24 sps:$4 sm:$0xff]  }
 0xc48   : > { %v14900_v47 = vmul.f32 %v14876_v26, %v28840_v62  ;;  %18447 = vmatpush2.bf16.msra.mxu0 %v24736_v38  ;;  %v24748_v62 = vld [vmem:[%s26134_s17 + $0x240] ss:$24 sps:$4 sm:$0xff]   ;;  %v25589_v8 = vpop.eup %25588  ;;  %v14839_v44 = vadd.f32 1.0, %v25587_v22  ;;  %v14877_v38 = vmul.f32 0.5, %v14853_v36  ;;  %v24810_v22 = vld [vmem:[%s26134_s17 + $0x664] ss:$24 sps:$4 sm:$0xff]  }
 0xc49   : > { %18490 = vmatpush2.bf16.msra.mxu1 %v24739_v3  ;;  %18448 = vmatprep.subr.bf16.mxu0 %v24744_v7  ;;  %v14841_v19 = vadd.f32 1.0, %v25589_v8  ;;  %v24780_v3 = vld [vmem:[%s26134_s17 + $0x754] ss:$24 sps:$4 sm:$0xff]   ;;  %v24808_v8 = vld [vmem:[%s26134_s17 + $0x660] ss:$24 sps:$4 sm:$0xff]  }
 0xc4a   : > { %v28911_v12 = vpack.c.bf16 %v14900_v47, %v14888_v16  ;;  %18491 = vmatprep.subr.bf16.mxu1 %v24747_v40  ;;  %v14863_v7 = vmul.f32 0.5, %v14839_v44  ;;  %v14899_v40 = vmul.f32 %v14875_v13, %v28856_v46  ;;  %v24778_v16 = vld [vmem:[%s26134_s17 + $0x750] ss:$24 sps:$4 sm:$0xff]   ;;  %v14901_v47 = vmul.f32 %v14877_v38, %v28858_v17  ;;  %v24819_v36 = vld [vmem:[%s26134_s17 + $0x934] ss:$24 sps:$4 sm:$0xff]  }
 0xc4b   : > { %v14865_v26 = vmul.f32 0.5, %v14841_v19  ;;  %v24822_v44 = vld [vmem:[%s26134_s17 + $0x604] ss:$24 sps:$4 sm:$0xff]   ;;  %v24820_v19 = vld [vmem:[%s26134_s17 + $0x600] ss:$24 sps:$4 sm:$0xff]  }
 0xc4c   : > { %18449 = vmatpush2.bf16.msra.mxu0 %v24742_v55  ;;  %v24781_v55 = vld [vmem:[%s26134_s17 + $0xa50] ss:$24 sps:$4 sm:$0xff]   ;;  %v24823_v13 = vld [vmem:[%s26134_s17 + $0x900] ss:$24 sps:$4 sm:$0xff]   ;;  %v24831_v38 = vld [vmem:[%s26134_s17 + $0xbd4] ss:$24 sps:$4 sm:$0xff]  }
 0xc4d   : > { %18492 = vmatpush2.bf16.msra.mxu1 %v24745_v14  ;;  %18450 = vmatprep.subr.bf16.mxu0 %v24750_v27  ;;  %v14887_v14 = vmul.f32 %v14863_v7, %v28862_v34  ;;  %v14889_v27 = vmul.f32 %v14865_v26, %v28866_v2  ;;  %v24787_v34 = vld [vmem:[%s26134_s17 + $0xa20] ss:$24 sps:$4 sm:$0xff]   ;;  %v24792_v2 = vld [vmem:[%s26134_s17 + $0x6f4] ss:$24 sps:$4 sm:$0xff]   ;;  %v24834_v7 = vld [vmem:[%s26134_s17 + $0x8a4] ss:$24 sps:$4 sm:$0xff]  }
 0xc4e   : > { %18493 = vmatprep.subr.bf16.mxu1 %v24753_v23  ;;  %v24786_v23 = vld [vmem:[%s26134_s17 + $0x724] ss:$24 sps:$4 sm:$0xff]   ;;  %v24832_v26 = vld [vmem:[%s26134_s17 + $0x8a0] ss:$24 sps:$4 sm:$0xff]  }
 0xc4f   : > { %v28942_v46 = vpack.c.bf16 %v14899_v40, %v14887_v14  ;;  %v28946_v17 = vpack.c.bf16 %v14901_v47, %v14889_v27  ;;  %v24835_v40 = vld [vmem:[%s26134_s17 + $0xba0] ss:$24 sps:$4 sm:$0xff]   ;;  %v24843_v47 = vld [vmem:[%s26134_s17 + $0xb74] ss:$24 sps:$4 sm:$0xff]   ;;  %v24841_v14 = vld [vmem:[%s26134_s17 + $0xb70] ss:$24 sps:$4 sm:$0xff]  }
 0xc50   : > { %18451 = vmatpush2.bf16.msra.mxu0 %v24748_v62  ;;  %v24789_v62 = vld [vmem:[%s26134_s17 + $0xa24] ss:$24 sps:$4 sm:$0xff]  }
 0xc51   : > { %18494 = vmatpush2.bf16.msra.mxu1 %v24751_v50  ;;  %18452 = vmatprep.subr.bf16.mxu0 %v24756_v30  ;;  %v24784_v50 = vld [vmem:[%s26134_s17 + $0x720] ss:$24 sps:$4 sm:$0xff]   ;;  %v24795_v30 = vld [vmem:[%s26134_s17 + $0x9f4] ss:$24 sps:$4 sm:$0xff]   ;;  %v24846_v27 = vld [vmem:[%s26134_s17 + $0x844] ss:$24 sps:$4 sm:$0xff]  }
 0xc52   : > { %18495 = vmatprep.subr.bf16.mxu1 %v24759_v57  ;;  %v24790_v57 = vld [vmem:[%s26134_s17 + $0x6f0] ss:$24 sps:$4 sm:$0xff]  }
 0xc54   : > { %18453 = vmatpush2.bf16.msra.mxu0 %v24754_v32  ;;  %v24793_v32 = vld [vmem:[%s26134_s17 + $0x9f0] ss:$24 sps:$4 sm:$0xff]  }
 0xc55   : > { %18496 = vmatpush2.bf16.msra.mxu1 %v24757_v56  ;;  %18454 = vmatprep.subr.bf16.mxu0 %v24762_v28  ;;  %v24798_v56 = vld [vmem:[%s26134_s17 + $0x6c4] ss:$24 sps:$4 sm:$0xff]  }
 0xc56   : > { %18497 = vmatprep.subr.bf16.mxu1 %v24765_v49  ;;  %v24801_v28 = vld [vmem:[%s26134_s17 + $0x9c4] ss:$24 sps:$4 sm:$0xff]   ;;  %v24796_v49 = vld [vmem:[%s26134_s17 + $0x6c0] ss:$24 sps:$4 sm:$0xff]  }
 0xc58   : > { %18455 = vmatpush2.bf16.msra.mxu0 %v24760_v9  ;;  %v24804_v9 = vld [vmem:[%s26134_s17 + $0x694] ss:$24 sps:$4 sm:$0xff]  }
 0xc59   : > { %18498 = vmatpush2.bf16.msra.mxu1 %v24763_v53  ;;  %18456 = vmatprep.subr.bf16.mxu0 %v24768_v25  ;;  %v24802_v53 = vld [vmem:[%s26134_s17 + $0x690] ss:$24 sps:$4 sm:$0xff]  }
 0xc5a   : > { %18499 = vmatprep.subr.bf16.mxu1 %v24771_v37  ;;  %v24805_v25 = vld [vmem:[%s26134_s17 + $0x990] ss:$24 sps:$4 sm:$0xff]   ;;  %v24813_v37 = vld [vmem:[%s26134_s17 + $0x964] ss:$24 sps:$4 sm:$0xff]  }
 0xc5c   : > { %18457 = vmatpush2.bf16.msra.mxu0 %v24766_v0  ;;  %v24816_v0 = vld [vmem:[%s26134_s17 + $0x634] ss:$24 sps:$4 sm:$0xff]  }
 0xc5d   : > { %18500 = vmatpush2.bf16.msra.mxu1 %v24769_v29  ;;  %18458 = vmatprep.subr.bf16.mxu0 %v24774_v24  ;;  %v24814_v29 = vld [vmem:[%s26134_s17 + $0x630] ss:$24 sps:$4 sm:$0xff]  }
 0xc5e   : > { %18501 = vmatprep.subr.bf16.mxu1 %v24777_v39  ;;  %v24817_v24 = vld [vmem:[%s26134_s17 + $0x930] ss:$24 sps:$4 sm:$0xff]   ;;  %v24825_v39 = vld [vmem:[%s26134_s17 + $0x904] ss:$24 sps:$4 sm:$0xff]  }
 0xc60   : > { %18459 = vmatpush2.bf16.msra.mxu0 %v24772_v20  ;;  %v24828_v20 = vld [vmem:[%s26134_s17 + $0x8d4] ss:$24 sps:$4 sm:$0xff]  }
 0xc61   : > { %18502 = vmatpush2.bf16.msra.mxu1 %v24775_v15  ;;  %18514 = vmatprep.subr.bf16.mxu0 %v24780_v3  ;;  %v24826_v15 = vld [vmem:[%s26134_s17 + $0x8d0] ss:$24 sps:$4 sm:$0xff]  }
 0xc62   : > { %18557 = vmatprep.subr.bf16.mxu1 %v24783_v35  ;;  %v24829_v3 = vld [vmem:[%s26134_s17 + $0xbd0] ss:$24 sps:$4 sm:$0xff]   ;;  %v24837_v35 = vld [vmem:[%s26134_s17 + $0xba4] ss:$24 sps:$4 sm:$0xff]  }
 0xc63   : > { %18461 = vmatmul.mubr.bf16.vlgmr.msra.gmra.mxu0 %v28448_v60 }
 0xc64   : > { %18504 = vmatmul.mubr.bf16.vlgmr.msra.gmra.mxu1 %v28553_v63  ;;  %18515 = vmatpush1.bf16.msra.mxu0 %v24778_v16  ;;  %v24840_v16 = vld [vmem:[%s26134_s17 + $0x874] ss:$24 sps:$4 sm:$0xff]  }
 0xc65   : > { %18546 = vmatprep.mubr.bf16.mxu0 %v28942_v46  ;;  %18558 = vmatpush1.bf16.msra.mxu1 %v24781_v55  ;;  %v24838_v55 = vld [vmem:[%s26134_s17 + $0x870] ss:$24 sps:$4 sm:$0xff]  }
 0xc66   : > { %18589 = vmatprep.mubr.bf16.mxu1 %v28946_v17  ;;  %18516 = vmatprep.subr.bf16.mxu0 %v24786_v23  ;;  %v24849_v23 = vld [vmem:[%s26134_s17 + $0xb44] ss:$24 sps:$4 sm:$0xff]  }
 0xc67   : > { %18559 = vmatprep.subr.bf16.mxu1 %v24789_v62  ;;  %v24844_v62 = vld [vmem:[%s26134_s17 + $0x840] ss:$24 sps:$4 sm:$0xff]  }
 0xc68   : > { %18517 = vmatpush1.bf16.msra.mxu0 %v24784_v50  ;;  %v24847_v50 = vld [vmem:[%s26134_s17 + $0xb40] ss:$24 sps:$4 sm:$0xff]  }
 0xc69   : > { %18560 = vmatpush1.bf16.msra.mxu1 %v24787_v34  ;;  %18518 = vmatprep.subr.bf16.mxu0 %v24792_v2  ;;  %v24852_v34 = vld [vmem:[%s26134_s17 + $0x814] ss:$24 sps:$4 sm:$0xff]  }
 0xc6a   : > { %18561 = vmatprep.subr.bf16.mxu1 %v24795_v30  ;;  %v24855_v2 = vld [vmem:[%s26134_s17 + $0xb14] ss:$24 sps:$4 sm:$0xff]   ;;  %v24850_v30 = vld [vmem:[%s26134_s17 + $0x810] ss:$24 sps:$4 sm:$0xff]  }
 0xc6c   : > { %18519 = vmatpush1.bf16.msra.mxu0 %v24790_v57  ;;  %v24853_v57 = vld [vmem:[%s26134_s17 + $0xb10] ss:$24 sps:$4 sm:$0xff]  }
 0xc6d   : > { %18562 = vmatpush1.bf16.msra.mxu1 %v24793_v32  ;;  %18520 = vmatprep.subr.bf16.mxu0 %v24798_v56  ;;  %v24858_v32 = vld [vmem:[%s26134_s17 + $0x7e4] ss:$24 sps:$4 sm:$0xff]  }
 0xc6e   : > { %18563 = vmatprep.subr.bf16.mxu1 %v24801_v28  ;;  %v24861_v56 = vld [vmem:[%s26134_s17 + $0xae4] ss:$24 sps:$4 sm:$0xff]   ;;  %v24856_v28 = vld [vmem:[%s26134_s17 + $0x7e0] ss:$24 sps:$4 sm:$0xff]  }
 0xc70   : > { %18521 = vmatpush1.bf16.msra.mxu0 %v24796_v49  ;;  %v28999_v49 = vpop.f32.mrf.mxu0 }
 0xc71   : > { %18564 = vmatpush1.bf16.msra.mxu1 %v24799_v43  ;;  %18522 = vmatprep.subr.bf16.mxu0 %v24804_v9  ;;  %v24859_v43 = vld [vmem:[%s26134_s17 + $0xae0] ss:$24 sps:$4 sm:$0xff]   ;;  %v24864_v9 = vld [vmem:[%s26134_s17 + $0x7b4] ss:$24 sps:$4 sm:$0xff]  }
 0xc72   : > { %18565 = vmatprep.subr.bf16.mxu1 %v24807_v48  ;;  %v24867_v48 = vld [vmem:[%s26134_s17 + $0xab4] ss:$24 sps:$4 sm:$0xff]  }
 0xc74   : > { %18523 = vmatpush1.bf16.msra.mxu0 %v24802_v53  ;;  %v25637_v53 = vld [vmem:[%s26446_s3 + $0x20] sm:$0xff] }
 0xc75   : > { %18566 = vmatpush1.bf16.msra.mxu1 %v24805_v25  ;;  %18524 = vmatprep.subr.bf16.mxu0 %v24810_v22  ;;  %v10967_v25 = vrot.slane %v25637_v53, %v28663_v33  ;;  %v24862_v22 = vld [vmem:[%s26134_s17 + $0x7b0] ss:$24 sps:$4 sm:$0xff]  }
 0xc76   : > { %18567 = vmatprep.subr.bf16.mxu1 %v24813_v37  ;;  %v14468_v37 = vpop.f32.mrf.mxu0 }
 0xc78   : > { %18525 = vmatpush1.bf16.msra.mxu0 %v24808_v8  ;;  %v24865_v8 = vld [vmem:[%s26134_s17 + $0xab0] ss:$24 sps:$4 sm:$0xff]  }
 0xc79   : > { %18568 = vmatpush1.bf16.msra.mxu1 %v24811_v45  ;;  %18526 = vmatprep.subr.bf16.mxu0 %v24816_v0  ;;  %v24870_v45 = vld [vmem:[%s26134_s17 + $0x784] ss:$24 sps:$4 sm:$0xff]  }
 0xc7a   : > { %18569 = vmatprep.subr.bf16.mxu1 %v24819_v36  ;;  %v24873_v0 = vld [vmem:[%s26134_s17 + $0xa84] ss:$24 sps:$4 sm:$0xff]   ;;  %v14509_v36 = vpop.f32.mrf.mxu1 }
 0xc7c   : > { %18527 = vmatpush1.bf16.msra.mxu0 %v24814_v29  ;;  %v11027_v29 = vrot.slane %v10967_v25, %v28296_v10  ;;  %v24885_v25 = vld [vmem:[%s26134_s17 + $0xcc4] ss:$24 sps:$4 sm:$0xff]  }
 0xc7d   : > { %18570 = vmatpush1.bf16.msra.mxu1 %v24817_v24  ;;  %18528 = vmatprep.subr.bf16.mxu0 %v24822_v44  ;;  %v24868_v24 = vld [vmem:[%s26134_s17 + $0x780] ss:$24 sps:$4 sm:$0xff]   ;;  %v14470_v44 = vpop.f32.mrf.mxu0 }
 0xc7e   : > { %18571 = vmatprep.subr.bf16.mxu1 %v24825_v39  ;;  %v24871_v39 = vld [vmem:[%s26134_s17 + $0xa80] ss:$24 sps:$4 sm:$0xff]  }
 0xc80   : > { %18529 = vmatpush1.bf16.msra.mxu0 %v24820_v19  ;;  %v24876_v19 = vld [vmem:[%s26134_s17 + $0xd54] ss:$24 sps:$4 sm:$0xff]  }
 0xc81   : > { %18572 = vmatpush1.bf16.msra.mxu1 %v24823_v13  ;;  %18530 = vmatprep.subr.bf16.mxu0 %v24828_v20  ;;  %v24909_v13 = vld [vmem:[%s26134_s17 + $0x1054] ss:$24 sps:$4 sm:$0xff]   ;;  %v14511_v20 = vpop.f32.mrf.mxu1 }
 0xc82   : > { %18573 = vmatprep.subr.bf16.mxu1 %v24831_v38  ;;  %v14469_v38 = vadd.f32 %v14468_v37, %v11027_v29 }
 0xc84   : > { %18531 = vmatpush2.bf16.msra.mxu0 %v24826_v15  ;;  %v24874_v15 = vld [vmem:[%s26134_s17 + $0xd50] ss:$24 sps:$4 sm:$0xff]  }
 0xc85   : > { %18574 = vmatpush2.bf16.msra.mxu1 %v24829_v3  ;;  %18532 = vmatprep.subr.bf16.mxu0 %v24834_v7  ;;  %v10963_v3 = vrot.slane %v25637_v53, %v28296_v10  ;;  %v14472_v7 = vpop.f32.mrf.mxu0 }
 0xc86   : > { %18575 = vmatprep.subr.bf16.mxu1 %v24837_v35  ;;  %v24879_v35 = vld [vmem:[%s26134_s17 + $0xd24] ss:$24 sps:$4 sm:$0xff]  }
 0xc88   : > { %18533 = vmatpush2.bf16.msra.mxu0 %v24832_v26  ;;  %v24907_v26 = vld [vmem:[%s26134_s17 + $0x1050] ss:$24 sps:$4 sm:$0xff]  }
 0xc89   : > { %18576 = vmatpush2.bf16.msra.mxu1 %v24835_v40  ;;  %18534 = vmatprep.subr.bf16.mxu0 %v24840_v16  ;;  %v24915_v40 = vld [vmem:[%s26134_s17 + $0x1024] ss:$24 sps:$4 sm:$0xff]   ;;  %v14513_v16 = vpop.f32.mrf.mxu1 }
 0xc8a   : > { %18577 = vmatprep.subr.bf16.mxu1 %v24843_v47 }
 0xc8c   : > { %18535 = vmatpush2.bf16.msra.mxu0 %v24838_v55  ;;  %v14512_v55 = vadd.f32 %v14511_v20, %v14469_v38 }
 0xc8d   : > { %18578 = vmatpush2.bf16.msra.mxu1 %v24841_v14  ;;  %18536 = vmatprep.subr.bf16.mxu0 %v24846_v27  ;;  %v14473_v14 = vadd.f32 %v14472_v7, %v11027_v29  ;;  %v24877_v27 = vld [vmem:[%s26134_s17 + $0xd20] ss:$24 sps:$4 sm:$0xff]  }
 0xc8e   : > { %18579 = vmatprep.subr.bf16.mxu1 %v24849_v23  ;;  %v11023_v23 = vrot.slane %v10963_v3, %v28296_v10 }
 0xc90   : > { %18537 = vmatpush2.bf16.msra.mxu0 %v24844_v62 }
 0xc91   : > { %18580 = vmatpush2.bf16.msra.mxu1 %v24847_v50  ;;  %18538 = vmatprep.subr.bf16.mxu0 %v24852_v34  ;;  %v24882_v50 = vld [vmem:[%s26134_s17 + $0xcf4] ss:$24 sps:$4 sm:$0xff]   ;;  %v24913_v34 = vld [vmem:[%s26134_s17 + $0x1020] ss:$24 sps:$4 sm:$0xff]  }
 0xc92   : > { %18581 = vmatprep.subr.bf16.mxu1 %v24855_v2 }
 0xc94   : > { %18539 = vmatpush2.bf16.msra.mxu0 %v24850_v30  ;;  %v24921_v30 = vld [vmem:[%s26134_s17 + $0xff4] ss:$24 sps:$4 sm:$0xff]  }
 0xc95   : > { %18582 = vmatpush2.bf16.msra.mxu1 %v24853_v57  ;;  %18540 = vmatprep.subr.bf16.mxu0 %v24858_v32  ;;  %v14471_v57 = vadd.f32 %v14470_v44, %v11023_v23  ;;  %v14515_v32 = vpop.f32.mrf.mxu1 }
 0xc96   : > { %18583 = vmatprep.subr.bf16.mxu1 %v24861_v56 }
 0xc98   : > { %18541 = vmatpush2.bf16.msra.mxu0 %v24856_v28  ;;  %v14516_v28 = vadd.f32 %v14515_v32, %v14473_v14  ;;  %v24892_v32 = vld [vmem:[%s26134_s17 + $0xc30] ss:$24 sps:$4 sm:$0xff]  }
 0xc99   : > { %18584 = vmatpush2.bf16.msra.mxu1 %v24859_v43  ;;  %18542 = vmatprep.subr.bf16.mxu0 %v24864_v9  ;;  %v24880_v9 = vld [vmem:[%s26134_s17 + $0xcf0] ss:$24 sps:$4 sm:$0xff]  }
 0xc9a   : > { %18585 = vmatprep.subr.bf16.mxu1 %v24867_v48  ;;  %v14467_v48 = vadd.f32 %v28999_v49, %v11023_v23  ;;  %v24883_v49 = vld [vmem:[%s26134_s17 + $0xcc0] ss:$24 sps:$4 sm:$0xff]  }
 0xc9b   : > { %v24889_v23 = vld [vmem:[%s26134_s17 + $0xc60] ss:$24 sps:$4 sm:$0xff]  }
 0xc9c   : > { %18543 = vmatpush2.bf16.msra.mxu0 %v24862_v22  ;;  %v24919_v22 = vld [vmem:[%s26134_s17 + $0xff0] ss:$24 sps:$4 sm:$0xff]   ;;  %v14510_v44 = vadd.f32 %v14509_v36, %v14467_v48 }
 0xc9d   : > { %18586 = vmatpush2.bf16.msra.mxu1 %v24865_v8  ;;  %18544 = vmatprep.subr.bf16.mxu0 %v24870_v45  ;;  %v24927_v45 = vld [vmem:[%s26134_s17 + $0xfc4] ss:$24 sps:$4 sm:$0xff]  }
 0xc9e   : > { %18587 = vmatprep.subr.bf16.mxu1 %v24873_v0  ;;  %v14514_v0 = vadd.f32 %v14513_v16, %v14471_v57  ;;  %v24931_v16 = vld [vmem:[%s26134_s17 + $0xf90] ss:$24 sps:$4 sm:$0xff]  }
 0xca0   : > { %18545 = vmatpush2.bf16.msra.mxu0 %v24868_v24 }
 0xca1   : > { %18588 = vmatpush2.bf16.msra.mxu1 %v24871_v39  ;;  %18600 = vmatprep.subr.bf16.mxu0 %v24876_v19  ;;  %v24888_v19 = vld [vmem:[%s26134_s17 + $0xc94] ss:$24 sps:$4 sm:$0xff]  }
 0xca2   : > { %18643 = vmatprep.subr.bf16.mxu1 %v24909_v13  ;;  %v24925_v13 = vld [vmem:[%s26134_s17 + $0xfc0] ss:$24 sps:$4 sm:$0xff]  }
 0xca3   : > { %v14552_v47 = vpop.f32.mrf.mxu0  ;;  %18547 = vmatmul.mubr.bf16.vlgmr.msra.gmra.mxu0 %v28771_v41 }
 0xca4   : > { %18590 = vmatmul.mubr.bf16.vlgmr.msra.gmra.mxu1 %v28911_v12  ;;  %18601 = vmatpush1.bf16.msra.mxu0 %v24874_v15  ;;  %v24933_v15 = vld [vmem:[%s26134_s17 + $0xf94] ss:$24 sps:$4 sm:$0xff]   ;;  %v29049_v3 = vadd.f32 %v14552_v47, %v14510_v44  ;;  %v24939_v47 = vld [vmem:[%s26134_s17 + $0xf64] ss:$24 sps:$4 sm:$0xff]  }
 0xca5   : > { %v14554_v62 = vpop.f32.mrf.mxu0  ;;  %18602 = vmatprep.subr.bf16.mxu0 %v24879_v35  ;;  %18644 = vmatpush1.bf16.msra.mxu1 %v24907_v26  ;;  %v24886_v35 = vld [vmem:[%s26134_s17 + $0xc90] ss:$24 sps:$4 sm:$0xff]  }
 0xca6   : > { %v29026_v2 = vadd.f32 %v14554_v62, %v14512_v55  ;;  %18645 = vmatprep.subr.bf16.mxu1 %v24915_v40  ;;  %v24891_v40 = vld [vmem:[%s26134_s17 + $0xc64] ss:$24 sps:$4 sm:$0xff]   ;;  %v14698_v14 = vmul.f32 %v29049_v3, %v29049_v3 }
 0xca7   : > { %v14556_v56 = vpop.f32.mrf.mxu0 }
 0xca8   : > { %v14699_v43 = vmul.f32 %v29026_v2, %v29026_v2  ;;  %18603 = vmatpush1.bf16.msra.mxu0 %v24877_v27  ;;  %v29042_v39 = vadd.f32 %v14556_v56, %v14514_v0  ;;  %v14722_v57 = vmul.f32 %v14698_v14, %v29049_v3 }
 0xca9   : > { %v14558_v53 = vpop.f32.mrf.mxu0  ;;  %18604 = vmatprep.subr.bf16.mxu0 %v24882_v50  ;;  %18646 = vmatpush1.bf16.msra.mxu1 %v24913_v34  ;;  %v24894_v50 = vld [vmem:[%s26134_s17 + $0xc34] ss:$24 sps:$4 sm:$0xff]   ;;  %v24937_v34 = vld [vmem:[%s26134_s17 + $0xf60] ss:$24 sps:$4 sm:$0xff]  }
 0xcaa   : > { %v14723_v37 = vmul.f32 %v14699_v43, %v29026_v2  ;;  %v29036_v8 = vadd.f32 %v14558_v53, %v14516_v28  ;;  %18647 = vmatprep.subr.bf16.mxu1 %v24921_v30  ;;  %v14710_v26 = vmul.f32 %v29042_v39, %v29042_v39  ;;  %v24945_v30 = vld [vmem:[%s26134_s17 + $0xf34] ss:$24 sps:$4 sm:$0xff]   ;;  %v24897_v28 = vld [vmem:[%s26134_s17 + $0xc04] ss:$24 sps:$4 sm:$0xff]   ;;  %v24943_v43 = vld [vmem:[%s26134_s17 + $0xf30] ss:$24 sps:$4 sm:$0xff]  }
 0xcab   : > { %v14746_v48 = vmul.f32 0.044715, %v14722_v57  ;;  %v24895_v53 = vld [vmem:[%s26134_s17 + $0xc00] ss:$24 sps:$4 sm:$0xff]   ;;  %v24981_v57 = vld [vmem:[%s26134_s17 + $0x1114] ss:$24 sps:$4 sm:$0xff]  }
 0xcac   : > { %v14747_v29 = vmul.f32 0.044715, %v14723_v37  ;;  %v14711_v24 = vmul.f32 %v29036_v8, %v29036_v8  ;;  %18605 = vmatpush1.bf16.msra.mxu0 %v24880_v9  ;;  %v14734_v62 = vmul.f32 %v14710_v26, %v29042_v39  ;;  %v24951_v9 = vld [vmem:[%s26134_s17 + $0xf04] ss:$24 sps:$4 sm:$0xff]   ;;  %v24949_v37 = vld [vmem:[%s26134_s17 + $0xf00] ss:$24 sps:$4 sm:$0xff]  }
 0xcad   : > { %18606 = vmatprep.subr.bf16.mxu0 %v24885_v25  ;;  %18648 = vmatpush1.bf16.msra.mxu1 %v24919_v22  ;;  %v24900_v22 = vld [vmem:[%s26134_s17 + $0xed4] ss:$24 sps:$4 sm:$0xff]  }
 0xcae   : > { %v14771_v20 = vadd.f32 %v14747_v29, %v29026_v2  ;;  %v14735_v38 = vmul.f32 %v14711_v24, %v29036_v8  ;;  %18649 = vmatprep.subr.bf16.mxu1 %v24927_v45  ;;  %v14758_v56 = vmul.f32 0.044715, %v14734_v62  ;;  %v24957_v45 = vld [vmem:[%s26134_s17 + $0x11d4] ss:$24 sps:$4 sm:$0xff]   ;;  %v14770_v29 = vadd.f32 %v14746_v48, %v29049_v3  ;;  %v24898_v24 = vld [vmem:[%s26134_s17 + $0xed0] ss:$24 sps:$4 sm:$0xff]  }
 0xcaf   : > { %v24906_v26 = vld [vmem:[%s26134_s17 + $0xe74] ss:$24 sps:$4 sm:$0xff]   ;;  %v24967_v62 = vld [vmem:[%s26134_s17 + $0x1170] ss:$24 sps:$4 sm:$0xff]  }
 0xcb0   : > { %v14795_v7 = vmul.f32 0.7978846, %v14771_v20  ;;  %v14759_v36 = vmul.f32 0.044715, %v14735_v38  ;;  %18607 = vmatpush1.bf16.msra.mxu0 %v24883_v49  ;;  %v14782_v25 = vadd.f32 %v14758_v56, %v29042_v39  ;;  %v24963_v20 = vld [vmem:[%s26134_s17 + $0x11a4] ss:$24 sps:$4 sm:$0xff]  }
 0xcb1   : > { %18608 = vmatprep.subr.bf16.mxu0 %v24888_v19  ;;  %18650 = vmatpush1.bf16.msra.mxu1 %v24925_v13  ;;  %v24903_v19 = vld [vmem:[%s26134_s17 + $0xea4] ss:$24 sps:$4 sm:$0xff]   ;;  %v24955_v13 = vld [vmem:[%s26134_s17 + $0x11d0] ss:$24 sps:$4 sm:$0xff]  }
 0xcb2   : > { %25590 = vtanh.f32 %v14795_v7  ;;  %v14783_v55 = vadd.f32 %v14759_v36, %v29036_v8  ;;  %18651 = vmatprep.subr.bf16.mxu1 %v24933_v15  ;;  %v14806_v44 = vmul.f32 0.7978846, %v14782_v25  ;;  %v14794_v15 = vmul.f32 0.7978846, %v14770_v29  ;;  %v24901_v7 = vld [vmem:[%s26134_s17 + $0xea0] ss:$24 sps:$4 sm:$0xff]  }
 0xcb3   : > { %v24924_v56 = vld [vmem:[%s26134_s17 + $0xde4] ss:$24 sps:$4 sm:$0xff]  }
 0xcb4   : > { %v14807_v27 = vmul.f32 0.7978846, %v14783_v55  ;;  %18609 = vmatpush1.bf16.msra.mxu0 %v24886_v35  ;;  %v24969_v55 = vld [vmem:[%s26134_s17 + $0x1174] ss:$24 sps:$4 sm:$0xff]  }
 0xcb5   : > { %18610 = vmatprep.subr.bf16.mxu0 %v24891_v40  ;;  %18652 = vmatpush1.bf16.msra.mxu1 %v24931_v16  ;;  %v24961_v40 = vld [vmem:[%s26134_s17 + $0x11a0] ss:$24 sps:$4 sm:$0xff]  }
 0xcb6   : > { %25592 = vtanh.f32 %v14807_v27  ;;  %18653 = vmatprep.subr.bf16.mxu1 %v24939_v47  ;;  %v24904_v47 = vld [vmem:[%s26134_s17 + $0xe70] ss:$24 sps:$4 sm:$0xff]  }
 0xcb7   : > { %25594 = vtanh.f32 %v14806_v44  ;;  %v24936_v44 = vld [vmem:[%s26134_s17 + $0xd84] ss:$24 sps:$4 sm:$0xff]  }
 0xcb8   : > { %18611 = vmatpush1.bf16.msra.mxu0 %v24889_v23  ;;  %25596 = vtanh.f32 %v14794_v15  ;;  %v24912_v23 = vld [vmem:[%s26134_s17 + $0xe44] ss:$24 sps:$4 sm:$0xff]  }
 0xcb9   : > { %18612 = vmatprep.subr.bf16.mxu0 %v24894_v50  ;;  %18654 = vmatpush1.bf16.msra.mxu1 %v24937_v34  ;;  %v24975_v34 = vld [vmem:[%s26134_s17 + $0x1144] ss:$24 sps:$4 sm:$0xff]  }
 0xcba   : > { %18655 = vmatprep.subr.bf16.mxu1 %v24945_v30  ;;  %v24910_v30 = vld [vmem:[%s26134_s17 + $0xe40] ss:$24 sps:$4 sm:$0xff]   ;;  %v24999_v15 = vld [vmem:[%s26134_s17 + $0x1084] ss:$24 sps:$4 sm:$0xff]  }
 0xcbc   : > { %18613 = vmatpush1.bf16.msra.mxu0 %v24892_v32  ;;  %v24916_v32 = vld [vmem:[%s26134_s17 + $0xe10] ss:$24 sps:$4 sm:$0xff]  }
 0xcbd   : > { %18614 = vmatprep.subr.bf16.mxu0 %v24897_v28  ;;  %18656 = vmatpush1.bf16.msra.mxu1 %v24943_v43  ;;  %v24979_v28 = vld [vmem:[%s26134_s17 + $0x1110] ss:$24 sps:$4 sm:$0xff]  }
 0xcbe   : > { %18657 = vmatprep.subr.bf16.mxu1 %v24951_v9  ;;  %v24987_v9 = vld [vmem:[%s26134_s17 + $0x10e4] ss:$24 sps:$4 sm:$0xff]  }
 0xcbf   : > { %v25591_v0 = vpop.eup %25590 }
 0xcc0   : > { %18615 = vmatpush1.bf16.msra.mxu0 %v24895_v53  ;;  %v14843_v49 = vadd.f32 1.0, %v25591_v0  ;;  %v24922_v53 = vld [vmem:[%s26134_s17 + $0xde0] ss:$24 sps:$4 sm:$0xff]   ;;  %v24993_v0 = vld [vmem:[%s26134_s17 + $0x10b4] ss:$24 sps:$4 sm:$0xff]  }
 0xcc1   : > { %18616 = vmatprep.subr.bf16.mxu0 %v24900_v22  ;;  %18658 = vmatpush1.bf16.msra.mxu1 %v24949_v37  ;;  %v24930_v22 = vld [vmem:[%s26134_s17 + $0xdb4] ss:$24 sps:$4 sm:$0xff]   ;;  %v24985_v37 = vld [vmem:[%s26134_s17 + $0x10e0] ss:$24 sps:$4 sm:$0xff]  }
 0xcc2   : > { %18659 = vmatprep.subr.bf16.mxu1 %v24957_v45  ;;  %v14867_v35 = vmul.f32 0.5, %v14843_v49  ;;  %v14595_v45 = vpop.f32.mrf.mxu1 }
 0xcc3   : > { %v25593_v38 = vpop.eup %25592 }
 0xcc4   : > { %18617 = vmatpush2.bf16.msra.mxu0 %v24898_v24  ;;  %v14855_v36 = vadd.f32 1.0, %v25593_v38  ;;  %v14891_v14 = vmul.f32 %v14867_v35, %v29026_v2  ;;  %v24918_v2 = vld [vmem:[%s26134_s17 + $0xe14] ss:$24 sps:$4 sm:$0xff]   ;;  %v25595_v43 = vpop.eup %25594  ;;  %v24928_v24 = vld [vmem:[%s26134_s17 + $0xdb0] ss:$24 sps:$4 sm:$0xff]   ;;  %v14597_v38 = vpop.f32.mrf.mxu1 }
 0xcc5   : > { %18618 = vmatprep.subr.bf16.mxu0 %v24903_v19  ;;  %18660 = vmatpush2.bf16.msra.mxu1 %v24955_v13  ;;  %v25597_v48 = vpop.eup %25596  ;;  %v14854_v25 = vadd.f32 1.0, %v25595_v43  ;;  %v24991_v19 = vld [vmem:[%s26134_s17 + $0x10b0] ss:$24 sps:$4 sm:$0xff]   ;;  %v24934_v35 = vld [vmem:[%s26134_s17 + $0xd80] ss:$24 sps:$4 sm:$0xff]  }
 0xcc6   : > { %v14879_v16 = vmul.f32 0.5, %v14855_v36  ;;  %18661 = vmatprep.subr.bf16.mxu1 %v24963_v20  ;;  %v14842_v29 = vadd.f32 1.0, %v25597_v48  ;;  %v25638_v13 = vld [vmem:[%s26446_s3 + $0x28] sm:$0xff] }
 0xcc7   : > { %v14878_v49 = vmul.f32 0.5, %v14854_v25  ;;  %v10971_v20 = vrot.slane %v25638_v13, %v28296_v10  ;;  %v10975_v36 = vrot.slane %v25638_v13, %v28663_v33  ;;  %v24954_v43 = vld [vmem:[%s26134_s17 + $0xfc] ss:$24 sps:$4 sm:$0xff]  }
 0xcc8   : > { %18619 = vmatpush2.bf16.msra.mxu0 %v24901_v7  ;;  %v14903_v27 = vmul.f32 %v14879_v16, %v29036_v8  ;;  %v24973_v8 = vld [vmem:[%s26134_s17 + $0x1140] ss:$24 sps:$4 sm:$0xff]   ;;  %v14866_v7 = vmul.f32 0.5, %v14842_v29 }
 0xcc9   : > { %18620 = vmatprep.subr.bf16.mxu0 %v24906_v26  ;;  %18662 = vmatpush2.bf16.msra.mxu1 %v24961_v40  ;;  %v14902_v26 = vmul.f32 %v14878_v49, %v29042_v39  ;;  %v24942_v40 = vld [vmem:[%s26134_s17 + $0x15c] ss:$24 sps:$4 sm:$0xff]   ;;  %v24997_v16 = vld [vmem:[%s26134_s17 + $0x1080] ss:$24 sps:$4 sm:$0xff]   ;;  %v24948_v39 = vld [vmem:[%s26134_s17 + $0x12c] ss:$24 sps:$4 sm:$0xff]  }
 0xcca   : > { %v29089_v50 = vpack.c.bf16 %v14903_v27, %v14891_v14  ;;  %18663 = vmatprep.subr.bf16.mxu1 %v24969_v55  ;;  %v11031_v55 = vrot.slane %v10971_v20, %v28296_v10  ;;  %v25005_v14 = vld [vmem:[%s26134_s17 + $0x45c] ss:$24 sps:$4 sm:$0xff]   ;;  %v14890_v27 = vmul.f32 %v14866_v7, %v29049_v3  ;;  %v24952_v49 = vld [vmem:[%s26134_s17 + $0xf8] ss:$24 sps:$4 sm:$0xff]  }
 0xccc   : > { %18621 = vmatpush2.bf16.msra.mxu0 %v24904_v47  ;;  %18632 = vmatprep.mubr.bf16.mxu0 %v29089_v50  ;;  %v14599_v47 = vpop.f32.mrf.mxu1 }
 0xccd   : > { %18622 = vmatprep.subr.bf16.mxu0 %v24912_v23  ;;  %18664 = vmatpush2.bf16.msra.mxu1 %v24967_v62  ;;  %v11035_v23 = vrot.slane %v10975_v36, %v28296_v10  ;;  %v24940_v62 = vld [vmem:[%s26134_s17 + $0x158] ss:$24 sps:$4 sm:$0xff]  }
 0xcce   : > { %18665 = vmatprep.subr.bf16.mxu1 %v24975_v34  ;;  %v29121_v34 = vpack.c.bf16 %v14902_v26, %v14890_v27 }
 0xcd0   : > { %18623 = vmatpush2.bf16.msra.mxu0 %v24910_v30  ;;  %v14596_v30 = vadd.f32 %v14595_v45, %v11031_v55 }
 0xcd1   : > { %18624 = vmatprep.subr.bf16.mxu0 %v24918_v2  ;;  %18666 = vmatpush2.bf16.msra.mxu1 %v24973_v8  ;;  %v14601_v2 = vpop.f32.mrf.mxu1 }
 0xcd2   : > { %18667 = vmatprep.subr.bf16.mxu1 %v24981_v57  ;;  %v14598_v57 = vadd.f32 %v14597_v38, %v11035_v23 }
 0xcd4   : > { %18625 = vmatpush2.bf16.msra.mxu0 %v24916_v32 }
 0xcd5   : > { %18626 = vmatprep.subr.bf16.mxu0 %v24924_v56  ;;  %18668 = vmatpush2.bf16.msra.mxu1 %v24979_v28  ;;  %v24946_v56 = vld [vmem:[%s26134_s17 + $0x128] ss:$24 sps:$4 sm:$0xff]  }
 0xcd6   : > { %18669 = vmatprep.subr.bf16.mxu1 %v24987_v9  ;;  %v14600_v9 = vadd.f32 %v14599_v47, %v11031_v55  ;;  %v24966_v55 = vld [vmem:[%s26134_s17 + $0x9c] ss:$24 sps:$4 sm:$0xff]  }
 0xcd8   : > { %18627 = vmatpush2.bf16.msra.mxu0 %v24922_v53 }
 0xcd9   : > { %18628 = vmatprep.subr.bf16.mxu0 %v24930_v22  ;;  %18670 = vmatpush2.bf16.msra.mxu1 %v24985_v37  ;;  %v14602_v37 = vadd.f32 %v14601_v2, %v11035_v23 }
 0xcda   : > { %18671 = vmatprep.subr.bf16.mxu1 %v24993_v0 }
 0xcdc   : > { %18629 = vmatpush2.bf16.msra.mxu0 %v24928_v24 }
 0xcdd   : > { %18630 = vmatprep.subr.bf16.mxu0 %v24936_v44  ;;  %18672 = vmatpush2.bf16.msra.mxu1 %v24991_v19  ;;  %v24960_v19 = vld [vmem:[%s26134_s17 + $0xcc] ss:$24 sps:$4 sm:$0xff]  }
 0xcde   : > { %18673 = vmatprep.subr.bf16.mxu1 %v24999_v15 }
 0xce0   : > { %18631 = vmatpush2.bf16.msra.mxu0 %v24934_v35 }
 0xce1   : > { %18686 = vmatprep.subr.bf16.mxu0 %v24942_v40  ;;  %18674 = vmatpush2.bf16.msra.mxu1 %v24997_v16  ;;  %v24958_v16 = vld [vmem:[%s26134_s17 + $0xc8] ss:$24 sps:$4 sm:$0xff]  }
 0xce2   : > { %18729 = vmatprep.subr.bf16.mxu1 %v25005_v14 }
 0xce3   : > { %v14638_v8 = vpop.f32.mrf.mxu0  ;;  %18633 = vmatmul.mubr.bf16.vlgmr.msra.gmra.mxu0 %v29121_v34 }
 0xce4   : > { %v14639_v32 = vadd.f32 %v14638_v8, %v14596_v30  ;;  %v14681_v3 = vpop.f32.mrf.mxu1  ;;  %18687 = vmatpush1.bf16.msra.mxu0 %v24940_v62  ;;  %18718 = vmatprep.mubr.bf16.mxu0 %v28816_v61  ;;  %v24964_v8 = vld [vmem:[%s26134_s17 + $0x98] ss:$24 sps:$4 sm:$0xff]  }
 0xce5   : > { %v14640_v28 = vpop.f32.mrf.mxu0  ;;  %18688 = vmatprep.subr.bf16.mxu0 %v24948_v39 }
 0xce6   : > { %v29128_v48 = vadd.f32 %v14681_v3, %v14639_v32  ;;  %v14641_v53 = vadd.f32 %v14640_v28, %v14598_v57  ;;  %v14683_v25 = vpop.f32.mrf.mxu1  ;;  %v24972_v57 = vld [vmem:[%s26134_s17 + $0x6c] ss:$24 sps:$4 sm:$0xff]  }
 0xce7   : > { %v14642_v22 = vpop.f32.mrf.mxu0 }
 0xce8   : > { %v14700_v45 = vmul.f32 %v29128_v48, %v29128_v48  ;;  %v29132_v0 = vadd.f32 %v14683_v25, %v14641_v53  ;;  %v14643_v29 = vadd.f32 %v14642_v22, %v14600_v9  ;;  %v14685_v24 = vpop.f32.mrf.mxu1  ;;  %18689 = vmatpush1.bf16.msra.mxu0 %v24946_v56  ;;  %v24970_v9 = vld [vmem:[%s26134_s17 + $0x68] ss:$24 sps:$4 sm:$0xff]   ;;  %v24978_v53 = vld [vmem:[%s26134_s17 + $0x3c] ss:$24 sps:$4 sm:$0xff]   ;;  %v24976_v22 = vld [vmem:[%s26134_s17 + $0x38] ss:$24 sps:$4 sm:$0xff]  }
 0xce9   : > { %v14644_v44 = vpop.f32.mrf.mxu0  ;;  %18690 = vmatprep.subr.bf16.mxu0 %v24954_v43 }
 0xcea   : > { %v14724_v13 = vmul.f32 %v14700_v45, %v29128_v48  ;;  %v14701_v20 = vmul.f32 %v29132_v0, %v29132_v0  ;;  %v29139_v38 = vadd.f32 %v14685_v24, %v14643_v29  ;;  %v14645_v15 = vadd.f32 %v14644_v44, %v14602_v37  ;;  %v14687_v7 = vpop.f32.mrf.mxu1  ;;  %v24984_v37 = vld [vmem:[%s26134_s17 + $0xc] ss:$24 sps:$4 sm:$0xff]   ;;  %v24982_v45 = vld [vmem:[%s26134_s17 + $0x8] ss:$24 sps:$4 sm:$0xff]   ;;  %v24990_v29 = vld [vmem:[%s26134_s17 + $0x2dc] ss:$24 sps:$4 sm:$0xff]  }
 0xcec   : > { %v14748_v36 = vmul.f32 0.044715, %v14724_v13  ;;  %v14725_v35 = vmul.f32 %v14701_v20, %v29132_v0  ;;  %v14712_v26 = vmul.f32 %v29139_v38, %v29139_v38  ;;  %v29144_v40 = vadd.f32 %v14687_v7, %v14645_v15  ;;  %18691 = vmatpush1.bf16.msra.mxu0 %v24952_v49  ;;  %v24988_v49 = vld [vmem:[%s26134_s17 + $0x2d8] ss:$24 sps:$4 sm:$0xff]  }
 0xced   : > { %18692 = vmatprep.subr.bf16.mxu0 %v24960_v19  ;;  %v24996_v19 = vld [vmem:[%s26134_s17 + $0x2ac] ss:$24 sps:$4 sm:$0xff]  }
 0xcee   : > { %v14772_v47 = vadd.f32 %v14748_v36, %v29128_v48  ;;  %v14749_v14 = vmul.f32 0.044715, %v14725_v35  ;;  %v14736_v27 = vmul.f32 %v14712_v26, %v29139_v38  ;;  %v14713_v23 = vmul.f32 %v29144_v40, %v29144_v40  ;;  %v24994_v36 = vld [vmem:[%s26134_s17 + $0x2a8] ss:$24 sps:$4 sm:$0xff]   ;;  %v25002_v26 = vld [vmem:[%s26134_s17 + $0x27c] ss:$24 sps:$4 sm:$0xff]  }
 0xcf0   : > { %v14796_v62 = vmul.f32 0.7978846, %v14772_v47  ;;  %v14773_v39 = vadd.f32 %v14749_v14, %v29132_v0  ;;  %v14760_v30 = vmul.f32 0.044715, %v14736_v27  ;;  %v14737_v2 = vmul.f32 %v14713_v23, %v29144_v40  ;;  %18693 = vmatpush1.bf16.msra.mxu0 %v24958_v16  ;;  %v25000_v27 = vld [vmem:[%s26134_s17 + $0x278] ss:$24 sps:$4 sm:$0xff]  }
 0xcf1   : > { %18694 = vmatprep.subr.bf16.mxu0 %v24966_v55 }
 0xcf2   : > { %v14797_v32 = vmul.f32 0.7978846, %v14773_v39  ;;  %v14784_v3 = vadd.f32 %v14760_v30, %v29139_v38  ;;  %v14761_v56 = vmul.f32 0.044715, %v14737_v2  ;;  %25598 = vtanh.f32 %v14796_v62  ;;  %v25008_v39 = vld [vmem:[%s26134_s17 + $0x24c] ss:$24 sps:$4 sm:$0xff]  }
 0xcf4   : > { %25600 = vtanh.f32 %v14797_v32  ;;  %v14808_v28 = vmul.f32 0.7978846, %v14784_v3  ;;  %v14785_v43 = vadd.f32 %v14761_v56, %v29144_v40  ;;  %18695 = vmatpush1.bf16.msra.mxu0 %v24964_v8  ;;  %v25003_v32 = vld [vmem:[%s26134_s17 + $0x458] ss:$24 sps:$4 sm:$0xff]   ;;  %v25006_v3 = vld [vmem:[%s26134_s17 + $0x248] ss:$24 sps:$4 sm:$0xff]  }
 0xcf5   : > { %18696 = vmatprep.subr.bf16.mxu0 %v24972_v57 }
 0xcf6   : > { %25602 = vtanh.f32 %v14808_v28  ;;  %v14809_v25 = vmul.f32 0.7978846, %v14785_v43  ;;  %v25017_v28 = vld [vmem:[%s26134_s17 + $0x3fc] ss:$24 sps:$4 sm:$0xff]   ;;  %v25020_v43 = vld [vmem:[%s26134_s17 + $0x1ec] ss:$24 sps:$4 sm:$0xff]  }
 0xcf8   : > { %25604 = vtanh.f32 %v14809_v25  ;;  %18697 = vmatpush1.bf16.msra.mxu0 %v24970_v9  ;;  %v25015_v9 = vld [vmem:[%s26134_s17 + $0x3f8] ss:$24 sps:$4 sm:$0xff]   ;;  %v25023_v25 = vld [vmem:[%s26134_s17 + $0x3cc] ss:$24 sps:$4 sm:$0xff]  }
 0xcf9   : > { %18698 = vmatprep.subr.bf16.mxu0 %v24978_v53  ;;  %v25018_v53 = vld [vmem:[%s26134_s17 + $0x1e8] ss:$24 sps:$4 sm:$0xff]  }
 0xcfc   : > { %18699 = vmatpush1.bf16.msra.mxu0 %v24976_v22  ;;  %v25026_v22 = vld [vmem:[%s26134_s17 + $0x1bc] ss:$24 sps:$4 sm:$0xff]  }
 0xcfd   : > { %18700 = vmatprep.subr.bf16.mxu0 %v24984_v37  ;;  %v25021_v37 = vld [vmem:[%s26134_s17 + $0x3c8] ss:$24 sps:$4 sm:$0xff]  }
 0xcff   : > { %v25599_v24 = vpop.eup %25598 }
 0xd00   : > { %18701 = vmatpush1.bf16.msra.mxu0 %v24982_v45  ;;  %v14844_v15 = vadd.f32 1.0, %v25599_v24  ;;  %v25024_v45 = vld [vmem:[%s26134_s17 + $0x1b8] ss:$24 sps:$4 sm:$0xff]   ;;  %v25032_v24 = vld [vmem:[%s26134_s17 + $0x18c] ss:$24 sps:$4 sm:$0xff]  }
 0xd01   : > { %v25601_v44 = vpop.eup %25600  ;;  %18702 = vmatprep.subr.bf16.mxu0 %v24990_v29  ;;  %v25029_v29 = vld [vmem:[%s26134_s17 + $0x39c] ss:$24 sps:$4 sm:$0xff]  }
 0xd02   : > { %v14845_v13 = vadd.f32 1.0, %v25601_v44  ;;  %v14868_v14 = vmul.f32 0.5, %v14844_v15  ;;  %v25030_v44 = vld [vmem:[%s26134_s17 + $0x188] ss:$24 sps:$4 sm:$0xff]   ;;  %v25036_v15 = vld [vmem:[%s26134_s17 + $0x758] ss:$24 sps:$4 sm:$0xff]  }
 0xd03   : > { %v25603_v20 = vpop.eup %25602 }
 0xd04   : > { %v14856_v7 = vadd.f32 1.0, %v25603_v20  ;;  %18703 = vmatpush2.bf16.msra.mxu0 %v24988_v49  ;;  %v14869_v47 = vmul.f32 0.5, %v14845_v13  ;;  %v14892_v8 = vmul.f32 %v14868_v14, %v29128_v48  ;;  %v25009_v48 = vld [vmem:[%s26134_s17 + $0x428] ss:$24 sps:$4 sm:$0xff]   ;;  %v25027_v49 = vld [vmem:[%s26134_s17 + $0x398] ss:$24 sps:$4 sm:$0xff]  }
 0xd05   : > { %v25605_v35 = vpop.eup %25604  ;;  %18704 = vmatprep.subr.bf16.mxu0 %v24996_v19  ;;  %v25035_v19 = vld [vmem:[%s26134_s17 + $0x36c] ss:$24 sps:$4 sm:$0xff]   ;;  %v25038_v13 = vld [vmem:[%s26134_s17 + $0x75c] ss:$24 sps:$4 sm:$0xff]   ;;  %v25033_v20 = vld [vmem:[%s26134_s17 + $0x368] ss:$24 sps:$4 sm:$0xff]  }
 0xd06   : > { %v14880_v16 = vmul.f32 0.5, %v14856_v7  ;;  %v14857_v55 = vadd.f32 1.0, %v25605_v35  ;;  %v14893_v30 = vmul.f32 %v14869_v47, %v29132_v0  ;;  %v25014_v0 = vld [vmem:[%s26134_s17 + $0x21c] ss:$24 sps:$4 sm:$0xff]   ;;  %v25039_v35 = vld [vmem:[%s26134_s17 + $0x338] ss:$24 sps:$4 sm:$0xff]  }
 0xd07   : > { %v25041_v7 = vld [vmem:[%s26134_s17 + $0x33c] ss:$24 sps:$4 sm:$0xff]   ;;  %v25045_v47 = vld [vmem:[%s26134_s17 + $0x308] ss:$24 sps:$4 sm:$0xff]   ;;  %v25048_v14 = vld [vmem:[%s26134_s17 + $0x6f8] ss:$24 sps:$4 sm:$0xff]  }
 0xd08   : > { %18705 = vmatpush2.bf16.msra.mxu0 %v24994_v36  ;;  %v14881_v23 = vmul.f32 0.5, %v14857_v55  ;;  %v14904_v62 = vmul.f32 %v14880_v16, %v29139_v38  ;;  %v25011_v38 = vld [vmem:[%s26134_s17 + $0x42c] ss:$24 sps:$4 sm:$0xff]   ;;  %v25050_v55 = vld [vmem:[%s26134_s17 + $0x6fc] ss:$24 sps:$4 sm:$0xff]  }
 0xd09   : > { %18706 = vmatprep.subr.bf16.mxu0 %v25002_v26  ;;  %v25044_v36 = vld [vmem:[%s26134_s17 + $0x72c] ss:$24 sps:$4 sm:$0xff]   ;;  %v25042_v26 = vld [vmem:[%s26134_s17 + $0x728] ss:$24 sps:$4 sm:$0xff]  }
 0xd0a   : > { %v14905_v2 = vmul.f32 %v14881_v23, %v29144_v40  ;;  %v29178_v56 = vpack.c.bf16 %v14904_v62, %v14892_v8  ;;  %v25012_v40 = vld [vmem:[%s26134_s17 + $0x218] ss:$24 sps:$4 sm:$0xff]   ;;  %v25047_v16 = vld [vmem:[%s26134_s17 + $0x30c] ss:$24 sps:$4 sm:$0xff]   ;;  %v25057_v8 = vld [vmem:[%s26134_s17 + $0x5a8] ss:$24 sps:$4 sm:$0xff]  }
 0xd0b   : > { %v25056_v23 = vld [vmem:[%s26134_s17 + $0x6cc] ss:$24 sps:$4 sm:$0xff]   ;;  %v25051_v62 = vld [vmem:[%s26134_s17 + $0x5d8] ss:$24 sps:$4 sm:$0xff]  }
 0xd0c   : > { %18707 = vmatpush2.bf16.msra.mxu0 %v25000_v27  ;;  %v29174_v57 = vpack.c.bf16 %v14905_v2, %v14893_v30  ;;  %v25053_v27 = vld [vmem:[%s26134_s17 + $0x5dc] ss:$24 sps:$4 sm:$0xff]   ;;  %v25059_v30 = vld [vmem:[%s26134_s17 + $0x5ac] ss:$24 sps:$4 sm:$0xff]  }
 0xd0d   : > { %18708 = vmatprep.subr.bf16.mxu0 %v25008_v39  ;;  %v25054_v39 = vld [vmem:[%s26134_s17 + $0x6c8] ss:$24 sps:$4 sm:$0xff]   ;;  %v25062_v2 = vld [vmem:[%s26134_s17 + $0x69c] ss:$24 sps:$4 sm:$0xff]  }
 0xd0e   : > { %18675 = vmatprep.mubr.bf16.mxu1 %v29174_v57 }
 0xd0f   : > { %18676 = vmatmul.mubr.bf16.vlgmr.msra.gmra.mxu1 %v29178_v56 }
 0xd10   : > { %18730 = vmatpush1.bf16.msra.mxu1 %v25003_v32  ;;  %18709 = vmatpush2.bf16.msra.mxu0 %v25006_v3  ;;  %v25060_v32 = vld [vmem:[%s26134_s17 + $0x698] ss:$24 sps:$4 sm:$0xff]   ;;  %v25065_v3 = vld [vmem:[%s26134_s17 + $0x57c] ss:$24 sps:$4 sm:$0xff]  }
 0xd11   : > { %18761 = vmatprep.mubr.bf16.mxu1 %v28821_v52  ;;  %18731 = vmatprep.subr.bf16.mxu1 %v25011_v38  ;;  %v25068_v38 = vld [vmem:[%s26134_s17 + $0x66c] ss:$24 sps:$4 sm:$0xff]  }
 0xd12   : > { %18710 = vmatprep.subr.bf16.mxu0 %v25014_v0  ;;  %v25063_v0 = vld [vmem:[%s26134_s17 + $0x578] ss:$24 sps:$4 sm:$0xff]  }
 0xd14   : > { %18732 = vmatpush1.bf16.msra.mxu1 %v25009_v48  ;;  %18711 = vmatpush2.bf16.msra.mxu0 %v25012_v40  ;;  %v25066_v48 = vld [vmem:[%s26134_s17 + $0x668] ss:$24 sps:$4 sm:$0xff]   ;;  %v25071_v40 = vld [vmem:[%s26134_s17 + $0x54c] ss:$24 sps:$4 sm:$0xff]  }
 0xd15   : > { %18733 = vmatprep.subr.bf16.mxu1 %v25017_v28  ;;  %18712 = vmatprep.subr.bf16.mxu0 %v25020_v43  ;;  %v25074_v28 = vld [vmem:[%s26134_s17 + $0x63c] ss:$24 sps:$4 sm:$0xff]   ;;  %v25069_v43 = vld [vmem:[%s26134_s17 + $0x548] ss:$24 sps:$4 sm:$0xff]  }
 0xd18   : > { %18734 = vmatpush1.bf16.msra.mxu1 %v25015_v9  ;;  %18713 = vmatpush2.bf16.msra.mxu0 %v25018_v53  ;;  %v25072_v9 = vld [vmem:[%s26134_s17 + $0x638] ss:$24 sps:$4 sm:$0xff]   ;;  %v25077_v53 = vld [vmem:[%s26134_s17 + $0x51c] ss:$24 sps:$4 sm:$0xff]  }
 0xd19   : > { %18735 = vmatprep.subr.bf16.mxu1 %v25023_v25  ;;  %18714 = vmatprep.subr.bf16.mxu0 %v25026_v22  ;;  %v25080_v25 = vld [vmem:[%s26134_s17 + $0x60c] ss:$24 sps:$4 sm:$0xff]   ;;  %v25075_v22 = vld [vmem:[%s26134_s17 + $0x518] ss:$24 sps:$4 sm:$0xff]  }
 0xd1c   : > { %18736 = vmatpush1.bf16.msra.mxu1 %v25021_v37  ;;  %18715 = vmatpush2.bf16.msra.mxu0 %v25024_v45  ;;  %v25078_v37 = vld [vmem:[%s26134_s17 + $0x608] ss:$24 sps:$4 sm:$0xff]   ;;  %v25083_v45 = vld [vmem:[%s26134_s17 + $0x4ec] ss:$24 sps:$4 sm:$0xff]  }
 0xd1d   : > { %18737 = vmatprep.subr.bf16.mxu1 %v25029_v29  ;;  %18716 = vmatprep.subr.bf16.mxu0 %v25032_v24  ;;  %v25086_v29 = vld [vmem:[%s26134_s17 + $0x8dc] ss:$24 sps:$4 sm:$0xff]   ;;  %v25081_v24 = vld [vmem:[%s26134_s17 + $0x4e8] ss:$24 sps:$4 sm:$0xff]  }
 0xd20   : > { %18738 = vmatpush1.bf16.msra.mxu1 %v25027_v49  ;;  %18717 = vmatpush2.bf16.msra.mxu0 %v25030_v44  ;;  %v25084_v49 = vld [vmem:[%s26134_s17 + $0x8d8] ss:$24 sps:$4 sm:$0xff]   ;;  %v25089_v44 = vld [vmem:[%s26134_s17 + $0x4bc] ss:$24 sps:$4 sm:$0xff]  }
 0xd21   : > { %18739 = vmatprep.subr.bf16.mxu1 %v25035_v19  ;;  %18772 = vmatprep.subr.bf16.mxu0 %v25038_v13  ;;  %v25092_v19 = vld [vmem:[%s26134_s17 + $0x8ac] ss:$24 sps:$4 sm:$0xff]   ;;  %v25087_v13 = vld [vmem:[%s26134_s17 + $0x4b8] ss:$24 sps:$4 sm:$0xff]  }
 0xd23   : > { %18719 = vmatmul.mubr.bf16.vlgmr.msra.gmra.mxu0 %v28448_v60 }
 0xd24   : > { %18740 = vmatpush1.bf16.msra.mxu1 %v25033_v20  ;;  %18773 = vmatpush1.bf16.msra.mxu0 %v25036_v15  ;;  %v25090_v20 = vld [vmem:[%s26134_s17 + $0x8a8] ss:$24 sps:$4 sm:$0xff]   ;;  %v25095_v15 = vld [vmem:[%s26134_s17 + $0x48c] ss:$24 sps:$4 sm:$0xff]  }
 0xd25   : > { %18804 = vmatprep.mubr.bf16.mxu0 %v28942_v46  ;;  %18741 = vmatprep.subr.bf16.mxu1 %v25041_v7  ;;  %v25098_v7 = vld [vmem:[%s26134_s17 + $0x87c] ss:$24 sps:$4 sm:$0xff]  }
 0xd26   : > { %18774 = vmatprep.subr.bf16.mxu0 %v25044_v36  ;;  %v25093_v36 = vld [vmem:[%s26134_s17 + $0x488] ss:$24 sps:$4 sm:$0xff]  }
 0xd28   : > { %18742 = vmatpush1.bf16.msra.mxu1 %v25039_v35  ;;  %18775 = vmatpush1.bf16.msra.mxu0 %v25042_v26  ;;  %v25096_v35 = vld [vmem:[%s26134_s17 + $0x878] ss:$24 sps:$4 sm:$0xff]   ;;  %v25101_v26 = vld [vmem:[%s26134_s17 + $0xa5c] ss:$24 sps:$4 sm:$0xff]  }
 0xd29   : > { %18743 = vmatprep.subr.bf16.mxu1 %v25047_v16  ;;  %18776 = vmatprep.subr.bf16.mxu0 %v25050_v55  ;;  %v25104_v16 = vld [vmem:[%s26134_s17 + $0x84c] ss:$24 sps:$4 sm:$0xff]   ;;  %v25099_v55 = vld [vmem:[%s26134_s17 + $0xa58] ss:$24 sps:$4 sm:$0xff]  }
 0xd2c   : > { %18744 = vmatpush1.bf16.msra.mxu1 %v25045_v47  ;;  %18777 = vmatpush1.bf16.msra.mxu0 %v25048_v14  ;;  %v25102_v47 = vld [vmem:[%s26134_s17 + $0x848] ss:$24 sps:$4 sm:$0xff]   ;;  %v25107_v14 = vld [vmem:[%s26134_s17 + $0xa2c] ss:$24 sps:$4 sm:$0xff]  }
 0xd2d   : > { %18745 = vmatprep.subr.bf16.mxu1 %v25053_v27  ;;  %18778 = vmatprep.subr.bf16.mxu0 %v25056_v23  ;;  %v25110_v27 = vld [vmem:[%s26134_s17 + $0x81c] ss:$24 sps:$4 sm:$0xff]   ;;  %v25105_v23 = vld [vmem:[%s26134_s17 + $0xa28] ss:$24 sps:$4 sm:$0xff]  }
 0xd30   : > { %18746 = vmatpush2.bf16.msra.mxu1 %v25051_v62  ;;  %18779 = vmatpush1.bf16.msra.mxu0 %v25054_v39  ;;  %v25108_v62 = vld [vmem:[%s26134_s17 + $0x818] ss:$24 sps:$4 sm:$0xff]   ;;  %v25113_v39 = vld [vmem:[%s26134_s17 + $0x9fc] ss:$24 sps:$4 sm:$0xff]  }
 0xd31   : > { %18747 = vmatprep.subr.bf16.mxu1 %v25059_v30  ;;  %18780 = vmatprep.subr.bf16.mxu0 %v25062_v2  ;;  %v25116_v30 = vld [vmem:[%s26134_s17 + $0x7ec] ss:$24 sps:$4 sm:$0xff]   ;;  %v25111_v2 = vld [vmem:[%s26134_s17 + $0x9f8] ss:$24 sps:$4 sm:$0xff]  }
 0xd34   : > { %18748 = vmatpush2.bf16.msra.mxu1 %v25057_v8  ;;  %18781 = vmatpush1.bf16.msra.mxu0 %v25060_v32  ;;  %v25114_v8 = vld [vmem:[%s26134_s17 + $0x7e8] ss:$24 sps:$4 sm:$0xff]   ;;  %v25119_v32 = vld [vmem:[%s26134_s17 + $0x9cc] ss:$24 sps:$4 sm:$0xff]  }
 0xd35   : > { %18749 = vmatprep.subr.bf16.mxu1 %v25065_v3  ;;  %18782 = vmatprep.subr.bf16.mxu0 %v25068_v38  ;;  %v25122_v3 = vld [vmem:[%s26134_s17 + $0x7bc] ss:$24 sps:$4 sm:$0xff]   ;;  %v25117_v38 = vld [vmem:[%s26134_s17 + $0x9c8] ss:$24 sps:$4 sm:$0xff]  }
 0xd38   : > { %18750 = vmatpush2.bf16.msra.mxu1 %v25063_v0  ;;  %18783 = vmatpush1.bf16.msra.mxu0 %v25066_v48  ;;  %v25120_v0 = vld [vmem:[%s26134_s17 + $0x7b8] ss:$24 sps:$4 sm:$0xff]   ;;  %v25125_v48 = vld [vmem:[%s26134_s17 + $0x99c] ss:$24 sps:$4 sm:$0xff]  }
 0xd39   : > { %18751 = vmatprep.subr.bf16.mxu1 %v25071_v40  ;;  %18784 = vmatprep.subr.bf16.mxu0 %v25074_v28  ;;  %v25128_v40 = vld [vmem:[%s26134_s17 + $0x78c] ss:$24 sps:$4 sm:$0xff]   ;;  %v25123_v28 = vld [vmem:[%s26134_s17 + $0x998] ss:$24 sps:$4 sm:$0xff]  }
 0xd3c   : > { %18752 = vmatpush2.bf16.msra.mxu1 %v25069_v43  ;;  %18785 = vmatpush1.bf16.msra.mxu0 %v25072_v9  ;;  %v25126_v43 = vld [vmem:[%s26134_s17 + $0x788] ss:$24 sps:$4 sm:$0xff]   ;;  %v25131_v9 = vld [vmem:[%s26134_s17 + $0x96c] ss:$24 sps:$4 sm:$0xff]  }
 0xd3d   : > { %18753 = vmatprep.subr.bf16.mxu1 %v25077_v53  ;;  %18786 = vmatprep.subr.bf16.mxu0 %v25080_v25  ;;  %v25134_v53 = vld [vmem:[%s26134_s17 + $0xd5c] ss:$24 sps:$4 sm:$0xff]   ;;  %v25129_v25 = vld [vmem:[%s26134_s17 + $0x968] ss:$24 sps:$4 sm:$0xff]  }
 0xd40   : > { %18754 = vmatpush2.bf16.msra.mxu1 %v25075_v22  ;;  %18787 = vmatpush1.bf16.msra.mxu0 %v25078_v37  ;;  %v25132_v22 = vld [vmem:[%s26134_s17 + $0xd58] ss:$24 sps:$4 sm:$0xff]   ;;  %v25137_v37 = vld [vmem:[%s26134_s17 + $0x93c] ss:$24 sps:$4 sm:$0xff]  }
 0xd41   : > { %18755 = vmatprep.subr.bf16.mxu1 %v25083_v45  ;;  %18788 = vmatprep.subr.bf16.mxu0 %v25086_v29  ;;  %v25140_v45 = vld [vmem:[%s26134_s17 + $0xd2c] ss:$24 sps:$4 sm:$0xff]   ;;  %v25135_v29 = vld [vmem:[%s26134_s17 + $0x938] ss:$24 sps:$4 sm:$0xff]  }
 0xd44   : > { %18756 = vmatpush2.bf16.msra.mxu1 %v25081_v24  ;;  %18789 = vmatpush2.bf16.msra.mxu0 %v25084_v49  ;;  %v25138_v24 = vld [vmem:[%s26134_s17 + $0xd28] ss:$24 sps:$4 sm:$0xff]   ;;  %v25143_v49 = vld [vmem:[%s26134_s17 + $0x90c] ss:$24 sps:$4 sm:$0xff]  }
 0xd45   : > { %18757 = vmatprep.subr.bf16.mxu1 %v25089_v44  ;;  %18790 = vmatprep.subr.bf16.mxu0 %v25092_v19  ;;  %v25146_v44 = vld [vmem:[%s26134_s17 + $0xcfc] ss:$24 sps:$4 sm:$0xff]   ;;  %v25141_v19 = vld [vmem:[%s26134_s17 + $0x908] ss:$24 sps:$4 sm:$0xff]  }
 0xd48   : > { %18758 = vmatpush2.bf16.msra.mxu1 %v25087_v13  ;;  %18791 = vmatpush2.bf16.msra.mxu0 %v25090_v20  ;;  %v25144_v13 = vld [vmem:[%s26134_s17 + $0xcf8] ss:$24 sps:$4 sm:$0xff]   ;;  %v25149_v20 = vld [vmem:[%s26134_s17 + $0xbdc] ss:$24 sps:$4 sm:$0xff]  }
 0xd49   : > { %18759 = vmatprep.subr.bf16.mxu1 %v25095_v15  ;;  %18792 = vmatprep.subr.bf16.mxu0 %v25098_v7  ;;  %v25152_v15 = vld [vmem:[%s26134_s17 + $0xccc] ss:$24 sps:$4 sm:$0xff]   ;;  %v25147_v7 = vld [vmem:[%s26134_s17 + $0xbd8] ss:$24 sps:$4 sm:$0xff]  }
 0xd4c   : > { %18760 = vmatpush2.bf16.msra.mxu1 %v25093_v36  ;;  %18793 = vmatpush2.bf16.msra.mxu0 %v25096_v35  ;;  %v25150_v36 = vld [vmem:[%s26134_s17 + $0xcc8] ss:$24 sps:$4 sm:$0xff]   ;;  %v25155_v35 = vld [vmem:[%s26134_s17 + $0xbac] ss:$24 sps:$4 sm:$0xff]  }
 0xd4d   : > { %18815 = vmatprep.subr.bf16.mxu1 %v25101_v26  ;;  %18794 = vmatprep.subr.bf16.mxu0 %v25104_v16  ;;  %v25158_v26 = vld [vmem:[%s26134_s17 + $0xc9c] ss:$24 sps:$4 sm:$0xff]   ;;  %v25153_v16 = vld [vmem:[%s26134_s17 + $0xba8] ss:$24 sps:$4 sm:$0xff]  }
 0xd4f   : > { %18762 = vmatmul.mubr.bf16.vlgmr.msra.gmra.mxu1 %v28553_v63 }
 0xd50   : > { %18816 = vmatpush1.bf16.msra.mxu1 %v25099_v55  ;;  %18847 = vmatprep.mubr.bf16.mxu1 %v28946_v17  ;;  %v25156_v55 = vld [vmem:[%s26134_s17 + $0xc98] ss:$24 sps:$4 sm:$0xff]  }
 0xd51   : > { %18795 = vmatpush2.bf16.msra.mxu0 %v25102_v47  ;;  %18817 = vmatprep.subr.bf16.mxu1 %v25107_v14  ;;  %v25161_v47 = vld [vmem:[%s26134_s17 + $0xb7c] ss:$24 sps:$4 sm:$0xff]   ;;  %v25164_v14 = vld [vmem:[%s26134_s17 + $0xc6c] ss:$24 sps:$4 sm:$0xff]  }
 0xd52   : > { %18796 = vmatprep.subr.bf16.mxu0 %v25110_v27  ;;  %v25159_v27 = vld [vmem:[%s26134_s17 + $0xb78] ss:$24 sps:$4 sm:$0xff]  }
 0xd54   : > { %18818 = vmatpush1.bf16.msra.mxu1 %v25105_v23  ;;  %v25162_v23 = vld [vmem:[%s26134_s17 + $0xc68] ss:$24 sps:$4 sm:$0xff]  }
 0xd55   : > { %18797 = vmatpush2.bf16.msra.mxu0 %v25108_v62  ;;  %18819 = vmatprep.subr.bf16.mxu1 %v25113_v39  ;;  %v25167_v62 = vld [vmem:[%s26134_s17 + $0xb4c] ss:$24 sps:$4 sm:$0xff]   ;;  %v25170_v39 = vld [vmem:[%s26134_s17 + $0xc3c] ss:$24 sps:$4 sm:$0xff]  }
 0xd56   : > { %18798 = vmatprep.subr.bf16.mxu0 %v25116_v30  ;;  %v25165_v30 = vld [vmem:[%s26134_s17 + $0xb48] ss:$24 sps:$4 sm:$0xff]  }
 0xd58   : > { %18820 = vmatpush1.bf16.msra.mxu1 %v25111_v2  ;;  %v25168_v2 = vld [vmem:[%s26134_s17 + $0xc38] ss:$24 sps:$4 sm:$0xff]  }
 0xd59   : > { %18799 = vmatpush2.bf16.msra.mxu0 %v25114_v8  ;;  %18821 = vmatprep.subr.bf16.mxu1 %v25119_v32  ;;  %v25173_v8 = vld [vmem:[%s26134_s17 + $0xb1c] ss:$24 sps:$4 sm:$0xff]   ;;  %v25176_v32 = vld [vmem:[%s26134_s17 + $0xc0c] ss:$24 sps:$4 sm:$0xff]  }
 0xd5a   : > { %18800 = vmatprep.subr.bf16.mxu0 %v25122_v3  ;;  %v25171_v3 = vld [vmem:[%s26134_s17 + $0xb18] ss:$24 sps:$4 sm:$0xff]  }
 0xd5c   : > { %18822 = vmatpush1.bf16.msra.mxu1 %v25117_v38  ;;  %v25174_v38 = vld [vmem:[%s26134_s17 + $0xc08] ss:$24 sps:$4 sm:$0xff]  }
 0xd5d   : > { %18801 = vmatpush2.bf16.msra.mxu0 %v25120_v0  ;;  %18823 = vmatprep.subr.bf16.mxu1 %v25125_v48  ;;  %v25179_v0 = vld [vmem:[%s26134_s17 + $0xaec] ss:$24 sps:$4 sm:$0xff]   ;;  %v25182_v48 = vld [vmem:[%s26134_s17 + $0xedc] ss:$24 sps:$4 sm:$0xff]  }
 0xd5e   : > { %18802 = vmatprep.subr.bf16.mxu0 %v25128_v40  ;;  %v25177_v40 = vld [vmem:[%s26134_s17 + $0xae8] ss:$24 sps:$4 sm:$0xff]  }
 0xd60   : > { %18824 = vmatpush1.bf16.msra.mxu1 %v25123_v28  ;;  %v25180_v28 = vld [vmem:[%s26134_s17 + $0xed8] ss:$24 sps:$4 sm:$0xff]  }
 0xd61   : > { %18803 = vmatpush2.bf16.msra.mxu0 %v25126_v43  ;;  %18825 = vmatprep.subr.bf16.mxu1 %v25131_v9  ;;  %v25185_v43 = vld [vmem:[%s26134_s17 + $0xabc] ss:$24 sps:$4 sm:$0xff]   ;;  %v25188_v9 = vld [vmem:[%s26134_s17 + $0xeac] ss:$24 sps:$4 sm:$0xff]  }
 0xd62   : > { %18858 = vmatprep.subr.bf16.mxu0 %v25134_v53  ;;  %v25183_v53 = vld [vmem:[%s26134_s17 + $0xab8] ss:$24 sps:$4 sm:$0xff]  }
 0xd64   : > { %18805 = vmatmul.mubr.bf16.vlgmr.msra.gmra.mxu0 %v28771_v41  ;;  %18826 = vmatpush1.bf16.msra.mxu1 %v25129_v25  ;;  %v25186_v25 = vld [vmem:[%s26134_s17 + $0xea8] ss:$24 sps:$4 sm:$0xff]  }
 0xd65   : > { %18859 = vmatpush1.bf16.msra.mxu0 %v25132_v22  ;;  %18890 = vmatprep.mubr.bf16.mxu0 %v29089_v50  ;;  %v25191_v22 = vld [vmem:[%s26134_s17 + $0xa8c] ss:$24 sps:$4 sm:$0xff]  }
 0xd66   : > { %18827 = vmatprep.subr.bf16.mxu1 %v25137_v37  ;;  %18860 = vmatprep.subr.bf16.mxu0 %v25140_v45  ;;  %v25194_v37 = vld [vmem:[%s26134_s17 + $0xe7c] ss:$24 sps:$4 sm:$0xff]   ;;  %v25189_v45 = vld [vmem:[%s26134_s17 + $0xa88] ss:$24 sps:$4 sm:$0xff]  }
 0xd68   : > { %18828 = vmatpush1.bf16.msra.mxu1 %v25135_v29  ;;  %v25192_v29 = vld [vmem:[%s26134_s17 + $0xe78] ss:$24 sps:$4 sm:$0xff]  }
 0xd69   : > { %18861 = vmatpush1.bf16.msra.mxu0 %v25138_v24  ;;  %18829 = vmatprep.subr.bf16.mxu1 %v25143_v49  ;;  %v25197_v24 = vld [vmem:[%s26134_s17 + $0x105c] ss:$24 sps:$4 sm:$0xff]   ;;  %v25200_v49 = vld [vmem:[%s26134_s17 + $0xe4c] ss:$24 sps:$4 sm:$0xff]  }
 0xd6a   : > { %18862 = vmatprep.subr.bf16.mxu0 %v25146_v44  ;;  %v25195_v44 = vld [vmem:[%s26134_s17 + $0x1058] ss:$24 sps:$4 sm:$0xff]  }
 0xd6c   : > { %18830 = vmatpush1.bf16.msra.mxu1 %v25141_v19  ;;  %v25198_v19 = vld [vmem:[%s26134_s17 + $0xe48] ss:$24 sps:$4 sm:$0xff]  }
 0xd6d   : > { %18863 = vmatpush1.bf16.msra.mxu0 %v25144_v13  ;;  %18831 = vmatprep.subr.bf16.mxu1 %v25149_v20  ;;  %v25203_v13 = vld [vmem:[%s26134_s17 + $0x102c] ss:$24 sps:$4 sm:$0xff]   ;;  %v25206_v20 = vld [vmem:[%s26134_s17 + $0xe1c] ss:$24 sps:$4 sm:$0xff]  }
 0xd6e   : > { %18864 = vmatprep.subr.bf16.mxu0 %v25152_v15  ;;  %v25201_v15 = vld [vmem:[%s26134_s17 + $0x1028] ss:$24 sps:$4 sm:$0xff]  }
 0xd70   : > { %18832 = vmatpush2.bf16.msra.mxu1 %v25147_v7  ;;  %v25204_v7 = vld [vmem:[%s26134_s17 + $0xe18] ss:$24 sps:$4 sm:$0xff]  }
 0xd71   : > { %18865 = vmatpush1.bf16.msra.mxu0 %v25150_v36  ;;  %18833 = vmatprep.subr.bf16.mxu1 %v25155_v35  ;;  %v25209_v36 = vld [vmem:[%s26134_s17 + $0xffc] ss:$24 sps:$4 sm:$0xff]   ;;  %v25212_v35 = vld [vmem:[%s26134_s17 + $0xdec] ss:$24 sps:$4 sm:$0xff]  }
 0xd72   : > { %18866 = vmatprep.subr.bf16.mxu0 %v25158_v26  ;;  %v25207_v26 = vld [vmem:[%s26134_s17 + $0xff8] ss:$24 sps:$4 sm:$0xff]  }
 0xd74   : > { %18834 = vmatpush2.bf16.msra.mxu1 %v25153_v16  ;;  %v25210_v16 = vld [vmem:[%s26134_s17 + $0xde8] ss:$24 sps:$4 sm:$0xff]  }
 0xd75   : > { %18867 = vmatpush1.bf16.msra.mxu0 %v25156_v55  ;;  %18835 = vmatprep.subr.bf16.mxu1 %v25161_v47  ;;  %v25215_v55 = vld [vmem:[%s26134_s17 + $0xfcc] ss:$24 sps:$4 sm:$0xff]   ;;  %v25218_v47 = vld [vmem:[%s26134_s17 + $0xdbc] ss:$24 sps:$4 sm:$0xff]  }
 0xd76   : > { %18868 = vmatprep.subr.bf16.mxu0 %v25164_v14  ;;  %v25213_v14 = vld [vmem:[%s26134_s17 + $0xfc8] ss:$24 sps:$4 sm:$0xff]  }
 0xd78   : > { %18836 = vmatpush2.bf16.msra.mxu1 %v25159_v27  ;;  %v25216_v27 = vld [vmem:[%s26134_s17 + $0xdb8] ss:$24 sps:$4 sm:$0xff]  }
 0xd79   : > { %18869 = vmatpush1.bf16.msra.mxu0 %v25162_v23  ;;  %18837 = vmatprep.subr.bf16.mxu1 %v25167_v62  ;;  %v25221_v23 = vld [vmem:[%s26134_s17 + $0xf9c] ss:$24 sps:$4 sm:$0xff]   ;;  %v25224_v62 = vld [vmem:[%s26134_s17 + $0xd8c] ss:$24 sps:$4 sm:$0xff]  }
 0xd7a   : > { %18870 = vmatprep.subr.bf16.mxu0 %v25170_v39  ;;  %v25219_v39 = vld [vmem:[%s26134_s17 + $0xf98] ss:$24 sps:$4 sm:$0xff]  }
 0xd7c   : > { %18838 = vmatpush2.bf16.msra.mxu1 %v25165_v30  ;;  %v25222_v30 = vld [vmem:[%s26134_s17 + $0xd88] ss:$24 sps:$4 sm:$0xff]  }
 0xd7d   : > { %18871 = vmatpush1.bf16.msra.mxu0 %v25168_v2  ;;  %18839 = vmatprep.subr.bf16.mxu1 %v25173_v8  ;;  %v25227_v2 = vld [vmem:[%s26134_s17 + $0xf6c] ss:$24 sps:$4 sm:$0xff]  }
 0xd7e   : > { %18872 = vmatprep.subr.bf16.mxu0 %v25176_v32  ;;  %v25230_v8 = vld [vmem:[%s26134_s17 + $0x164] ss:$24 sps:$4 sm:$0xff]   ;;  %v25225_v32 = vld [vmem:[%s26134_s17 + $0xf68] ss:$24 sps:$4 sm:$0xff]  }
 0xd80   : > { %18840 = vmatpush2.bf16.msra.mxu1 %v25171_v3  ;;  %v25228_v3 = vld [vmem:[%s26134_s17 + $0x160] ss:$24 sps:$4 sm:$0xff]  }
 0xd81   : > { %18873 = vmatpush1.bf16.msra.mxu0 %v25174_v38  ;;  %18841 = vmatprep.subr.bf16.mxu1 %v25179_v0  ;;  %v25233_v38 = vld [vmem:[%s26134_s17 + $0xf3c] ss:$24 sps:$4 sm:$0xff]  }
 0xd82   : > { %18874 = vmatprep.subr.bf16.mxu0 %v25182_v48  ;;  %v25236_v0 = vld [vmem:[%s26134_s17 + $0x134] ss:$24 sps:$4 sm:$0xff]   ;;  %v25231_v48 = vld [vmem:[%s26134_s17 + $0xf38] ss:$24 sps:$4 sm:$0xff]  }
 0xd84   : > { %18842 = vmatpush2.bf16.msra.mxu1 %v25177_v40  ;;  %v25234_v40 = vld [vmem:[%s26134_s17 + $0x130] ss:$24 sps:$4 sm:$0xff]  }
 0xd85   : > { %18875 = vmatpush2.bf16.msra.mxu0 %v25180_v28  ;;  %18843 = vmatprep.subr.bf16.mxu1 %v25185_v43  ;;  %v25239_v28 = vld [vmem:[%s26134_s17 + $0xf0c] ss:$24 sps:$4 sm:$0xff]  }
 0xd86   : > { %18876 = vmatprep.subr.bf16.mxu0 %v25188_v9  ;;  %v25242_v43 = vld [vmem:[%s26134_s17 + $0x104] ss:$24 sps:$4 sm:$0xff]   ;;  %v25237_v9 = vld [vmem:[%s26134_s17 + $0xf08] ss:$24 sps:$4 sm:$0xff]  }
 0xd88   : > { %18844 = vmatpush2.bf16.msra.mxu1 %v25183_v53  ;;  %v25240_v53 = vld [vmem:[%s26134_s17 + $0x100] ss:$24 sps:$4 sm:$0xff]  }
 0xd89   : > { %18877 = vmatpush2.bf16.msra.mxu0 %v25186_v25  ;;  %18845 = vmatprep.subr.bf16.mxu1 %v25191_v22  ;;  %v25245_v25 = vld [vmem:[%s26134_s17 + $0x11dc] ss:$24 sps:$4 sm:$0xff]  }
 0xd8a   : > { %18878 = vmatprep.subr.bf16.mxu0 %v25194_v37  ;;  %v25248_v22 = vld [vmem:[%s26134_s17 + $0xd4] ss:$24 sps:$4 sm:$0xff]   ;;  %v25246_v37 = vld [vmem:[%s26134_s17 + $0xd0] ss:$24 sps:$4 sm:$0xff]  }
 0xd8c   : > { %18846 = vmatpush2.bf16.msra.mxu1 %v25189_v45  ;;  %v25251_v45 = vld [vmem:[%s26134_s17 + $0x11ac] ss:$24 sps:$4 sm:$0xff]  }
 0xd8d   : > { %18879 = vmatpush2.bf16.msra.mxu0 %v25192_v29  ;;  %18901 = vmatprep.subr.bf16.mxu1 %v25197_v24  ;;  %v25254_v29 = vld [vmem:[%s26134_s17 + $0xa4] ss:$24 sps:$4 sm:$0xff]   ;;  %v25249_v24 = vld [vmem:[%s26134_s17 + $0x11a8] ss:$24 sps:$4 sm:$0xff]  }
 0xd8e   : > { %18880 = vmatprep.subr.bf16.mxu0 %v25200_v49  ;;  %v25252_v49 = vld [vmem:[%s26134_s17 + $0xa0] ss:$24 sps:$4 sm:$0xff]  }
 0xd8f   : > { %18848 = vmatmul.mubr.bf16.vlgmr.msra.gmra.mxu1 %v28911_v12 }
 0xd90   : > { %18902 = vmatpush1.bf16.msra.mxu1 %v25195_v44  ;;  %18933 = vmatprep.mubr.bf16.mxu1 %v29174_v57  ;;  %v25257_v44 = vld [vmem:[%s26134_s17 + $0x117c] ss:$24 sps:$4 sm:$0xff]  }
 0xd91   : > { %18881 = vmatpush2.bf16.msra.mxu0 %v25198_v19  ;;  %18903 = vmatprep.subr.bf16.mxu1 %v25203_v13  ;;  %v25260_v19 = vld [vmem:[%s26134_s17 + $0x74] ss:$24 sps:$4 sm:$0xff]   ;;  %v25255_v13 = vld [vmem:[%s26134_s17 + $0x1178] ss:$24 sps:$4 sm:$0xff]  }
 0xd92   : > { %18882 = vmatprep.subr.bf16.mxu0 %v25206_v20  ;;  %v25258_v20 = vld [vmem:[%s26134_s17 + $0x70] ss:$24 sps:$4 sm:$0xff]  }
 0xd94   : > { %18904 = vmatpush1.bf16.msra.mxu1 %v25201_v15  ;;  %v25263_v15 = vld [vmem:[%s26134_s17 + $0x114c] ss:$24 sps:$4 sm:$0xff]  }
 0xd95   : > { %18883 = vmatpush2.bf16.msra.mxu0 %v25204_v7  ;;  %18905 = vmatprep.subr.bf16.mxu1 %v25209_v36  ;;  %v25266_v7 = vld [vmem:[%s26134_s17 + $0x44] ss:$24 sps:$4 sm:$0xff]   ;;  %v25261_v36 = vld [vmem:[%s26134_s17 + $0x1148] ss:$24 sps:$4 sm:$0xff]  }
 0xd96   : > { %18884 = vmatprep.subr.bf16.mxu0 %v25212_v35  ;;  %v25264_v35 = vld [vmem:[%s26134_s17 + $0x40] ss:$24 sps:$4 sm:$0xff]  }
 0xd98   : > { %18906 = vmatpush1.bf16.msra.mxu1 %v25207_v26  ;;  %v25269_v26 = vld [vmem:[%s26134_s17 + $0x111c] ss:$24 sps:$4 sm:$0xff]  }
 0xd99   : > { %18885 = vmatpush2.bf16.msra.mxu0 %v25210_v16  ;;  %18907 = vmatprep.subr.bf16.mxu1 %v25215_v55  ;;  %v25272_v16 = vld [vmem:[%s26134_s17 + $0x14] ss:$24 sps:$4 sm:$0xff]   ;;  %v25267_v55 = vld [vmem:[%s26134_s17 + $0x1118] ss:$24 sps:$4 sm:$0xff]  }
 0xd9a   : > { %18886 = vmatprep.subr.bf16.mxu0 %v25218_v47  ;;  %v25270_v47 = vld [vmem:[%s26134_s17 + $0x10] ss:$24 sps:$4 sm:$0xff]  }
 0xd9c   : > { %18908 = vmatpush1.bf16.msra.mxu1 %v25213_v14  ;;  %v25275_v14 = vld [vmem:[%s26134_s17 + $0x10ec] ss:$24 sps:$4 sm:$0xff]  }
 0xd9d   : > { %18887 = vmatpush2.bf16.msra.mxu0 %v25216_v27  ;;  %18909 = vmatprep.subr.bf16.mxu1 %v25221_v23  ;;  %v25278_v27 = vld [vmem:[%s26134_s17 + $0x2e4] ss:$24 sps:$4 sm:$0xff]   ;;  %v25273_v23 = vld [vmem:[%s26134_s17 + $0x10e8] ss:$24 sps:$4 sm:$0xff]  }
 0xd9e   : > { %18888 = vmatprep.subr.bf16.mxu0 %v25224_v62  ;;  %v25276_v62 = vld [vmem:[%s26134_s17 + $0x2e0] ss:$24 sps:$4 sm:$0xff]  }
 0xda0   : > { %18910 = vmatpush1.bf16.msra.mxu1 %v25219_v39  ;;  %v25281_v39 = vld [vmem:[%s26134_s17 + $0x10bc] ss:$24 sps:$4 sm:$0xff]  }
 0xda1   : > { %18889 = vmatpush2.bf16.msra.mxu0 %v25222_v30  ;;  %18911 = vmatprep.subr.bf16.mxu1 %v25227_v2  ;;  %v25284_v30 = vld [vmem:[%s26134_s17 + $0x2b4] ss:$24 sps:$4 sm:$0xff]   ;;  %v25279_v2 = vld [vmem:[%s26134_s17 + $0x10b8] ss:$24 sps:$4 sm:$0xff]  }
 0xda2   : > { %18944 = vmatprep.subr.bf16.mxu0 %v25230_v8  ;;  %v25282_v8 = vld [vmem:[%s26134_s17 + $0x2b0] ss:$24 sps:$4 sm:$0xff]  }
 0xda4   : > { %18891 = vmatmul.mubr.bf16.vlgmr.msra.gmra.mxu0 %v29121_v34  ;;  %18912 = vmatpush1.bf16.msra.mxu1 %v25225_v32  ;;  %v25287_v32 = vld [vmem:[%s26134_s17 + $0x108c] ss:$24 sps:$4 sm:$0xff]  }
 0xda5   : > { %18945 = vmatpush1.bf16.msra.mxu0 %v25228_v3  ;;  %18976 = vmatprep.mubr.bf16.mxu0 %v28816_v61  ;;  %v25243_v61 = vld [vmem:[%s26134_s17 + $0x11d8] ss:$24 sps:$4 sm:$0xff]   ;;  %v25290_v3 = vld [vmem:[%s26134_s17 + $0x284] ss:$24 sps:$4 sm:$0xff]  }
 0xda6   : > { %18913 = vmatprep.subr.bf16.mxu1 %v25233_v38  ;;  %18946 = vmatprep.subr.bf16.mxu0 %v25236_v0  ;;  %v25285_v38 = vld [vmem:[%s26134_s17 + $0x1088] ss:$24 sps:$4 sm:$0xff]  }
 0xda7   : > { %v25288_v0 = vld [vmem:[%s26134_s17 + $0x280] ss:$24 sps:$4 sm:$0xff]  }
 0xda8   : > { %18914 = vmatpush1.bf16.msra.mxu1 %v25231_v48  ;;  %v25293_v48 = vld [vmem:[%s26134_s17 + $0x464] ss:$24 sps:$4 sm:$0xff]  }
 0xda9   : > { %18947 = vmatpush1.bf16.msra.mxu0 %v25234_v40  ;;  %18915 = vmatprep.subr.bf16.mxu1 %v25239_v28  ;;  %v25296_v40 = vld [vmem:[%s26134_s17 + $0x254] ss:$24 sps:$4 sm:$0xff]   ;;  %v25291_v28 = vld [vmem:[%s26134_s17 + $0x460] ss:$24 sps:$4 sm:$0xff]  }
 0xdaa   : > { %18948 = vmatprep.subr.bf16.mxu0 %v25242_v43  ;;  %v25294_v43 = vld [vmem:[%s26134_s17 + $0x250] ss:$24 sps:$4 sm:$0xff]  }
 0xdac   : > { %18916 = vmatpush1.bf16.msra.mxu1 %v25237_v9  ;;  %v25299_v9 = vld [vmem:[%s26134_s17 + $0x434] ss:$24 sps:$4 sm:$0xff]  }
 0xdad   : > { %18949 = vmatpush1.bf16.msra.mxu0 %v25240_v53  ;;  %18917 = vmatprep.subr.bf16.mxu1 %v25245_v25  ;;  %v25302_v53 = vld [vmem:[%s26134_s17 + $0x224] ss:$24 sps:$4 sm:$0xff]   ;;  %v25297_v25 = vld [vmem:[%s26134_s17 + $0x430] ss:$24 sps:$4 sm:$0xff]  }
 0xdae   : > { %18950 = vmatprep.subr.bf16.mxu0 %v25248_v22  ;;  %v25300_v22 = vld [vmem:[%s26134_s17 + $0x220] ss:$24 sps:$4 sm:$0xff]  }
 0xdb0   : > { %18918 = vmatpush2.bf16.msra.mxu1 %v25243_v61  ;;  %v25305_v61 = vld [vmem:[%s26134_s17 + $0x404] ss:$24 sps:$4 sm:$0xff]  }
 0xdb1   : > { %18951 = vmatpush1.bf16.msra.mxu0 %v25246_v37  ;;  %18919 = vmatprep.subr.bf16.mxu1 %v25251_v45  ;;  %v25308_v37 = vld [vmem:[%s26134_s17 + $0x1f4] ss:$24 sps:$4 sm:$0xff]   ;;  %v25303_v45 = vld [vmem:[%s26134_s17 + $0x400] ss:$24 sps:$4 sm:$0xff]  }
 0xdb2   : > { %18952 = vmatprep.subr.bf16.mxu0 %v25254_v29  ;;  %v25306_v29 = vld [vmem:[%s26134_s17 + $0x1f0] ss:$24 sps:$4 sm:$0xff]  }
 0xdb4   : > { %18920 = vmatpush2.bf16.msra.mxu1 %v25249_v24  ;;  %v25311_v24 = vld [vmem:[%s26134_s17 + $0x3d4] ss:$24 sps:$4 sm:$0xff]  }
 0xdb5   : > { %18953 = vmatpush1.bf16.msra.mxu0 %v25252_v49  ;;  %18921 = vmatprep.subr.bf16.mxu1 %v25257_v44  ;;  %v25309_v49 = vld [vmem:[%s26134_s17 + $0x3d0] ss:$24 sps:$4 sm:$0xff]   ;;  %v25312_v44 = vld [vmem:[%s26134_s17 + $0x1c0] ss:$24 sps:$4 sm:$0xff]  }
 0xdb6   : > { %18954 = vmatprep.subr.bf16.mxu0 %v25260_v19  ;;  %v25317_v19 = vld [vmem:[%s26134_s17 + $0x3a4] ss:$24 sps:$4 sm:$0xff]  }
 0xdb8   : > { %18922 = vmatpush2.bf16.msra.mxu1 %v25255_v13  ;;  %v25320_v13 = vld [vmem:[%s26134_s17 + $0x194] ss:$24 sps:$4 sm:$0xff]  }
 0xdb9   : > { %18955 = vmatpush1.bf16.msra.mxu0 %v25258_v20  ;;  %18923 = vmatprep.subr.bf16.mxu1 %v25263_v15  ;;  %v25315_v20 = vld [vmem:[%s26134_s17 + $0x3a0] ss:$24 sps:$4 sm:$0xff]   ;;  %v25318_v15 = vld [vmem:[%s26134_s17 + $0x190] ss:$24 sps:$4 sm:$0xff]  }
 0xdba   : > { %18956 = vmatprep.subr.bf16.mxu0 %v25266_v7  ;;  %v25323_v7 = vld [vmem:[%s26134_s17 + $0x374] ss:$24 sps:$4 sm:$0xff]  }
 0xdbc   : > { %18924 = vmatpush2.bf16.msra.mxu1 %v25261_v36  ;;  %v25326_v36 = vld [vmem:[%s26134_s17 + $0x764] ss:$24 sps:$4 sm:$0xff]  }
 0xdbd   : > { %18957 = vmatpush1.bf16.msra.mxu0 %v25264_v35  ;;  %18925 = vmatprep.subr.bf16.mxu1 %v25269_v26  ;;  %v25321_v35 = vld [vmem:[%s26134_s17 + $0x370] ss:$24 sps:$4 sm:$0xff]   ;;  %v25324_v26 = vld [vmem:[%s26134_s17 + $0x760] ss:$24 sps:$4 sm:$0xff]  }
 0xdbe   : > { %18958 = vmatprep.subr.bf16.mxu0 %v25272_v16  ;;  %v25329_v16 = vld [vmem:[%s26134_s17 + $0x344] ss:$24 sps:$4 sm:$0xff]  }
 0xdc0   : > { %18926 = vmatpush2.bf16.msra.mxu1 %v25267_v55  ;;  %v25332_v55 = vld [vmem:[%s26134_s17 + $0x734] ss:$24 sps:$4 sm:$0xff]  }
 0xdc1   : > { %18959 = vmatpush1.bf16.msra.mxu0 %v25270_v47  ;;  %18927 = vmatprep.subr.bf16.mxu1 %v25275_v14  ;;  %v25327_v47 = vld [vmem:[%s26134_s17 + $0x340] ss:$24 sps:$4 sm:$0xff]   ;;  %v25330_v14 = vld [vmem:[%s26134_s17 + $0x730] ss:$24 sps:$4 sm:$0xff]  }
 0xdc2   : > { %18960 = vmatprep.subr.bf16.mxu0 %v25278_v27  ;;  %v25335_v27 = vld [vmem:[%s26134_s17 + $0x314] ss:$24 sps:$4 sm:$0xff]  }
 0xdc4   : > { %18928 = vmatpush2.bf16.msra.mxu1 %v25273_v23  ;;  %v25338_v23 = vld [vmem:[%s26134_s17 + $0x704] ss:$24 sps:$4 sm:$0xff]  }
 0xdc5   : > { %18961 = vmatpush2.bf16.msra.mxu0 %v25276_v62  ;;  %18929 = vmatprep.subr.bf16.mxu1 %v25281_v39  ;;  %v25333_v62 = vld [vmem:[%s26134_s17 + $0x310] ss:$24 sps:$4 sm:$0xff]   ;;  %v25341_v39 = vld [vmem:[%s26134_s17 + $0x5e4] ss:$24 sps:$4 sm:$0xff]  }
 0xdc6   : > { %18962 = vmatprep.subr.bf16.mxu0 %v25284_v30  ;;  %v25344_v30 = vld [vmem:[%s26134_s17 + $0x6d4] ss:$24 sps:$4 sm:$0xff]  }
 0xdc8   : > { %18930 = vmatpush2.bf16.msra.mxu1 %v25279_v2  ;;  %v25342_v2 = vld [vmem:[%s26134_s17 + $0x6d0] ss:$24 sps:$4 sm:$0xff]  }
 0xdc9   : > { %18963 = vmatpush2.bf16.msra.mxu0 %v25282_v8  ;;  %18931 = vmatprep.subr.bf16.mxu1 %v25287_v32  ;;  %v25347_v8 = vld [vmem:[%s26134_s17 + $0x5b4] ss:$24 sps:$4 sm:$0xff]   ;;  %v25350_v32 = vld [vmem:[%s26134_s17 + $0x6a4] ss:$24 sps:$4 sm:$0xff]  }
 0xdca   : > { %18964 = vmatprep.subr.bf16.mxu0 %v25290_v3  ;;  %v25345_v3 = vld [vmem:[%s26134_s17 + $0x5b0] ss:$24 sps:$4 sm:$0xff]  }
 0xdcc   : > { %18932 = vmatpush2.bf16.msra.mxu1 %v25285_v38  ;;  %v25348_v38 = vld [vmem:[%s26134_s17 + $0x6a0] ss:$24 sps:$4 sm:$0xff]  }
 0xdcd   : > { %18965 = vmatpush2.bf16.msra.mxu0 %v25288_v0  ;;  %18987 = vmatprep.subr.bf16.mxu1 %v25293_v48  ;;  %v25353_v0 = vld [vmem:[%s26134_s17 + $0x584] ss:$24 sps:$4 sm:$0xff]   ;;  %v25356_v48 = vld [vmem:[%s26134_s17 + $0x674] ss:$24 sps:$4 sm:$0xff]  }
 0xdce   : > { %18966 = vmatprep.subr.bf16.mxu0 %v25296_v40  ;;  %v25351_v40 = vld [vmem:[%s26134_s17 + $0x580] ss:$24 sps:$4 sm:$0xff]  }
 0xdcf   : > { %18934 = vmatmul.mubr.bf16.vlgmr.msra.gmra.mxu1 %v29178_v56 }
 0xdd0   : > { %18988 = vmatpush1.bf16.msra.mxu1 %v25291_v28  ;;  %19019 = vmatprep.mubr.bf16.mxu1 %v28821_v52  ;;  %v25314_v52 = vld [vmem:[%s26134_s17 + $0x1c4] ss:$24 sps:$4 sm:$0xff]   ;;  %v25354_v28 = vld [vmem:[%s26134_s17 + $0x670] ss:$24 sps:$4 sm:$0xff]  }
 0xdd1   : > { %18967 = vmatpush2.bf16.msra.mxu0 %v25294_v43  ;;  %18989 = vmatprep.subr.bf16.mxu1 %v25299_v9  ;;  %v25359_v43 = vld [vmem:[%s26134_s17 + $0x554] ss:$24 sps:$4 sm:$0xff]   ;;  %v25362_v9 = vld [vmem:[%s26134_s17 + $0x644] ss:$24 sps:$4 sm:$0xff]  }
 0xdd2   : > { %18968 = vmatprep.subr.bf16.mxu0 %v25302_v53  ;;  %v25357_v53 = vld [vmem:[%s26134_s17 + $0x550] ss:$24 sps:$4 sm:$0xff]  }
 0xdd4   : > { %18990 = vmatpush1.bf16.msra.mxu1 %v25297_v25  ;;  %v25360_v25 = vld [vmem:[%s26134_s17 + $0x640] ss:$24 sps:$4 sm:$0xff]  }
 0xdd5   : > { %18969 = vmatpush2.bf16.msra.mxu0 %v25300_v22  ;;  %18991 = vmatprep.subr.bf16.mxu1 %v25305_v61  ;;  %v25365_v22 = vld [vmem:[%s26134_s17 + $0x524] ss:$24 sps:$4 sm:$0xff]   ;;  %v25368_v61 = vld [vmem:[%s26134_s17 + $0x614] ss:$24 sps:$4 sm:$0xff]  }
 0xdd6   : > { %18970 = vmatprep.subr.bf16.mxu0 %v25308_v37  ;;  %v25363_v37 = vld [vmem:[%s26134_s17 + $0x520] ss:$24 sps:$4 sm:$0xff]  }
 0xdd8   : > { %18992 = vmatpush1.bf16.msra.mxu1 %v25303_v45  ;;  %v25366_v45 = vld [vmem:[%s26134_s17 + $0x610] ss:$24 sps:$4 sm:$0xff]  }
 0xdd9   : > { %18971 = vmatpush2.bf16.msra.mxu0 %v25306_v29  ;;  %18993 = vmatprep.subr.bf16.mxu1 %v25311_v24  ;;  %v25371_v29 = vld [vmem:[%s26134_s17 + $0x4f4] ss:$24 sps:$4 sm:$0xff]   ;;  %v25374_v24 = vld [vmem:[%s26134_s17 + $0x8e4] ss:$24 sps:$4 sm:$0xff]  }
 0xdda   : > { %18972 = vmatprep.subr.bf16.mxu0 %v25314_v52  ;;  %v25369_v52 = vld [vmem:[%s26134_s17 + $0x4f0] ss:$24 sps:$4 sm:$0xff]  }
 0xddc   : > { %18994 = vmatpush1.bf16.msra.mxu1 %v25309_v49  ;;  %v25372_v49 = vld [vmem:[%s26134_s17 + $0x8e0] ss:$24 sps:$4 sm:$0xff]  }
 0xddd   : > { %18973 = vmatpush2.bf16.msra.mxu0 %v25312_v44  ;;  %18995 = vmatprep.subr.bf16.mxu1 %v25317_v19  ;;  %v25377_v44 = vld [vmem:[%s26134_s17 + $0x4c4] ss:$24 sps:$4 sm:$0xff]   ;;  %v25380_v19 = vld [vmem:[%s26134_s17 + $0x8b4] ss:$24 sps:$4 sm:$0xff]  }
 0xdde   : > { %18974 = vmatprep.subr.bf16.mxu0 %v25320_v13  ;;  %v25375_v13 = vld [vmem:[%s26134_s17 + $0x4c0] ss:$24 sps:$4 sm:$0xff]  }
 0xde0   : > { %18996 = vmatpush1.bf16.msra.mxu1 %v25315_v20  ;;  %v25378_v20 = vld [vmem:[%s26134_s17 + $0x8b0] ss:$24 sps:$4 sm:$0xff]  }
 0xde1   : > { %18975 = vmatpush2.bf16.msra.mxu0 %v25318_v15  ;;  %18997 = vmatprep.subr.bf16.mxu1 %v25323_v7  ;;  %v25383_v15 = vld [vmem:[%s26134_s17 + $0x494] ss:$24 sps:$4 sm:$0xff]   ;;  %v25386_v7 = vld [vmem:[%s26134_s17 + $0x884] ss:$24 sps:$4 sm:$0xff]  }
 0xde2   : > { %19030 = vmatprep.subr.bf16.mxu0 %v25326_v36  ;;  %v25381_v36 = vld [vmem:[%s26134_s17 + $0x490] ss:$24 sps:$4 sm:$0xff]  }
 0xde4   : > { %18977 = vmatmul.mubr.bf16.vlgmr.msra.gmra.mxu0 %v28448_v60  ;;  %18998 = vmatpush1.bf16.msra.mxu1 %v25321_v35  ;;  %v25336_v60 = vld [vmem:[%s26134_s17 + $0x700] ss:$24 sps:$4 sm:$0xff]  }
 0xde5   : > { %19031 = vmatpush1.bf16.msra.mxu0 %v25324_v26  ;;  %19062 = vmatprep.mubr.bf16.mxu0 %v28942_v46  ;;  %v25339_v46 = vld [vmem:[%s26134_s17 + $0x5e0] ss:$24 sps:$4 sm:$0xff]   ;;  %v25389_v26 = vld [vmem:[%s26134_s17 + $0xa64] ss:$24 sps:$4 sm:$0xff]  }
 0xde6   : > { %18999 = vmatprep.subr.bf16.mxu1 %v25329_v16  ;;  %19032 = vmatprep.subr.bf16.mxu0 %v25332_v55  ;;  %v25384_v35 = vld [vmem:[%s26134_s17 + $0x880] ss:$24 sps:$4 sm:$0xff]   ;;  %v25392_v16 = vld [vmem:[%s26134_s17 + $0x854] ss:$24 sps:$4 sm:$0xff]  }
 0xde7   : > { %v25387_v55 = vld [vmem:[%s26134_s17 + $0xa60] ss:$24 sps:$4 sm:$0xff]  }
 0xde8   : > { %19000 = vmatpush1.bf16.msra.mxu1 %v25327_v47  ;;  %v25390_v47 = vld [vmem:[%s26134_s17 + $0x850] ss:$24 sps:$4 sm:$0xff]  }
 0xde9   : > { %19033 = vmatpush1.bf16.msra.mxu0 %v25330_v14  ;;  %19001 = vmatprep.subr.bf16.mxu1 %v25335_v27  ;;  %v25395_v14 = vld [vmem:[%s26134_s17 + $0xa34] ss:$24 sps:$4 sm:$0xff]   ;;  %v25398_v27 = vld [vmem:[%s26134_s17 + $0x824] ss:$24 sps:$4 sm:$0xff]  }
 0xdea   : > { %19034 = vmatprep.subr.bf16.mxu0 %v25338_v23  ;;  %v25393_v23 = vld [vmem:[%s26134_s17 + $0xa30] ss:$24 sps:$4 sm:$0xff]  }
 0xdec   : > { %19002 = vmatpush1.bf16.msra.mxu1 %v25333_v62  ;;  %v25396_v62 = vld [vmem:[%s26134_s17 + $0x820] ss:$24 sps:$4 sm:$0xff]  }
 0xded   : > { %19035 = vmatpush1.bf16.msra.mxu0 %v25336_v60  ;;  %19003 = vmatprep.subr.bf16.mxu1 %v25341_v39  ;;  %v25401_v60 = vld [vmem:[%s26134_s17 + $0xa04] ss:$24 sps:$4 sm:$0xff]   ;;  %v25404_v39 = vld [vmem:[%s26134_s17 + $0x7f4] ss:$24 sps:$4 sm:$0xff]  }
 0xdee   : > { %19036 = vmatprep.subr.bf16.mxu0 %v25344_v30  ;;  %v25399_v30 = vld [vmem:[%s26134_s17 + $0xa00] ss:$24 sps:$4 sm:$0xff]  }
 0xdf0   : > { %19004 = vmatpush2.bf16.msra.mxu1 %v25339_v46  ;;  %v25407_v46 = vld [vmem:[%s26134_s17 + $0x9d4] ss:$24 sps:$4 sm:$0xff]  }
 0xdf1   : > { %19037 = vmatpush1.bf16.msra.mxu0 %v25342_v2  ;;  %19005 = vmatprep.subr.bf16.mxu1 %v25347_v8  ;;  %v25405_v2 = vld [vmem:[%s26134_s17 + $0x9d0] ss:$24 sps:$4 sm:$0xff]   ;;  %v25408_v8 = vld [vmem:[%s26134_s17 + $0x7c0] ss:$24 sps:$4 sm:$0xff]  }
 0xdf2   : > { %19038 = vmatprep.subr.bf16.mxu0 %v25350_v32  ;;  %v25413_v32 = vld [vmem:[%s26134_s17 + $0x9a4] ss:$24 sps:$4 sm:$0xff]  }
 0xdf4   : > { %19006 = vmatpush2.bf16.msra.mxu1 %v25345_v3  ;;  %v25416_v3 = vld [vmem:[%s26134_s17 + $0x794] ss:$24 sps:$4 sm:$0xff]  }
 0xdf5   : > { %19039 = vmatpush1.bf16.msra.mxu0 %v25348_v38  ;;  %19007 = vmatprep.subr.bf16.mxu1 %v25353_v0  ;;  %v25411_v38 = vld [vmem:[%s26134_s17 + $0x9a0] ss:$24 sps:$4 sm:$0xff]   ;;  %v25414_v0 = vld [vmem:[%s26134_s17 + $0x790] ss:$24 sps:$4 sm:$0xff]  }
 0xdf6   : > { %19040 = vmatprep.subr.bf16.mxu0 %v25356_v48  ;;  %v25419_v48 = vld [vmem:[%s26134_s17 + $0x974] ss:$24 sps:$4 sm:$0xff]  }
 0xdf8   : > { %19008 = vmatpush2.bf16.msra.mxu1 %v25351_v40  ;;  %v25422_v40 = vld [vmem:[%s26134_s17 + $0xd64] ss:$24 sps:$4 sm:$0xff]  }
 0xdf9   : > { %19041 = vmatpush1.bf16.msra.mxu0 %v25354_v28  ;;  %19009 = vmatprep.subr.bf16.mxu1 %v25359_v43  ;;  %v25417_v28 = vld [vmem:[%s26134_s17 + $0x970] ss:$24 sps:$4 sm:$0xff]   ;;  %v25420_v43 = vld [vmem:[%s26134_s17 + $0xd60] ss:$24 sps:$4 sm:$0xff]  }
 0xdfa   : > { %19042 = vmatprep.subr.bf16.mxu0 %v25362_v9  ;;  %v25425_v9 = vld [vmem:[%s26134_s17 + $0x944] ss:$24 sps:$4 sm:$0xff]  }
 0xdfc   : > { %19010 = vmatpush2.bf16.msra.mxu1 %v25357_v53  ;;  %v25428_v53 = vld [vmem:[%s26134_s17 + $0xd34] ss:$24 sps:$4 sm:$0xff]  }
 0xdfd   : > { %19043 = vmatpush1.bf16.msra.mxu0 %v25360_v25  ;;  %19011 = vmatprep.subr.bf16.mxu1 %v25365_v22  ;;  %v25423_v25 = vld [vmem:[%s26134_s17 + $0x940] ss:$24 sps:$4 sm:$0xff]   ;;  %v25426_v22 = vld [vmem:[%s26134_s17 + $0xd30] ss:$24 sps:$4 sm:$0xff]  }
 0xdfe   : > { %19044 = vmatprep.subr.bf16.mxu0 %v25368_v61  ;;  %v25431_v61 = vld [vmem:[%s26134_s17 + $0x914] ss:$24 sps:$4 sm:$0xff]  }
 0xe00   : > { %19012 = vmatpush2.bf16.msra.mxu1 %v25363_v37  ;;  %v25434_v37 = vld [vmem:[%s26134_s17 + $0xd04] ss:$24 sps:$4 sm:$0xff]  }
 0xe01   : > { %19045 = vmatpush1.bf16.msra.mxu0 %v25366_v45  ;;  %19013 = vmatprep.subr.bf16.mxu1 %v25371_v29  ;;  %v25429_v45 = vld [vmem:[%s26134_s17 + $0x910] ss:$24 sps:$4 sm:$0xff]   ;;  %v25437_v29 = vld [vmem:[%s26134_s17 + $0xbe4] ss:$24 sps:$4 sm:$0xff]  }
 0xe02   : > { %19046 = vmatprep.subr.bf16.mxu0 %v25374_v24  ;;  %v25440_v24 = vld [vmem:[%s26134_s17 + $0xcd4] ss:$24 sps:$4 sm:$0xff]  }
 0xe04   : > { %19014 = vmatpush2.bf16.msra.mxu1 %v25369_v52  ;;  %v25438_v52 = vld [vmem:[%s26134_s17 + $0xcd0] ss:$24 sps:$4 sm:$0xff]  }
 0xe05   : > { %19047 = vmatpush2.bf16.msra.mxu0 %v25372_v49  ;;  %19015 = vmatprep.subr.bf16.mxu1 %v25377_v44  ;;  %v25443_v49 = vld [vmem:[%s26134_s17 + $0xbb4] ss:$24 sps:$4 sm:$0xff]   ;;  %v25446_v44 = vld [vmem:[%s26134_s17 + $0xca4] ss:$24 sps:$4 sm:$0xff]  }
 0xe06   : > { %19048 = vmatprep.subr.bf16.mxu0 %v25380_v19  ;;  %v25441_v19 = vld [vmem:[%s26134_s17 + $0xbb0] ss:$24 sps:$4 sm:$0xff]  }
 0xe08   : > { %19016 = vmatpush2.bf16.msra.mxu1 %v25375_v13  ;;  %v25444_v13 = vld [vmem:[%s26134_s17 + $0xca0] ss:$24 sps:$4 sm:$0xff]  }
 0xe09   : > { %19049 = vmatpush2.bf16.msra.mxu0 %v25378_v20  ;;  %19017 = vmatprep.subr.bf16.mxu1 %v25383_v15  ;;  %v25449_v20 = vld [vmem:[%s26134_s17 + $0xb84] ss:$24 sps:$4 sm:$0xff]   ;;  %v25452_v15 = vld [vmem:[%s26134_s17 + $0xc74] ss:$24 sps:$4 sm:$0xff]  }
 0xe0a   : > { %19050 = vmatprep.subr.bf16.mxu0 %v25386_v7  ;;  %v25447_v7 = vld [vmem:[%s26134_s17 + $0xb80] ss:$24 sps:$4 sm:$0xff]  }
 0xe0c   : > { %19018 = vmatpush2.bf16.msra.mxu1 %v25381_v36  ;;  %v25450_v36 = vld [vmem:[%s26134_s17 + $0xc70] ss:$24 sps:$4 sm:$0xff]  }
 0xe0d   : > { %19051 = vmatpush2.bf16.msra.mxu0 %v25384_v35  ;;  %19073 = vmatprep.subr.bf16.mxu1 %v25389_v26  ;;  %v25455_v35 = vld [vmem:[%s26134_s17 + $0xb54] ss:$24 sps:$4 sm:$0xff]   ;;  %v25458_v26 = vld [vmem:[%s26134_s17 + $0xc44] ss:$24 sps:$4 sm:$0xff]  }
 0xe0e   : > { %19052 = vmatprep.subr.bf16.mxu0 %v25392_v16  ;;  %v25453_v16 = vld [vmem:[%s26134_s17 + $0xb50] ss:$24 sps:$4 sm:$0xff]  }
 0xe0f   : > { %19020 = vmatmul.mubr.bf16.vlgmr.msra.gmra.mxu1 %v28553_v63  ;;  %v25402_v63 = vld [vmem:[%s26134_s17 + $0x7f0] ss:$24 sps:$4 sm:$0xff]  }
 0xe10   : > { %19074 = vmatpush1.bf16.msra.mxu1 %v25387_v55  ;;  %19105 = vmatprep.mubr.bf16.mxu1 %v28946_v17  ;;  %v25410_v17 = vld [vmem:[%s26134_s17 + $0x7c4] ss:$24 sps:$4 sm:$0xff]   ;;  %v25456_v55 = vld [vmem:[%s26134_s17 + $0xc40] ss:$24 sps:$4 sm:$0xff]  }
 0xe11   : > { %19053 = vmatpush2.bf16.msra.mxu0 %v25390_v47  ;;  %19075 = vmatprep.subr.bf16.mxu1 %v25395_v14  ;;  %v25461_v47 = vld [vmem:[%s26134_s17 + $0xb24] ss:$24 sps:$4 sm:$0xff]   ;;  %v25464_v14 = vld [vmem:[%s26134_s17 + $0xc14] ss:$24 sps:$4 sm:$0xff]  }
 0xe12   : > { %19054 = vmatprep.subr.bf16.mxu0 %v25398_v27  ;;  %v25459_v27 = vld [vmem:[%s26134_s17 + $0xb20] ss:$24 sps:$4 sm:$0xff]  }
 0xe14   : > { %19076 = vmatpush1.bf16.msra.mxu1 %v25393_v23  ;;  %v25462_v23 = vld [vmem:[%s26134_s17 + $0xc10] ss:$24 sps:$4 sm:$0xff]  }
 0xe15   : > { %19055 = vmatpush2.bf16.msra.mxu0 %v25396_v62  ;;  %19077 = vmatprep.subr.bf16.mxu1 %v25401_v60  ;;  %v25467_v62 = vld [vmem:[%s26134_s17 + $0xaf4] ss:$24 sps:$4 sm:$0xff]   ;;  %v25470_v60 = vld [vmem:[%s26134_s17 + $0xee4] ss:$24 sps:$4 sm:$0xff]  }
 0xe16   : > { %19056 = vmatprep.subr.bf16.mxu0 %v25404_v39  ;;  %v25465_v39 = vld [vmem:[%s26134_s17 + $0xaf0] ss:$24 sps:$4 sm:$0xff]  }
 0xe18   : > { %19078 = vmatpush1.bf16.msra.mxu1 %v25399_v30  ;;  %v25468_v30 = vld [vmem:[%s26134_s17 + $0xee0] ss:$24 sps:$4 sm:$0xff]  }
 0xe19   : > { %19057 = vmatpush2.bf16.msra.mxu0 %v25402_v63  ;;  %19079 = vmatprep.subr.bf16.mxu1 %v25407_v46  ;;  %v25473_v63 = vld [vmem:[%s26134_s17 + $0xac4] ss:$24 sps:$4 sm:$0xff]   ;;  %v25476_v46 = vld [vmem:[%s26134_s17 + $0xeb4] ss:$24 sps:$4 sm:$0xff]  }
 0xe1a   : > { %19058 = vmatprep.subr.bf16.mxu0 %v25410_v17  ;;  %v25471_v17 = vld [vmem:[%s26134_s17 + $0xac0] ss:$24 sps:$4 sm:$0xff]  }
 0xe1c   : > { %19080 = vmatpush1.bf16.msra.mxu1 %v25405_v2  ;;  %v25474_v2 = vld [vmem:[%s26134_s17 + $0xeb0] ss:$24 sps:$4 sm:$0xff]  }
 0xe1d   : > { %19059 = vmatpush2.bf16.msra.mxu0 %v25408_v8  ;;  %19081 = vmatprep.subr.bf16.mxu1 %v25413_v32  ;;  %v25479_v8 = vld [vmem:[%s26134_s17 + $0xa94] ss:$24 sps:$4 sm:$0xff]   ;;  %v25482_v32 = vld [vmem:[%s26134_s17 + $0xe84] ss:$24 sps:$4 sm:$0xff]  }
 0xe1e   : > { %19060 = vmatprep.subr.bf16.mxu0 %v25416_v3  ;;  %v25477_v3 = vld [vmem:[%s26134_s17 + $0xa90] ss:$24 sps:$4 sm:$0xff]  }
 0xe20   : > { %19082 = vmatpush1.bf16.msra.mxu1 %v25411_v38  ;;  %v25480_v38 = vld [vmem:[%s26134_s17 + $0xe80] ss:$24 sps:$4 sm:$0xff]  }
 0xe21   : > { %19061 = vmatpush2.bf16.msra.mxu0 %v25414_v0  ;;  %19083 = vmatprep.subr.bf16.mxu1 %v25419_v48  ;;  %v25485_v0 = vld [vmem:[%s26134_s17 + $0x1064] ss:$24 sps:$4 sm:$0xff]   ;;  %v25488_v48 = vld [vmem:[%s26134_s17 + $0xe54] ss:$24 sps:$4 sm:$0xff]  }
 0xe22   : > { %19116 = vmatprep.subr.bf16.mxu0 %v25422_v40  ;;  %v25483_v40 = vld [vmem:[%s26134_s17 + $0x1060] ss:$24 sps:$4 sm:$0xff]  }
 0xe24   : > { %19063 = vmatmul.mubr.bf16.vlgmr.msra.gmra.mxu0 %v28771_v41  ;;  %19084 = vmatpush1.bf16.msra.mxu1 %v25417_v28  ;;  %v25432_v41 = vld [vmem:[%s26134_s17 + $0xd00] ss:$24 sps:$4 sm:$0xff]   ;;  %v25486_v28 = vld [vmem:[%s26134_s17 + $0xe50] ss:$24 sps:$4 sm:$0xff]  }
 0xe25   : > { %19117 = vmatpush1.bf16.msra.mxu0 %v25420_v43  ;;  %19148 = vmatprep.mubr.bf16.mxu0 %v29089_v50  ;;  %v25435_v50 = vld [vmem:[%s26134_s17 + $0xbe0] ss:$24 sps:$4 sm:$0xff]   ;;  %v25491_v43 = vld [vmem:[%s26134_s17 + $0x1034] ss:$24 sps:$4 sm:$0xff]  }
 0xe26   : > { %19085 = vmatprep.subr.bf16.mxu1 %v25425_v9  ;;  %19118 = vmatprep.subr.bf16.mxu0 %v25428_v53  ;;  %v25494_v9 = vld [vmem:[%s26134_s17 + $0xe24] ss:$24 sps:$4 sm:$0xff]   ;;  %v25489_v53 = vld [vmem:[%s26134_s17 + $0x1030] ss:$24 sps:$4 sm:$0xff]  }
 0xe28   : > { %19086 = vmatpush1.bf16.msra.mxu1 %v25423_v25  ;;  %v25492_v25 = vld [vmem:[%s26134_s17 + $0xe20] ss:$24 sps:$4 sm:$0xff]  }
 0xe29   : > { %19119 = vmatpush1.bf16.msra.mxu0 %v25426_v22  ;;  %19087 = vmatprep.subr.bf16.mxu1 %v25431_v61  ;;  %v25497_v22 = vld [vmem:[%s26134_s17 + $0x1004] ss:$24 sps:$4 sm:$0xff]   ;;  %v25500_v61 = vld [vmem:[%s26134_s17 + $0xdf4] ss:$24 sps:$4 sm:$0xff]  }
 0xe2a   : > { %19120 = vmatprep.subr.bf16.mxu0 %v25434_v37  ;;  %v25495_v37 = vld [vmem:[%s26134_s17 + $0x1000] ss:$24 sps:$4 sm:$0xff]  }
 0xe2c   : > { %19088 = vmatpush1.bf16.msra.mxu1 %v25429_v45  ;;  %v25503_v45 = vld [vmem:[%s26134_s17 + $0xfd4] ss:$24 sps:$4 sm:$0xff]  }
 0xe2d   : > { %19121 = vmatpush1.bf16.msra.mxu0 %v25432_v41  ;;  %19089 = vmatprep.subr.bf16.mxu1 %v25437_v29  ;;  %v25501_v41 = vld [vmem:[%s26134_s17 + $0xfd0] ss:$24 sps:$4 sm:$0xff]   ;;  %v25504_v29 = vld [vmem:[%s26134_s17 + $0xdc0] ss:$24 sps:$4 sm:$0xff]  }
 0xe2e   : > { %19122 = vmatprep.subr.bf16.mxu0 %v25440_v24  ;;  %v25509_v24 = vld [vmem:[%s26134_s17 + $0xfa4] ss:$24 sps:$4 sm:$0xff]  }
 0xe30   : > { %19090 = vmatpush2.bf16.msra.mxu1 %v25435_v50  ;;  %v25512_v50 = vld [vmem:[%s26134_s17 + $0xd94] ss:$24 sps:$4 sm:$0xff]  }
 0xe31   : > { %19123 = vmatpush1.bf16.msra.mxu0 %v25438_v52  ;;  %19091 = vmatprep.subr.bf16.mxu1 %v25443_v49  ;;  %v25507_v52 = vld [vmem:[%s26134_s17 + $0xfa0] ss:$24 sps:$4 sm:$0xff]   ;;  %v25510_v49 = vld [vmem:[%s26134_s17 + $0xd90] ss:$24 sps:$4 sm:$0xff]  }
 0xe32   : > { %19124 = vmatprep.subr.bf16.mxu0 %v25446_v44  ;;  %v25515_v44 = vld [vmem:[%s26134_s17 + $0xf74] ss:$24 sps:$4 sm:$0xff]  }
 0xe34   : > { %19092 = vmatpush2.bf16.msra.mxu1 %v25441_v19  ;;  %v25513_v19 = vld [vmem:[%s26134_s17 + $0xf70] ss:$24 sps:$4 sm:$0xff]  }
 0xe35   : > { %19125 = vmatpush1.bf16.msra.mxu0 %v25444_v13  ;;  %19093 = vmatprep.subr.bf16.mxu1 %v25449_v20  ;;  %v25518_v13 = vld [vmem:[%s26134_s17 + $0xf44] ss:$24 sps:$4 sm:$0xff]   ;;  %v25516_v20 = vld [vmem:[%s26134_s17 + $0xf40] ss:$24 sps:$4 sm:$0xff]  }
 0xe36   : > { %19126 = vmatprep.subr.bf16.mxu0 %v25452_v15  ;;  %v25521_v15 = vld [vmem:[%s26134_s17 + $0xf14] ss:$24 sps:$4 sm:$0xff]  }
 0xe38   : > { %19094 = vmatpush2.bf16.msra.mxu1 %v25447_v7  ;;  %v25519_v7 = vld [vmem:[%s26134_s17 + $0xf10] ss:$24 sps:$4 sm:$0xff]  }
 0xe39   : > { %19127 = vmatpush1.bf16.msra.mxu0 %v25450_v36  ;;  %19095 = vmatprep.subr.bf16.mxu1 %v25455_v35  ;;  %v25524_v36 = vld [vmem:[%s26134_s17 + $0x11e4] ss:$24 sps:$4 sm:$0xff]   ;;  %v25522_v35 = vld [vmem:[%s26134_s17 + $0x11e0] ss:$24 sps:$4 sm:$0xff]  }
 0xe3a   : > { %19128 = vmatprep.subr.bf16.mxu0 %v25458_v26  ;;  %v25527_v26 = vld [vmem:[%s26134_s17 + $0x11b4] ss:$24 sps:$4 sm:$0xff]  }
 0xe3c   : > { %19096 = vmatpush2.bf16.msra.mxu1 %v25453_v16  ;;  %v25530_v16 = vld [vmem:[%s26134_s17 + $0x1184] ss:$24 sps:$4 sm:$0xff]  }
 0xe3d   : > { %19129 = vmatpush1.bf16.msra.mxu0 %v25456_v55  ;;  %19097 = vmatprep.subr.bf16.mxu1 %v25461_v47  ;;  %v25528_v55 = vld [vmem:[%s26134_s17 + $0x1180] ss:$24 sps:$4 sm:$0xff]   ;;  %v25533_v47 = vld [vmem:[%s26134_s17 + $0x1154] ss:$24 sps:$4 sm:$0xff]  }
 0xe3e   : > { %19130 = vmatprep.subr.bf16.mxu0 %v25464_v14  ;;  %v25531_v14 = vld [vmem:[%s26134_s17 + $0x1150] ss:$24 sps:$4 sm:$0xff]  }
 0xe40   : > { %19098 = vmatpush2.bf16.msra.mxu1 %v25459_v27  ;;  %v25536_v27 = vld [vmem:[%s26134_s17 + $0x1124] ss:$24 sps:$4 sm:$0xff]  }
 0xe41   : > { %19131 = vmatpush1.bf16.msra.mxu0 %v25462_v23  ;;  %19099 = vmatprep.subr.bf16.mxu1 %v25467_v62  ;;  %v25534_v23 = vld [vmem:[%s26134_s17 + $0x1120] ss:$24 sps:$4 sm:$0xff]   ;;  %v25539_v62 = vld [vmem:[%s26134_s17 + $0x10f4] ss:$24 sps:$4 sm:$0xff]  }
 0xe42   : > { %19132 = vmatprep.subr.bf16.mxu0 %v25470_v60  ;;  %v25537_v60 = vld [vmem:[%s26134_s17 + $0x10f0] ss:$24 sps:$4 sm:$0xff]  }
 0xe44   : > { %19100 = vmatpush2.bf16.msra.mxu1 %v25465_v39  ;;  %v25542_v39 = vld [vmem:[%s26134_s17 + $0x10c4] ss:$24 sps:$4 sm:$0xff]  }
 0xe45   : > { %19133 = vmatpush2.bf16.msra.mxu0 %v25468_v30  ;;  %19101 = vmatprep.subr.bf16.mxu1 %v25473_v63  ;;  %v25540_v30 = vld [vmem:[%s26134_s17 + $0x10c0] ss:$24 sps:$4 sm:$0xff]   ;;  %v25545_v63 = vld [vmem:[%s26134_s17 + $0x1094] ss:$24 sps:$4 sm:$0xff]  }
 0xe46   : > { %19134 = vmatprep.subr.bf16.mxu0 %v25476_v46  ;;  %v25543_v46 = vld [vmem:[%s26134_s17 + $0x1090] ss:$24 sps:$4 sm:$0xff]  }
 0xe48   : > { %19102 = vmatpush2.bf16.msra.mxu1 %v25471_v17  ;;  %v18462_v17 = vpop.f32.mrf.mxu0 }
 0xe49   : > { %19135 = vmatpush2.bf16.msra.mxu0 %v25474_v2  ;;  %19103 = vmatprep.subr.bf16.mxu1 %v25479_v8 }
 0xe4a   : > { %19136 = vmatprep.subr.bf16.mxu0 %v25482_v32  ;;  %v18464_v2 = vpop.f32.mrf.mxu0  ;;  %v29563_v32 = vpop.f32.mrf.mxu1 }
 0xe4c   : > { %19104 = vmatpush2.bf16.msra.mxu1 %v25477_v3  ;;  %v18466_v8 = vpop.f32.mrf.mxu0 }
 0xe4d   : > { %19137 = vmatpush2.bf16.msra.mxu0 %v25480_v38  ;;  %19159 = vmatprep.subr.bf16.mxu1 %v25485_v0  ;;  %v18507_v38 = vpop.f32.mrf.mxu1 }
 0xe4e   : > { %19138 = vmatprep.subr.bf16.mxu0 %v25488_v48  ;;  %v29565_v3 = vpop.f32.mrf.mxu0 }
 0xe4f   : > { %19106 = vmatmul.mubr.bf16.vlgmr.msra.gmra.mxu1 %v28911_v12  ;;  %v25498_v12 = vld [vmem:[%s26134_s17 + $0xdf0] ss:$24 sps:$4 sm:$0xff]   ;;  %v29569_v48 = vpop.f32.mrf.mxu1 }
 0xe50   : > { %19160 = vmatpush1.bf16.msra.mxu1 %v25483_v40  ;;  %19191 = vmatprep.mubr.bf16.mxu1 %v29174_v57  ;;  %v25506_v57 = vld [vmem:[%s26134_s17 + $0xdc4] ss:$24 sps:$4 sm:$0xff]   ;;  %v29567_v0 = vpop.f32.mrf.mxu0 }
 0xe51   : > { %19139 = vmatpush2.bf16.msra.mxu0 %v25486_v28  ;;  %19161 = vmatprep.subr.bf16.mxu1 %v25491_v43  ;;  %v29571_v28 = vpop.f32.mrf.mxu1 }
 0xe52   : > { %19140 = vmatprep.subr.bf16.mxu0 %v25494_v9  ;;  %v18550_v40 = vpop.f32.mrf.mxu0 }
 0xe53   : > { %v29575_v9 = vpop.f32.mrf.mxu1 }
 0xe54   : > { %19162 = vmatpush1.bf16.msra.mxu1 %v25489_v53  ;;  %v29573_v43 = vpop.f32.mrf.mxu0 }
 0xe55   : > { %19141 = vmatpush2.bf16.msra.mxu0 %v25492_v25  ;;  %19163 = vmatprep.subr.bf16.mxu1 %v25497_v22  ;;  %v29579_v53 = vpop.f32.mrf.mxu1 }
 0xe56   : > { %19142 = vmatprep.subr.bf16.mxu0 %v25500_v61 }
 0xe57   : > { %v29583_v22 = vpop.f32.mrf.mxu1 }
 0xe58   : > { %19164 = vmatpush1.bf16.msra.mxu1 %v25495_v37 }
 0xe59   : > { %19143 = vmatpush2.bf16.msra.mxu0 %v25498_v12  ;;  %19165 = vmatprep.subr.bf16.mxu1 %v25503_v45  ;;  %v29587_v37 = vpop.f32.mrf.mxu1 }
 0xe5a   : > { %19144 = vmatprep.subr.bf16.mxu0 %v25506_v57 }
 0xe5b   : > { %v29591_v45 = vpop.f32.mrf.mxu1 }
 0xe5c   : > { %19166 = vmatpush1.bf16.msra.mxu1 %v25501_v41 }
 0xe5d   : > { %19145 = vmatpush2.bf16.msra.mxu0 %v25504_v29  ;;  %19167 = vmatprep.subr.bf16.mxu1 %v25509_v24  ;;  %v29595_v41 = vpop.f32.mrf.mxu1 }
 0xe5e   : > { %19146 = vmatprep.subr.bf16.mxu0 %v25512_v50 }
 0xe5f   : > { %v29597_v24 = vpop.f32.mrf.mxu1 }
 0xe60   : > { %19168 = vmatpush1.bf16.msra.mxu1 %v25507_v52 }
 0xe61   : > { %19147 = vmatpush2.bf16.msra.mxu0 %v25510_v49  ;;  %19169 = vmatprep.subr.bf16.mxu1 %v25515_v44  ;;  %v29599_v52 = vpop.f32.mrf.mxu1 }
 0xe63   : > { %v18763_v44 = vpop.f32.mrf.mxu1 }
 0xe64   : > { %19149 = vmatmul.mubr.bf16.vlgmr.msra.gmra.mxu0 %v29121_v34  ;;  %19170 = vmatpush1.bf16.msra.mxu1 %v25513_v19  ;;  %v25525_v34 = vld [vmem:[%s26134_s17 + $0x11b0] ss:$24 sps:$4 sm:$0xff]  }
 0xe65   : > { %19171 = vmatprep.subr.bf16.mxu1 %v25518_v13  ;;  %v29603_v13 = vpop.f32.mrf.mxu1 }
 0xe68   : > { %19172 = vmatpush1.bf16.msra.mxu1 %v25516_v20 }
 0xe69   : > { %19173 = vmatprep.subr.bf16.mxu1 %v25521_v15  ;;  %v29605_v15 = vpop.f32.mrf.mxu1 }
 0xe6c   : > { %19174 = vmatpush1.bf16.msra.mxu1 %v25519_v7 }
 0xe6d   : > { %19175 = vmatprep.subr.bf16.mxu1 %v25524_v36  ;;  %v29609_v36 = vpop.f32.mrf.mxu1 }
 0xe70   : > { %19176 = vmatpush2.bf16.msra.mxu1 %v25522_v35 }
 0xe71   : > { %19177 = vmatprep.subr.bf16.mxu1 %v25527_v26  ;;  %v18849_v26 = vpop.f32.mrf.mxu1 }
 0xe74   : > { %19178 = vmatpush2.bf16.msra.mxu1 %v25525_v34 }
 0xe75   : > { %19179 = vmatprep.subr.bf16.mxu1 %v25530_v16  ;;  %v29615_v16 = vpop.f32.mrf.mxu1 }
 0xe78   : > { %19180 = vmatpush2.bf16.msra.mxu1 %v25528_v55 }
 0xe79   : > { %19181 = vmatprep.subr.bf16.mxu1 %v25533_v47  ;;  %v29619_v47 = vpop.f32.mrf.mxu1 }
 0xe7c   : > { %19182 = vmatpush2.bf16.msra.mxu1 %v25531_v14 }
 0xe7d   : > { %19183 = vmatprep.subr.bf16.mxu1 %v25536_v27  ;;  %v29623_v27 = vpop.f32.mrf.mxu1 }
 0xe7e   : > { %29929 = vst [vmem:[#allocation32_spill] sm:$0xff] %v29623_v27 }
 0xe80   : > { %19184 = vmatpush2.bf16.msra.mxu1 %v25534_v23 }
 0xe81   : > { %19185 = vmatprep.subr.bf16.mxu1 %v25539_v62 }
 0xe84   : > { %19186 = vmatpush2.bf16.msra.mxu1 %v25537_v60 }
 0xe85   : > { %19187 = vmatprep.subr.bf16.mxu1 %v25542_v39 }
 0xe88   : > { %19188 = vmatpush2.bf16.msra.mxu1 %v25540_v30 }
 0xe89   : > { %19189 = vmatprep.subr.bf16.mxu1 %v25545_v63  ;;  %v25639_v63 = vld [vmem:[%s26446_s3 + $0x30] sm:$0xff] }
 0xe8a   : > { %v15497_v42 = vrot.slane %v25639_v63, %v28296_v10 }
 0xe8c   : > { %19190 = vmatpush2.bf16.msra.mxu1 %v25543_v46  ;;  %v15501_v46 = vrot.slane %v25639_v63, %v28663_v33  ;;  %v15527_v31 = vrot.slane %v15497_v42, %v28296_v10 }
 0xe8e   : > { %v15531_v6 = vrot.slane %v15501_v46, %v28296_v10  ;;  %v18467_v1 = vadd.f32 %v18466_v8, %v15527_v31  ;;  %v15509_v46 = vrot.slane %v25640_v18, %v28663_v33 }
 0xe8f   : > { %19192 = vmatmul.mubr.bf16.vlgmr.msra.gmra.mxu1 %v29178_v56  ;;  %v29577_v56 = vpop.f32.mrf.mxu0  ;;  %v29627_v62 = vpop.f32.mrf.mxu1 }
 0xe90   : > { %v18465_v5 = vadd.f32 %v18464_v2, %v15531_v6  ;;  %v18510_v2 = vadd.f32 %v29569_v48, %v18467_v1 }
 0xe91   : > { %v29581_v25 = vpop.f32.mrf.mxu0  ;;  %v29631_v39 = vpop.f32.mrf.mxu1 }
 0xe92   : > { %29931 = vst [vmem:[#allocation27_spill] sm:$0xff] %v29631_v39  ;;  %v18508_v42 = vadd.f32 %v18507_v38, %v18465_v5  ;;  %v18553_v5 = vadd.f32 %v29573_v43, %v18510_v2 }
 0xe93   : > { %v29585_v61 = vpop.f32.mrf.mxu0  ;;  %v29637_v59 = vpop.f32.mrf.mxu1 }
 0xe94   : > { %29932 = vst [vmem:[#allocation34_spill] sm:$0xff] %v29637_v59  ;;  %v18463_v59 = vadd.f32 %v18462_v17, %v15527_v31  ;;  %v15539_v31 = vrot.slane %v15509_v46, %v28296_v10 }
 0xe95   : > { %v29589_v12 = vpop.f32.mrf.mxu0  ;;  %v29643_v54 = vpop.f32.mrf.mxu1 }
 0xe96   : > { %29934 = vst [vmem:[#allocation40_spill] sm:$0xff] %v29643_v54 }
 0xe97   : > { %v29593_v57 = vpop.f32.mrf.mxu0 }
 0xe99   : > { %v18720_v29 = vpop.f32.mrf.mxu0 }
 0xe9b   : > { %v18722_v50 = vpop.f32.mrf.mxu0 }
 0xe9d   : > { %v18724_v49 = vpop.f32.mrf.mxu0 }
 0xe9f   : > { %v29601_v19 = vpop.f32.mrf.mxu0 }
 0xea1   : > { %v18806_v20 = vpop.f32.mrf.mxu0 }
 0xea3   : > { %v29607_v7 = vpop.f32.mrf.mxu0 }
 0xea5   : > { %v29611_v35 = vpop.f32.mrf.mxu0 }
 0xea7   : > { %v29613_v34 = vpop.f32.mrf.mxu0 }
 0xea9   : > { %v29617_v55 = vpop.f32.mrf.mxu0 }
 0xeab   : > { %v29621_v14 = vpop.f32.mrf.mxu0 }
 0xead   : > { %v29625_v23 = vpop.f32.mrf.mxu0 }
 0xeaf   : > { %v29629_v60 = vpop.f32.mrf.mxu0 }
 0xeb0   : > { %29930 = vst [vmem:[#allocation20_spill] sm:$0xff] %v29629_v60  ;;  %v15505_v60 = vrot.slane %v25640_v18, %v28296_v10 }
 0xeb1   : > { %v29633_v30 = vpop.f32.mrf.mxu0 }
 0xeb2   : > { %v15535_v63 = vrot.slane %v15505_v60, %v28296_v10 }
 0xeb3   : > { %v29639_v58 = vpop.f32.mrf.mxu0 }
 0xeb4   : > { %29933 = vst [vmem:[#allocation35_spill] sm:$0xff] %v29639_v58  ;;  %v18506_v58 = vadd.f32 %v29563_v32, %v18463_v59  ;;  %v25641_v32 = vld [vmem:[%s26446_s3 + $0x40] sm:$0xff]  ;;  %v18725_v48 = vadd.f32 %v18724_v49, %v15535_v63 }
 0xeb5   : > { %v29645_v51 = vpop.f32.mrf.mxu0  ;;  %v15513_v1 = vrot.slane %v25641_v32, %v28296_v10 }
 0xeb6   : > { %29935 = vst [vmem:[#allocation24_spill] sm:$0xff] %v29645_v51  ;;  %v18469_v51 = vadd.f32 %v29565_v3, %v15531_v6  ;;  %v18549_v60 = vadd.f32 %v29567_v0, %v18506_v58  ;;  %v18723_v3 = vadd.f32 %v18722_v50, %v15539_v31  ;;  %v15517_v58 = vrot.slane %v25641_v32, %v28663_v33 }
 0xeb7   : > { %v29652_v39 = vpop.f32.mrf.mxu0  ;;  %v18596_v0 = vadd.f32 %v29583_v22, %v18553_v5  ;;  %v29942_v5 = vld [vmem:[#allocation27_spill] sm:$0xff] }
 0xeb8   : > { %29937 = vst [vmem:[#allocation16_spill] sm:$0xff] %v29652_v39  ;;  %v18721_v39 = vadd.f32 %v18720_v29, %v15535_v63  ;;  %v18512_v18 = vadd.f32 %v29571_v28, %v18469_v51  ;;  %v18768_v28 = vadd.f32 %v29605_v15, %v18725_v48  ;;  %v29946_v48 = vld [vmem:[#allocation17_spill] sm:$0xff] }
 0xeba   : > { %v18764_v38 = vadd.f32 %v18763_v44, %v18721_v39  ;;  %v18555_v59 = vadd.f32 %v29577_v56, %v18512_v18  ;;  %v18811_v22 = vadd.f32 %v29611_v35, %v18768_v28 }
 0xecf   : > { %v29650_v4 = vpop.f32.mrf.mxu1 }
 0xed0   : > { %29936 = vst [vmem:[#allocation30_spill] sm:$0xff] %v29650_v4  ;;  %v18551_v4 = vadd.f32 %v18550_v40, %v18508_v42  ;;  %v18807_v40 = vadd.f32 %v18806_v20, %v18764_v38  ;;  %v18592_v42 = vadd.f32 %v29575_v9, %v18549_v60  ;;  %v15543_v9 = vrot.slane %v15513_v1, %v28296_v10  ;;  %v29941_v60 = vld [vmem:[#allocation26_spill] sm:$0xff]  ;;  %v29945_v1 = vld [vmem:[#allocation19_spill] sm:$0xff] }
 0xed1   : > { %v29656_v27 = vpop.f32.mrf.mxu1  ;;  %v18639_v20 = vadd.f32 %v29589_v12, %v18596_v0  ;;  %v29943_v38 = vld [vmem:[#allocation34_spill] sm:$0xff] }
 0xed2   : > { %v18594_v6 = vadd.f32 %v29579_v53, %v18551_v4  ;;  %v18766_v4 = vadd.f32 %v29603_v13, %v18723_v3  ;;  %v18850_v43 = vadd.f32 %v18849_v26, %v18807_v40  ;;  %v18598_v53 = vadd.f32 %v29587_v37, %v18555_v59  ;;  %v29944_v59 = vld [vmem:[#allocation24_spill] sm:$0xff] }
 0xed3   : > { %v29664_v17 = vpop.f32.mrf.mxu1  ;;  %v18635_v50 = vadd.f32 %v29581_v25, %v18592_v42  ;;  %v15547_v25 = vrot.slane %v15517_v58, %v28296_v10  ;;  %v18682_v12 = vadd.f32 %v29597_v24, %v18639_v20  ;;  %v29947_v42 = vld [vmem:[#allocation20_spill] sm:$0xff] }
 0xed4   : > { %v18637_v51 = vadd.f32 %v29585_v61, %v18594_v6  ;;  %v18727_v61 = vadd.f32 %v29601_v19, %v15539_v31  ;;  %v18809_v33 = vadd.f32 %v29607_v7, %v18766_v4  ;;  %v18893_v44 = vadd.f32 %v29617_v55, %v18850_v43  ;;  %v29948_v58 = vld [vmem:[#allocation16_spill] sm:$0xff] }
 0xed5   : > { %v19027_v29 = vpop.f32.mrf.mxu1  ;;  %v18641_v15 = vadd.f32 %v29593_v57, %v18598_v53  ;;  %v18678_v37 = vadd.f32 %v29591_v45, %v18635_v50  ;;  %v18854_v19 = vadd.f32 %v29619_v47, %v18811_v22  ;;  %v18979_v57 = vadd.f32 %v29633_v30, %v15543_v9  ;;  %v29949_v50 = vld [vmem:[#allocation22_spill] sm:$0xff] }
 0xed6   : > { %v18680_v49 = vadd.f32 %v29595_v41, %v18637_v51  ;;  %v18770_v41 = vadd.f32 %v29609_v36, %v18727_v61  ;;  %v18852_v26 = vadd.f32 %v29615_v16, %v18809_v33  ;;  %v18936_v7 = vadd.f32 %v29627_v62, %v18893_v44  ;;  %v29938_v62 = vld [vmem:[#allocation35_spill] sm:$0xff] }
 0xed7   : > { %v18684_v45 = vadd.f32 %v29599_v52, %v18641_v15  ;;  %v18897_v16 = vadd.f32 %v29625_v23, %v18854_v19  ;;  %v19202_v47 = vadd.f32 %v18678_v37, %v28046_v21  ;;  %v18981_v63 = vadd.f32 %v29938_v62, %v15547_v25  ;;  %v29939_v2 = vld [vmem:[#allocation30_spill] sm:$0xff]  ;;  %v29953_v62 = vld [vmem:[#allocation29_spill] sm:$0xff] }
 0xed8   : > { %v29698_v55 = vadd.f32 %v18680_v49, %v28038_v11  ;;  %v18813_v10 = vadd.f32 %v29613_v34, %v18770_v41  ;;  %v18895_v36 = vadd.f32 %v29621_v14, %v18852_v26  ;;  %v19022_v31 = vadd.f32 %v29939_v2, %v18979_v57  ;;  %v29940_v11 = vld [vmem:[#allocation32_spill] sm:$0xff]  ;;  %v29950_v49 = vld [vmem:[#allocation37_spill] sm:$0xff] }
 0xed9   : > { %v19204_v24 = vadd.f32 %v18936_v7, %v29941_v60  ;;  %v18940_v52 = vadd.f32 %v29943_v38, %v18897_v16  ;;  %v18983_v14 = vadd.f32 %v29944_v59, %v15543_v9  ;;  %v19024_v23 = vadd.f32 %v29656_v27, %v18981_v63  ;;  %v29951_v9 = vld [vmem:[#allocation40_spill] sm:$0xff]  ;;  %v29955_v60 = vld [vmem:[#allocation21_spill] sm:$0xff] }
 0xeda   : > { %v18856_v18 = vadd.f32 %v29940_v11, %v18813_v10  ;;  %v18938_v30 = vadd.f32 %v29942_v5, %v18895_v36  ;;  %v19214_v32 = vadd.f32 %v29698_v55, %v19202_v47  ;;  %v19208_v3 = vadd.f32 %v18682_v12, %v29945_v1  ;;  %v29952_v12 = vld [vmem:[#allocation31_spill] sm:$0xff] }
 0xedb   : > { %v19209_v40 = vadd.f32 %v18684_v45, %v29946_v48  ;;  %v18985_v0 = vadd.f32 %v29948_v58, %v15547_v25  ;;  %v19026_v4 = vadd.f32 %v29664_v17, %v18983_v14 }
 0xedc   : > { %v18899_v51 = vadd.f32 %v29947_v42, %v18856_v18  ;;  %v19215_v53 = vadd.f32 %v19214_v32, %v19204_v24  ;;  %v19205_v27 = vadd.f32 %v18938_v30, %v29949_v50 }
 0xedd   : > { %v19028_v44 = vadd.f32 %v19027_v29, %v18985_v0  ;;  %v19221_v41 = vadd.f32 %v19209_v40, %v19208_v3 }
 0xede   : > { %v18942_v61 = vadd.f32 %v29951_v9, %v18899_v51 }
 0xee0   : > { %v19211_v57 = vadd.f32 %v18942_v61, %v29952_v12 }
 0xee4   : > { %v29658_v54 = vpop.f32.mrf.mxu0 }
 0xee5   : > { %v19065_v21 = vadd.f32 %v29658_v54, %v19022_v31  ;;  %v19210_v54 = vadd.f32 %v18940_v52, %v29950_v49  ;;  %v29956_v52 = vld [vmem:[#allocation28_spill] sm:$0xff] }
 0xee6   : > { %v29666_v8 = vpop.f32.mrf.mxu0 }
 0xee7   : > { %v19067_v28 = vadd.f32 %v29666_v8, %v19024_v23  ;;  %v19222_v7 = vadd.f32 %v19221_v41, %v19210_v54 }
 0xee8   : > { %v19068_v46 = vpop.f32.mrf.mxu0 }
 0xee9   : > { %v19069_v20 = vadd.f32 %v19068_v46, %v19026_v4  ;;  %v19223_v18 = vadd.f32 %v19222_v7, %v19211_v57 }
 0xeea   : > { %v19070_v13 = vpop.f32.mrf.mxu0 }
 0xeeb   : > { %v19071_v26 = vadd.f32 %v19070_v13, %v19028_v44 }
 0xf0f   : > { %v19107_v56 = vpop.f32.mrf.mxu1 }
 0xf10   : > { %v19108_v43 = vadd.f32 %v19107_v56, %v19065_v21  ;;  %v19216_v56 = vadd.f32 %v19215_v53, %v19205_v27 }
 0xf11   : > { %v19109_v35 = vpop.f32.mrf.mxu1 }
 0xf12   : > { %v19110_v15 = vadd.f32 %v19109_v35, %v19067_v28 }
 0xf13   : > { %v19111_v6 = vpop.f32.mrf.mxu1 }
 0xf14   : > { %v19112_v17 = vadd.f32 %v19111_v6, %v19069_v20 }
 0xf15   : > { %v19113_v33 = vpop.f32.mrf.mxu1 }
 0xf16   : > { %v19114_v36 = vadd.f32 %v19113_v33, %v19071_v26 }
 0xf24   : > { %v19150_v39 = vpop.f32.mrf.mxu0 }
 0xf25   : > { %v19151_v37 = vadd.f32 %v19150_v39, %v19108_v43  ;;  %v29954_v39 = vld [vmem:[#allocation36_spill] sm:$0xff] }
 0xf26   : > { %v19152_v34 = vpop.f32.mrf.mxu0 }
 0xf27   : > { %v19153_v19 = vadd.f32 %v19152_v34, %v19110_v15 }
 0xf28   : > { %v19154_v22 = vpop.f32.mrf.mxu0 }
 0xf29   : > { %v19155_v16 = vadd.f32 %v19154_v22, %v19112_v17 }
 0xf2a   : > { %v19156_v45 = vpop.f32.mrf.mxu0 }
 0xf2b   : > { %v19157_v35 = vadd.f32 %v19156_v45, %v19114_v36 }
 0xf4f   : > { %v19193_v25 = vpop.f32.mrf.mxu1 }
 0xf50   : > { %v19194_v8 = vadd.f32 %v19193_v25, %v19151_v37 }
 0xf51   : > { %v19195_v10 = vpop.f32.mrf.mxu1 }
 0xf52   : > { %v19206_v63 = vadd.f32 %v19194_v8, %v29953_v62  ;;  %v19196_v29 = vadd.f32 %v19195_v10, %v19153_v19 }
 0xf53   : > { %v19197_v46 = vpop.f32.mrf.mxu1 }
 0xf54   : > { %v19207_v2 = vadd.f32 %v19196_v29, %v29954_v39  ;;  %v19198_v31 = vadd.f32 %v19197_v46, %v19155_v16  ;;  %v19217_v13 = vadd.f32 %v19216_v56, %v19206_v63  ;;  %v29957_v16 = vld [vmem:[#allocation15_spill] sm:$0xff]  ;;  %v25642_v29 = vld [vmem:[%s26446_s3] sm:$0xff] }
 0xf55   : > { %v19199_v11 = vpop.f32.mrf.mxu1  ;;  %v19292_v62 = vsub.s32 7, %v29957_v16 }
 0xf56   : > { %v19212_v5 = vadd.f32 %v19198_v31, %v29955_v60  ;;  %v19200_v30 = vadd.f32 %v19199_v11, %v19157_v35  ;;  %v19218_v38 = vadd.f32 %v19217_v13, %v19207_v2  ;;  %v25643_v35 = vld [vmem:[%s26446_s3 + $0x8] sm:$0xff]  ;;  %v25645_v60 = vld [vmem:[%s26446_s3 + $0x18] sm:$0xff] }
 0xf57   : > { %v19293_v46 = vrot.slane %v25642_v29, %v19292_v62  ;;  %v19301_v39 = vrot.slane %v25643_v35, %v19292_v62 }
 0xf58   : > { %v19213_v6 = vadd.f32 %v19200_v30, %v29956_v52  ;;  %19219 = vadd.xlane.f32.xlu1 %v19218_v38  ;;  %v19224_v34 = vadd.f32 %v19223_v18, %v19212_v5 }
 0xf5a   : > { %v19225_v59 = vadd.f32 %v19224_v34, %v19213_v6  ;;  %v25646_v34 = vld [vmem:[%s26446_s3 + $0x20] sm:$0xff] }
 0xf5c   : > { %19226 = vadd.xlane.f32.xlu0 %v19225_v59 }
 0xfe1   : > { %v19220_v14 = vpop.xlane.xlu1 %19219 }
 0xfe2   : > { %v19228_v23 = vmul.f32 0.0013020834, %v19220_v14  ;;  %v19367_v14 = vrot.slane %v25646_v34, %v19292_v62 }
 0xfe4   : > { %v29731_v21 = vsub.f32 %v19202_v47, %v19228_v23  ;;  %v29734_v32 = vsub.f32 %v29698_v55, %v19228_v23  ;;  %v29736_v1 = vsub.f32 %v19204_v24, %v19228_v23  ;;  %v29738_v42 = vsub.f32 %v19205_v27, %v19228_v23 }
 0xfe5   : > { %v19227_v48 = vpop.xlane.xlu0 %19226  ;;  %v29744_v4 = vsub.f32 %v19206_v63, %v19228_v23  ;;  %v29754_v53 = vsub.f32 %v19207_v2, %v19228_v23  ;;  %v19288_v63 = vsub.s32 3, %v29957_v16  ;;  %v25644_v2 = vld [vmem:[%s26446_s3 + $0x10] sm:$0xff] }
 0xfe6   : > { %v19229_v51 = vmul.f32 0.0013020834, %v19227_v48  ;;  %v19242_v58 = vmul.f32 %v29731_v21, %v29731_v21  ;;  %v19243_v0 = vmul.f32 %v29734_v32, %v29734_v32  ;;  %v19244_v47 = vmul.f32 %v29736_v1, %v29736_v1 }
 0xfe7   : > { %v19245_v50 = vmul.f32 %v29738_v42, %v29738_v42  ;;  %v19247_v44 = vmul.f32 %v29754_v53, %v29754_v53  ;;  %v19309_v31 = vrot.slane %v25644_v2, %v19292_v62  ;;  %v19289_v13 = vrot.slane %v25642_v29, %v19288_v63 }
 0xfe8   : > { %v19254_v28 = vadd.f32 %v19243_v0, %v19242_v58  ;;  %v29748_v55 = vsub.f32 %v19208_v3, %v19229_v51  ;;  %v29750_v24 = vsub.f32 %v19209_v40, %v19229_v51  ;;  %v29752_v43 = vsub.f32 %v19210_v54, %v19229_v51  ;;  %v25647_v58 = vld [vmem:[%s26446_s3 + $0x28] sm:$0xff] }
 0xfe9   : > { %v29758_v49 = vsub.f32 %v19211_v57, %v19229_v51  ;;  %v19246_v3 = vmul.f32 %v29744_v4, %v29744_v4  ;;  %v29766_v54 = vsub.f32 %v19212_v5, %v19229_v51  ;;  %v29772_v15 = vsub.f32 %v19213_v6, %v19229_v51 }
 0xfea   : > { %v19255_v27 = vadd.f32 %v19254_v28, %v19244_v47  ;;  %v19248_v9 = vmul.f32 %v29748_v55, %v29748_v55  ;;  %v19249_v61 = vmul.f32 %v29750_v24, %v29750_v24  ;;  %v19250_v33 = vmul.f32 %v29752_v43, %v29752_v43 }
 0xfeb   : > { %v19251_v37 = vmul.f32 %v29758_v49, %v29758_v49  ;;  %v19252_v26 = vmul.f32 %v29766_v54, %v29766_v54  ;;  %v19253_v19 = vmul.f32 %v29772_v15, %v29772_v15  ;;  %v19297_v11 = vrot.slane %v25643_v35, %v19288_v63 }
 0xfec   : > { %v19256_v40 = vadd.f32 %v19255_v27, %v19245_v50  ;;  %v19261_v22 = vadd.f32 %v19249_v61, %v19248_v9  ;;  %v19305_v18 = vrot.slane %v25644_v2, %v19288_v63  ;;  %v19355_v5 = vrot.slane %v25645_v60, %v19288_v63 }
 0xfed   : > { %v19323_v30 = vrot.slane %v19293_v46, %v19288_v63  ;;  %v19331_v38 = vrot.slane %v19301_v39, %v19288_v63  ;;  %v19339_v52 = vrot.slane %v19309_v31, %v19288_v63  ;;  %v19359_v6 = vrot.slane %v25645_v60, %v19292_v62 }
 0xfee   : > { %v19257_v20 = vadd.f32 %v19256_v40, %v19246_v3  ;;  %v19262_v41 = vadd.f32 %v19261_v22, %v19250_v33  ;;  %v19363_v59 = vrot.slane %v25646_v34, %v19288_v63  ;;  %v19319_v23 = vrot.slane %v19289_v13, %v19288_v63 }
 0xfef   : > { %v19327_v48 = vrot.slane %v19297_v11, %v19288_v63  ;;  %v19371_v0 = vrot.slane %v25647_v58, %v19288_v63  ;;  %v19375_v47 = vrot.slane %v25647_v58, %v19292_v62  ;;  %v19335_v28 = vrot.slane %v19305_v18, %v19288_v63 }
 0xff0   : > { %v19258_v25 = vadd.f32 %v19257_v20, %v19247_v44  ;;  %v19263_v17 = vadd.f32 %v19262_v41, %v19251_v37  ;;  %v25845_v50 = vmov 1983009808   ;;  %v19385_v33 = vrot.slane %v19355_v5, %v19288_v63 }
 0xff1   : > { %v19433_v27 = vunpack.c.l.s4 %v25845_v50  ;;  %v19389_v22 = vrot.slane %v19359_v6, %v19288_v63  ;;  %v19393_v37 = vrot.slane %v19363_v59, %v19288_v63 }
 0xff2   : > { %19259 = vadd.xlane.f32.xlu1 %v19258_v25  ;;  %v19264_v8 = vadd.f32 %v19263_v17, %v19252_v26 }
 0xff4   : > { %v19265_v56 = vadd.f32 %v19264_v8, %v19253_v19  ;;  %v19397_v19 = vrot.slane %v19367_v14, %v19288_v63 }
 0xff6   : > { %19266 = vadd.xlane.f32.xlu0 %v19265_v56  ;;  %v19405_v56 = vrot.slane %v19375_v47, %v19288_v63 }
0x107b   : > { %v19260_v7 = vpop.xlane.xlu1 %19259 }
0x107c   : > { %v19268_v12 = vmul.f32 0.0013020834, %v19260_v7 }
0x107e   : > { %v19270_v57 = vadd.f32 1e-12, %v19268_v12 }
0x107f   : > { %v19267_v45 = vpop.xlane.xlu0 %19266 }
0x1080   : > { %25606 = vrsqrt.f32 %v19270_v57  ;;  %v19269_v10 = vmul.f32 0.0013020834, %v19267_v45 }
0x1082   : > { %v19271_v36 = vadd.f32 1e-12, %v19269_v10 }
0x1084   : > { %25608 = vrsqrt.f32 %v19271_v36 }
0x108d   : > { %v25607_v51 = vpop.eup %25606 }
0x108e   : > { %v19274_v9 = vmul.f32 %v25607_v51, %v29731_v21  ;;  %v19275_v61 = vmul.f32 %v25607_v51, %v29734_v32  ;;  %v19276_v3 = vmul.f32 %v25607_v51, %v29736_v1  ;;  %v19277_v40 = vmul.f32 %v25607_v51, %v29738_v42 }
0x108f   : > { %v19278_v44 = vmul.f32 %v25607_v51, %v29744_v4  ;;  %v19279_v20 = vmul.f32 %v25607_v51, %v29754_v53  ;;  %v19401_v21 = vrot.slane %v19371_v0, %v19288_v63  ;;  %v19434_v32 = vunpack.c.0.s8 %v19433_v27 }
0x1090   : > { %v19340_v41 = vmul.f32 %v19319_v23, %v19274_v9  ;;  %v19341_v25 = vmul.f32 %v19323_v30, %v19275_v61  ;;  %v19342_v26 = vmul.f32 %v19327_v48, %v19276_v3  ;;  %v19343_v8 = vmul.f32 %v19331_v38, %v19277_v40 }
0x1091   : > { %v25609_v17 = vpop.eup %25608  ;;  %v19344_v7 = vmul.f32 %v19335_v28, %v19278_v44  ;;  %v19345_v1 = vmul.f32 %v19339_v52, %v19279_v20  ;;  %v19437_v46 = vsub.s32 %v19434_v32, %v29957_v16 }
0x1092   : > { %v19406_v12 = vadd.f32 %v19385_v33, %v19340_v41  ;;  %v19280_v42 = vmul.f32 %v25609_v17, %v29748_v55  ;;  %v19281_v57 = vmul.f32 %v25609_v17, %v29750_v24  ;;  %v19407_v4 = vadd.f32 %v19389_v22, %v19341_v25 }
0x1093   : > { %v19408_v45 = vadd.f32 %v19393_v37, %v19342_v26  ;;  %v19282_v53 = vmul.f32 %v25609_v17, %v29752_v43  ;;  %v19283_v10 = vmul.f32 %v25609_v17, %v29758_v49  ;;  %v19409_v36 = vadd.f32 %v19397_v19, %v19343_v8 }
0x1094   : > { %v19284_v62 = vmul.f32 %v25609_v17, %v29766_v54  ;;  %v19285_v29 = vmul.f32 %v25609_v17, %v29772_v15  ;;  %v19346_v63 = vmul.f32 %v19319_v23, %v19280_v42  ;;  %v19410_v35 = vadd.f32 %v19401_v21, %v19344_v7 }
0x1095   : > { %v19347_v39 = vmul.f32 %v19323_v30, %v19281_v57  ;;  %v19348_v2 = vmul.f32 %v19327_v48, %v19282_v53  ;;  %v19411_v55 = vadd.f32 %v19405_v56, %v19345_v1  ;;  %v19349_v31 = vmul.f32 %v19331_v38, %v19283_v10 }
0x1096   : > { %v19350_v24 = vmul.f32 %v19335_v28, %v19284_v62  ;;  %v19351_v13 = vmul.f32 %v19339_v52, %v19285_v29  ;;  %v19430_v11 = vcombine.low %v19406_v12, %v19407_v4  ;;  %v19412_v18 = vadd.f32 %v19385_v33, %v19346_v63 }
0x1097   : > { %v19413_v43 = vadd.f32 %v19389_v22, %v19347_v39  ;;  %v19414_v49 = vadd.f32 %v19393_v37, %v19348_v2  ;;  %v19431_v60 = vcombine.low %v19408_v45, %v19409_v36  ;;  %v19415_v5 = vadd.f32 %v19397_v19, %v19349_v31 }
0x1098   : > { %v19416_v54 = vadd.f32 %v19401_v21, %v19350_v24  ;;  %v19417_v6 = vadd.f32 %v19405_v56, %v19351_v13  ;;  %v19447_v34 = vcombine.low %v19410_v35, %v19411_v55  ;;  %v19438_v30 = vrot.slane %v19430_v11, %v19437_v46 }
0x1099   : > { %v19455_v15 = vcombine.low %v19412_v18, %v19413_v43  ;;  %v19456_v59 = vcombine.low %v19414_v49, %v19415_v5  ;;  %v19445_v23 = vrot.slane %v19431_v60, %v19437_v46 }
0x109a   : > { %v19472_v16 = vcombine.low %v19416_v54, %v19417_v6  ;;  %v19454_v52 = vrot.slane %v19447_v34, %v19437_v46 }
0x109b   : > { %v19463_v14 = vrot.slane %v19455_v15, %v19437_v46  ;;  %v19470_v48 = vrot.slane %v19456_v59, %v19437_v46  ;;  %v19446_v0 = vcombine.low %v19438_v30, %v19445_v23 }
0x109c   : > { %v19479_v38 = vrot.slane %v19472_v16, %v19437_v46 }
0x109d   : > { %v19471_v51 = vcombine.low %v19463_v14, %v19470_v48 }
0x109e   : > { %v19495_v58 = vrot.slane %v19479_v38, 7 }
0x109f   : > { %v19484_v47 = vrot.slane %v19471_v51, 7 }
0x10a0   : > { %v19496_v28 = vsel %vm19485_vm1, %v19495_v58, %v19454_v52 }
0x10a1   : > { %v19497_v50 = vsel %vm19487_vm2, %v19495_v58, %v19496_v28  ;;  %v19486_v27 = vsel %vm19485_vm1, %v19484_v47, %v19446_v0 }
0x10a2   : > { %v19498_v9 = vsel %vm19489_vm3, %v19495_v58, %v19497_v50  ;;  %v19488_v61 = vsel %vm19487_vm2, %v19484_v47, %v19486_v27 }
0x10a3   : > { %v19499_v3 = vsel %vm19491_vm4, %v19495_v58, %v19498_v9  ;;  %v19490_v40 = vsel %vm19489_vm3, %v19484_v47, %v19488_v61 }
0x10a4   : > { %19503 = vst [vmem:[%s487_s26 + $0x8] sm:$0xf] %v19499_v3  ;;  %v19492_v33 = vsel %vm19491_vm4, %v19484_v47, %v19490_v40 }
0x10a5   : > { %19502 = vst [vmem:[%s487_s26] sm:$0xff] %v19492_v33 }
0x10a6 PF: > { %s29958_s28 = sld [smem:[#allocation13_spill]]  ;;  %p23_p11 = scmp.ge.s32.totalorder %s25908_s29, 4  }
0x10a7   : > { %s29959_s26 = sld [smem:[#allocation14_spill]]  ;;  %s29960_s24 = smov %s25822_s25 }
0x10a8   : > { %s29962_s27 = smov %s25908_s29  ;;  %25 = sbr.rel (!%p23_p11) target bundleno = 12 (0xc), region = 142 }
0x10ac   : > { %s29961_s25 = smov %s29958_s28 }
0x10ad   :  { %19525 = vsyncpa [#allocation3], 1 }
0x10ae   :  { %19527 = vsyncpa [#allocation3 + $0x1], 1 }
0x10af   :  { %19528 = vsyncpa [#allocation5], 1 }
0x10b0   :  { %19530 = vsyncpa [#allocation5 + $0x1], 1 }
0x10b1   :  { %19531 = vsyncpa [#allocation8], 1 }
0x10b2   :  { %19533 = vsyncpa [#allocation8 + $0x1], 1 }

</bundles_post_ra>
